<compile_context>
chip_gen: v7x
topology: tpu7x:2x2x1
jax: 0.10.0
libtpu: 0.0.40
codegen_flags: <defaults>
</compile_context>

<pallas_src>
import functools

import jax
import jax.numpy as jnp
from jax import lax
from jax.experimental import pallas as pl
from jax.experimental.pallas import tpu as pltpu


# ----------------------------------------------------------------------------------
# Static polyphase bookkeeping (pure Python, runs at trace time)
# ----------------------------------------------------------------------------------
def _polyphase_taps(k, d, pb):
    """For output parity r in {0,1}: list of (flipped-kernel tap kh, input offset s)
    so that  y[2*u + r] += x[u + s] * w_flipped[kh]   (x zero-extended outside [0, H))."""
    taps = {0: [], 1: []}
    for r in (0, 1):
        for kh in range(k):
            t = r + kh * d - pb
            if t % 2 == 0:
                taps[r].append((kh, t // 2))
    return taps


def _pad_amounts(taps, n_in, n_out):
    """Left/right zero-halo (in original-input coordinates) needed by the tap offsets."""
    lo, hi = 0, n_in - 1
    for r in (0, 1):
        n_r = (n_out - r + 1) // 2
        for (_, s) in taps[r]:
            lo = min(lo, s)
            hi = max(hi, s + n_r - 1)
    return max(0, -lo), max(0, hi - (n_in - 1))


# ----------------------------------------------------------------------------------
# Kernel: one grid step == one channel block (channels on lanes), fusing polyphase
# depthwise deconv + training-mode BatchNorm (+ optional ReLU), polyphase output layout.
# ----------------------------------------------------------------------------------
def _deconv_bn_kernel(x_ref, w_ref, g_ref, b_ref, o_ref, xpad_ref, acc_ref, *,
                      k, taps_h, taps_w, pad_h, pad_w, H, W, Hout, Wout, act, eps):
    Nb = x_ref.shape[0]
    Cb = x_ref.shape[3]
    padLH, padRH = pad_h
    padLW, padRW = pad_w
    Hp = H + padLH + padRH
    Wp = W + padLW + padRW

    # ---- zero-halo padded input in VMEM scratch: thin halo zeroes + one interior store.
    # (Halo is re-zeroed every step -- cheap -- so this stays correct when megacore
    #  splits the "parallel" channel axis across cores with separate scratch.)
    if padLH:
        xpad_ref[:, 0:padLH, :, :] = jnp.zeros((Nb, padLH, Wp, Cb), jnp.float32)
    if padRH:
        xpad_ref[:, padLH + H:Hp, :, :] = jnp.zeros((Nb, padRH, Wp, Cb), jnp.float32)
    if padLW:
        xpad_ref[:, :, 0:padLW, :] = jnp.zeros((Nb, Hp, padLW, Cb), jnp.float32)
    if padRW:
        xpad_ref[:, :, padLW + W:Wp, :] = jnp.zeros((Nb, Hp, padRW, Cb), jnp.float32)
    xpad_ref[:, padLH:padLH + H, padLW:padLW + W, :] = x_ref[...].astype(jnp.float32)

    # If Hout/Wout is odd the unused tail rows/cols of the polyphase slab are cropped in
    # the wrapper; zero them once so no stale VMEM leaks into HBM.
    if (Hout % 2) or (Wout % 2):
        o_ref[...] = jnp.zeros(o_ref.shape, o_ref.dtype)

    wk = w_ref[...]                                    # (k*k, Cb) f32 per-lane weights

    # ---- stride-2 polyphase depthwise transposed conv: only real taps are MAC'd ----
    s_sum = jnp.zeros((1, 1, 1, Cb), jnp.float32)
    s_sq = jnp.zeros((1, 1, 1, Cb), jnp.float32)
    for ry in (0, 1):
        nHr = (Hout - ry + 1) // 2
        for rx in (0, 1):
            nWr = (Wout - rx + 1) // 2
            acc = jnp.zeros((Nb, nHr, nWr, Cb), jnp.float32)
            # kw-outer: hoist the sublane-offset W slice once per tap column,
            # reuse it across all kh (H slices are whole-tile offsets -> cheap).
            for (kw, sw) in taps_w[rx]:
                xw = xpad_ref[:, :, sw + padLW: sw + padLW + nWr, :]   # (Nb, Hp, nWr, Cb)
                for (kh, sh) in taps_h[ry]:
                    wv = wk[kh * k + kw].reshape(1, 1, 1, Cb)
                    acc = acc + xw[:, sh + padLH: sh + padLH + nHr] * wv
            # per-lane (= per-channel) BatchNorm partial sums: reductions keep lanes,
            # so no cross-lane (XLU) reduce is ever needed.
            s_sum = s_sum + jnp.sum(acc, axis=(0, 1, 2), keepdims=True)
            s_sq = s_sq + jnp.sum(acc * acc, axis=(0, 1, 2), keepdims=True)
            # Stage un-normalized slab in f32 VMEM scratch (bounds vreg pressure).
            acc_ref[2 * ry + rx, :, 0:nHr, 0:nWr, :] = acc

    # ---- training-mode BatchNorm2d (biased variance over N,Hout,Wout), per lane ----
    cnt = float(Nb * Hout * Wout)
    mean = s_sum / cnt
    var = jnp.maximum(s_sq / cnt - mean * mean, 0.0)   # guard one-pass cancellation
    inv_std = lax.rsqrt(var + eps)
    scale = g_ref[...].reshape(1, 1, 1, Cb) * inv_std
    shift = b_ref[...].reshape(1, 1, 1, Cb) - mean * scale

    # ---- normalize + (ReLU) and store dense polyphase slabs (lane = channels) ----
    for ry in (0, 1):
        nHr = (Hout - ry + 1) // 2
        for rx in (0, 1):
            nWr = (Wout - rx + 1) // 2
            y = acc_ref[2 * ry + rx, :, 0:nHr, 0:nWr, :] * scale + shift
            if act:
                y = jnp.maximum(y, 0.0)
            o_ref[2 * ry + rx, :, 0:nHr, 0:nWr, :] = y.astype(o_ref.dtype)


# ----------------------------------------------------------------------------------
# Wrapper: NCHW in, NCHW out.  One transpose each way; depth-to-space done by XLA.
# ----------------------------------------------------------------------------------
def deconv_depthwise_module(x, w, gamma, beta, *, k, d=3, act=False, eps=1e-5):
    """x: (N, Cin, H, W).  w: (Cin, Cout//Cin, k, k) (PyTorch ConvTranspose2d layout)."""
    N, Cin, H, W = x.shape
    cin_w, mult, kh_, kw_ = w.shape
    assert cin_w == Cin and kh_ == k and kw_ == k
    Cout = Cin * mult
    assert gamma.shape[0] == Cout and beta.shape[0] == Cout
    stride = 2
    p = d + 1
    o_p = 1 if d == 2 else 0
    pb = d * (k - 1) - p
    assert pb >= 0, "kernel/dilation too small for this padding (would require cropping)"
    Hout = (H - 1) * stride - 2 * p + d * (k - 1) + o_p + 1
    Wout = (W - 1) * stride - 2 * p + d * (k - 1) + o_p + 1
    assert Hout >= 2 and Wout >= 2
    nHf = (Hout + 1) // 2
    nWf = (Wout + 1) // 2

    taps = _polyphase_taps(k, d, pb)                   # square kernel: same for H and W
    taps_t = (tuple(taps[0]), tuple(taps[1]))
    pad_h = _pad_amounts(taps, H, Hout)
    pad_w = _pad_amounts(taps, W, Wout)
    Hp = H + pad_h[0] + pad_h[1]
    Wp = W + pad_w[0] + pad_w[1]

    # Channels-last for the kernel (lane dim = channels).  One HBM pass each way.
    xt = jnp.transpose(x, (0, 2, 3, 1))                # (N, H, W, Cin)
    if mult > 1:                                       # depthwise multiplier > 1
        xt = jnp.repeat(xt, mult, axis=-1)             # lane co uses input channel co//mult
    # Flipped weights as a (k*k, Cout) per-lane table (f32 VMEM tile, not SMEM scalars).
    wt = jnp.transpose(jnp.flip(w, axis=(2, 3)), (2, 3, 0, 1)).reshape(k * k, Cout)
    wt = wt.astype(jnp.float32)
    g2 = gamma.astype(jnp.float32).reshape(1, Cout)
    b2 = beta.astype(jnp.float32).reshape(1, Cout)

    # Channel block per grid step (the lane dimension): must divide Cout and be either
    # the whole Cout or a multiple of 128 to satisfy the (8,128) block constraint.
    if Cout > 256 and Cout % 256 == 0:
        Cb = 256
    elif Cout > 128 and Cout % 128 == 0:
        Cb = 128
    else:
        Cb = Cout
    n_cblk = Cout // Cb

    kernel = functools.partial(
        _deconv_bn_kernel, k=k, taps_h=taps_t, taps_w=taps_t,
        pad_h=pad_h, pad_w=pad_w, H=H, W=W, Hout=Hout, Wout=Wout, act=act, eps=eps)

    itemsize = jnp.dtype(x.dtype).itemsize
    in_blk = N * H * W * Cb * itemsize
    out_blk = 4 * N * nHf * nWf * Cb * itemsize
    scratch_b = N * Hp * Wp * Cb * 4 + 4 * N * nHf * nWf * Cb * 4
    vmem_need = 2 * in_blk + 2 * out_blk + scratch_b + (1 << 20)
    vmem_limit = int(min(96 * 2**20, max(32 * 2**20, 2 * vmem_need)))

    conv_flops = 2 * Cout * sum(
        N * ((Hout - ry + 1) // 2) * ((Wout - rx + 1) // 2) * len(taps[ry]) * len(taps[rx])
        for ry in (0, 1) for rx in (0, 1))
    bn_flops = 8 * Cout * N * Hout * Wout
    cost = pl.CostEstimate(
        flops=int(conv_flops + bn_flops),
        transcendentals=int(Cout),
        bytes_accessed=int(N * H * W * Cout * itemsize
                           + 4 * N * nHf * nWf * Cout * itemsize
                           + wt.size * 4 + 2 * Cout * 4))

    out_poly = pl.pallas_call(
        kernel,
        out_shape=jax.ShapeDtypeStruct((4, N, nHf, nWf, Cout), x.dtype),
        grid=(n_cblk,),
        in_specs=[
            pl.BlockSpec((N, H, W, Cb), lambda c: (0, 0, 0, c)),      # channels-last input
            pl.BlockSpec((k * k, Cb), lambda c: (0, c)),              # flipped weights
            pl.BlockSpec((1, Cb), lambda c: (0, c)),                  # BN gamma
            pl.BlockSpec((1, Cb), lambda c: (0, c)),                  # BN beta
        ],
        out_specs=pl.BlockSpec((4, N, nHf, nWf, Cb), lambda c: (0, 0, 0, 0, c)),
        scratch_shapes=[
            pltpu.VMEM((N, Hp, Wp, Cb), jnp.float32),                 # padded input halo
            pltpu.VMEM((4, N, nHf, nWf, Cb), jnp.float32),            # parity accumulators
        ],
        compiler_params=pltpu.CompilerParams(
            dimension_semantics=("parallel",),
            vmem_limit_bytes=vmem_limit,
        ),
        cost_estimate=cost,
    )(xt, wt, g2, b2)

    # Depth-to-space (parity interleave) + crop + back to NCHW: one cheap XLA pass,
    # replacing the per-sample selection matmuls of the previous version.
    y = out_poly.reshape(2, 2, N, nHf, nWf, Cout)
    y = jnp.transpose(y, (2, 5, 3, 0, 4, 1))           # (N, C, nHf, 2, nWf, 2)
    y = y.reshape(N, Cout, 2 * nHf, 2 * nWf)[:, :, :Hout, :Wout]
    return y


# ----------------------------------------------------------------------------------
# Pure-JAX reference (independent of the kernel math)
# ----------------------------------------------------------------------------------
def _reference(x, w, gamma, beta, *, k, d=3, act=False, eps=1e-5):
    N, Cin, H, W = x.shape
    _, mult, _, _ = w.shape
    Cout = Cin * mult
    p = d + 1
    o_p = 1 if d == 2 else 0
    pb = d * (k - 1) - p
    pa = pb + o_p
    w_conv = jnp.flip(w, axis=(2, 3)).reshape(Cout, 1, k, k).astype(jnp.float32)
    y = lax.conv_general_dilated(
        x.astype(jnp.float32), w_conv,
        window_strides=(1, 1),
        padding=[(pb, pa), (pb, pa)],
        lhs_dilation=(2, 2),
        rhs_dilation=(d, d),
        dimension_numbers=("NCHW", "OIHW", "NCHW"),
        feature_group_count=Cin,
        precision=lax.Precision.HIGHEST)
    mean = y.mean(axis=(0, 2, 3), keepdims=True)
    var = ((y - mean) ** 2).mean(axis=(0, 2, 3), keepdims=True)
    y = (y - mean) * lax.rsqrt(var + eps)
    y = y * gamma[None, :, None, None] + beta[None, :, None, None]
    if act:
        y = jnp.maximum(y, 0.0)
    return y


if __name__ == "__main__":
    # batch=2, inch=outch=4 (depthwise), spatial=16, k=4, d=3 -> exact 2x upsampling.
    N, C, H, W = 2, 4, 16, 16
    k, d, act = 4, 3, False

    key = jax.random.PRNGKey(0)
    kx, kw, kg, kb = jax.random.split(key, 4)
    x = jax.random.normal(kx, (N, C, H, W), jnp.float32)
    w = 0.1 * jax.random.normal(kw, (C, 1, k, k), jnp.float32)        # ConvTranspose2d weight
    gamma = 1.0 + 0.1 * jax.random.normal(kg, (C,), jnp.float32)      # BatchNorm2d.weight
    beta = 0.1 * jax.random.normal(kb, (C,), jnp.float32)             # BatchNorm2d.bias

    out = deconv_depthwise_module(x, w, gamma, beta, k=k, d=d, act=act)
    out = jax.block_until_ready(out)

    ref = _reference(x, w, gamma, beta, k=k, d=d, act=act)
    assert out.shape == (N, C, 2 * H, 2 * W), out.shape
    assert jnp.allclose(out, ref, atol=2e-4, rtol=2e-4), float(jnp.abs(out - ref).max())

    print("KERNEL_OK")
</pallas_src>

<mosaic_0001>
module attributes {stable_mosaic.version = 11 : i64} {
  func.func @_deconv_bn_kernel(%arg0: i32, %arg1: memref<2x16x16x4xf32, #tpu.memory_space<vmem>>, %arg2: memref<16x4xf32, #tpu.memory_space<vmem>>, %arg3: memref<1x4xf32, #tpu.memory_space<vmem>>, %arg4: memref<1x4xf32, #tpu.memory_space<vmem>>, %arg5: memref<4x2x16x16x4xf32, #tpu.memory_space<vmem>>, %arg6: memref<2x20x20x4xf32, #tpu.memory_space<vmem>>, %arg7: memref<4x2x16x16x4xf32, #tpu.memory_space<vmem>>) attributes {dimension_semantics = [#tpu.dimension_semantics<parallel>], iteration_bounds = array<i64: 1>, scalar_prefetch = 0 : i64, scratch_operands = 2 : i64, tpu.core_type = #tpu.core_type<tc>, window_params = [{transform_indices = @transform_0, window_bounds = array<i64: 2, 16, 16, 4>}, {transform_indices = @transform_1, window_bounds = array<i64: 16, 4>}, {transform_indices = @transform_2, window_bounds = array<i64: 1, 4>}, {transform_indices = @transform_3, window_bounds = array<i64: 1, 4>}, {transform_indices = @transform_4, window_bounds = array<i64: 4, 2, 16, 16, 4>}]} {
    %cst = arith.constant 0.000000e+00 : f32
    %0 = vector.broadcast %cst : f32 to vector<2x2x20x4xf32>
    %c0 = arith.constant 0 : index
    %c0_0 = arith.constant 0 : index
    %c0_1 = arith.constant 0 : index
    %c0_2 = arith.constant 0 : index
    %1 = vector.load %arg6[%c0, %c0_0, %c0_1, %c0_2] : memref<2x20x20x4xf32, #tpu.memory_space<vmem>>, vector<2x2x20x4xf32>
    tpu.vector_store %arg6[%c0, %c0_0, %c0_1, %c0_2], %0 {strides = array<i32>} : memref<2x20x20x4xf32, #tpu.memory_space<vmem>>, vector<2x2x20x4xf32>,
    %cst_3 = arith.constant 0.000000e+00 : f32
    %2 = vector.broadcast %cst_3 : f32 to vector<2x2x20x4xf32>
    %c0_4 = arith.constant 0 : index
    %c18 = arith.constant 18 : index
    %c0_5 = arith.constant 0 : index
    %c0_6 = arith.constant 0 : index
    %3 = vector.load %arg6[%c0_4, %c18, %c0_5, %c0_6] : memref<2x20x20x4xf32, #tpu.memory_space<vmem>>, vector<2x2x20x4xf32>
    tpu.vector_store %arg6[%c0_4, %c18, %c0_5, %c0_6], %2 {strides = array<i32>} : memref<2x20x20x4xf32, #tpu.memory_space<vmem>>, vector<2x2x20x4xf32>,
    %cst_7 = arith.constant 0.000000e+00 : f32
    %4 = vector.broadcast %cst_7 : f32 to vector<2x20x2x4xf32>
    %c0_8 = arith.constant 0 : index
    %c0_9 = arith.constant 0 : index
    %c0_10 = arith.constant 0 : index
    %c0_11 = arith.constant 0 : index
    %5 = vector.load %arg6[%c0_8, %c0_9, %c0_10, %c0_11] : memref<2x20x20x4xf32, #tpu.memory_space<vmem>>, vector<2x20x2x4xf32>
    tpu.vector_store %arg6[%c0_8, %c0_9, %c0_10, %c0_11], %4 {strides = array<i32>} : memref<2x20x20x4xf32, #tpu.memory_space<vmem>>, vector<2x20x2x4xf32>,
    %cst_12 = arith.constant 0.000000e+00 : f32
    %6 = vector.broadcast %cst_12 : f32 to vector<2x20x2x4xf32>
    %c0_13 = arith.constant 0 : index
    %c0_14 = arith.constant 0 : index
    %c18_15 = arith.constant 18 : index
    %c0_16 = arith.constant 0 : index
    %7 = vector.load %arg6[%c0_13, %c0_14, %c18_15, %c0_16] : memref<2x20x20x4xf32, #tpu.memory_space<vmem>>, vector<2x20x2x4xf32>
    tpu.vector_store %arg6[%c0_13, %c0_14, %c18_15, %c0_16], %6 {strides = array<i32>} : memref<2x20x20x4xf32, #tpu.memory_space<vmem>>, vector<2x20x2x4xf32>,
    %c0_17 = arith.constant 0 : index
    %c0_18 = arith.constant 0 : index
    %c0_19 = arith.constant 0 : index
    %c0_20 = arith.constant 0 : index
    %8 = vector.load %arg1[%c0_17, %c0_18, %c0_19, %c0_20] : memref<2x16x16x4xf32, #tpu.memory_space<vmem>>, vector<2x16x16x4xf32>
    %c0_21 = arith.constant 0 : index
    %c2 = arith.constant 2 : index
    %c2_22 = arith.constant 2 : index
    %c0_23 = arith.constant 0 : index
    %9 = vector.load %arg6[%c0_21, %c2, %c2_22, %c0_23] : memref<2x20x20x4xf32, #tpu.memory_space<vmem>>, vector<2x16x16x4xf32>
    tpu.vector_store %arg6[%c0_21, %c2, %c2_22, %c0_23], %8 {strides = array<i32>} : memref<2x20x20x4xf32, #tpu.memory_space<vmem>>, vector<2x16x16x4xf32>,
    %c0_24 = arith.constant 0 : index
    %c0_25 = arith.constant 0 : index
    %10 = vector.load %arg2[%c0_24, %c0_25] : memref<16x4xf32, #tpu.memory_space<vmem>>, vector<16x4xf32>
    %cst_26 = arith.constant 0.000000e+00 : f32
    %11 = vector.broadcast %cst_26 : f32 to vector<1x1x1x4xf32>
    %cst_27 = arith.constant 0.000000e+00 : f32
    %12 = vector.broadcast %cst_27 : f32 to vector<1x1x1x4xf32>
    %cst_28 = arith.constant 0.000000e+00 : f32
    %13 = vector.broadcast %cst_28 : f32 to vector<2x16x16x4xf32>
    %c0_29 = arith.constant 0 : index
    %c0_30 = arith.constant 0 : index
    %c1 = arith.constant 1 : index
    %c0_31 = arith.constant 0 : index
    %14 = vector.load %arg6[%c0_29, %c0_30, %c1, %c0_31] : memref<2x20x20x4xf32, #tpu.memory_space<vmem>>, vector<2x20x16x4xf32>
    %15 = vector.extract_strided_slice %10 {offsets = [5, 0], sizes = [1, 4], strides = [1, 1]} : vector<16x4xf32> to vector<1x4xf32>
    %16 = vector.shape_cast %15 : vector<1x4xf32> to vector<4xf32>
    %17 = vector.shape_cast %16 : vector<4xf32> to vector<1x1x1x4xf32>
    %18 = vector.extract_strided_slice %14 {offsets = [0, 1, 0, 0], sizes = [2, 16, 16, 4], strides = [1, 1, 1, 1]} : vector<2x20x16x4xf32> to vector<2x16x16x4xf32>
    %19 = vector.broadcast %17 : vector<1x1x1x4xf32> to vector<2x16x16x4xf32>
    %20 = arith.mulf %18, %19 : vector<2x16x16x4xf32>
    %21 = arith.addf %13, %20 : vector<2x16x16x4xf32>
    %22 = vector.extract_strided_slice %10 {offsets = [13, 0], sizes = [1, 4], strides = [1, 1]} : vector<16x4xf32> to vector<1x4xf32>
    %23 = vector.shape_cast %22 : vector<1x4xf32> to vector<4xf32>
    %24 = vector.shape_cast %23 : vector<4xf32> to vector<1x1x1x4xf32>
    %25 = vector.extract_strided_slice %14 {offsets = [0, 4, 0, 0], sizes = [2, 16, 16, 4], strides = [1, 1, 1, 1]} : vector<2x20x16x4xf32> to vector<2x16x16x4xf32>
    %26 = vector.broadcast %24 : vector<1x1x1x4xf32> to vector<2x16x16x4xf32>
    %27 = arith.mulf %25, %26 : vector<2x16x16x4xf32>
    %28 = arith.addf %21, %27 : vector<2x16x16x4xf32>
    %c0_32 = arith.constant 0 : index
    %c0_33 = arith.constant 0 : index
    %c4 = arith.constant 4 : index
    %c0_34 = arith.constant 0 : index
    %29 = vector.load %arg6[%c0_32, %c0_33, %c4, %c0_34] : memref<2x20x20x4xf32, #tpu.memory_space<vmem>>, vector<2x20x16x4xf32>
    %30 = vector.extract_strided_slice %10 {offsets = [7, 0], sizes = [1, 4], strides = [1, 1]} : vector<16x4xf32> to vector<1x4xf32>
    %31 = vector.shape_cast %30 : vector<1x4xf32> to vector<4xf32>
    %32 = vector.shape_cast %31 : vector<4xf32> to vector<1x1x1x4xf32>
    %33 = vector.extract_strided_slice %29 {offsets = [0, 1, 0, 0], sizes = [2, 16, 16, 4], strides = [1, 1, 1, 1]} : vector<2x20x16x4xf32> to vector<2x16x16x4xf32>
    %34 = vector.broadcast %32 : vector<1x1x1x4xf32> to vector<2x16x16x4xf32>
    %35 = arith.mulf %33, %34 : vector<2x16x16x4xf32>
    %36 = arith.addf %28, %35 : vector<2x16x16x4xf32>
    %37 = vector.extract_strided_slice %10 {offsets = [15, 0], sizes = [1, 4], strides = [1, 1]} : vector<16x4xf32> to vector<1x4xf32>
    %38 = vector.shape_cast %37 : vector<1x4xf32> to vector<4xf32>
    %39 = vector.shape_cast %38 : vector<4xf32> to vector<1x1x1x4xf32>
    %40 = vector.extract_strided_slice %29 {offsets = [0, 4, 0, 0], sizes = [2, 16, 16, 4], strides = [1, 1, 1, 1]} : vector<2x20x16x4xf32> to vector<2x16x16x4xf32>
    %41 = vector.broadcast %39 : vector<1x1x1x4xf32> to vector<2x16x16x4xf32>
    %42 = arith.mulf %40, %41 : vector<2x16x16x4xf32>
    %43 = arith.addf %36, %42 : vector<2x16x16x4xf32>
    %cst_35 = arith.constant dense<0.000000e+00> : vector<4xf32>
    %44 = vector.multi_reduction <add>, %43, %cst_35 [0, 1, 2] : vector<2x16x16x4xf32> to vector<4xf32>
    %45 = vector.shape_cast %44 : vector<4xf32> to vector<1x1x1x4xf32>
    %46 = arith.addf %11, %45 : vector<1x1x1x4xf32>
    %47 = arith.mulf %43, %43 : vector<2x16x16x4xf32>
    %cst_36 = arith.constant dense<0.000000e+00> : vector<4xf32>
    %48 = vector.multi_reduction <add>, %47, %cst_36 [0, 1, 2] : vector<2x16x16x4xf32> to vector<4xf32>
    %49 = vector.shape_cast %48 : vector<4xf32> to vector<1x1x1x4xf32>
    %50 = arith.addf %12, %49 : vector<1x1x1x4xf32>
    %c0_37 = arith.constant 0 : index
    %c0_38 = arith.constant 0 : index
    %c0_39 = arith.constant 0 : index
    %c0_40 = arith.constant 0 : index
    %c0_41 = arith.constant 0 : index
    %51 = vector.load %arg7[%c0_37, %c0_38, %c0_39, %c0_40, %c0_41] : memref<4x2x16x16x4xf32, #tpu.memory_space<vmem>>, vector<1x2x16x16x4xf32>
    %52 = vector.shape_cast %51 : vector<1x2x16x16x4xf32> to vector<2x16x16x4xf32>
    %53 = vector.shape_cast %43 : vector<2x16x16x4xf32> to vector<1x2x16x16x4xf32>
    tpu.vector_store %arg7[%c0_37, %c0_38, %c0_39, %c0_40, %c0_41], %53 {strides = array<i32>} : memref<4x2x16x16x4xf32, #tpu.memory_space<vmem>>, vector<1x2x16x16x4xf32>,
    %cst_42 = arith.constant 0.000000e+00 : f32
    %54 = vector.broadcast %cst_42 : f32 to vector<2x16x16x4xf32>
    %c0_43 = arith.constant 0 : index
    %c0_44 = arith.constant 0 : index
    %c0_45 = arith.constant 0 : index
    %c0_46 = arith.constant 0 : index
    %55 = vector.load %arg6[%c0_43, %c0_44, %c0_45, %c0_46] : memref<2x20x20x4xf32, #tpu.memory_space<vmem>>, vector<2x20x16x4xf32>
    %56 = vector.extract_strided_slice %10 {offsets = [4, 0], sizes = [1, 4], strides = [1, 1]} : vector<16x4xf32> to vector<1x4xf32>
    %57 = vector.shape_cast %56 : vector<1x4xf32> to vector<4xf32>
    %58 = vector.shape_cast %57 : vector<4xf32> to vector<1x1x1x4xf32>
    %59 = vector.extract_strided_slice %55 {offsets = [0, 1, 0, 0], sizes = [2, 16, 16, 4], strides = [1, 1, 1, 1]} : vector<2x20x16x4xf32> to vector<2x16x16x4xf32>
    %60 = vector.broadcast %58 : vector<1x1x1x4xf32> to vector<2x16x16x4xf32>
    %61 = arith.mulf %59, %60 : vector<2x16x16x4xf32>
    %62 = arith.addf %54, %61 : vector<2x16x16x4xf32>
    %63 = vector.extract_strided_slice %10 {offsets = [12, 0], sizes = [1, 4], strides = [1, 1]} : vector<16x4xf32> to vector<1x4xf32>
    %64 = vector.shape_cast %63 : vector<1x4xf32> to vector<4xf32>
    %65 = vector.shape_cast %64 : vector<4xf32> to vector<1x1x1x4xf32>
    %66 = vector.extract_strided_slice %55 {offsets = [0, 4, 0, 0], sizes = [2, 16, 16, 4], strides = [1, 1, 1, 1]} : vector<2x20x16x4xf32> to vector<2x16x16x4xf32>
    %67 = vector.broadcast %65 : vector<1x1x1x4xf32> to vector<2x16x16x4xf32>
    %68 = arith.mulf %66, %67 : vector<2x16x16x4xf32>
    %69 = arith.addf %62, %68 : vector<2x16x16x4xf32>
    %c0_47 = arith.constant 0 : index
    %c0_48 = arith.constant 0 : index
    %c3 = arith.constant 3 : index
    %c0_49 = arith.constant 0 : index
    %70 = vector.load %arg6[%c0_47, %c0_48, %c3, %c0_49] : memref<2x20x20x4xf32, #tpu.memory_space<vmem>>, vector<2x20x16x4xf32>
    %71 = vector.extract_strided_slice %10 {offsets = [6, 0], sizes = [1, 4], strides = [1, 1]} : vector<16x4xf32> to vector<1x4xf32>
    %72 = vector.shape_cast %71 : vector<1x4xf32> to vector<4xf32>
    %73 = vector.shape_cast %72 : vector<4xf32> to vector<1x1x1x4xf32>
    %74 = vector.extract_strided_slice %70 {offsets = [0, 1, 0, 0], sizes = [2, 16, 16, 4], strides = [1, 1, 1, 1]} : vector<2x20x16x4xf32> to vector<2x16x16x4xf32>
    %75 = vector.broadcast %73 : vector<1x1x1x4xf32> to vector<2x16x16x4xf32>
    %76 = arith.mulf %74, %75 : vector<2x16x16x4xf32>
    %77 = arith.addf %69, %76 : vector<2x16x16x4xf32>
    %78 = vector.extract_strided_slice %10 {offsets = [14, 0], sizes = [1, 4], strides = [1, 1]} : vector<16x4xf32> to vector<1x4xf32>
    %79 = vector.shape_cast %78 : vector<1x4xf32> to vector<4xf32>
    %80 = vector.shape_cast %79 : vector<4xf32> to vector<1x1x1x4xf32>
    %81 = vector.extract_strided_slice %70 {offsets = [0, 4, 0, 0], sizes = [2, 16, 16, 4], strides = [1, 1, 1, 1]} : vector<2x20x16x4xf32> to vector<2x16x16x4xf32>
    %82 = vector.broadcast %80 : vector<1x1x1x4xf32> to vector<2x16x16x4xf32>
    %83 = arith.mulf %81, %82 : vector<2x16x16x4xf32>
    %84 = arith.addf %77, %83 : vector<2x16x16x4xf32>
    %cst_50 = arith.constant dense<0.000000e+00> : vector<4xf32>
    %85 = vector.multi_reduction <add>, %84, %cst_50 [0, 1, 2] : vector<2x16x16x4xf32> to vector<4xf32>
    %86 = vector.shape_cast %85 : vector<4xf32> to vector<1x1x1x4xf32>
    %87 = arith.addf %46, %86 : vector<1x1x1x4xf32>
    %88 = arith.mulf %84, %84 : vector<2x16x16x4xf32>
    %cst_51 = arith.constant dense<0.000000e+00> : vector<4xf32>
    %89 = vector.multi_reduction <add>, %88, %cst_51 [0, 1, 2] : vector<2x16x16x4xf32> to vector<4xf32>
    %90 = vector.shape_cast %89 : vector<4xf32> to vector<1x1x1x4xf32>
    %91 = arith.addf %50, %90 : vector<1x1x1x4xf32>
    %c1_52 = arith.constant 1 : index
    %c0_53 = arith.constant 0 : index
    %c0_54 = arith.constant 0 : index
    %c0_55 = arith.constant 0 : index
    %c0_56 = arith.constant 0 : index
    %92 = vector.load %arg7[%c1_52, %c0_53, %c0_54, %c0_55, %c0_56] : memref<4x2x16x16x4xf32, #tpu.memory_space<vmem>>, vector<1x2x16x16x4xf32>
    %93 = vector.shape_cast %92 : vector<1x2x16x16x4xf32> to vector<2x16x16x4xf32>
    %94 = vector.shape_cast %84 : vector<2x16x16x4xf32> to vector<1x2x16x16x4xf32>
    tpu.vector_store %arg7[%c1_52, %c0_53, %c0_54, %c0_55, %c0_56], %94 {strides = array<i32>} : memref<4x2x16x16x4xf32, #tpu.memory_space<vmem>>, vector<1x2x16x16x4xf32>,
    %cst_57 = arith.constant 0.000000e+00 : f32
    %95 = vector.broadcast %cst_57 : f32 to vector<2x16x16x4xf32>
    %c0_58 = arith.constant 0 : index
    %c0_59 = arith.constant 0 : index
    %c1_60 = arith.constant 1 : index
    %c0_61 = arith.constant 0 : index
    %96 = vector.load %arg6[%c0_58, %c0_59, %c1_60, %c0_61] : memref<2x20x20x4xf32, #tpu.memory_space<vmem>>, vector<2x20x16x4xf32>
    %97 = vector.extract_strided_slice %10 {offsets = [1, 0], sizes = [1, 4], strides = [1, 1]} : vector<16x4xf32> to vector<1x4xf32>
    %98 = vector.shape_cast %97 : vector<1x4xf32> to vector<4xf32>
    %99 = vector.shape_cast %98 : vector<4xf32> to vector<1x1x1x4xf32>
    %100 = vector.extract_strided_slice %96 {offsets = [0, 0, 0, 0], sizes = [2, 16, 16, 4], strides = [1, 1, 1, 1]} : vector<2x20x16x4xf32> to vector<2x16x16x4xf32>
    %101 = vector.broadcast %99 : vector<1x1x1x4xf32> to vector<2x16x16x4xf32>
    %102 = arith.mulf %100, %101 : vector<2x16x16x4xf32>
    %103 = arith.addf %95, %102 : vector<2x16x16x4xf32>
    %104 = vector.extract_strided_slice %10 {offsets = [9, 0], sizes = [1, 4], strides = [1, 1]} : vector<16x4xf32> to vector<1x4xf32>
    %105 = vector.shape_cast %104 : vector<1x4xf32> to vector<4xf32>
    %106 = vector.shape_cast %105 : vector<4xf32> to vector<1x1x1x4xf32>
    %107 = vector.extract_strided_slice %96 {offsets = [0, 3, 0, 0], sizes = [2, 16, 16, 4], strides = [1, 1, 1, 1]} : vector<2x20x16x4xf32> to vector<2x16x16x4xf32>
    %108 = vector.broadcast %106 : vector<1x1x1x4xf32> to vector<2x16x16x4xf32>
    %109 = arith.mulf %107, %108 : vector<2x16x16x4xf32>
    %110 = arith.addf %103, %109 : vector<2x16x16x4xf32>
    %c0_62 = arith.constant 0 : index
    %c0_63 = arith.constant 0 : index
    %c4_64 = arith.constant 4 : index
    %c0_65 = arith.constant 0 : index
    %111 = vector.load %arg6[%c0_62, %c0_63, %c4_64, %c0_65] : memref<2x20x20x4xf32, #tpu.memory_space<vmem>>, vector<2x20x16x4xf32>
    %112 = vector.extract_strided_slice %10 {offsets = [3, 0], sizes = [1, 4], strides = [1, 1]} : vector<16x4xf32> to vector<1x4xf32>
    %113 = vector.shape_cast %112 : vector<1x4xf32> to vector<4xf32>
    %114 = vector.shape_cast %113 : vector<4xf32> to vector<1x1x1x4xf32>
    %115 = vector.extract_strided_slice %111 {offsets = [0, 0, 0, 0], sizes = [2, 16, 16, 4], strides = [1, 1, 1, 1]} : vector<2x20x16x4xf32> to vector<2x16x16x4xf32>
    %116 = vector.broadcast %114 : vector<1x1x1x4xf32> to vector<2x16x16x4xf32>
    %117 = arith.mulf %115, %116 : vector<2x16x16x4xf32>
    %118 = arith.addf %110, %117 : vector<2x16x16x4xf32>
    %119 = vector.extract_strided_slice %10 {offsets = [11, 0], sizes = [1, 4], strides = [1, 1]} : vector<16x4xf32> to vector<1x4xf32>
    %120 = vector.shape_cast %119 : vector<1x4xf32> to vector<4xf32>
    %121 = vector.shape_cast %120 : vector<4xf32> to vector<1x1x1x4xf32>
    %122 = vector.extract_strided_slice %111 {offsets = [0, 3, 0, 0], sizes = [2, 16, 16, 4], strides = [1, 1, 1, 1]} : vector<2x20x16x4xf32> to vector<2x16x16x4xf32>
    %123 = vector.broadcast %121 : vector<1x1x1x4xf32> to vector<2x16x16x4xf32>
    %124 = arith.mulf %122, %123 : vector<2x16x16x4xf32>
    %125 = arith.addf %118, %124 : vector<2x16x16x4xf32>
    %cst_66 = arith.constant dense<0.000000e+00> : vector<4xf32>
    %126 = vector.multi_reduction <add>, %125, %cst_66 [0, 1, 2] : vector<2x16x16x4xf32> to vector<4xf32>
    %127 = vector.shape_cast %126 : vector<4xf32> to vector<1x1x1x4xf32>
    %128 = arith.addf %87, %127 : vector<1x1x1x4xf32>
    %129 = arith.mulf %125, %125 : vector<2x16x16x4xf32>
    %cst_67 = arith.constant dense<0.000000e+00> : vector<4xf32>
    %130 = vector.multi_reduction <add>, %129, %cst_67 [0, 1, 2] : vector<2x16x16x4xf32> to vector<4xf32>
    %131 = vector.shape_cast %130 : vector<4xf32> to vector<1x1x1x4xf32>
    %132 = arith.addf %91, %131 : vector<1x1x1x4xf32>
    %c2_68 = arith.constant 2 : index
    %c0_69 = arith.constant 0 : index
    %c0_70 = arith.constant 0 : index
    %c0_71 = arith.constant 0 : index
    %c0_72 = arith.constant 0 : index
    %133 = vector.load %arg7[%c2_68, %c0_69, %c0_70, %c0_71, %c0_72] : memref<4x2x16x16x4xf32, #tpu.memory_space<vmem>>, vector<1x2x16x16x4xf32>
    %134 = vector.shape_cast %133 : vector<1x2x16x16x4xf32> to vector<2x16x16x4xf32>
    %135 = vector.shape_cast %125 : vector<2x16x16x4xf32> to vector<1x2x16x16x4xf32>
    tpu.vector_store %arg7[%c2_68, %c0_69, %c0_70, %c0_71, %c0_72], %135 {strides = array<i32>} : memref<4x2x16x16x4xf32, #tpu.memory_space<vmem>>, vector<1x2x16x16x4xf32>,
    %cst_73 = arith.constant 0.000000e+00 : f32
    %136 = vector.broadcast %cst_73 : f32 to vector<2x16x16x4xf32>
    %c0_74 = arith.constant 0 : index
    %c0_75 = arith.constant 0 : index
    %c0_76 = arith.constant 0 : index
    %c0_77 = arith.constant 0 : index
    %137 = vector.load %arg6[%c0_74, %c0_75, %c0_76, %c0_77] : memref<2x20x20x4xf32, #tpu.memory_space<vmem>>, vector<2x20x16x4xf32>
    %138 = vector.extract_strided_slice %10 {offsets = [0, 0], sizes = [1, 4], strides = [1, 1]} : vector<16x4xf32> to vector<1x4xf32>
    %139 = vector.shape_cast %138 : vector<1x4xf32> to vector<4xf32>
    %140 = vector.shape_cast %139 : vector<4xf32> to vector<1x1x1x4xf32>
    %141 = vector.extract_strided_slice %137 {offsets = [0, 0, 0, 0], sizes = [2, 16, 16, 4], strides = [1, 1, 1, 1]} : vector<2x20x16x4xf32> to vector<2x16x16x4xf32>
    %142 = vector.broadcast %140 : vector<1x1x1x4xf32> to vector<2x16x16x4xf32>
    %143 = arith.mulf %141, %142 : vector<2x16x16x4xf32>
    %144 = arith.addf %136, %143 : vector<2x16x16x4xf32>
    %145 = vector.extract_strided_slice %10 {offsets = [8, 0], sizes = [1, 4], strides = [1, 1]} : vector<16x4xf32> to vector<1x4xf32>
    %146 = vector.shape_cast %145 : vector<1x4xf32> to vector<4xf32>
    %147 = vector.shape_cast %146 : vector<4xf32> to vector<1x1x1x4xf32>
    %148 = vector.extract_strided_slice %137 {offsets = [0, 3, 0, 0], sizes = [2, 16, 16, 4], strides = [1, 1, 1, 1]} : vector<2x20x16x4xf32> to vector<2x16x16x4xf32>
    %149 = vector.broadcast %147 : vector<1x1x1x4xf32> to vector<2x16x16x4xf32>
    %150 = arith.mulf %148, %149 : vector<2x16x16x4xf32>
    %151 = arith.addf %144, %150 : vector<2x16x16x4xf32>
    %c0_78 = arith.constant 0 : index
    %c0_79 = arith.constant 0 : index
    %c3_80 = arith.constant 3 : index
    %c0_81 = arith.constant 0 : index
    %152 = vector.load %arg6[%c0_78, %c0_79, %c3_80, %c0_81] : memref<2x20x20x4xf32, #tpu.memory_space<vmem>>, vector<2x20x16x4xf32>
    %153 = vector.extract_strided_slice %10 {offsets = [2, 0], sizes = [1, 4], strides = [1, 1]} : vector<16x4xf32> to vector<1x4xf32>
    %154 = vector.shape_cast %153 : vector<1x4xf32> to vector<4xf32>
    %155 = vector.shape_cast %154 : vector<4xf32> to vector<1x1x1x4xf32>
    %156 = vector.extract_strided_slice %152 {offsets = [0, 0, 0, 0], sizes = [2, 16, 16, 4], strides = [1, 1, 1, 1]} : vector<2x20x16x4xf32> to vector<2x16x16x4xf32>
    %157 = vector.broadcast %155 : vector<1x1x1x4xf32> to vector<2x16x16x4xf32>
    %158 = arith.mulf %156, %157 : vector<2x16x16x4xf32>
    %159 = arith.addf %151, %158 : vector<2x16x16x4xf32>
    %160 = vector.extract_strided_slice %10 {offsets = [10, 0], sizes = [1, 4], strides = [1, 1]} : vector<16x4xf32> to vector<1x4xf32>
    %161 = vector.shape_cast %160 : vector<1x4xf32> to vector<4xf32>
    %162 = vector.shape_cast %161 : vector<4xf32> to vector<1x1x1x4xf32>
    %163 = vector.extract_strided_slice %152 {offsets = [0, 3, 0, 0], sizes = [2, 16, 16, 4], strides = [1, 1, 1, 1]} : vector<2x20x16x4xf32> to vector<2x16x16x4xf32>
    %164 = vector.broadcast %162 : vector<1x1x1x4xf32> to vector<2x16x16x4xf32>
    %165 = arith.mulf %163, %164 : vector<2x16x16x4xf32>
    %166 = arith.addf %159, %165 : vector<2x16x16x4xf32>
    %cst_82 = arith.constant dense<0.000000e+00> : vector<4xf32>
    %167 = vector.multi_reduction <add>, %166, %cst_82 [0, 1, 2] : vector<2x16x16x4xf32> to vector<4xf32>
    %168 = vector.shape_cast %167 : vector<4xf32> to vector<1x1x1x4xf32>
    %169 = arith.addf %128, %168 : vector<1x1x1x4xf32>
    %170 = arith.mulf %166, %166 : vector<2x16x16x4xf32>
    %cst_83 = arith.constant dense<0.000000e+00> : vector<4xf32>
    %171 = vector.multi_reduction <add>, %170, %cst_83 [0, 1, 2] : vector<2x16x16x4xf32> to vector<4xf32>
    %172 = vector.shape_cast %171 : vector<4xf32> to vector<1x1x1x4xf32>
    %173 = arith.addf %132, %172 : vector<1x1x1x4xf32>
    %c3_84 = arith.constant 3 : index
    %c0_85 = arith.constant 0 : index
    %c0_86 = arith.constant 0 : index
    %c0_87 = arith.constant 0 : index
    %c0_88 = arith.constant 0 : index
    %174 = vector.load %arg7[%c3_84, %c0_85, %c0_86, %c0_87, %c0_88] : memref<4x2x16x16x4xf32, #tpu.memory_space<vmem>>, vector<1x2x16x16x4xf32>
    %175 = vector.shape_cast %174 : vector<1x2x16x16x4xf32> to vector<2x16x16x4xf32>
    %176 = vector.shape_cast %166 : vector<2x16x16x4xf32> to vector<1x2x16x16x4xf32>
    tpu.vector_store %arg7[%c3_84, %c0_85, %c0_86, %c0_87, %c0_88], %176 {strides = array<i32>} : memref<4x2x16x16x4xf32, #tpu.memory_space<vmem>>, vector<1x2x16x16x4xf32>,
    %cst_89 = arith.constant 2.048000e+03 : f32
    %177 = vector.broadcast %cst_89 : f32 to vector<1x1x1x4xf32>
    %178 = arith.divf %169, %177 : vector<1x1x1x4xf32>
    %cst_90 = arith.constant 2.048000e+03 : f32
    %179 = vector.broadcast %cst_90 : f32 to vector<1x1x1x4xf32>
    %180 = arith.divf %173, %179 : vector<1x1x1x4xf32>
    %181 = arith.mulf %178, %178 : vector<1x1x1x4xf32>
    %182 = arith.subf %180, %181 : vector<1x1x1x4xf32>
    %cst_91 = arith.constant 0.000000e+00 : f32
    %183 = vector.broadcast %cst_91 : f32 to vector<1x1x1x4xf32>
    %184 = arith.maximumf %182, %183 : vector<1x1x1x4xf32>
    %cst_92 = arith.constant 9.99999974E-6 : f32
    %185 = vector.broadcast %cst_92 : f32 to vector<1x1x1x4xf32>
    %186 = arith.addf %184, %185 : vector<1x1x1x4xf32>
    %187 = math.rsqrt %186 : vector<1x1x1x4xf32>
    %c0_93 = arith.constant 0 : index
    %c0_94 = arith.constant 0 : index
    %188 = vector.load %arg3[%c0_93, %c0_94] : memref<1x4xf32, #tpu.memory_space<vmem>>, vector<1x4xf32>
    %189 = vector.shape_cast %188 : vector<1x4xf32> to vector<1x1x1x4xf32>
    %190 = arith.mulf %189, %187 : vector<1x1x1x4xf32>
    %c0_95 = arith.constant 0 : index
    %c0_96 = arith.constant 0 : index
    %191 = vector.load %arg4[%c0_95, %c0_96] : memref<1x4xf32, #tpu.memory_space<vmem>>, vector<1x4xf32>
    %192 = vector.shape_cast %191 : vector<1x4xf32> to vector<1x1x1x4xf32>
    %193 = arith.mulf %178, %190 : vector<1x1x1x4xf32>
    %194 = arith.subf %192, %193 : vector<1x1x1x4xf32>
    %c0_97 = arith.constant 0 : index
    %c0_98 = arith.constant 0 : index
    %c0_99 = arith.constant 0 : index
    %c0_100 = arith.constant 0 : index
    %c0_101 = arith.constant 0 : index
    %195 = vector.load %arg7[%c0_97, %c0_98, %c0_99, %c0_100, %c0_101] : memref<4x2x16x16x4xf32, #tpu.memory_space<vmem>>, vector<1x2x16x16x4xf32>
    %196 = vector.shape_cast %195 : vector<1x2x16x16x4xf32> to vector<2x16x16x4xf32>
    %197 = vector.broadcast %190 : vector<1x1x1x4xf32> to vector<2x16x16x4xf32>
    %198 = arith.mulf %196, %197 : vector<2x16x16x4xf32>
    %199 = vector.broadcast %194 : vector<1x1x1x4xf32> to vector<2x16x16x4xf32>
    %200 = arith.addf %198, %199 : vector<2x16x16x4xf32>
    %c0_102 = arith.constant 0 : index
    %c0_103 = arith.constant 0 : index
    %c0_104 = arith.constant 0 : index
    %c0_105 = arith.constant 0 : index
    %c0_106 = arith.constant 0 : index
    %201 = vector.load %arg5[%c0_102, %c0_103, %c0_104, %c0_105, %c0_106] : memref<4x2x16x16x4xf32, #tpu.memory_space<vmem>>, vector<1x2x16x16x4xf32>
    %202 = vector.shape_cast %201 : vector<1x2x16x16x4xf32> to vector<2x16x16x4xf32>
    %203 = vector.shape_cast %200 : vector<2x16x16x4xf32> to vector<1x2x16x16x4xf32>
    tpu.vector_store %arg5[%c0_102, %c0_103, %c0_104, %c0_105, %c0_106], %203 {strides = array<i32>} : memref<4x2x16x16x4xf32, #tpu.memory_space<vmem>>, vector<1x2x16x16x4xf32>,
    %c1_107 = arith.constant 1 : index
    %c0_108 = arith.constant 0 : index
    %c0_109 = arith.constant 0 : index
    %c0_110 = arith.constant 0 : index
    %c0_111 = arith.constant 0 : index
    %204 = vector.load %arg7[%c1_107, %c0_108, %c0_109, %c0_110, %c0_111] : memref<4x2x16x16x4xf32, #tpu.memory_space<vmem>>, vector<1x2x16x16x4xf32>
    %205 = vector.shape_cast %204 : vector<1x2x16x16x4xf32> to vector<2x16x16x4xf32>
    %206 = vector.broadcast %190 : vector<1x1x1x4xf32> to vector<2x16x16x4xf32>
    %207 = arith.mulf %205, %206 : vector<2x16x16x4xf32>
    %208 = vector.broadcast %194 : vector<1x1x1x4xf32> to vector<2x16x16x4xf32>
    %209 = arith.addf %207, %208 : vector<2x16x16x4xf32>
    %c1_112 = arith.constant 1 : index
    %c0_113 = arith.constant 0 : index
    %c0_114 = arith.constant 0 : index
    %c0_115 = arith.constant 0 : index
    %c0_116 = arith.constant 0 : index
    %210 = vector.load %arg5[%c1_112, %c0_113, %c0_114, %c0_115, %c0_116] : memref<4x2x16x16x4xf32, #tpu.memory_space<vmem>>, vector<1x2x16x16x4xf32>
    %211 = vector.shape_cast %210 : vector<1x2x16x16x4xf32> to vector<2x16x16x4xf32>
    %212 = vector.shape_cast %209 : vector<2x16x16x4xf32> to vector<1x2x16x16x4xf32>
    tpu.vector_store %arg5[%c1_112, %c0_113, %c0_114, %c0_115, %c0_116], %212 {strides = array<i32>} : memref<4x2x16x16x4xf32, #tpu.memory_space<vmem>>, vector<1x2x16x16x4xf32>,
    %c2_117 = arith.constant 2 : index
    %c0_118 = arith.constant 0 : index
    %c0_119 = arith.constant 0 : index
    %c0_120 = arith.constant 0 : index
    %c0_121 = arith.constant 0 : index
    %213 = vector.load %arg7[%c2_117, %c0_118, %c0_119, %c0_120, %c0_121] : memref<4x2x16x16x4xf32, #tpu.memory_space<vmem>>, vector<1x2x16x16x4xf32>
    %214 = vector.shape_cast %213 : vector<1x2x16x16x4xf32> to vector<2x16x16x4xf32>
    %215 = vector.broadcast %190 : vector<1x1x1x4xf32> to vector<2x16x16x4xf32>
    %216 = arith.mulf %214, %215 : vector<2x16x16x4xf32>
    %217 = vector.broadcast %194 : vector<1x1x1x4xf32> to vector<2x16x16x4xf32>
    %218 = arith.addf %216, %217 : vector<2x16x16x4xf32>
    %c2_122 = arith.constant 2 : index
    %c0_123 = arith.constant 0 : index
    %c0_124 = arith.constant 0 : index
    %c0_125 = arith.constant 0 : index
    %c0_126 = arith.constant 0 : index
    %219 = vector.load %arg5[%c2_122, %c0_123, %c0_124, %c0_125, %c0_126] : memref<4x2x16x16x4xf32, #tpu.memory_space<vmem>>, vector<1x2x16x16x4xf32>
    %220 = vector.shape_cast %219 : vector<1x2x16x16x4xf32> to vector<2x16x16x4xf32>
    %221 = vector.shape_cast %218 : vector<2x16x16x4xf32> to vector<1x2x16x16x4xf32>
    tpu.vector_store %arg5[%c2_122, %c0_123, %c0_124, %c0_125, %c0_126], %221 {strides = array<i32>} : memref<4x2x16x16x4xf32, #tpu.memory_space<vmem>>, vector<1x2x16x16x4xf32>,
    %c3_127 = arith.constant 3 : index
    %c0_128 = arith.constant 0 : index
    %c0_129 = arith.constant 0 : index
    %c0_130 = arith.constant 0 : index
    %c0_131 = arith.constant 0 : index
    %222 = vector.load %arg7[%c3_127, %c0_128, %c0_129, %c0_130, %c0_131] : memref<4x2x16x16x4xf32, #tpu.memory_space<vmem>>, vector<1x2x16x16x4xf32>
    %223 = vector.shape_cast %222 : vector<1x2x16x16x4xf32> to vector<2x16x16x4xf32>
    %224 = vector.broadcast %190 : vector<1x1x1x4xf32> to vector<2x16x16x4xf32>
    %225 = arith.mulf %223, %224 : vector<2x16x16x4xf32>
    %226 = vector.broadcast %194 : vector<1x1x1x4xf32> to vector<2x16x16x4xf32>
    %227 = arith.addf %225, %226 : vector<2x16x16x4xf32>
    %c3_132 = arith.constant 3 : index
    %c0_133 = arith.constant 0 : index
    %c0_134 = arith.constant 0 : index
    %c0_135 = arith.constant 0 : index
    %c0_136 = arith.constant 0 : index
    %228 = vector.load %arg5[%c3_132, %c0_133, %c0_134, %c0_135, %c0_136] : memref<4x2x16x16x4xf32, #tpu.memory_space<vmem>>, vector<1x2x16x16x4xf32>
    %229 = vector.shape_cast %228 : vector<1x2x16x16x4xf32> to vector<2x16x16x4xf32>
    %230 = vector.shape_cast %227 : vector<2x16x16x4xf32> to vector<1x2x16x16x4xf32>
    tpu.vector_store %arg5[%c3_132, %c0_133, %c0_134, %c0_135, %c0_136], %230 {strides = array<i32>} : memref<4x2x16x16x4xf32, #tpu.memory_space<vmem>>, vector<1x2x16x16x4xf32>,
    return
  }
  func.func @transform_0(%arg0: i32) -> (i32, i32, i32, i32) {
    %c0_i32 = arith.constant 0 : i32
    %c0_i32_0 = arith.constant 0 : i32
    %c0_i32_1 = arith.constant 0 : i32
    %c0_i32_2 = arith.constant 0 : i32
    return %c0_i32, %c0_i32_0, %c0_i32_1, %arg0 : i32, i32, i32, i32
  }
  func.func @transform_1(%arg0: i32) -> (i32, i32) {
    %c0_i32 = arith.constant 0 : i32
    %c0_i32_0 = arith.constant 0 : i32
    return %c0_i32, %arg0 : i32, i32
  }
  func.func @transform_2(%arg0: i32) -> (i32, i32) {
    %c0_i32 = arith.constant 0 : i32
    %c0_i32_0 = arith.constant 0 : i32
    return %c0_i32, %arg0 : i32, i32
  }
  func.func @transform_3(%arg0: i32) -> (i32, i32) {
    %c0_i32 = arith.constant 0 : i32
    %c0_i32_0 = arith.constant 0 : i32
    return %c0_i32, %arg0 : i32, i32
  }
  func.func @transform_4(%arg0: i32) -> (i32, i32, i32, i32, i32) {
    %c0_i32 = arith.constant 0 : i32
    %c0_i32_0 = arith.constant 0 : i32
    %c0_i32_1 = arith.constant 0 : i32
    %c0_i32_2 = arith.constant 0 : i32
    %c0_i32_3 = arith.constant 0 : i32
    return %c0_i32, %c0_i32_0, %c0_i32_1, %c0_i32_2, %arg0 : i32, i32, i32, i32, i32
  }
}

</mosaic_0001>

<bundles_post_ra>
// kernel: tpu_custom_call.1
= control target key start
LH: loop header
LB: loop body
LE: loop exit
PB: predicated region body
PF: predicated region fallthrough
CT: control target
= control target key end

     0   :  { %vm17_vm0 = vcmask 31744   ;;  %vm20_vm1 = vcmask 27648   ;;  %vm44_vm2 = vcmask 25600   ;;  %v5842_v0 = vmov 0.0   ;;  %s11496_s0 = inlined_call_operand.vmem [shape: f32[2,16,16,4], index: 0, kind: input, shape index: {}]   ;;  %s11497_s1 = inlined_call_operand.vmem [shape: f32[16,4], index: 1, kind: input, shape index: {}]   ;;  %s11498_s2 = inlined_call_operand.vmem [shape: f32[1,4], index: 2, kind: input, shape index: {}]   ;;  %s11499_s3 = inlined_call_operand.vmem [shape: f32[1,4], index: 3, kind: input, shape index: {}]   ;;  %s11500_s4 = inlined_call_operand.vmem [shape: f32[4,2,16,16,4], index: 4, kind: output, shape index: {}]  }
   0x1   :  { %18 = vst.msk [vmem:[#allocation2] sm:$0xff] %vm17_vm0, %v5842_v0  ;;  %19 = vst.msk [vmem:[#allocation2 + $0x8] sm:$0xff] %vm17_vm0, %v5842_v0  ;;  %v125_v1 = vld [vmem:[%s11496_s0] sm:$0xff]  ;;  %v126_v2 = vld [vmem:[%s11496_s0 + $0x8] sm:$0xff]  ;;  %v332_v4 = vlaneseq }
   0x2   :  { %22 = vst.msk [vmem:[#allocation2 + $0x18] sm:$0xff] %vm17_vm0, %v5842_v0  ;;  %23 = vst.msk [vmem:[#allocation2 + $0x20] sm:$0xff] %vm17_vm0, %v5842_v0  ;;  %v127_v3 = vld [vmem:[%s11496_s0 + $0x10] sm:$0xff]  ;;  %v128_v5 = vld [vmem:[%s11496_s0 + $0x18] sm:$0xff] }
   0x3   :  { %25 = vst.msk [vmem:[#allocation2 + $0x1e0] sm:$0xff] %vm17_vm0, %v5842_v0  ;;  %26 = vst.msk [vmem:[#allocation2 + $0x1e8] sm:$0xff] %vm17_vm0, %v5842_v0  ;;  %v129_v6 = vld [vmem:[%s11496_s0 + $0x20] sm:$0xff]  ;;  %v130_v7 = vld [vmem:[%s11496_s0 + $0x28] sm:$0xff]  ;;  %v6109_v11 = vshrl.u32 %v332_v4, 7 }
   0x4   :  { %28 = vst.msk [vmem:[#allocation2 + $0x1f8] sm:$0xff] %vm17_vm0, %v5842_v0  ;;  %29 = vst.msk [vmem:[#allocation2 + $0x200] sm:$0xff] %vm17_vm0, %v5842_v0  ;;  %v131_v8 = vld [vmem:[%s11496_s0 + $0x30] sm:$0xff]  ;;  %v132_v9 = vld [vmem:[%s11496_s0 + $0x38] sm:$0xff] }
   0x5   :  { %32 = vst.msk [vmem:[#allocation2 + $0x1b0] sm:$0xff] %vm17_vm0, %v5842_v0  ;;  %33 = vst.msk [vmem:[#allocation2 + $0x1b8] sm:$0xff] %vm17_vm0, %v5842_v0  ;;  %v133_v10 = vld [vmem:[%s11496_s0 + $0x40] sm:$0xff]  ;;  %v134_v12 = vld [vmem:[%s11496_s0 + $0x48] sm:$0xff]  ;;  %v334_v18 = vsub.s32 5, %v6109_v11  ;;  %v674_v19 = vsub.s32 7, %v6109_v11 }
   0x6   :  { %35 = vst.msk [vmem:[#allocation2 + $0x1c8] sm:$0xff] %vm17_vm0, %v5842_v0  ;;  %36 = vst.msk [vmem:[#allocation2 + $0x1d0] sm:$0xff] %vm17_vm0, %v5842_v0  ;;  %v135_v13 = vld [vmem:[%s11496_s0 + $0x50] sm:$0xff]  ;;  %v136_v14 = vld [vmem:[%s11496_s0 + $0x58] sm:$0xff]  ;;  %v1410_v23 = vsub.s32 4, %v6109_v11  ;;  %v1750_v24 = vsub.s32 6, %v6109_v11 }
   0x7   :  { %38 = vst.msk [vmem:[#allocation2 + $0x390] sm:$0xff] %vm17_vm0, %v5842_v0  ;;  %39 = vst.msk [vmem:[#allocation2 + $0x398] sm:$0xff] %vm17_vm0, %v5842_v0  ;;  %v137_v15 = vld [vmem:[%s11496_s0 + $0x60] sm:$0xff]  ;;  %v138_v16 = vld [vmem:[%s11496_s0 + $0x68] sm:$0xff]  ;;  %v6181_v33 = vsub.s32 0, %v6109_v11 }
   0x8   :  { %41 = vst.msk [vmem:[#allocation2 + $0x3a8] sm:$0xff] %vm17_vm0, %v5842_v0  ;;  %42 = vst.msk [vmem:[#allocation2 + $0x3b0] sm:$0xff] %vm17_vm0, %v5842_v0  ;;  %v139_v17 = vld [vmem:[%s11496_s0 + $0x70] sm:$0xff]  ;;  %v140_v20 = vld [vmem:[%s11496_s0 + $0x78] sm:$0xff] }
   0x9   :  { %24 = vst.msk [vmem:[#allocation2 + $0x28] sm:$0xf] %vm20_vm1, %v5842_v0  ;;  %21 = vst.msk [vmem:[#allocation2 + $0x10] sm:$0xf] %vm20_vm1, %v5842_v0  ;;  %v141_v21 = vld [vmem:[%s11496_s0 + $0x80] sm:$0xff]  ;;  %v142_v22 = vld [vmem:[%s11496_s0 + $0x88] sm:$0xff] }
   0xa   :  { %27 = vst.msk [vmem:[#allocation2 + $0x1f0] sm:$0xf] %vm20_vm1, %v5842_v0  ;;  %30 = vst.msk [vmem:[#allocation2 + $0x208] sm:$0xf] %vm20_vm1, %v5842_v0  ;;  %v143_v25 = vld [vmem:[%s11496_s0 + $0x90] sm:$0xff]  ;;  %v144_v26 = vld [vmem:[%s11496_s0 + $0x98] sm:$0xff] }
   0xb   :  { %34 = vst.msk [vmem:[#allocation2 + $0x1c0] sm:$0xf] %vm20_vm1, %v5842_v0  ;;  %37 = vst.msk [vmem:[#allocation2 + $0x1d8] sm:$0xf] %vm20_vm1, %v5842_v0  ;;  %v145_v27 = vld [vmem:[%s11496_s0 + $0xa0] sm:$0xff]  ;;  %v6175_v30 = vld [vmem:[%s11497_s1 + $0x8] sm:$0xff] }
   0xc   :  { %40 = vst.msk [vmem:[#allocation2 + $0x3a0] sm:$0xf] %vm20_vm1, %v5842_v0  ;;  %43 = vst.msk [vmem:[#allocation2 + $0x3b8] sm:$0xf] %vm20_vm1, %v5842_v0  ;;  %v6170_v29 = vld [vmem:[%s11497_s1] sm:$0xff]  ;;  %v6190_v37 = vrot.slane %v6175_v30, %v334_v18  ;;  %v6196_v39 = vrot.slane %v6175_v30, %v674_v19  ;;  %v6212_v46 = vrot.slane %v6175_v30, %v1410_v23 }
   0xd   :  { %47 = vst.msk [vmem:[#allocation2 + $0x30] sm:$0x3] %vm44_vm2, %v5842_v0  ;;  %48 = vst.msk [vmem:[#allocation2 + $0x48] sm:$0x3] %vm44_vm2, %v5842_v0  ;;  %v6177_v31 = vld [vmem:[#allocation2 + $0x1c] sm:$0xff]  ;;  %v6187_v36 = vrot.slane %v6170_v29, %v334_v18  ;;  %v6193_v38 = vrot.slane %v6170_v29, %v674_v19  ;;  %v6209_v45 = vrot.slane %v6170_v29, %v1410_v23 }
   0xe   :  { %49 = vst.msk [vmem:[#allocation2 + $0x60] sm:$0x3] %vm44_vm2, %v5842_v0  ;;  %50 = vst.msk [vmem:[#allocation2 + $0x78] sm:$0x3] %vm44_vm2, %v5842_v0  ;;  %v6215_v47 = vrot.slane %v6170_v29, %v1750_v24  ;;  %v6218_v48 = vrot.slane %v6175_v30, %v1750_v24 }
   0xf   :  { %51 = vst.msk [vmem:[#allocation2 + $0x90] sm:$0x3] %vm44_vm2, %v5842_v0  ;;  %52 = vst.msk [vmem:[#allocation2 + $0xa8] sm:$0x3] %vm44_vm2, %v5842_v0  ;;  %v676_v51 = vmul.f32 %v6193_v38, %v6177_v31 }
  0x10   :  { %53 = vst.msk [vmem:[#allocation2 + $0xc0] sm:$0x3] %vm44_vm2, %v5842_v0  ;;  %54 = vst.msk [vmem:[#allocation2 + $0xd8] sm:$0x3] %vm44_vm2, %v5842_v0  ;;  %v6198_v40 = vld [vmem:[#allocation2 + $0x21] sm:$0xff] }
  0x11   :  { %55 = vst.msk [vmem:[#allocation2 + $0xf0] sm:$0x3] %vm44_vm2, %v5842_v0  ;;  %56 = vst.msk [vmem:[#allocation2 + $0x108] sm:$0x3] %vm44_vm2, %v5842_v0  ;;  %v337_v56 = vmul.f32 %v6187_v36, %v6198_v40 }
  0x12   :  { %57 = vst.msk [vmem:[#allocation2 + $0x120] sm:$0x3] %vm44_vm2, %v5842_v0  ;;  %58 = vst.msk [vmem:[#allocation2 + $0x138] sm:$0x3] %vm44_vm2, %v5842_v0 }
  0x13   :  { %59 = vst.msk [vmem:[#allocation2 + $0x150] sm:$0x3] %vm44_vm2, %v5842_v0  ;;  %60 = vst.msk [vmem:[#allocation2 + $0x168] sm:$0x3] %vm44_vm2, %v5842_v0 }
  0x14   :  { %61 = vst.msk [vmem:[#allocation2 + $0x180] sm:$0x3] %vm44_vm2, %v5842_v0  ;;  %62 = vst.msk [vmem:[#allocation2 + $0x198] sm:$0x3] %vm44_vm2, %v5842_v0 }
  0x15   :  { %67 = vst.msk [vmem:[#allocation2 + $0x210] sm:$0x3] %vm44_vm2, %v5842_v0  ;;  %68 = vst.msk [vmem:[#allocation2 + $0x228] sm:$0x3] %vm44_vm2, %v5842_v0 }
  0x16   :  { %69 = vst.msk [vmem:[#allocation2 + $0x240] sm:$0x3] %vm44_vm2, %v5842_v0  ;;  %70 = vst.msk [vmem:[#allocation2 + $0x258] sm:$0x3] %vm44_vm2, %v5842_v0 }
  0x17   :  { %71 = vst.msk [vmem:[#allocation2 + $0x270] sm:$0x3] %vm44_vm2, %v5842_v0  ;;  %72 = vst.msk [vmem:[#allocation2 + $0x288] sm:$0x3] %vm44_vm2, %v5842_v0 }
  0x18   :  { %73 = vst.msk [vmem:[#allocation2 + $0x2a0] sm:$0x3] %vm44_vm2, %v5842_v0  ;;  %74 = vst.msk [vmem:[#allocation2 + $0x2b8] sm:$0x3] %vm44_vm2, %v5842_v0 }
  0x19   :  { %75 = vst.msk [vmem:[#allocation2 + $0x2d0] sm:$0x3] %vm44_vm2, %v5842_v0  ;;  %76 = vst.msk [vmem:[#allocation2 + $0x2e8] sm:$0x3] %vm44_vm2, %v5842_v0 }
  0x1a   :  { %77 = vst.msk [vmem:[#allocation2 + $0x300] sm:$0x3] %vm44_vm2, %v5842_v0  ;;  %78 = vst.msk [vmem:[#allocation2 + $0x318] sm:$0x3] %vm44_vm2, %v5842_v0 }
  0x1b   :  { %79 = vst.msk [vmem:[#allocation2 + $0x330] sm:$0x3] %vm44_vm2, %v5842_v0  ;;  %80 = vst.msk [vmem:[#allocation2 + $0x348] sm:$0x3] %vm44_vm2, %v5842_v0 }
  0x1c   :  { %81 = vst.msk [vmem:[#allocation2 + $0x360] sm:$0x3] %vm44_vm2, %v5842_v0  ;;  %82 = vst.msk [vmem:[#allocation2 + $0x378] sm:$0x3] %vm44_vm2, %v5842_v0 }
  0x1d   :  { %87 = vst.msk [vmem:[#allocation2 + $0x42] sm:$0x3] %vm44_vm2, %v5842_v0  ;;  %88 = vst.msk [vmem:[#allocation2 + $0x5a] sm:$0x3] %vm44_vm2, %v5842_v0 }
  0x1e   :  { %89 = vst.msk [vmem:[#allocation2 + $0x72] sm:$0x3] %vm44_vm2, %v5842_v0  ;;  %90 = vst.msk [vmem:[#allocation2 + $0x8a] sm:$0x3] %vm44_vm2, %v5842_v0 }
  0x1f   :  { %91 = vst.msk [vmem:[#allocation2 + $0xa2] sm:$0x3] %vm44_vm2, %v5842_v0  ;;  %92 = vst.msk [vmem:[#allocation2 + $0xba] sm:$0x3] %vm44_vm2, %v5842_v0 }
  0x20   :  { %93 = vst.msk [vmem:[#allocation2 + $0xd2] sm:$0x3] %vm44_vm2, %v5842_v0  ;;  %94 = vst.msk [vmem:[#allocation2 + $0xea] sm:$0x3] %vm44_vm2, %v5842_v0 }
  0x21   :  { %95 = vst.msk [vmem:[#allocation2 + $0x102] sm:$0x3] %vm44_vm2, %v5842_v0  ;;  %96 = vst.msk [vmem:[#allocation2 + $0x11a] sm:$0x3] %vm44_vm2, %v5842_v0 }
  0x22   :  { %97 = vst.msk [vmem:[#allocation2 + $0x132] sm:$0x3] %vm44_vm2, %v5842_v0  ;;  %98 = vst.msk [vmem:[#allocation2 + $0x14a] sm:$0x3] %vm44_vm2, %v5842_v0 }
  0x23   :  { %99 = vst.msk [vmem:[#allocation2 + $0x162] sm:$0x3] %vm44_vm2, %v5842_v0  ;;  %100 = vst.msk [vmem:[#allocation2 + $0x17a] sm:$0x3] %vm44_vm2, %v5842_v0 }
  0x24   :  { %101 = vst.msk [vmem:[#allocation2 + $0x192] sm:$0x3] %vm44_vm2, %v5842_v0  ;;  %102 = vst.msk [vmem:[#allocation2 + $0x1aa] sm:$0x3] %vm44_vm2, %v5842_v0 }
  0x25   :  { %107 = vst.msk [vmem:[#allocation2 + $0x222] sm:$0x3] %vm44_vm2, %v5842_v0  ;;  %108 = vst.msk [vmem:[#allocation2 + $0x23a] sm:$0x3] %vm44_vm2, %v5842_v0 }
  0x26   :  { %109 = vst.msk [vmem:[#allocation2 + $0x252] sm:$0x3] %vm44_vm2, %v5842_v0  ;;  %110 = vst.msk [vmem:[#allocation2 + $0x26a] sm:$0x3] %vm44_vm2, %v5842_v0 }
  0x27   :  { %111 = vst.msk [vmem:[#allocation2 + $0x282] sm:$0x3] %vm44_vm2, %v5842_v0  ;;  %112 = vst.msk [vmem:[#allocation2 + $0x29a] sm:$0x3] %vm44_vm2, %v5842_v0 }
  0x28   :  { %113 = vst.msk [vmem:[#allocation2 + $0x2b2] sm:$0x3] %vm44_vm2, %v5842_v0  ;;  %114 = vst.msk [vmem:[#allocation2 + $0x2ca] sm:$0x3] %vm44_vm2, %v5842_v0 }
  0x29   :  { %115 = vst.msk [vmem:[#allocation2 + $0x2e2] sm:$0x3] %vm44_vm2, %v5842_v0  ;;  %116 = vst.msk [vmem:[#allocation2 + $0x2fa] sm:$0x3] %vm44_vm2, %v5842_v0 }
  0x2a   :  { %117 = vst.msk [vmem:[#allocation2 + $0x312] sm:$0x3] %vm44_vm2, %v5842_v0  ;;  %118 = vst.msk [vmem:[#allocation2 + $0x32a] sm:$0x3] %vm44_vm2, %v5842_v0 }
  0x2b   :  { %119 = vst.msk [vmem:[#allocation2 + $0x342] sm:$0x3] %vm44_vm2, %v5842_v0  ;;  %120 = vst.msk [vmem:[#allocation2 + $0x35a] sm:$0x3] %vm44_vm2, %v5842_v0 }
  0x2c   :  { %121 = vst.msk [vmem:[#allocation2 + $0x372] sm:$0x3] %vm44_vm2, %v5842_v0  ;;  %122 = vst.msk [vmem:[#allocation2 + $0x38a] sm:$0x3] %vm44_vm2, %v5842_v0 }
  0x2d   :  { %45 = vst.msk [vmem:[#allocation2] sm:$0x3] %vm44_vm2, %v5842_v0  ;;  %46 = vst.msk [vmem:[#allocation2 + $0x18] sm:$0x3] %vm44_vm2, %v5842_v0 }
  0x2e   :  { %63 = vst.msk [vmem:[#allocation2 + $0x1b0] sm:$0x3] %vm44_vm2, %v5842_v0  ;;  %64 = vst.msk [vmem:[#allocation2 + $0x1c8] sm:$0x3] %vm44_vm2, %v5842_v0 }
  0x2f   :  { %65 = vst.msk [vmem:[#allocation2 + $0x1e0] sm:$0x3] %vm44_vm2, %v5842_v0  ;;  %66 = vst.msk [vmem:[#allocation2 + $0x1f8] sm:$0x3] %vm44_vm2, %v5842_v0 }
  0x30   :  { %83 = vst.msk [vmem:[#allocation2 + $0x390] sm:$0x3] %vm44_vm2, %v5842_v0  ;;  %84 = vst.msk [vmem:[#allocation2 + $0x3a8] sm:$0x3] %vm44_vm2, %v5842_v0 }
  0x31   :  { %85 = vst.msk [vmem:[#allocation2 + $0x12] sm:$0x3] %vm44_vm2, %v5842_v0  ;;  %86 = vst.msk [vmem:[#allocation2 + $0x2a] sm:$0x3] %vm44_vm2, %v5842_v0 }
  0x32   :  { %103 = vst.msk [vmem:[#allocation2 + $0x1c2] sm:$0x3] %vm44_vm2, %v5842_v0  ;;  %104 = vst.msk [vmem:[#allocation2 + $0x1da] sm:$0x3] %vm44_vm2, %v5842_v0 }
  0x33   :  { %105 = vst.msk [vmem:[#allocation2 + $0x1f2] sm:$0x3] %vm44_vm2, %v5842_v0  ;;  %106 = vst.msk [vmem:[#allocation2 + $0x20a] sm:$0x3] %vm44_vm2, %v5842_v0 }
  0x34   :  { %123 = vst.msk [vmem:[#allocation2 + $0x3a2] sm:$0x3] %vm44_vm2, %v5842_v0  ;;  %124 = vst.msk [vmem:[#allocation2 + $0x3ba] sm:$0x3] %vm44_vm2, %v5842_v0  ;;  %v6184_v35 = vld [vmem:[#allocation2 + $0x19] sm:$0xff] }
  0x35   :  { %190 = vst.msk [vmem:[#allocation2 + $0x32] sm:$0xff] %vm17_vm0, %v125_v1  ;;  %191 = vst.msk [vmem:[#allocation2 + $0x3a] sm:$0xff] %vm17_vm0, %v126_v2  ;;  %v336_v49 = vmul.f32 %v6187_v36, %v6184_v35 }
  0x36   :  { %192 = vst.msk [vmem:[#allocation2 + $0x4a] sm:$0xff] %vm17_vm0, %v127_v3  ;;  %193 = vst.msk [vmem:[#allocation2 + $0x52] sm:$0xff] %vm17_vm0, %v128_v5 }
  0x37   :  { %194 = vst.msk [vmem:[#allocation2 + $0x62] sm:$0xff] %vm17_vm0, %v129_v6  ;;  %195 = vst.msk [vmem:[#allocation2 + $0x6a] sm:$0xff] %vm17_vm0, %v130_v7 }
  0x38   :  { %196 = vst.msk [vmem:[#allocation2 + $0x7a] sm:$0xff] %vm17_vm0, %v131_v8  ;;  %197 = vst.msk [vmem:[#allocation2 + $0x82] sm:$0xff] %vm17_vm0, %v132_v9  ;;  %v6200_v41 = vld [vmem:[#allocation2 + $0x24] sm:$0xff] }
  0x39   :  { %198 = vst.msk [vmem:[#allocation2 + $0x92] sm:$0xff] %vm17_vm0, %v133_v10  ;;  %199 = vst.msk [vmem:[#allocation2 + $0x9a] sm:$0xff] %vm17_vm0, %v134_v12  ;;  %v677_v58 = vmul.f32 %v6193_v38, %v6200_v41 }
  0x3a   :  { %200 = vst.msk [vmem:[#allocation2 + $0xaa] sm:$0xff] %vm17_vm0, %v135_v13  ;;  %201 = vst.msk [vmem:[#allocation2 + $0xb2] sm:$0xff] %vm17_vm0, %v136_v14 }
  0x3b   :  { %202 = vst.msk [vmem:[#allocation2 + $0xc2] sm:$0xff] %vm17_vm0, %v137_v15  ;;  %203 = vst.msk [vmem:[#allocation2 + $0xca] sm:$0xff] %vm17_vm0, %v138_v16 }
  0x3c   :  { %204 = vst.msk [vmem:[#allocation2 + $0xda] sm:$0xff] %vm17_vm0, %v139_v17  ;;  %205 = vst.msk [vmem:[#allocation2 + $0xe2] sm:$0xff] %vm17_vm0, %v140_v20  ;;  %v6230_v54 = vld [vmem:[#allocation2 + $0x31] sm:$0xff]  ;;  %v6246_v62 = vld [vmem:[#allocation2 + $0x39] sm:$0xff] }
  0x3d   :  { %206 = vst.msk [vmem:[#allocation2 + $0xf2] sm:$0xff] %vm17_vm0, %v141_v21  ;;  %207 = vst.msk [vmem:[#allocation2 + $0xfa] sm:$0xff] %vm17_vm0, %v142_v22  ;;  %v6242_v60 = vld [vmem:[#allocation2 + $0x34] sm:$0xff]  ;;  %v338_v0 = vmul.f32 %v6187_v36, %v6230_v54  ;;  %v6256_v4 = vld [vmem:[#allocation2 + $0x3c] sm:$0xff]  ;;  %v339_v8 = vmul.f32 %v6187_v36, %v6246_v62 }
  0x3e   :  { %208 = vst.msk [vmem:[#allocation2 + $0x10a] sm:$0xff] %vm17_vm0, %v143_v25  ;;  %209 = vst.msk [vmem:[#allocation2 + $0x112] sm:$0xff] %vm17_vm0, %v144_v26  ;;  %v6202_v42 = vld [vmem:[#allocation2 + $0x61] sm:$0xff]  ;;  %v6206_v44 = vld [vmem:[#allocation2 + $0x69] sm:$0xff]  ;;  %v678_v2 = vmul.f32 %v6193_v38, %v6242_v60  ;;  %v679_v16 = vmul.f32 %v6193_v38, %v6256_v4 }
  0x3f   :  { %210 = vst.msk [vmem:[#allocation2 + $0x122] sm:$0xff] %vm17_vm0, %v145_v27  ;;  %11670 = vst [vmem:[#allocation4_spill] sm:$0xff] %v6181_v33  ;;  %v6204_v43 = vld [vmem:[#allocation2 + $0x64] sm:$0xff]  ;;  %v468_v50 = vmul.f32 %v6190_v37, %v6202_v42  ;;  %v6228_v53 = vld [vmem:[#allocation2 + $0x6c] sm:$0xff]  ;;  %v469_v57 = vmul.f32 %v6190_v37, %v6206_v44 }
  0x40   :  { %11671 = vst [vmem:[#allocation5_spill] sm:$0xff] %v6187_v36  ;;  %11672 = vst [vmem:[#allocation6_spill] sm:$0xff] %v6190_v37  ;;  %v808_v52 = vmul.f32 %v6196_v39, %v6204_v43  ;;  %v6232_v55 = vld [vmem:[#allocation2 + $0x79] sm:$0xff]  ;;  %v809_v59 = vmul.f32 %v6196_v39, %v6228_v53  ;;  %v6254_v3 = vld [vmem:[#allocation2 + $0x81] sm:$0xff] }
  0x41   :  { %11673 = vst [vmem:[#allocation7_spill] sm:$0xff] %v6193_v38  ;;  %11674 = vst [vmem:[#allocation8_spill] sm:$0xff] %v6196_v39  ;;  %v6244_v61 = vld [vmem:[#allocation2 + $0x7c] sm:$0xff]  ;;  %v532_v63 = vadd.f32 %v468_v50, %v336_v49  ;;  %v470_v1 = vmul.f32 %v6190_v37, %v6232_v55  ;;  %v6258_v5 = vld [vmem:[#allocation2 + $0x84] sm:$0xff]  ;;  %v533_v6 = vadd.f32 %v469_v57, %v337_v56 }
  0x42   :  { %11675 = vst [vmem:[#allocation9_spill] sm:$0xff] %v6209_v45  ;;  %11676 = vst [vmem:[#allocation10_spill] sm:$0xff] %v6212_v46  ;;  %v810_v7 = vmul.f32 %v6196_v39, %v6244_v61  ;;  %v471_v9 = vmul.f32 %v6190_v37, %v6254_v3  ;;  %v6266_v10 = vld [vmem:[#allocation2 + $0x49] sm:$0xff]  ;;  %v6268_v12 = vld [vmem:[#allocation2 + $0x91] sm:$0xff]  ;;  %v811_v17 = vmul.f32 %v6196_v39, %v6258_v5 }
  0x43   :  { %11677 = vst [vmem:[#allocation11_spill] sm:$0xff] %v6215_v47  ;;  %11678 = vst [vmem:[#allocation12_spill] sm:$0xff] %v6218_v48  ;;  %v6270_v13 = vld [vmem:[#allocation2 + $0x4c] sm:$0xff]  ;;  %v740_v14 = vadd.f32 %v676_v51, %v532_v63  ;;  %v534_v15 = vadd.f32 %v470_v1, %v338_v0  ;;  %v6276_v18 = vld [vmem:[#allocation2 + $0x94] sm:$0xff]  ;;  %v741_v20 = vadd.f32 %v677_v58, %v533_v6 }
  0x44   :  { %v6278_v19 = vld [vmem:[#allocation2 + $0x51] sm:$0xff]  ;;  %v535_v21 = vadd.f32 %v471_v9, %v339_v8  ;;  %v340_v22 = vmul.f32 %v6187_v36, %v6266_v10  ;;  %v472_v23 = vmul.f32 %v6190_v37, %v6268_v12  ;;  %v6284_v24 = vld [vmem:[#allocation2 + $0x99] sm:$0xff]  ;;  %v680_v27 = vmul.f32 %v6193_v38, %v6270_v13 }
  0x45   :  { %v872_v25 = vadd.f32 %v808_v52, %v740_v14  ;;  %v742_v26 = vadd.f32 %v678_v2, %v534_v15  ;;  %v812_v49 = vmul.f32 %v6196_v39, %v6276_v18  ;;  %v873_v50 = vadd.f32 %v809_v59, %v741_v20  ;;  %v6353_v34 = vld [vmem:[#allocation2 + $0x60] sm:$0xff]  ;;  %v6410_v33 = vld [vmem:[#allocation2 + $0x33] sm:$0xff] }
  0x46   :  { %v743_v51 = vadd.f32 %v679_v16, %v535_v21  ;;  %v536_v56 = vadd.f32 %v472_v23, %v340_v22  ;;  %v341_v57 = vmul.f32 %v6187_v36, %v6278_v19  ;;  %v473_v52 = vmul.f32 %v6190_v37, %v6284_v24  ;;  %v6301_v16 = vld [vmem:[#allocation2 + $0x54] sm:$0xff]  ;;  %11690 = vst [vmem:[#allocation24_spill] sm:$0xff] %v6410_v33 }
  0x47   :  { %v936_v58 = vsel %vm17_vm0, %v872_v25, 0.0  ;;  %v1070_v63 = vmul.f32 %v872_v25, %v872_v25  ;;  %1268 = vst.msk [vmem:[#allocation3] sm:$0xff] %vm17_vm0, %v872_v25  ;;  %v874_v0 = vadd.f32 %v810_v7, %v742_v26  ;;  %v937_v1 = vsel %vm17_vm0, %v873_v50, 0.0  ;;  %1269 = vst.msk [vmem:[#allocation3 + $0x8] sm:$0xff] %vm17_vm0, %v873_v50 }
  0x48   :  { %v1071_v2 = vmul.f32 %v873_v50, %v873_v50  ;;  %v875_v59 = vadd.f32 %v811_v17, %v743_v51  ;;  %v744_v6 = vadd.f32 %v680_v27, %v536_v56  ;;  %v938_v9 = vadd.f32 %v937_v1, %v936_v58  ;;  %v6306_v17 = vld [vmem:[#allocation2 + $0x9c] sm:$0xff]  ;;  %v6309_v50 = vld [vmem:[#allocation2 + $0xa9] sm:$0xff] }
  0x49   :  { %v1134_v8 = vsel %vm17_vm0, %v1070_v63, 0.0  ;;  %v939_v14 = vsel %vm17_vm0, %v874_v0, 0.0  ;;  %v1072_v15 = vmul.f32 %v874_v0, %v874_v0  ;;  %1270 = vst.msk [vmem:[#allocation3 + $0x10] sm:$0xff] %vm17_vm0, %v874_v0  ;;  %v537_v27 = vadd.f32 %v473_v52, %v341_v57  ;;  %11679 = vst [vmem:[#allocation13_spill] sm:$0xff] %v6309_v50  ;;  %v6322_v52 = vld [vmem:[#allocation2 + $0xb1] sm:$0xff] }
  0x4a   :  { %v1135_v7 = vsel %vm17_vm0, %v1071_v2, 0.0  ;;  %v941_v20 = vsel %vm17_vm0, %v875_v59, 0.0  ;;  %v1073_v21 = vmul.f32 %v875_v59, %v875_v59  ;;  %1271 = vst.msk [vmem:[#allocation3 + $0x18] sm:$0xff] %vm17_vm0, %v875_v59  ;;  %v876_v22 = vadd.f32 %v812_v49, %v744_v6  ;;  %v6316_v49 = vld [vmem:[#allocation2 + $0xac] sm:$0xff]  ;;  %11681 = vst [vmem:[#allocation15_spill] sm:$0xff] %v6322_v52 }
  0x4b   :  { %v1136_v23 = vadd.f32 %v1135_v7, %v1134_v8  ;;  %v940_v25 = vadd.f32 %v939_v14, %v938_v9  ;;  %v1137_v26 = vsel %vm17_vm0, %v1072_v15, 0.0  ;;  %v681_v63 = vmul.f32 %v6193_v38, %v6301_v16  ;;  %11680 = vst [vmem:[#allocation14_spill] sm:$0xff] %v6316_v49  ;;  %v6329_v14 = vld [vmem:[#allocation2 + $0xb4] sm:$0xff]  ;;  %v6331_v15 = vld [vmem:[#allocation2 + $0xc1] sm:$0xff] }
  0x4c   :  { %v1139_v51 = vsel %vm17_vm0, %v1073_v21, 0.0  ;;  %v943_v56 = vsel %vm17_vm0, %v876_v22, 0.0  ;;  %v1074_v58 = vmul.f32 %v876_v22, %v876_v22  ;;  %1272 = vst.msk [vmem:[#allocation3 + $0x20] sm:$0xff] %vm17_vm0, %v876_v22  ;;  %v813_v2 = vmul.f32 %v6196_v39, %v6306_v17  ;;  %11682 = vst [vmem:[#allocation16_spill] sm:$0xff] %v6329_v14 }
  0x4d   :  { %v1138_v0 = vadd.f32 %v1137_v26, %v1136_v23  ;;  %v942_v1 = vadd.f32 %v941_v20, %v940_v25  ;;  %v342_v57 = vmul.f32 %v6187_v36, %v6202_v42  ;;  %v745_v6 = vadd.f32 %v681_v63, %v537_v27  ;;  %11683 = vst [vmem:[#allocation17_spill] sm:$0xff] %v6331_v15 }
  0x4e   :  { %v1141_v59 = vsel %vm17_vm0, %v1074_v58, 0.0  ;;  %v474_v8 = vmul.f32 %v6190_v37, %v6309_v50  ;;  %v682_v9 = vmul.f32 %v6193_v38, %v6204_v43  ;;  %v814_v21 = vmul.f32 %v6196_v39, %v6316_v49  ;;  %v6341_v58 = vld [vmem:[#allocation2 + $0xc4] sm:$0xff]  ;;  %v6472_v49 = vld [vmem:[#allocation2 + $0x53] sm:$0xff] }
  0x4f   :  { %v1140_v7 = vadd.f32 %v1139_v51, %v1138_v0  ;;  %v944_v20 = vadd.f32 %v943_v56, %v942_v1  ;;  %v343_v22 = vmul.f32 %v6187_v36, %v6206_v44  ;;  %v877_v23 = vadd.f32 %v813_v2, %v745_v6  ;;  %11684 = vst [vmem:[#allocation18_spill] sm:$0xff] %v6341_v58  ;;  %v6349_v1 = vld [vmem:[#allocation2 + $0x18] sm:$0xff] }
  0x50   :  { %v538_v25 = vadd.f32 %v474_v8, %v342_v57  ;;  %v475_v26 = vmul.f32 %v6190_v37, %v6322_v52  ;;  %v683_v27 = vmul.f32 %v6193_v38, %v6228_v53  ;;  %v815_v51 = vmul.f32 %v6196_v39, %v6329_v14  ;;  %11685 = vst [vmem:[#allocation19_spill] sm:$0xff] %v6349_v1 }
  0x51   :  { %v1142_v63 = vadd.f32 %v1141_v59, %v1140_v7  ;;  %v344_v56 = vmul.f32 %v6187_v36, %v6232_v55  ;;  %v476_v0 = vmul.f32 %v6190_v37, %v6331_v15  ;;  %v945_v2 = vsel %vm17_vm0, %v877_v23, 0.0  ;;  %1273 = vst.msk [vmem:[#allocation3 + $0x28] sm:$0xff] %vm17_vm0, %v877_v23  ;;  %v6355_v59 = vld [vmem:[#allocation2 + $0x1b] sm:$0xff]  ;;  %v6361_v36 = vld [vmem:[#allocation2 + $0x63] sm:$0xff] }
  0x52   :  { %v1075_v57 = vmul.f32 %v877_v23, %v877_v23  ;;  %v746_v6 = vadd.f32 %v682_v9, %v538_v25  ;;  %v539_v8 = vadd.f32 %v475_v26, %v343_v22  ;;  %11686 = vst [vmem:[#allocation20_spill] sm:$0xff] %v6355_v59  ;;  %v946_v7 = vadd.f32 %v945_v2, %v944_v20  ;;  %v146_v23 = vld [vmem:[%s11496_s0 + $0xa8] sm:$0xff]  ;;  %v6369_v26 = vld [vmem:[#allocation2 + $0x20] sm:$0xff]  ;;  %v6466_v15 = vld [vmem:[#allocation2 + $0x98] sm:$0xff] }
  0x53   :  { %v540_v32 = vadd.f32 %v476_v0, %v344_v56  ;;  %v684_v28 = vmul.f32 %v6193_v38, %v6244_v61  ;;  %v816_v37 = vmul.f32 %v6196_v39, %v6341_v58  ;;  %v1412_v20 = vmul.f32 %v6209_v45, %v6349_v1  ;;  %11687 = vst [vmem:[#allocation21_spill] sm:$0xff] %v6369_v26  ;;  %v6376_v38 = vld [vmem:[#allocation2 + $0x68] sm:$0xff] }
  0x54   :  { %v1143_v9 = vsel %vm17_vm0, %v1075_v57, 0.0  ;;  %v878_v22 = vadd.f32 %v814_v21, %v746_v6  ;;  %v747_v25 = vadd.f32 %v683_v27, %v539_v8  ;;  %211 = vst.msk [vmem:[#allocation2 + $0x12a] sm:$0xff] %vm17_vm0, %v146_v23  ;;  %v1544_v2 = vmul.f32 %v6212_v46, %v6353_v34  ;;  %v147_v21 = vld [vmem:[%s11496_s0 + $0xb0] sm:$0xff]  ;;  %11701 = vst [vmem:[#allocation35_spill] sm:$0xff] %v6466_v15 }
  0x55   :  { %v1144_v56 = vadd.f32 %v1143_v9, %v1142_v63  ;;  %v748_v0 = vadd.f32 %v684_v28, %v540_v32  ;;  %v1752_v39 = vmul.f32 %v6215_v47, %v6355_v59  ;;  %v1884_v28 = vmul.f32 %v6218_v48, %v6361_v36  ;;  %212 = vst.msk [vmem:[#allocation2 + $0x13a] sm:$0xff] %vm17_vm0, %v147_v21  ;;  %v148_v32 = vld [vmem:[%s11496_s0 + $0xb8] sm:$0xff]  ;;  %v6391_v59 = vld [vmem:[#allocation2 + $0x23] sm:$0xff] }
  0x56   :  { %v947_v27 = vsel %vm17_vm0, %v878_v22, 0.0  ;;  %v1076_v57 = vmul.f32 %v878_v22, %v878_v22  ;;  %1274 = vst.msk [vmem:[#allocation3 + $0x30] sm:$0xff] %vm17_vm0, %v878_v22  ;;  %v879_v6 = vadd.f32 %v815_v51, %v747_v25  ;;  %v1608_v23 = vadd.f32 %v1544_v2, %v1412_v20  ;;  %11688 = vst [vmem:[#allocation22_spill] sm:$0xff] %v6391_v59 }
  0x57   :  { %v948_v63 = vadd.f32 %v947_v27, %v946_v7  ;;  %v880_v8 = vadd.f32 %v816_v37, %v748_v0  ;;  %v1413_v9 = vmul.f32 %v6209_v45, %v6369_v26  ;;  %213 = vst.msk [vmem:[#allocation2 + $0x142] sm:$0xff] %vm17_vm0, %v148_v32  ;;  %v1545_v21 = vmul.f32 %v6212_v46, %v6376_v38  ;;  %v6399_v7 = vld [vmem:[#allocation2 + $0x6b] sm:$0xff] }
  0x58   :  { %v1145_v51 = vsel %vm17_vm0, %v1076_v57, 0.0  ;;  %v949_v22 = vsel %vm17_vm0, %v879_v6, 0.0  ;;  %v1077_v25 = vmul.f32 %v879_v6, %v879_v6  ;;  %1275 = vst.msk [vmem:[#allocation3 + $0x38] sm:$0xff] %vm17_vm0, %v879_v6  ;;  %v6403_v27 = vld [vmem:[#allocation2 + $0x30] sm:$0xff]  ;;  %v6405_v57 = vld [vmem:[#allocation2 + $0x78] sm:$0xff]  ;;  %v1816_v26 = vadd.f32 %v1752_v39, %v1608_v23 }
  0x59   :  { %v1146_v37 = vadd.f32 %v1145_v51, %v1144_v56  ;;  %v950_v20 = vadd.f32 %v949_v22, %v948_v63  ;;  %v951_v0 = vsel %vm17_vm0, %v880_v8, 0.0  ;;  %v1078_v2 = vmul.f32 %v880_v8, %v880_v8  ;;  %1276 = vst.msk [vmem:[#allocation3 + $0x40] sm:$0xff] %vm17_vm0, %v880_v8  ;;  %11689 = vst [vmem:[#allocation23_spill] sm:$0xff] %v6403_v27  ;;  %v6412_v56 = vld [vmem:[#allocation2 + $0x7b] sm:$0xff] }
  0x5a   :  { %v1147_v32 = vsel %vm17_vm0, %v1077_v25, 0.0  ;;  %v1609_v6 = vadd.f32 %v1545_v21, %v1413_v9  ;;  %v1753_v1 = vmul.f32 %v6215_v47, %v6391_v59  ;;  %v6414_v63 = vld [vmem:[#allocation2 + $0x38] sm:$0xff]  ;;  %v1885_v58 = vmul.f32 %v6218_v48, %v6399_v7  ;;  %v6421_v25 = vld [vmem:[#allocation2 + $0x80] sm:$0xff] }
  0x5b   :  { %11691 = vst [vmem:[#allocation25_spill] sm:$0xff] %v6414_v63  ;;  %v1148_v51 = vadd.f32 %v1147_v32, %v1146_v37  ;;  %v6416_v22 = vadd.f32 %v951_v0, %v950_v20  ;;  %v1149_v8 = vsel %vm17_vm0, %v1078_v2, 0.0  ;;  %11693 = vst [vmem:[#allocation27_spill] sm:$0xff] %v6421_v25  ;;  %v1948_v39 = vadd.f32 %v1884_v28, %v1816_v26  ;;  %v6427_v59 = vld [vmem:[#allocation2 + $0x3b] sm:$0xff]  ;;  %v6429_v37 = vld [vmem:[#allocation2 + $0x83] sm:$0xff] }
  0x5c   :  { %v1817_v23 = vadd.f32 %v1753_v1, %v1609_v6  ;;  %v1414_v9 = vmul.f32 %v6209_v45, %v6403_v27  ;;  %v1546_v21 = vmul.f32 %v6212_v46, %v6405_v57  ;;  %11694 = vst [vmem:[#allocation28_spill] sm:$0xff] %v6427_v59  ;;  %11695 = vst [vmem:[#allocation29_spill] sm:$0xff] %v6429_v37  ;;  %v6431_v20 = vld [vmem:[#allocation2 + $0x48] sm:$0xff]  ;;  %v6443_v27 = vld [vmem:[#allocation2 + $0x90] sm:$0xff] }
  0x5d   :  { %11692 = vst [vmem:[#allocation26_spill] sm:$0xff] %v6416_v22  ;;  %11696 = vst [vmem:[#allocation30_spill] sm:$0xff] %v6431_v20  ;;  %v6433_v0 = vadd.f32 %v1149_v8, %v1148_v51  ;;  %v1754_v2 = vmul.f32 %v6215_v47, %v6410_v33  ;;  %v1886_v1 = vmul.f32 %v6218_v48, %v6412_v56  ;;  %v2012_v28 = vsel %vm17_vm0, %v1948_v39, 0.0  ;;  %v6445_v51 = vld [vmem:[#allocation2 + $0x4b] sm:$0xff]  ;;  %v149_v8 = vld [vmem:[%s11496_s0 + $0xc0] sm:$0xff] }
  0x5e   :  { %v1415_v26 = vmul.f32 %v6209_v45, %v6414_v63  ;;  %v2146_v32 = vmul.f32 %v1948_v39, %v1948_v39  ;;  %2345 = vst.msk [vmem:[#allocation3 + $0x200] sm:$0xff] %vm17_vm0, %v1948_v39  ;;  %v1949_v6 = vadd.f32 %v1885_v58, %v1817_v23  ;;  %v1610_v22 = vadd.f32 %v1546_v21, %v1414_v9  ;;  %v6458_v39 = vld [vmem:[#allocation2 + $0x93] sm:$0xff] }
  0x5f   :  { %11697 = vst [vmem:[#allocation31_spill] sm:$0xff] %v6433_v0  ;;  %11698 = vst [vmem:[#allocation32_spill] sm:$0xff] %v6443_v27  ;;  %v1547_v0 = vmul.f32 %v6212_v46, %v6421_v25  ;;  %v1755_v63 = vmul.f32 %v6215_v47, %v6427_v59  ;;  %v1887_v33 = vmul.f32 %v6218_v48, %v6429_v37  ;;  %v6460_v23 = vld [vmem:[#allocation2 + $0x50] sm:$0xff] }
  0x60   :  { %11699 = vst [vmem:[#allocation33_spill] sm:$0xff] %v6445_v51  ;;  %v1416_v58 = vmul.f32 %v6209_v45, %v6431_v20  ;;  %11700 = vst [vmem:[#allocation34_spill] sm:$0xff] %v6458_v39  ;;  %v2210_v9 = vsel %vm17_vm0, %v2146_v32, 0.0  ;;  %v2013_v21 = vsel %vm17_vm0, %v1949_v6, 0.0  ;;  %v2147_v25 = vmul.f32 %v1949_v6, %v1949_v6 }
  0x61   :  { %214 = vst.msk [vmem:[#allocation2 + $0x152] sm:$0xff] %vm17_vm0, %v149_v8  ;;  %2346 = vst.msk [vmem:[#allocation3 + $0x208] sm:$0xff] %vm17_vm0, %v1949_v6  ;;  %v1818_v59 = vadd.f32 %v1754_v2, %v1610_v22  ;;  %v2014_v37 = vadd.f32 %v2013_v21, %v2012_v28  ;;  %v1611_v14 = vadd.f32 %v1547_v0, %v1415_v26  ;;  %v6474_v8 = vld [vmem:[#allocation2 + $0x9b] sm:$0xff]  ;;  %v6483_v21 = vld [vmem:[#allocation2 + $0xa8] sm:$0xff] }
  0x62   :  { %v1548_v20 = vmul.f32 %v6212_v46, %v6443_v27  ;;  %v1756_v52 = vmul.f32 %v6215_v47, %v6445_v51  ;;  %11702 = vst [vmem:[#allocation36_spill] sm:$0xff] %v6474_v8  ;;  %v2211_v32 = vsel %vm17_vm0, %v2147_v25, 0.0  ;;  %v1888_v22 = vmul.f32 %v6218_v48, %v6458_v39 }
  0x63   :  { %v1950_v50 = vadd.f32 %v1886_v1, %v1818_v59  ;;  %v1417_v2 = vmul.f32 %v6209_v45, %v6460_v23  ;;  %v2212_v0 = vadd.f32 %v2211_v32, %v2210_v9  ;;  %v1819_v26 = vadd.f32 %v1755_v63, %v1611_v14 }
  0x64   :  { %v1612_v28 = vadd.f32 %v1548_v20, %v1416_v58  ;;  %v1549_v6 = vmul.f32 %v6212_v46, %v6466_v15  ;;  %v1757_v59 = vmul.f32 %v6215_v47, %v6472_v49  ;;  %v1889_v25 = vmul.f32 %v6218_v48, %v6474_v8  ;;  %v6491_v20 = vld [vmem:[#allocation2 + $0xab] sm:$0xff] }
  0x65   :  { %v2015_v27 = vsel %vm17_vm0, %v1950_v50, 0.0  ;;  %v2148_v51 = vmul.f32 %v1950_v50, %v1950_v50  ;;  %2347 = vst.msk [vmem:[#allocation3 + $0x210] sm:$0xff] %vm17_vm0, %v1950_v50  ;;  %v1951_v9 = vadd.f32 %v1887_v33, %v1819_v26  ;;  %v1418_v32 = vmul.f32 %v6209_v45, %v6353_v34  ;;  %v6504_v26 = vld [vmem:[#allocation2 + $0xb0] sm:$0xff] }
  0x66   :  { %v2016_v1 = vadd.f32 %v2015_v27, %v2014_v37  ;;  %v1820_v14 = vadd.f32 %v1756_v52, %v1612_v28  ;;  %v1613_v63 = vadd.f32 %v1549_v6, %v1417_v2  ;;  %v1550_v50 = vmul.f32 %v6212_v46, %v6483_v21  ;;  %v6506_v28 = vld [vmem:[#allocation2 + $0xb3] sm:$0xff] }
  0x67   :  { %v2213_v58 = vsel %vm17_vm0, %v2148_v51, 0.0  ;;  %v1758_v15 = vmul.f32 %v6215_v47, %v6361_v36  ;;  %v2017_v8 = vsel %vm17_vm0, %v1951_v9, 0.0  ;;  %v2149_v27 = vmul.f32 %v1951_v9, %v1951_v9  ;;  %2348 = vst.msk [vmem:[#allocation3 + $0x218] sm:$0xff] %vm17_vm0, %v1951_v9  ;;  %11703 = vst [vmem:[#allocation37_spill] sm:$0xff] %v6506_v28 }
  0x68   :  { %v2214_v39 = vadd.f32 %v2213_v58, %v2212_v0  ;;  %v1952_v33 = vadd.f32 %v1888_v22, %v1820_v14  ;;  %v2018_v52 = vadd.f32 %v2017_v8, %v2016_v1  ;;  %v1821_v37 = vadd.f32 %v1757_v59, %v1613_v63  ;;  %v6513_v14 = vld [vmem:[#allocation2 + $0xc0] sm:$0xff]  ;;  %v150_v63 = vld [vmem:[%s11496_s0 + $0xc8] sm:$0xff] }
  0x69   :  { %v1614_v2 = vadd.f32 %v1550_v50, %v1418_v32  ;;  %v1890_v51 = vmul.f32 %v6218_v48, %v6491_v20  ;;  %v2215_v6 = vsel %vm17_vm0, %v2149_v27, 0.0  ;;  %v1419_v22 = vmul.f32 %v6209_v45, %v6376_v38  ;;  %215 = vst.msk [vmem:[#allocation2 + $0x15a] sm:$0xff] %vm17_vm0, %v150_v63 }
  0x6a   :  { %v2019_v0 = vsel %vm17_vm0, %v1952_v33, 0.0  ;;  %v2150_v58 = vmul.f32 %v1952_v33, %v1952_v33  ;;  %2349 = vst.msk [vmem:[#allocation3 + $0x220] sm:$0xff] %vm17_vm0, %v1952_v33  ;;  %v2216_v8 = vadd.f32 %v2215_v6, %v2214_v39  ;;  %v1953_v1 = vadd.f32 %v1889_v25, %v1821_v37 }
  0x6b   :  { %v2020_v59 = vadd.f32 %v2019_v0, %v2018_v52  ;;  %v1822_v9 = vadd.f32 %v1758_v15, %v1614_v2  ;;  %v1551_v50 = vmul.f32 %v6212_v46, %v6504_v26  ;;  %v1759_v27 = vmul.f32 %v6215_v47, %v6399_v7 }
  0x6c   :  { %v2217_v32 = vsel %vm17_vm0, %v2150_v58, 0.0  ;;  %v1891_v39 = vmul.f32 %v6218_v48, %v6506_v28  ;;  %v2021_v25 = vsel %vm17_vm0, %v1953_v1, 0.0  ;;  %v2151_v33 = vmul.f32 %v1953_v1, %v1953_v1  ;;  %2350 = vst.msk [vmem:[#allocation3 + $0x228] sm:$0xff] %vm17_vm0, %v1953_v1  ;;  %v6532_v58 = vld [vmem:[#allocation2 + $0xc3] sm:$0xff] }
  0x6d   :  { %v2218_v15 = vadd.f32 %v2217_v32, %v2216_v8  ;;  %v1954_v52 = vadd.f32 %v1890_v51, %v1822_v9  ;;  %v2022_v37 = vadd.f32 %v2021_v25, %v2020_v59  ;;  %v1615_v2 = vadd.f32 %v1551_v50, %v1419_v22  ;;  %11704 = vst [vmem:[#allocation38_spill] sm:$0xff] %v6532_v58  ;;  %v2409_v32 = vld [vmem:[#allocation2 + $0x1] sm:$0xff]  ;;  %v2410_v50 = vld [vmem:[#allocation2 + $0x9] sm:$0xff] }
  0x6e   :  { %v1420_v6 = vmul.f32 %v6209_v45, %v6405_v57  ;;  %v1552_v0 = vmul.f32 %v6212_v46, %v6513_v14  ;;  %v2219_v28 = vsel %vm17_vm0, %v2151_v33, 0.0  ;;  %v1760_v51 = vmul.f32 %v6215_v47, %v6412_v56 }
  0x6f   :  { %v2023_v8 = vsel %vm17_vm0, %v1954_v52, 0.0  ;;  %v2152_v63 = vmul.f32 %v1954_v52, %v1954_v52  ;;  %2351 = vst.msk [vmem:[#allocation3 + $0x230] sm:$0xff] %vm17_vm0, %v1954_v52  ;;  %v2220_v59 = vadd.f32 %v2219_v28, %v2218_v15  ;;  %v1823_v1 = vadd.f32 %v1759_v27, %v1615_v2  ;;  %v2749_v28 = vld [vmem:[#allocation2 + $0x4] sm:$0xff] }
  0x70   :  { %v2024_v22 = vadd.f32 %v2023_v8, %v2022_v37  ;;  %v1616_v9 = vadd.f32 %v1552_v0, %v1420_v6  ;;  %v1892_v46 = vmul.f32 %v6218_v48, %v6532_v58  ;;  %v11705_v33 = vsub.s32 1, %v6109_v11 }
  0x71   :  { %v2221_v25 = vsel %vm17_vm0, %v2152_v63, 0.0  ;;  %v1955_v15 = vadd.f32 %v1891_v39, %v1823_v1  ;;  %v11707_v2 = vsub.s32 3, %v6109_v11 }
  0x72   :  { %v6545_v45 = vrot.slane %v6170_v29, %v11705_v33  ;;  %v11706_v52 = vmov %v11705_v33  ;;  %v2222_v27 = vadd.f32 %v2221_v25, %v2220_v59  ;;  %v1824_v37 = vadd.f32 %v1760_v51, %v1616_v9  ;;  %v2750_v59 = vld [vmem:[#allocation2 + $0xc] sm:$0xff] }
  0x73   :  { %v6550_v47 = vrot.slane %v6175_v30, %v11706_v52  ;;  %v6555_v6 = vrot.slane %v6170_v29, %v11707_v2  ;;  %v11708_v63 = vmov %v11707_v2  ;;  %v2025_v39 = vsel %vm17_vm0, %v1955_v15, 0.0  ;;  %2352 = vst.msk [vmem:[#allocation3 + $0x238] sm:$0xff] %vm17_vm0, %v1955_v15 }
  0x74   :  { %v2489_v0 = vmul.f32 %v6545_v45, %v2409_v32  ;;  %v6563_v33 = vrot.slane %v6175_v30, %v11708_v63  ;;  %v2490_v52 = vmul.f32 %v6545_v45, %v2410_v50  ;;  %v2153_v51 = vmul.f32 %v1955_v15, %v1955_v15 }
  0x75   :  { %v2621_v8 = vmul.f32 %v6550_v47, %v6266_v10  ;;  %v1956_v1 = vadd.f32 %v1892_v46, %v1824_v37  ;;  %v2829_v9 = vmul.f32 %v6555_v6, %v2749_v28  ;;  %v2026_v32 = vadd.f32 %v2025_v39, %v2024_v22 }
  0x76   :  { %v2961_v2 = vmul.f32 %v6563_v33, %v6270_v13  ;;  %v2622_v63 = vmul.f32 %v6550_v47, %v6278_v19  ;;  %v2223_v48 = vsel %vm17_vm0, %v2153_v51, 0.0  ;;  %v2830_v15 = vmul.f32 %v6555_v6, %v2750_v59 }
  0x77   :  { %v2685_v25 = vadd.f32 %v2621_v8, %v2489_v0  ;;  %v2027_v50 = vsel %vm17_vm0, %v1956_v1, 0.0  ;;  %v2154_v58 = vmul.f32 %v1956_v1, %v1956_v1  ;;  %2353 = vst.msk [vmem:[#allocation3 + $0x240] sm:$0xff] %vm17_vm0, %v1956_v1  ;;  %v2224_v46 = vadd.f32 %v2223_v48, %v2222_v27  ;;  %v151_v0 = vld [vmem:[%s11496_s0 + $0xd0] sm:$0xff] }
  0x78   :  { %v6577_v37 = vadd.f32 %v2027_v50, %v2026_v32  ;;  %v2686_v28 = vadd.f32 %v2622_v63, %v2490_v52  ;;  %v2962_v39 = vmul.f32 %v6563_v33, %v6301_v16  ;;  %v2491_v51 = vmul.f32 %v6545_v45, %v6184_v35  ;;  %216 = vst.msk [vmem:[#allocation2 + $0x16a] sm:$0xff] %vm17_vm0, %v151_v0 }
  0x79   :  { %v2893_v22 = vadd.f32 %v2829_v9, %v2685_v25  ;;  %v2225_v8 = vsel %vm17_vm0, %v2154_v58, 0.0  ;;  %v2623_v59 = vmul.f32 %v6550_v47, %v6202_v42  ;;  %v2831_v1 = vmul.f32 %v6555_v6, %v6177_v31 }
  0x7a   :  { %v6590_v48 = vadd.f32 %v2225_v8, %v2224_v46  ;;  %v2894_v52 = vadd.f32 %v2830_v15, %v2686_v28  ;;  %v2963_v58 = vmul.f32 %v6563_v33, %v6204_v43  ;;  %v2492_v32 = vmul.f32 %v6545_v45, %v6198_v40 }
  0x7b   :  { %v3025_v27 = vadd.f32 %v2961_v2, %v2893_v22  ;;  %v2687_v9 = vadd.f32 %v2623_v59, %v2491_v51  ;;  %v2624_v35 = vmul.f32 %v6550_v47, %v6206_v44  ;;  %v2832_v50 = vmul.f32 %v6555_v6, %v6200_v41 }
  0x7c   :  { %v3026_v2 = vadd.f32 %v2962_v39, %v2894_v52  ;;  %v2964_v46 = vmul.f32 %v6563_v33, %v6228_v53  ;;  %v2493_v40 = vmul.f32 %v6545_v45, %v6230_v54  ;;  %v2625_v8 = vmul.f32 %v6550_v47, %v6232_v55 }
  0x7d   :  { %v3089_v25 = vsel %vm17_vm0, %v3025_v27, 0.0  ;;  %v3223_v63 = vmul.f32 %v3025_v27, %v3025_v27  ;;  %3422 = vst.msk [vmem:[#allocation3 + $0x400] sm:$0xff] %vm17_vm0, %v3025_v27  ;;  %v2895_v31 = vadd.f32 %v2831_v1, %v2687_v9  ;;  %v2688_v15 = vadd.f32 %v2624_v35, %v2492_v32 }
  0x7e   :  { %v3090_v28 = vsel %vm17_vm0, %v3026_v2, 0.0  ;;  %v3224_v0 = vmul.f32 %v3026_v2, %v3026_v2  ;;  %3423 = vst.msk [vmem:[#allocation3 + $0x408] sm:$0xff] %vm17_vm0, %v3026_v2  ;;  %v2833_v59 = vmul.f32 %v6555_v6, %v6242_v60  ;;  %v2689_v52 = vadd.f32 %v2625_v8, %v2493_v40 }
  0x7f   :  { %v3287_v22 = vsel %vm17_vm0, %v3223_v63, 0.0  ;;  %v3091_v39 = vadd.f32 %v3090_v28, %v3089_v25  ;;  %v3027_v41 = vadd.f32 %v2963_v58, %v2895_v31  ;;  %v2896_v51 = vadd.f32 %v2832_v50, %v2688_v15 }
  0x80   :  { %v3288_v27 = vsel %vm17_vm0, %v3224_v0, 0.0  ;;  %v2965_v54 = vmul.f32 %v6563_v33, %v6244_v61  ;;  %v2494_v1 = vmul.f32 %v6545_v45, %v6246_v62  ;;  %v2897_v63 = vadd.f32 %v2833_v59, %v2689_v52 }
  0x81   :  { %v3289_v9 = vadd.f32 %v3288_v27, %v3287_v22  ;;  %v3092_v32 = vsel %vm17_vm0, %v3027_v41, 0.0  ;;  %v3225_v35 = vmul.f32 %v3027_v41, %v3027_v41  ;;  %3424 = vst.msk [vmem:[#allocation3 + $0x410] sm:$0xff] %vm17_vm0, %v3027_v41  ;;  %v3028_v58 = vadd.f32 %v2964_v46, %v2896_v51 }
  0x82   :  { %v3093_v25 = vadd.f32 %v3092_v32, %v3091_v39  ;;  %v2626_v60 = vmul.f32 %v6550_v47, %v6254_v3  ;;  %v2834_v2 = vmul.f32 %v6555_v6, %v6256_v4  ;;  %v2966_v15 = vmul.f32 %v6563_v33, %v6258_v5  ;;  %v152_v3 = vld [vmem:[%s11496_s0 + $0xd8] sm:$0xff] }
  0x83   :  { %v3290_v50 = vsel %vm17_vm0, %v3225_v35, 0.0  ;;  %v3094_v31 = vsel %vm17_vm0, %v3028_v58, 0.0  ;;  %v3226_v62 = vmul.f32 %v3028_v58, %v3028_v58  ;;  %3425 = vst.msk [vmem:[#allocation3 + $0x418] sm:$0xff] %vm17_vm0, %v3028_v58  ;;  %v3029_v22 = vadd.f32 %v2965_v54, %v2897_v63  ;;  %217 = vst.msk [vmem:[#allocation2 + $0x172] sm:$0xff] %vm17_vm0, %v152_v3  ;;  %v11711_v3 = vld [vmem:[#allocation15_spill] sm:$0xff] }
  0x84   :  { %v3291_v40 = vadd.f32 %v3290_v50, %v3289_v9  ;;  %v3095_v46 = vadd.f32 %v3094_v31, %v3093_v25  ;;  %v2690_v28 = vadd.f32 %v2626_v60, %v2494_v1  ;;  %v2495_v0 = vmul.f32 %v6545_v45, %v6266_v10  ;;  %v11709_v60 = vld [vmem:[#allocation13_spill] sm:$0xff]  ;;  %v11710_v31 = vld [vmem:[#allocation14_spill] sm:$0xff] }
  0x85   :  { %v3292_v4 = vsel %vm17_vm0, %v3226_v62, 0.0  ;;  %v2627_v8 = vmul.f32 %v6550_v47, %v6268_v12  ;;  %v2835_v39 = vmul.f32 %v6555_v6, %v6270_v13  ;;  %v3096_v41 = vsel %vm17_vm0, %v3029_v22, 0.0  ;;  %3426 = vst.msk [vmem:[#allocation3 + $0x420] sm:$0xff] %vm17_vm0, %v3029_v22 }
  0x86   :  { %v3293_v5 = vadd.f32 %v3292_v4, %v3291_v40  ;;  %v3227_v51 = vmul.f32 %v3029_v22, %v3029_v22  ;;  %v2898_v59 = vadd.f32 %v2834_v2, %v2690_v28  ;;  %v3097_v27 = vadd.f32 %v3096_v41, %v3095_v46 }
  0x87   :  { %v2691_v52 = vadd.f32 %v2627_v8, %v2495_v0  ;;  %v2967_v10 = vmul.f32 %v6563_v33, %v6276_v18  ;;  %v2496_v12 = vmul.f32 %v6545_v45, %v6278_v19  ;;  %v2628_v1 = vmul.f32 %v6550_v47, %v6284_v24 }
  0x88   :  { %v3294_v54 = vsel %vm17_vm0, %v3227_v51, 0.0  ;;  %v3030_v13 = vadd.f32 %v2966_v15, %v2898_v59  ;;  %v2836_v9 = vmul.f32 %v6555_v6, %v6301_v16  ;;  %v2968_v58 = vmul.f32 %v6563_v33, %v6306_v17  ;;  %v11712_v51 = vld [vmem:[#allocation16_spill] sm:$0xff] }
  0x89   :  { %v3295_v32 = vadd.f32 %v3294_v54, %v3293_v5  ;;  %v2899_v35 = vadd.f32 %v2835_v39, %v2691_v52  ;;  %v2497_v18 = vmul.f32 %v6545_v45, %v6202_v42  ;;  %v2692_v63 = vadd.f32 %v2628_v1, %v2496_v12  ;;  %v11713_v1 = vld [vmem:[#allocation17_spill] sm:$0xff] }
  0x8a   :  { %v3098_v25 = vsel %vm17_vm0, %v3030_v13, 0.0  ;;  %v3228_v19 = vmul.f32 %v3030_v13, %v3030_v13  ;;  %3427 = vst.msk [vmem:[#allocation3 + $0x428] sm:$0xff] %vm17_vm0, %v3030_v13  ;;  %v2629_v24 = vmul.f32 %v6550_v47, %v11709_v60  ;;  %v2837_v16 = vmul.f32 %v6555_v6, %v6204_v43 }
  0x8b   :  { %v3099_v2 = vadd.f32 %v3098_v25, %v3097_v27  ;;  %v3031_v50 = vadd.f32 %v2967_v10, %v2899_v35  ;;  %v2969_v17 = vmul.f32 %v6563_v33, %v11710_v31  ;;  %v2900_v42 = vadd.f32 %v2836_v9, %v2692_v63 }
  0x8c   :  { %v3296_v62 = vsel %vm17_vm0, %v3228_v19, 0.0  ;;  %v2693_v15 = vadd.f32 %v2629_v24, %v2497_v18  ;;  %v2498_v40 = vmul.f32 %v6545_v45, %v6206_v44  ;;  %v2630_v4 = vmul.f32 %v6550_v47, %v11711_v3  ;;  %v11714_v18 = vld [vmem:[#allocation18_spill] sm:$0xff] }
  0x8d   :  { %v3297_v46 = vadd.f32 %v3296_v62, %v3295_v32  ;;  %v3100_v22 = vsel %vm17_vm0, %v3031_v50, 0.0  ;;  %v3229_v28 = vmul.f32 %v3031_v50, %v3031_v50  ;;  %3428 = vst.msk [vmem:[#allocation3 + $0x430] sm:$0xff] %vm17_vm0, %v3031_v50  ;;  %v3032_v0 = vadd.f32 %v2968_v58, %v2900_v42  ;;  %v3826_v50 = vld [vmem:[#allocation2 + $0x3] sm:$0xff]  ;;  %v3827_v3 = vld [vmem:[#allocation2 + $0xb] sm:$0xff] }
  0x8e   :  { %v3101_v43 = vadd.f32 %v3100_v22, %v3099_v2  ;;  %v2901_v8 = vadd.f32 %v2837_v16, %v2693_v15  ;;  %v2838_v39 = vmul.f32 %v6555_v6, %v6228_v53  ;;  %v2694_v41 = vadd.f32 %v2630_v4, %v2498_v40  ;;  %v153_v53 = vld [vmem:[%s11496_s0 + $0xe0] sm:$0xff]  ;;  %v3487_v15 = vld [vmem:[#allocation2 + $0x8] sm:$0xff] }
  0x8f   :  { %v3298_v5 = vsel %vm17_vm0, %v3229_v28, 0.0  ;;  %v2970_v44 = vmul.f32 %v6563_v33, %v11712_v51  ;;  %v2499_v59 = vmul.f32 %v6545_v45, %v6232_v55  ;;  %v3102_v52 = vsel %vm17_vm0, %v3032_v0, 0.0  ;;  %3429 = vst.msk [vmem:[#allocation3 + $0x438] sm:$0xff] %vm17_vm0, %v3032_v0  ;;  %218 = vst.msk [vmem:[#allocation2 + $0x182] sm:$0xff] %vm17_vm0, %v153_v53  ;;  %v3486_v2 = vld [vmem:[#allocation2] sm:$0xff] }
  0x90   :  { %v3299_v27 = vadd.f32 %v3298_v5, %v3297_v46  ;;  %v3230_v10 = vmul.f32 %v3032_v0, %v3032_v0  ;;  %v3033_v12 = vadd.f32 %v2969_v17, %v2901_v8  ;;  %v3103_v54 = vadd.f32 %v3102_v52, %v3101_v43  ;;  %v11715_v16 = vld [vmem:[#allocation4_spill] sm:$0xff]  ;;  %v11717_v0 = vld [vmem:[#allocation30_spill] sm:$0xff] }
  0x91   :  { %v2902_v13 = vadd.f32 %v2838_v39, %v2694_v41  ;;  %v2631_v9 = vmul.f32 %v6550_v47, %v11713_v1  ;;  %v2839_v32 = vmul.f32 %v6555_v6, %v6244_v61  ;;  %v2971_v25 = vmul.f32 %v6563_v33, %v11714_v18  ;;  %v11722_v18 = vld [vmem:[#allocation20_spill] sm:$0xff] }
  0x92   :  { %v3300_v55 = vsel %vm17_vm0, %v3230_v10, 0.0  ;;  %v3104_v35 = vsel %vm17_vm0, %v3033_v12, 0.0  ;;  %v3231_v58 = vmul.f32 %v3033_v12, %v3033_v12  ;;  %3430 = vst.msk [vmem:[#allocation3 + $0x440] sm:$0xff] %vm17_vm0, %v3033_v12  ;;  %v6697_v31 = vrot.slane %v6170_v29, %v11715_v16 }
  0x93   :  { %v3301_v19 = vadd.f32 %v3300_v55, %v3299_v27  ;;  %v3105_v63 = vadd.f32 %v3104_v35, %v3103_v54  ;;  %v3034_v60 = vadd.f32 %v2970_v44, %v2902_v13  ;;  %v2695_v24 = vadd.f32 %v2631_v9, %v2499_v59  ;;  %v11720_v54 = vld [vmem:[#allocation33_spill] sm:$0xff] }
  0x94   :  { %v3302_v61 = vsel %vm17_vm0, %v3231_v58, 0.0  ;;  %v6701_v17 = vrot.slane %v6175_v30, %v11715_v16  ;;  %v11716_v62 = vsub.s32 2, %v6109_v11  ;;  %v3566_v43 = vmul.f32 %v6697_v31, %v3486_v2  ;;  %v11723_v2 = vld [vmem:[#allocation21_spill] sm:$0xff] }
  0x95   :  { %v3303_v40 = vadd.f32 %v3302_v61, %v3301_v19  ;;  %v3106_v46 = vsel %vm17_vm0, %v3034_v60, 0.0  ;;  %v3232_v22 = vmul.f32 %v3034_v60, %v3034_v60  ;;  %3431 = vst.msk [vmem:[#allocation3 + $0x448] sm:$0xff] %vm17_vm0, %v3034_v60  ;;  %v2903_v28 = vadd.f32 %v2839_v32, %v2695_v24  ;;  %v11721_v32 = vld [vmem:[#allocation19_spill] sm:$0xff]  ;;  %v154_v61 = vld [vmem:[%s11496_s0 + $0xe8] sm:$0xff] }
  0x96   :  { %v6706_v42 = vrot.slane %v6170_v29, %v11716_v62  ;;  %v3107_v4 = vadd.f32 %v3106_v46, %v3105_v63  ;;  %v3698_v8 = vmul.f32 %v6701_v17, %v11717_v0  ;;  %v11718_v41 = vmov %v11716_v62  ;;  %219 = vst.msk [vmem:[#allocation2 + $0x18a] sm:$0xff] %vm17_vm0, %v154_v61 }
  0x97   :  { %v3304_v29 = vsel %vm17_vm0, %v3232_v22, 0.0  ;;  %v3035_v5 = vadd.f32 %v2971_v25, %v2903_v28  ;;  %v6718_v51 = vrot.slane %v6175_v30, %v11718_v41  ;;  %v3567_v44 = vmul.f32 %v6697_v31, %v3487_v15  ;;  %v11726_v41 = vld [vmem:[#allocation24_spill] sm:$0xff] }
  0x98   :  { %v3906_v39 = vmul.f32 %v6706_v42, %v3826_v50  ;;  %v3305_v59 = vadd.f32 %v3304_v29, %v3303_v40  ;;  %v3762_v27 = vadd.f32 %v3698_v8, %v3566_v43  ;;  %v3699_v52 = vmul.f32 %v6701_v17, %v6460_v23  ;;  %v11724_v40 = vld [vmem:[#allocation22_spill] sm:$0xff]  ;;  %v11725_v43 = vld [vmem:[#allocation23_spill] sm:$0xff] }
  0x99   :  { %11719 = vst [vmem:[#allocation13_spill] sm:$0xff] %v6718_v51  ;;  %v3907_v10 = vmul.f32 %v6706_v42, %v3827_v3  ;;  %v3108_v12 = vsel %vm17_vm0, %v3035_v5, 0.0  ;;  %v3233_v53 = vmul.f32 %v3035_v5, %v3035_v5  ;;  %3432 = vst.msk [vmem:[#allocation3 + $0x450] sm:$0xff] %vm17_vm0, %v3035_v5  ;;  %v4038_v11 = vmul.f32 %v6718_v51, %v11720_v54 }
  0x9a   :  { %v4039_v30 = vmul.f32 %v6718_v51, %v6472_v49  ;;  %v6730_v13 = vadd.f32 %v3108_v12, %v3107_v4  ;;  %v3970_v1 = vadd.f32 %v3906_v39, %v3762_v27  ;;  %v3763_v9 = vadd.f32 %v3699_v52, %v3567_v44 }
  0x9b   :  { %v3568_v55 = vmul.f32 %v6697_v31, %v11721_v32  ;;  %v3306_v35 = vsel %vm17_vm0, %v3233_v53, 0.0  ;;  %v3700_v58 = vmul.f32 %v6701_v17, %v6353_v34  ;;  %v3908_v25 = vmul.f32 %v6706_v42, %v11722_v18 }
  0x9c   :  { %v4040_v19 = vmul.f32 %v6718_v51, %v6361_v36  ;;  %v6741_v63 = vadd.f32 %v3306_v35, %v3305_v59  ;;  %v4102_v60 = vadd.f32 %v4038_v11, %v3970_v1  ;;  %v3971_v24 = vadd.f32 %v3907_v10, %v3763_v9  ;;  %v11727_v9 = vld [vmem:[#allocation25_spill] sm:$0xff] }
  0x9d   :  { %v3569_v50 = vmul.f32 %v6697_v31, %v11723_v2  ;;  %v3764_v62 = vadd.f32 %v3700_v58, %v3568_v55  ;;  %v3701_v15 = vmul.f32 %v6701_v17, %v6376_v38  ;;  %v3909_v46 = vmul.f32 %v6706_v42, %v11724_v40  ;;  %v11728_v55 = vld [vmem:[#allocation27_spill] sm:$0xff]  ;;  %v11729_v58 = vld [vmem:[#allocation28_spill] sm:$0xff] }
  0x9e   :  { %v4041_v22 = vmul.f32 %v6718_v51, %v6399_v7  ;;  %v4166_v28 = vsel %vm17_vm0, %v4102_v60, 0.0  ;;  %v4300_v3 = vmul.f32 %v4102_v60, %v4102_v60  ;;  %4499 = vst.msk [vmem:[#allocation3 + $0x600] sm:$0xff] %vm17_vm0, %v4102_v60  ;;  %v4103_v4 = vadd.f32 %v4039_v30, %v3971_v24 }
  0x9f   :  { %v3570_v8 = vmul.f32 %v6697_v31, %v11725_v43  ;;  %v3972_v39 = vadd.f32 %v3908_v25, %v3764_v62  ;;  %v3765_v29 = vadd.f32 %v3701_v15, %v3569_v50  ;;  %v3702_v5 = vmul.f32 %v6701_v17, %v6405_v57  ;;  %v11730_v62 = vld [vmem:[#allocation29_spill] sm:$0xff] }
  0xa0   :  { %v3910_v44 = vmul.f32 %v6706_v42, %v11726_v41  ;;  %v4364_v59 = vsel %vm17_vm0, %v4300_v3, 0.0  ;;  %v4167_v27 = vsel %vm17_vm0, %v4103_v4, 0.0  ;;  %v4301_v52 = vmul.f32 %v4103_v4, %v4103_v4  ;;  %4500 = vst.msk [vmem:[#allocation3 + $0x608] sm:$0xff] %vm17_vm0, %v4103_v4 }
  0xa1   :  { %v4042_v10 = vmul.f32 %v6718_v51, %v6412_v56  ;;  %v4168_v12 = vadd.f32 %v4167_v27, %v4166_v28  ;;  %v4104_v53 = vadd.f32 %v4040_v19, %v3972_v39  ;;  %v3973_v11 = vadd.f32 %v3909_v46, %v3765_v29  ;;  %v11731_v29 = vld [vmem:[#allocation32_spill] sm:$0xff] }
  0xa2   :  { %v3766_v30 = vadd.f32 %v3702_v5, %v3570_v8  ;;  %v4365_v1 = vsel %vm17_vm0, %v4301_v52, 0.0  ;;  %v3571_v32 = vmul.f32 %v6697_v31, %v11727_v9  ;;  %v3703_v35 = vmul.f32 %v6701_v17, %v11728_v55 }
  0xa3   :  { %v3911_v18 = vmul.f32 %v6706_v42, %v11729_v58  ;;  %v4366_v25 = vadd.f32 %v4365_v1, %v4364_v59  ;;  %v4169_v60 = vsel %vm17_vm0, %v4104_v53, 0.0  ;;  %v4302_v24 = vmul.f32 %v4104_v53, %v4104_v53  ;;  %4501 = vst.msk [vmem:[#allocation3 + $0x610] sm:$0xff] %vm17_vm0, %v4104_v53 }
  0xa4   :  { %v4105_v19 = vadd.f32 %v4041_v22, %v3973_v11  ;;  %v4170_v2 = vadd.f32 %v4169_v60, %v4168_v12  ;;  %v3974_v50 = vadd.f32 %v3910_v44, %v3766_v30  ;;  %v3767_v61 = vadd.f32 %v3703_v35, %v3571_v32  ;;  %v11732_v44 = vld [vmem:[#allocation34_spill] sm:$0xff] }
  0xa5   :  { %v4043_v15 = vmul.f32 %v6718_v51, %v11730_v62  ;;  %v4367_v40 = vsel %vm17_vm0, %v4302_v24, 0.0  ;;  %v3572_v3 = vmul.f32 %v6697_v31, %v11717_v0  ;;  %v3704_v5 = vmul.f32 %v6701_v17, %v11731_v29 }
  0xa6   :  { %v4171_v46 = vsel %vm17_vm0, %v4105_v19, 0.0  ;;  %v4303_v28 = vmul.f32 %v4105_v19, %v4105_v19  ;;  %4502 = vst.msk [vmem:[#allocation3 + $0x618] sm:$0xff] %vm17_vm0, %v4105_v19  ;;  %v4368_v4 = vadd.f32 %v4367_v40, %v4366_v25  ;;  %v4106_v8 = vadd.f32 %v4042_v10, %v3974_v50  ;;  %v155_v10 = vld [vmem:[%s11496_s0 + $0xf0] sm:$0xff]  ;;  %v11734_v19 = vld [vmem:[#allocation36_spill] sm:$0xff] }
  0xa7   :  { %v4172_v43 = vadd.f32 %v4171_v46, %v4170_v2  ;;  %v3975_v22 = vadd.f32 %v3911_v18, %v3767_v61  ;;  %v3912_v41 = vmul.f32 %v6706_v42, %v11720_v54  ;;  %v4044_v59 = vmul.f32 %v6718_v51, %v11732_v44  ;;  %v11733_v54 = vld [vmem:[#allocation35_spill] sm:$0xff]  ;;  %220 = vst.msk [vmem:[#allocation2 + $0x19a] sm:$0xff] %vm17_vm0, %v155_v10  ;;  %v6832_v10 = vld [vmem:[#allocation2 + $0xc9] sm:$0xff] }
  0xa8   :  { %v4369_v39 = vsel %vm17_vm0, %v4303_v28, 0.0  ;;  %v4173_v52 = vsel %vm17_vm0, %v4106_v8, 0.0  ;;  %v4304_v12 = vmul.f32 %v4106_v8, %v4106_v8  ;;  %4503 = vst.msk [vmem:[#allocation3 + $0x620] sm:$0xff] %vm17_vm0, %v4106_v8  ;;  %v3768_v11 = vadd.f32 %v3704_v5, %v3572_v3 }
  0xa9   :  { %v4370_v27 = vadd.f32 %v4369_v39, %v4368_v4  ;;  %v4107_v0 = vadd.f32 %v4043_v15, %v3975_v22  ;;  %v4174_v53 = vadd.f32 %v4173_v52, %v4172_v43  ;;  %v3573_v30 = vmul.f32 %v6697_v31, %v6460_v23 }
  0xaa   :  { %v3705_v1 = vmul.f32 %v6701_v17, %v11733_v54  ;;  %v4371_v9 = vsel %vm17_vm0, %v4304_v12, 0.0  ;;  %v3913_v58 = vmul.f32 %v6706_v42, %v6472_v49  ;;  %v3976_v60 = vadd.f32 %v3912_v41, %v3768_v11  ;;  %v11735_v41 = vld [vmem:[#allocation37_spill] sm:$0xff]  ;;  %v11736_v54 = vld [vmem:[#allocation38_spill] sm:$0xff] }
  0xab   :  { %v4175_v32 = vsel %vm17_vm0, %v4107_v0, 0.0  ;;  %v4305_v35 = vmul.f32 %v4107_v0, %v4107_v0  ;;  %4504 = vst.msk [vmem:[#allocation3 + $0x628] sm:$0xff] %vm17_vm0, %v4107_v0  ;;  %v4372_v18 = vadd.f32 %v4371_v9, %v4370_v27  ;;  %v4045_v2 = vmul.f32 %v6718_v51, %v11734_v19  ;;  %v6849_v19 = vld [vmem:[#allocation2 + $0xcc] sm:$0xff] }
  0xac   :  { %v4176_v25 = vadd.f32 %v4175_v32, %v4174_v53  ;;  %v3769_v24 = vadd.f32 %v3705_v1, %v3573_v30  ;;  %v3574_v50 = vmul.f32 %v6697_v31, %v6353_v34  ;;  %v3706_v61 = vmul.f32 %v6701_v17, %v6483_v21 }
  0xad   :  { %v4373_v23 = vsel %vm17_vm0, %v4305_v35, 0.0  ;;  %v4108_v40 = vadd.f32 %v4044_v59, %v3976_v60  ;;  %v3914_v49 = vmul.f32 %v6706_v42, %v6361_v36  ;;  %v4046_v3 = vmul.f32 %v6718_v51, %v6491_v20  ;;  %v11737_v60 = vld [vmem:[#allocation5_spill] sm:$0xff] }
  0xae   :  { %v4374_v15 = vadd.f32 %v4373_v23, %v4372_v18  ;;  %v3977_v46 = vadd.f32 %v3913_v58, %v3769_v24  ;;  %v3770_v28 = vadd.f32 %v3706_v61, %v3574_v50  ;;  %v3575_v4 = vmul.f32 %v6697_v31, %v6376_v38  ;;  %v156_v58 = vld [vmem:[%s11496_s0 + $0xf8] sm:$0xff] }
  0xaf   :  { %v3707_v43 = vmul.f32 %v6701_v17, %v6504_v26  ;;  %v4177_v34 = vsel %vm17_vm0, %v4108_v40, 0.0  ;;  %v4306_v8 = vmul.f32 %v4108_v40, %v4108_v40  ;;  %4505 = vst.msk [vmem:[#allocation3 + $0x630] sm:$0xff] %vm17_vm0, %v4108_v40  ;;  %v3915_v22 = vmul.f32 %v6706_v42, %v6399_v7  ;;  %221 = vst.msk [vmem:[#allocation2 + $0x1a2] sm:$0xff] %vm17_vm0, %v156_v58  ;;  %v5815_v40 = vld [vmem:[#allocation2 + $0x84] sm:$0xff] }
  0xb0   :  { %v4109_v21 = vadd.f32 %v4045_v2, %v3977_v46  ;;  %v4178_v36 = vadd.f32 %v4177_v34, %v4176_v25  ;;  %v3978_v39 = vadd.f32 %v3914_v49, %v3770_v28  ;;  %v4047_v20 = vmul.f32 %v6718_v51, %v11735_v41  ;;  %v6851_v2 = vld [vmem:[#allocation2 + $0xc8] sm:$0xff]  ;;  %v11739_v46 = vld [vmem:[#allocation7_spill] sm:$0xff] }
  0xb1   :  { %v3771_v5 = vadd.f32 %v3707_v43, %v3575_v4  ;;  %v4375_v38 = vsel %vm17_vm0, %v4306_v8, 0.0  ;;  %v3576_v27 = vmul.f32 %v6697_v31, %v6405_v57  ;;  %v3708_v11 = vmul.f32 %v6701_v17, %v6513_v14  ;;  %v5814_v14 = vld [vmem:[#allocation2 + $0x81] sm:$0xff]  ;;  %v6858_v34 = vld [vmem:[#allocation2 + $0xcb] sm:$0xff] }
  0xb2   :  { %v4179_v59 = vsel %vm17_vm0, %v4109_v21, 0.0  ;;  %v4307_v26 = vmul.f32 %v4109_v21, %v4109_v21  ;;  %4506 = vst.msk [vmem:[#allocation3 + $0x638] sm:$0xff] %vm17_vm0, %v4109_v21  ;;  %v4376_v52 = vadd.f32 %v4375_v38, %v4374_v15  ;;  %v4110_v0 = vadd.f32 %v4046_v3, %v3978_v39  ;;  %v11740_v21 = vld [vmem:[#allocation8_spill] sm:$0xff] }
  0xb3   :  { %v4180_v12 = vadd.f32 %v4179_v59, %v4178_v36  ;;  %v3979_v7 = vadd.f32 %v3915_v22, %v3771_v5  ;;  %v3916_v30 = vmul.f32 %v6706_v42, %v6412_v56  ;;  %v4048_v1 = vmul.f32 %v6718_v51, %v11736_v54  ;;  %v11738_v56 = vld [vmem:[#allocation6_spill] sm:$0xff]  ;;  %v11741_v36 = vld [vmem:[#allocation9_spill] sm:$0xff] }
  0xb4   :  { %v4377_v53 = vsel %vm17_vm0, %v4307_v26, 0.0  ;;  %v4181_v57 = vsel %vm17_vm0, %v4110_v0, 0.0  ;;  %v4308_v32 = vmul.f32 %v4110_v0, %v4110_v0  ;;  %4507 = vst.msk [vmem:[#allocation3 + $0x640] sm:$0xff] %vm17_vm0, %v4110_v0  ;;  %v3772_v25 = vadd.f32 %v3708_v11, %v3576_v27  ;;  %v11742_v5 = vld [vmem:[#allocation10_spill] sm:$0xff]  ;;  %v11743_v26 = vld [vmem:[#allocation11_spill] sm:$0xff] }
  0xb5   :  { %v4378_v9 = vadd.f32 %v4377_v53, %v4376_v52  ;;  %v4111_v35 = vadd.f32 %v4047_v20, %v3979_v7  ;;  %v4182_v18 = vadd.f32 %v4181_v57, %v4180_v12  ;;  %v345_v24 = vmul.f32 %v5814_v14, %v11737_v60  ;;  %v11744_v12 = vld [vmem:[#allocation12_spill] sm:$0xff] }
  0xb6   :  { %v477_v23 = vmul.f32 %v11738_v56, %v6832_v10  ;;  %v4379_v50 = vsel %vm17_vm0, %v4308_v32, 0.0  ;;  %v685_v49 = vmul.f32 %v5815_v40, %v11739_v46  ;;  %v3980_v4 = vadd.f32 %v3916_v30, %v3772_v25 }
  0xb7   :  { %v4183_v61 = vsel %vm17_vm0, %v4111_v35, 0.0  ;;  %v4309_v15 = vmul.f32 %v4111_v35, %v4111_v35  ;;  %4508 = vst.msk [vmem:[#allocation3 + $0x648] sm:$0xff] %vm17_vm0, %v4111_v35  ;;  %v4380_v28 = vadd.f32 %v4379_v50, %v4378_v9  ;;  %v817_v22 = vmul.f32 %v11740_v21, %v6849_v19 }
  0xb8   :  { %v4184_v3 = vadd.f32 %v4183_v61, %v4182_v18  ;;  %v541_v43 = vadd.f32 %v477_v23, %v345_v24  ;;  %v1421_v39 = vmul.f32 %v11741_v36, %v11728_v55  ;;  %v1553_v41 = vmul.f32 %v11742_v5, %v6851_v2  ;;  %v11745_v23 = vld [vmem:[#allocation26_spill] sm:$0xff] }
  0xb9   :  { %v4381_v8 = vsel %vm17_vm0, %v4309_v15, 0.0  ;;  %v4112_v38 = vadd.f32 %v4048_v1, %v3980_v4  ;;  %v1761_v27 = vmul.f32 %v11743_v26, %v11730_v62  ;;  %v1893_v0 = vmul.f32 %v11744_v12, %v6858_v34 }
  0xba   :  { %v4382_v20 = vadd.f32 %v4381_v8, %v4380_v28  ;;  %v749_v59 = vadd.f32 %v685_v49, %v541_v43  ;;  %v1617_v52 = vadd.f32 %v1553_v41, %v1421_v39  ;;  %v2500_v7 = vmul.f32 %v5814_v14, %v6545_v45  ;;  %v11746_v43 = vld [vmem:[#allocation31_spill] sm:$0xff] }
  0xbb   :  { %v2632_v53 = vmul.f32 %v6550_v47, %v6832_v10  ;;  %v4185_v11 = vsel %vm17_vm0, %v4112_v38, 0.0  ;;  %v4310_v30 = vmul.f32 %v4112_v38, %v4112_v38  ;;  %4509 = vst.msk [vmem:[#allocation3 + $0x650] sm:$0xff] %vm17_vm0, %v4112_v38  ;;  %v2840_v1 = vmul.f32 %v5815_v40, %v6555_v6  ;;  %v6885_v40 = vld [vmem:[#allocation2 + $0xd9] sm:$0xff]  ;;  %v5816_v38 = vld [vmem:[#allocation2 + $0x91] sm:$0xff] }
  0xbc   :  { %v881_v54 = vadd.f32 %v817_v22, %v749_v59  ;;  %v4186_v9 = vadd.f32 %v4185_v11, %v4184_v3  ;;  %v1825_v57 = vadd.f32 %v1761_v27, %v1617_v52  ;;  %v2972_v35 = vmul.f32 %v6563_v33, %v6849_v19  ;;  %v6901_v27 = vld [vmem:[#allocation2 + $0xdc] sm:$0xff]  ;;  %v5817_v11 = vld [vmem:[#allocation2 + $0x94] sm:$0xff] }
  0xbd   :  { %v2696_v32 = vadd.f32 %v2632_v53, %v2500_v7  ;;  %v4383_v58 = vsel %vm17_vm0, %v4310_v30, 0.0  ;;  %v3577_v14 = vmul.f32 %v6697_v31, %v11728_v55  ;;  %v3709_v28 = vmul.f32 %v6701_v17, %v6851_v2  ;;  %v6903_v52 = vld [vmem:[#allocation2 + $0xd8] sm:$0xff] }
  0xbe   :  { %v953_v18 = vsel %vm17_vm0, %v881_v54, 0.0  ;;  %v1079_v25 = vmul.f32 %v881_v54, %v881_v54  ;;  %1277 = vst.msk [vmem:[#allocation3 + $0x48] sm:$0xff] %vm17_vm0, %v881_v54  ;;  %v4384_v24 = vadd.f32 %v4383_v58, %v4382_v20  ;;  %v1957_v61 = vadd.f32 %v1893_v0, %v1825_v57 }
  0xbf   :  { %v954_v50 = vadd.f32 %v953_v18, %v11745_v23  ;;  %v2904_v15 = vadd.f32 %v2840_v1, %v2696_v32  ;;  %v3917_v3 = vmul.f32 %v6706_v42, %v11730_v62  ;;  %v4049_v4 = vmul.f32 %v6718_v51, %v6858_v34  ;;  %v6911_v32 = vld [vmem:[#allocation2 + $0xdb] sm:$0xff] }
  0xc0   :  { %v1151_v49 = vsel %vm17_vm0, %v1079_v25, 0.0  ;;  %v2029_v8 = vsel %vm17_vm0, %v1957_v61, 0.0  ;;  %v2155_v22 = vmul.f32 %v1957_v61, %v1957_v61  ;;  %2354 = vst.msk [vmem:[#allocation3 + $0x248] sm:$0xff] %vm17_vm0, %v1957_v61  ;;  %v3773_v20 = vadd.f32 %v3709_v28, %v3577_v14 }
  0xc1   :  { %v1152_v55 = vadd.f32 %v1151_v49, %v11746_v43  ;;  %v3036_v39 = vadd.f32 %v2972_v35, %v2904_v15  ;;  %v2030_v41 = vadd.f32 %v2029_v8, %v6577_v37  ;;  %v346_v59 = vmul.f32 %v5816_v38, %v11737_v60 }
  0xc2   :  { %v478_v62 = vmul.f32 %v11738_v56, %v6885_v40  ;;  %v2227_v0 = vsel %vm17_vm0, %v2155_v22, 0.0  ;;  %v686_v37 = vmul.f32 %v5817_v11, %v11739_v46  ;;  %v3981_v1 = vadd.f32 %v3917_v3, %v3773_v20 }
  0xc3   :  { %v3110_v7 = vsel %vm17_vm0, %v3036_v39, 0.0  ;;  %v3234_v53 = vmul.f32 %v3036_v39, %v3036_v39  ;;  %3433 = vst.msk [vmem:[#allocation3 + $0x458] sm:$0xff] %vm17_vm0, %v3036_v39  ;;  %v2228_v30 = vadd.f32 %v2227_v0, %v6590_v48  ;;  %v818_v58 = vmul.f32 %v11740_v21, %v6901_v27 }
  0xc4   :  { %v3111_v54 = vadd.f32 %v3110_v7, %v6730_v13  ;;  %v542_v57 = vadd.f32 %v478_v62, %v346_v59  ;;  %v1422_v18 = vmul.f32 %v11741_v36, %v11731_v29  ;;  %v1554_v25 = vmul.f32 %v11742_v5, %v6903_v52 }
  0xc5   :  { %v3308_v35 = vsel %vm17_vm0, %v3234_v53, 0.0  ;;  %v4113_v48 = vadd.f32 %v4049_v4, %v3981_v1  ;;  %v1762_v13 = vmul.f32 %v11743_v26, %v11732_v44  ;;  %v1894_v15 = vmul.f32 %v11744_v12, %v6911_v32 }
  0xc6   :  { %v3309_v14 = vadd.f32 %v3308_v35, %v6741_v63  ;;  %v750_v23 = vadd.f32 %v686_v37, %v542_v57  ;;  %v1618_v61 = vadd.f32 %v1554_v25, %v1422_v18  ;;  %v2501_v49 = vmul.f32 %v5816_v38, %v6545_v45 }
  0xc7   :  { %v2633_v28 = vmul.f32 %v6550_v47, %v6885_v40  ;;  %v4187_v3 = vsel %vm17_vm0, %v4113_v48, 0.0  ;;  %v4311_v43 = vmul.f32 %v4113_v48, %v4113_v48  ;;  %4510 = vst.msk [vmem:[#allocation3 + $0x658] sm:$0xff] %vm17_vm0, %v4113_v48  ;;  %v2841_v4 = vmul.f32 %v5817_v11, %v6555_v6 }
  0xc8   :  { %v882_v63 = vadd.f32 %v818_v58, %v750_v23  ;;  %v4188_v8 = vadd.f32 %v4187_v3, %v4186_v9  ;;  %v1826_v22 = vadd.f32 %v1762_v13, %v1618_v61  ;;  %v2973_v20 = vmul.f32 %v6563_v33, %v6901_v27  ;;  %v6938_v9 = vld [vmem:[#allocation2 + $0xe1] sm:$0xff]  ;;  %v5818_v23 = vld [vmem:[#allocation2 + $0x99] sm:$0xff] }
  0xc9   :  { %v2697_v39 = vadd.f32 %v2633_v28, %v2501_v49  ;;  %v4385_v59 = vsel %vm17_vm0, %v4311_v43, 0.0  ;;  %v3578_v0 = vmul.f32 %v6697_v31, %v11731_v29  ;;  %v3710_v57 = vmul.f32 %v6701_v17, %v6903_v52  ;;  %v5819_v3 = vld [vmem:[#allocation2 + $0x9c] sm:$0xff] }
  0xca   :  { %v955_v38 = vsel %vm17_vm0, %v882_v63, 0.0  ;;  %v1080_v62 = vmul.f32 %v882_v63, %v882_v63  ;;  %1278 = vst.msk [vmem:[#allocation3 + $0x50] sm:$0xff] %vm17_vm0, %v882_v63  ;;  %v4386_v7 = vadd.f32 %v4385_v59, %v4384_v24  ;;  %v1958_v37 = vadd.f32 %v1894_v15, %v1826_v22  ;;  %v6952_v15 = vld [vmem:[#allocation2 + $0xe4] sm:$0xff] }
  0xcb   :  { %v956_v53 = vadd.f32 %v955_v38, %v954_v50  ;;  %v2905_v11 = vadd.f32 %v2841_v4, %v2697_v39  ;;  %v3918_v35 = vmul.f32 %v6706_v42, %v11732_v44  ;;  %v4050_v58 = vmul.f32 %v6718_v51, %v6911_v32  ;;  %v6954_v44 = vld [vmem:[#allocation2 + $0xe0] sm:$0xff]  ;;  %v5820_v38 = vld [vmem:[#allocation2 + $0x98] sm:$0xff] }
  0xcc   :  { %v1153_v1 = vsel %vm17_vm0, %v1080_v62, 0.0  ;;  %v2031_v29 = vsel %vm17_vm0, %v1958_v37, 0.0  ;;  %v2156_v24 = vmul.f32 %v1958_v37, %v1958_v37  ;;  %2355 = vst.msk [vmem:[#allocation3 + $0x250] sm:$0xff] %vm17_vm0, %v1958_v37  ;;  %v3774_v48 = vadd.f32 %v3710_v57, %v3578_v0  ;;  %v6960_v39 = vld [vmem:[#allocation2 + $0xe3] sm:$0xff] }
  0xcd   :  { %v1154_v18 = vadd.f32 %v1153_v1, %v1152_v55  ;;  %v3037_v50 = vadd.f32 %v2973_v20, %v2905_v11  ;;  %v2032_v25 = vadd.f32 %v2031_v29, %v2030_v41  ;;  %v347_v13 = vmul.f32 %v5818_v23, %v11737_v60 }
  0xce   :  { %v479_v61 = vmul.f32 %v11738_v56, %v6938_v9  ;;  %v2229_v55 = vsel %vm17_vm0, %v2156_v24, 0.0  ;;  %v687_v41 = vmul.f32 %v5819_v3, %v11739_v46  ;;  %v3982_v4 = vadd.f32 %v3918_v35, %v3774_v48 }
  0xcf   :  { %v3112_v49 = vsel %vm17_vm0, %v3037_v50, 0.0  ;;  %v3235_v28 = vmul.f32 %v3037_v50, %v3037_v50  ;;  %3434 = vst.msk [vmem:[#allocation3 + $0x460] sm:$0xff] %vm17_vm0, %v3037_v50  ;;  %v2230_v43 = vadd.f32 %v2229_v55, %v2228_v30  ;;  %v819_v59 = vmul.f32 %v11740_v21, %v6952_v15  ;;  %v5821_v30 = vld [vmem:[#allocation2 + $0x9b] sm:$0xff] }
  0xd0   :  { %v3113_v63 = vadd.f32 %v3112_v49, %v3111_v54  ;;  %v543_v22 = vadd.f32 %v479_v61, %v347_v13  ;;  %v1423_v62 = vmul.f32 %v5820_v38, %v11741_v36  ;;  %v1555_v0 = vmul.f32 %v11742_v5, %v6954_v44 }
  0xd1   :  { %v3310_v20 = vsel %vm17_vm0, %v3235_v28, 0.0  ;;  %v4114_v11 = vadd.f32 %v4050_v58, %v3982_v4  ;;  %v1763_v54 = vmul.f32 %v5821_v30, %v11743_v26  ;;  %v1895_v35 = vmul.f32 %v11744_v12, %v6960_v39 }
  0xd2   :  { %v3311_v37 = vadd.f32 %v3310_v20, %v3309_v14  ;;  %v751_v1 = vadd.f32 %v687_v41, %v543_v22  ;;  %v1619_v57 = vadd.f32 %v1555_v0, %v1423_v62  ;;  %v2502_v29 = vmul.f32 %v5818_v23, %v6545_v45 }
  0xd3   :  { %v2634_v24 = vmul.f32 %v6550_v47, %v6938_v9  ;;  %v4189_v50 = vsel %vm17_vm0, %v4114_v11, 0.0  ;;  %v4312_v48 = vmul.f32 %v4114_v11, %v4114_v11  ;;  %4511 = vst.msk [vmem:[#allocation3 + $0x660] sm:$0xff] %vm17_vm0, %v4114_v11  ;;  %v2842_v58 = vmul.f32 %v5819_v3, %v6555_v6  ;;  %v6983_v3 = vld [vmem:[#allocation2 + $0xf1] sm:$0xff] }
  0xd4   :  { %v883_v14 = vadd.f32 %v819_v59, %v751_v1  ;;  %v4190_v13 = vadd.f32 %v4189_v50, %v4188_v8  ;;  %v1827_v61 = vadd.f32 %v1763_v54, %v1619_v57  ;;  %v2974_v49 = vmul.f32 %v6563_v33, %v6952_v15 }
  0xd5   :  { %v2698_v55 = vadd.f32 %v2634_v24, %v2502_v29  ;;  %v4387_v28 = vsel %vm17_vm0, %v4312_v48, 0.0  ;;  %v3579_v4 = vmul.f32 %v5820_v38, %v6697_v31  ;;  %v3711_v0 = vmul.f32 %v6701_v17, %v6954_v44  ;;  %v5822_v29 = vld [vmem:[#allocation2 + $0xa9] sm:$0xff]  ;;  %v6996_v48 = vld [vmem:[#allocation2 + $0xf4] sm:$0xff] }
  0xd6   :  { %v957_v23 = vsel %vm17_vm0, %v883_v14, 0.0  ;;  %v1081_v41 = vmul.f32 %v883_v14, %v883_v14  ;;  %1279 = vst.msk [vmem:[#allocation3 + $0x58] sm:$0xff] %vm17_vm0, %v883_v14  ;;  %v4388_v22 = vadd.f32 %v4387_v28, %v4386_v7  ;;  %v1959_v59 = vadd.f32 %v1895_v35, %v1827_v61  ;;  %11747 = vst [vmem:[#allocation14_spill] sm:$0xff] %v6996_v48  ;;  %v5823_v61 = vld [vmem:[#allocation2 + $0xac] sm:$0xff] }
  0xd7   :  { %v958_v20 = vadd.f32 %v957_v23, %v956_v53  ;;  %v2906_v62 = vadd.f32 %v2842_v58, %v2698_v55  ;;  %v3919_v11 = vmul.f32 %v5821_v30, %v6706_v42  ;;  %v4051_v1 = vmul.f32 %v6718_v51, %v6960_v39  ;;  %v6998_v30 = vld [vmem:[#allocation2 + $0xf0] sm:$0xff] }
  0xd8   :  { %v1155_v8 = vsel %vm17_vm0, %v1081_v41, 0.0  ;;  %v2033_v57 = vsel %vm17_vm0, %v1959_v59, 0.0  ;;  %v2157_v38 = vmul.f32 %v1959_v59, %v1959_v59  ;;  %2356 = vst.msk [vmem:[#allocation3 + $0x258] sm:$0xff] %vm17_vm0, %v1959_v59  ;;  %v3775_v35 = vadd.f32 %v3711_v0, %v3579_v4  ;;  %11748 = vst [vmem:[#allocation15_spill] sm:$0xff] %v6998_v30  ;;  %v7004_v41 = vld [vmem:[#allocation2 + $0xf3] sm:$0xff] }
  0xd9   :  { %v1156_v54 = vadd.f32 %v1155_v8, %v1154_v18  ;;  %v3038_v7 = vadd.f32 %v2974_v49, %v2906_v62  ;;  %v2034_v53 = vadd.f32 %v2033_v57, %v2032_v25  ;;  %v348_v24 = vmul.f32 %v5822_v29, %v11737_v60  ;;  %11749 = vst [vmem:[#allocation16_spill] sm:$0xff] %v7004_v41  ;;  %v5824_v62 = vld [vmem:[#allocation2 + $0xa8] sm:$0xff] }
  0xda   :  { %v480_v50 = vmul.f32 %v11738_v56, %v6983_v3  ;;  %v2231_v18 = vsel %vm17_vm0, %v2157_v38, 0.0  ;;  %v688_v25 = vmul.f32 %v5823_v61, %v11739_v46  ;;  %v3983_v28 = vadd.f32 %v3919_v11, %v3775_v35 }
  0xdb   :  { %v3114_v14 = vsel %vm17_vm0, %v3038_v7, 0.0  ;;  %v3236_v58 = vmul.f32 %v3038_v7, %v3038_v7  ;;  %3435 = vst.msk [vmem:[#allocation3 + $0x468] sm:$0xff] %vm17_vm0, %v3038_v7  ;;  %v2232_v55 = vadd.f32 %v2231_v18, %v2230_v43  ;;  %v820_v59 = vmul.f32 %v11740_v21, %v6996_v48  ;;  %v5825_v43 = vld [vmem:[#allocation2 + $0xab] sm:$0xff] }
  0xdc   :  { %v3115_v49 = vadd.f32 %v3114_v14, %v3113_v63  ;;  %v544_v23 = vadd.f32 %v480_v50, %v348_v24  ;;  %v1424_v8 = vmul.f32 %v5824_v62, %v11741_v36  ;;  %v1556_v0 = vmul.f32 %v11742_v5, %v6998_v30 }
  0xdd   :  { %v3312_v4 = vsel %vm17_vm0, %v3236_v58, 0.0  ;;  %v4115_v38 = vadd.f32 %v4051_v1, %v3983_v28  ;;  %v1764_v63 = vmul.f32 %v5825_v43, %v11743_v26  ;;  %v1896_v35 = vmul.f32 %v11744_v12, %v7004_v41 }
  0xde   :  { %v3313_v57 = vadd.f32 %v3312_v4, %v3311_v37  ;;  %v752_v7 = vadd.f32 %v688_v25, %v544_v23  ;;  %v1620_v11 = vadd.f32 %v1556_v0, %v1424_v8  ;;  %v2503_v24 = vmul.f32 %v5822_v29, %v6545_v45 }
  0xdf   :  { %v2635_v50 = vmul.f32 %v6550_v47, %v6983_v3  ;;  %v4191_v18 = vsel %vm17_vm0, %v4115_v38, 0.0  ;;  %v4313_v14 = vmul.f32 %v4115_v38, %v4115_v38  ;;  %4512 = vst.msk [vmem:[#allocation3 + $0x668] sm:$0xff] %vm17_vm0, %v4115_v38  ;;  %v2843_v1 = vmul.f32 %v5823_v61, %v6555_v6  ;;  %v7027_v61 = vld [vmem:[#allocation2 + $0xf9] sm:$0xff] }
  0xe0   :  { %v884_v37 = vadd.f32 %v820_v59, %v752_v7  ;;  %v4192_v58 = vadd.f32 %v4191_v18, %v4190_v13  ;;  %v1828_v25 = vadd.f32 %v1764_v63, %v1620_v11  ;;  %v2975_v23 = vmul.f32 %v6563_v33, %v6996_v48  ;;  %11750 = vst [vmem:[#allocation17_spill] sm:$0xff] %v7027_v61 }
  0xe1   :  { %v2699_v28 = vadd.f32 %v2635_v50, %v2503_v24  ;;  %v4389_v4 = vsel %vm17_vm0, %v4313_v14, 0.0  ;;  %v3580_v0 = vmul.f32 %v5824_v62, %v6697_v31  ;;  %v3712_v63 = vmul.f32 %v6701_v17, %v6998_v30  ;;  %v5826_v14 = vld [vmem:[#allocation2 + $0xb1] sm:$0xff] }
  0xe2   :  { %v959_v29 = vsel %vm17_vm0, %v884_v37, 0.0  ;;  %v1082_v8 = vmul.f32 %v884_v37, %v884_v37  ;;  %1280 = vst.msk [vmem:[#allocation3 + $0x60] sm:$0xff] %vm17_vm0, %v884_v37  ;;  %v4390_v16 = vadd.f32 %v4389_v4, %v4388_v22  ;;  %v1960_v59 = vadd.f32 %v1896_v35, %v1828_v25  ;;  %v7040_v25 = vld [vmem:[#allocation2 + $0xfc] sm:$0xff] }
  0xe3   :  { %v960_v38 = vadd.f32 %v959_v29, %v958_v20  ;;  %v2907_v7 = vadd.f32 %v2843_v1, %v2699_v28  ;;  %v3920_v11 = vmul.f32 %v5825_v43, %v6706_v42  ;;  %v4052_v24 = vmul.f32 %v6718_v51, %v7004_v41  ;;  %11751 = vst [vmem:[#allocation18_spill] sm:$0xff] %v7040_v25  ;;  %v7042_v43 = vld [vmem:[#allocation2 + $0xf8] sm:$0xff] }
  0xe4   :  { %v1157_v13 = vsel %vm17_vm0, %v1082_v8, 0.0  ;;  %v2035_v18 = vsel %vm17_vm0, %v1960_v59, 0.0  ;;  %v2158_v62 = vmul.f32 %v1960_v59, %v1960_v59  ;;  %2357 = vst.msk [vmem:[#allocation3 + $0x260] sm:$0xff] %vm17_vm0, %v1960_v59  ;;  %v3776_v35 = vadd.f32 %v3712_v63, %v3580_v0  ;;  %11752 = vst [vmem:[#allocation30_spill] sm:$0xff] %v7042_v43 }
  0xe5   :  { %v1158_v50 = vadd.f32 %v1157_v13, %v1156_v54  ;;  %v3039_v22 = vadd.f32 %v2975_v23, %v2907_v7  ;;  %v2036_v20 = vadd.f32 %v2035_v18, %v2034_v53  ;;  %v349_v37 = vmul.f32 %v5826_v14, %v11737_v60  ;;  %v5827_v23 = vld [vmem:[#allocation2 + $0xb4] sm:$0xff] }
  0xe6   :  { %v481_v1 = vmul.f32 %v11738_v56, %v7027_v61  ;;  %v2233_v54 = vsel %vm17_vm0, %v2158_v62, 0.0  ;;  %v689_v53 = vmul.f32 %v5827_v23, %v11739_v46  ;;  %v3984_v0 = vadd.f32 %v3920_v11, %v3776_v35  ;;  %v7048_v7 = vld [vmem:[#allocation2 + $0xfb] sm:$0xff]  ;;  %v5828_v18 = vld [vmem:[#allocation2 + $0xb0] sm:$0xff] }
  0xe7   :  { %v3116_v28 = vsel %vm17_vm0, %v3039_v22, 0.0  ;;  %v3237_v4 = vmul.f32 %v3039_v22, %v3039_v22  ;;  %3436 = vst.msk [vmem:[#allocation3 + $0x470] sm:$0xff] %vm17_vm0, %v3039_v22  ;;  %v2234_v29 = vadd.f32 %v2233_v54, %v2232_v55  ;;  %11753 = vst [vmem:[#allocation33_spill] sm:$0xff] %v7048_v7  ;;  %v821_v63 = vmul.f32 %v11740_v21, %v7040_v25  ;;  %v5829_v55 = vld [vmem:[#allocation2 + $0xb3] sm:$0xff] }
  0xe8   :  { %v3117_v8 = vadd.f32 %v3116_v28, %v3115_v49  ;;  %v545_v59 = vadd.f32 %v481_v1, %v349_v37  ;;  %v1425_v62 = vmul.f32 %v5828_v18, %v11741_v36  ;;  %v1557_v22 = vmul.f32 %v11742_v5, %v7042_v43 }
  0xe9   :  { %v3314_v13 = vsel %vm17_vm0, %v3237_v4, 0.0  ;;  %v4116_v30 = vadd.f32 %v4052_v24, %v3984_v0  ;;  %v1765_v49 = vmul.f32 %v5829_v55, %v11743_v26  ;;  %v1897_v35 = vmul.f32 %v11744_v12, %v7048_v7 }
  0xea   :  { %v3315_v41 = vadd.f32 %v3314_v13, %v3313_v57  ;;  %v753_v48 = vadd.f32 %v689_v53, %v545_v59  ;;  %v1621_v11 = vadd.f32 %v1557_v22, %v1425_v62  ;;  %v2504_v37 = vmul.f32 %v5826_v14, %v6545_v45 }
  0xeb   :  { %v2636_v1 = vmul.f32 %v6550_v47, %v7027_v61  ;;  %v4193_v54 = vsel %vm17_vm0, %v4116_v30, 0.0  ;;  %v4314_v28 = vmul.f32 %v4116_v30, %v4116_v30  ;;  %4513 = vst.msk [vmem:[#allocation3 + $0x670] sm:$0xff] %vm17_vm0, %v4116_v30  ;;  %v2844_v24 = vmul.f32 %v5827_v23, %v6555_v6  ;;  %v7071_v23 = vld [vmem:[#allocation2 + $0x109] sm:$0xff] }
  0xec   :  { %v885_v57 = vadd.f32 %v821_v63, %v753_v48  ;;  %v4194_v4 = vadd.f32 %v4193_v54, %v4192_v58  ;;  %v1829_v53 = vadd.f32 %v1765_v49, %v1621_v11  ;;  %v2976_v59 = vmul.f32 %v6563_v33, %v7040_v25  ;;  %11754 = vst [vmem:[#allocation19_spill] sm:$0xff] %v7071_v23 }
  0xed   :  { %v2700_v0 = vadd.f32 %v2636_v1, %v2504_v37  ;;  %v4391_v13 = vsel %vm17_vm0, %v4314_v28, 0.0  ;;  %v3581_v22 = vmul.f32 %v5828_v18, %v6697_v31  ;;  %v3713_v49 = vmul.f32 %v6701_v17, %v7042_v43  ;;  %v5830_v28 = vld [vmem:[#allocation2 + $0xc1] sm:$0xff] }
  0xee   :  { %v961_v14 = vsel %vm17_vm0, %v885_v57, 0.0  ;;  %v1083_v62 = vmul.f32 %v885_v57, %v885_v57  ;;  %1281 = vst.msk [vmem:[#allocation3 + $0x68] sm:$0xff] %vm17_vm0, %v885_v57  ;;  %v4392_v61 = vadd.f32 %v4391_v13, %v4390_v16  ;;  %v1961_v48 = vadd.f32 %v1897_v35, %v1829_v53  ;;  %v7084_v53 = vld [vmem:[#allocation2 + $0x10c] sm:$0xff] }
  0xef   :  { %v962_v30 = vadd.f32 %v961_v14, %v960_v38  ;;  %v2908_v63 = vadd.f32 %v2844_v24, %v2700_v0  ;;  %v3921_v11 = vmul.f32 %v5829_v55, %v6706_v42  ;;  %v4053_v37 = vmul.f32 %v6718_v51, %v7048_v7  ;;  %v7086_v55 = vld [vmem:[#allocation2 + $0x108] sm:$0xff] }
  0xf0   :  { %v1159_v58 = vsel %vm17_vm0, %v1083_v62, 0.0  ;;  %v2037_v54 = vsel %vm17_vm0, %v1961_v48, 0.0  ;;  %v2159_v18 = vmul.f32 %v1961_v48, %v1961_v48  ;;  %2358 = vst.msk [vmem:[#allocation3 + $0x268] sm:$0xff] %vm17_vm0, %v1961_v48  ;;  %v3777_v35 = vadd.f32 %v3713_v49, %v3581_v22 }
  0xf1   :  { %v1160_v1 = vadd.f32 %v1159_v58, %v1158_v50  ;;  %v3040_v16 = vadd.f32 %v2976_v59, %v2908_v63  ;;  %v2038_v38 = vadd.f32 %v2037_v54, %v2036_v20  ;;  %v350_v57 = vmul.f32 %v5830_v28, %v11737_v60  ;;  %v5831_v59 = vld [vmem:[#allocation2 + $0xc4] sm:$0xff] }
  0xf2   :  { %v482_v24 = vmul.f32 %v11738_v56, %v7071_v23  ;;  %v2235_v50 = vsel %vm17_vm0, %v2159_v18, 0.0  ;;  %v690_v20 = vmul.f32 %v5831_v59, %v11739_v46  ;;  %v3985_v22 = vadd.f32 %v3921_v11, %v3777_v35  ;;  %v7092_v63 = vld [vmem:[#allocation2 + $0x10b] sm:$0xff]  ;;  %v5832_v54 = vld [vmem:[#allocation2 + $0xc0] sm:$0xff] }
  0xf3   :  { %v3118_v0 = vsel %vm17_vm0, %v3040_v16, 0.0  ;;  %v3238_v13 = vmul.f32 %v3040_v16, %v3040_v16  ;;  %3437 = vst.msk [vmem:[#allocation3 + $0x478] sm:$0xff] %vm17_vm0, %v3040_v16  ;;  %v2236_v14 = vadd.f32 %v2235_v50, %v2234_v29  ;;  %v822_v49 = vmul.f32 %v11740_v21, %v7084_v53  ;;  %v5833_v29 = vld [vmem:[#allocation2 + $0xc3] sm:$0xff] }
  0xf4   :  { %v3119_v62 = vadd.f32 %v3118_v0, %v3117_v8  ;;  %v546_v48 = vadd.f32 %v482_v24, %v350_v57  ;;  %v1426_v18 = vmul.f32 %v5832_v54, %v11741_v36  ;;  %v1558_v16 = vmul.f32 %v11742_v5, %v7086_v55 }
  0xf5   :  { %v3316_v58 = vsel %vm17_vm0, %v3238_v13, 0.0  ;;  %v4117_v43 = vadd.f32 %v4053_v37, %v3985_v22  ;;  %v1766_v8 = vmul.f32 %v5833_v29, %v11743_v26  ;;  %v1898_v35 = vmul.f32 %v11744_v12, %v7092_v63 }
  0xf6   :  { %v3317_v7 = vadd.f32 %v3316_v58, %v3315_v41  ;;  %v754_v25 = vadd.f32 %v690_v20, %v546_v48  ;;  %v1622_v11 = vadd.f32 %v1558_v16, %v1426_v18  ;;  %v2505_v57 = vmul.f32 %v5830_v28, %v6545_v45 }
  0xf7   :  { %v2637_v24 = vmul.f32 %v6550_v47, %v7071_v23  ;;  %v4195_v50 = vsel %vm17_vm0, %v4117_v43, 0.0  ;;  %v4315_v0 = vmul.f32 %v4117_v43, %v4117_v43  ;;  %4514 = vst.msk [vmem:[#allocation3 + $0x678] sm:$0xff] %vm17_vm0, %v4117_v43  ;;  %v2845_v37 = vmul.f32 %v5831_v59, %v6555_v6  ;;  %v7115_v59 = vld [vmem:[#allocation2 + $0x111] sm:$0xff] }
  0xf8   :  { %v886_v41 = vadd.f32 %v822_v49, %v754_v25  ;;  %v4196_v13 = vadd.f32 %v4195_v50, %v4194_v4  ;;  %v1830_v20 = vadd.f32 %v1766_v8, %v1622_v11  ;;  %v2977_v48 = vmul.f32 %v6563_v33, %v7084_v53 }
  0xf9   :  { %v2701_v22 = vadd.f32 %v2637_v24, %v2505_v57  ;;  %v4393_v58 = vsel %vm17_vm0, %v4315_v0, 0.0  ;;  %v3582_v16 = vmul.f32 %v5832_v54, %v6697_v31  ;;  %v3714_v8 = vmul.f32 %v6701_v17, %v7086_v55 }
  0xfa   :  { %v963_v28 = vsel %vm17_vm0, %v886_v41, 0.0  ;;  %v1084_v18 = vmul.f32 %v886_v41, %v886_v41  ;;  %1282 = vst.msk [vmem:[#allocation3 + $0x70] sm:$0xff] %vm17_vm0, %v886_v41  ;;  %v4394_v23 = vadd.f32 %v4393_v58, %v4392_v61  ;;  %v1962_v25 = vadd.f32 %v1898_v35, %v1830_v20 }
  0xfb   :  { %v964_v43 = vadd.f32 %v963_v28, %v962_v30  ;;  %v2909_v49 = vadd.f32 %v2845_v37, %v2701_v22  ;;  %v3922_v11 = vmul.f32 %v5833_v29, %v6706_v42  ;;  %v4054_v57 = vmul.f32 %v6718_v51, %v7092_v63  ;;  %v7129_v37 = vld [vmem:[#allocation2 + $0x114] sm:$0xff] }
  0xfc   :  { %v1161_v4 = vsel %vm17_vm0, %v1084_v18, 0.0  ;;  %v2039_v50 = vsel %vm17_vm0, %v1962_v25, 0.0  ;;  %v2160_v54 = vmul.f32 %v1962_v25, %v1962_v25  ;;  %2359 = vst.msk [vmem:[#allocation3 + $0x270] sm:$0xff] %vm17_vm0, %v1962_v25  ;;  %v3778_v35 = vadd.f32 %v3714_v8, %v3582_v16  ;;  %v7131_v29 = vld [vmem:[#allocation2 + $0x110] sm:$0xff] }
  0xfd   :  { %v1162_v24 = vadd.f32 %v1161_v4, %v1160_v1  ;;  %v3041_v61 = vadd.f32 %v2977_v48, %v2909_v49  ;;  %v2040_v30 = vadd.f32 %v2039_v50, %v2038_v38  ;;  %v351_v0 = vmul.f32 %v11737_v60, %v6832_v10  ;;  %v7138_v16 = vld [vmem:[#allocation2 + $0x113] sm:$0xff] }
  0xfe   :  { %v483_v41 = vmul.f32 %v11738_v56, %v7115_v59  ;;  %v2237_v1 = vsel %vm17_vm0, %v2160_v54, 0.0  ;;  %v691_v38 = vmul.f32 %v11739_v46, %v6849_v19  ;;  %v3986_v28 = vadd.f32 %v3922_v11, %v3778_v35 }
  0xff   :  { %v3120_v20 = vsel %vm17_vm0, %v3041_v61, 0.0  ;;  %v3239_v22 = vmul.f32 %v3041_v61, %v3041_v61  ;;  %3438 = vst.msk [vmem:[#allocation3 + $0x480] sm:$0xff] %vm17_vm0, %v3041_v61  ;;  %v2238_v48 = vadd.f32 %v2237_v1, %v2236_v14  ;;  %v823_v49 = vmul.f32 %v11740_v21, %v7129_v37 }
 0x100   :  { %v3121_v58 = vadd.f32 %v3120_v20, %v3119_v62  ;;  %v547_v18 = vadd.f32 %v483_v41, %v351_v0  ;;  %v1427_v4 = vmul.f32 %v11741_v36, %v6851_v2  ;;  %v1559_v8 = vmul.f32 %v11742_v5, %v7131_v29 }
 0x101   :  { %v3318_v25 = vsel %vm17_vm0, %v3239_v22, 0.0  ;;  %v4118_v54 = vadd.f32 %v4054_v57, %v3986_v28  ;;  %v1767_v14 = vmul.f32 %v11743_v26, %v6858_v34  ;;  %v1899_v11 = vmul.f32 %v11744_v12, %v7138_v16 }
 0x102   :  { %v3319_v50 = vadd.f32 %v3318_v25, %v3317_v7  ;;  %v755_v61 = vadd.f32 %v691_v38, %v547_v18  ;;  %v1623_v62 = vadd.f32 %v1559_v8, %v1427_v4  ;;  %v2506_v35 = vmul.f32 %v6545_v45, %v6832_v10 }
 0x103   :  { %v2638_v0 = vmul.f32 %v6550_v47, %v7115_v59  ;;  %v4197_v41 = vsel %vm17_vm0, %v4118_v54, 0.0  ;;  %v4316_v1 = vmul.f32 %v4118_v54, %v4118_v54  ;;  %4515 = vst.msk [vmem:[#allocation3 + $0x680] sm:$0xff] %vm17_vm0, %v4118_v54  ;;  %v2846_v57 = vmul.f32 %v6555_v6, %v6849_v19 }
 0x104   :  { %v887_v7 = vadd.f32 %v823_v49, %v755_v61  ;;  %v4198_v20 = vadd.f32 %v4197_v41, %v4196_v13  ;;  %v1831_v22 = vadd.f32 %v1767_v14, %v1623_v62  ;;  %v2978_v28 = vmul.f32 %v6563_v33, %v7129_v37  ;;  %v7166_v13 = vld [vmem:[#allocation2 + $0x121] sm:$0xff] }
 0x105   :  { %v2702_v38 = vadd.f32 %v2638_v0, %v2506_v35  ;;  %v4395_v10 = vsel %vm17_vm0, %v4316_v1, 0.0  ;;  %v3583_v4 = vmul.f32 %v6697_v31, %v6851_v2  ;;  %v3715_v14 = vmul.f32 %v6701_v17, %v7131_v29 }
 0x106   :  { %v965_v18 = vsel %vm17_vm0, %v887_v7, 0.0  ;;  %v1085_v25 = vmul.f32 %v887_v7, %v887_v7  ;;  %1283 = vst.msk [vmem:[#allocation3 + $0x78] sm:$0xff] %vm17_vm0, %v887_v7  ;;  %v4396_v49 = vadd.f32 %v4395_v10, %v4394_v23  ;;  %v1963_v54 = vadd.f32 %v1899_v11, %v1831_v22 }
 0x107   :  { %v966_v8 = vadd.f32 %v965_v18, %v964_v43  ;;  %v2910_v19 = vadd.f32 %v2846_v57, %v2702_v38  ;;  %v3923_v62 = vmul.f32 %v6706_v42, %v6858_v34  ;;  %v4055_v35 = vmul.f32 %v6718_v51, %v7138_v16  ;;  %v7181_v57 = vld [vmem:[#allocation2 + $0x124] sm:$0xff] }
 0x108   :  { %v1163_v61 = vsel %vm17_vm0, %v1085_v25, 0.0  ;;  %v2041_v2 = vsel %vm17_vm0, %v1963_v54, 0.0  ;;  %v2161_v23 = vmul.f32 %v1963_v54, %v1963_v54  ;;  %2360 = vst.msk [vmem:[#allocation3 + $0x278] sm:$0xff] %vm17_vm0, %v1963_v54  ;;  %v3779_v41 = vadd.f32 %v3715_v14, %v3583_v4  ;;  %v7183_v34 = vld [vmem:[#allocation2 + $0x120] sm:$0xff] }
 0x109   :  { %v1164_v0 = vadd.f32 %v1163_v61, %v1162_v24  ;;  %v3042_v43 = vadd.f32 %v2978_v28, %v2910_v19  ;;  %v2042_v11 = vadd.f32 %v2041_v2, %v2040_v30  ;;  %v352_v1 = vmul.f32 %v11737_v60, %v6885_v40  ;;  %v7190_v4 = vld [vmem:[#allocation2 + $0x123] sm:$0xff] }
 0x10a   :  { %v484_v7 = vmul.f32 %v11738_v56, %v7166_v13  ;;  %v2239_v24 = vsel %vm17_vm0, %v2161_v23, 0.0  ;;  %v692_v30 = vmul.f32 %v11739_v46, %v6901_v27  ;;  %v3987_v18 = vadd.f32 %v3923_v62, %v3779_v41 }
 0x10b   :  { %v3122_v22 = vsel %vm17_vm0, %v3042_v43, 0.0  ;;  %v3240_v38 = vmul.f32 %v3042_v43, %v3042_v43  ;;  %3439 = vst.msk [vmem:[#allocation3 + $0x488] sm:$0xff] %vm17_vm0, %v3042_v43  ;;  %v2240_v28 = vadd.f32 %v2239_v24, %v2238_v48  ;;  %v824_v19 = vmul.f32 %v11740_v21, %v7181_v57 }
 0x10c   :  { %v3123_v10 = vadd.f32 %v3122_v22, %v3121_v58  ;;  %v548_v25 = vadd.f32 %v484_v7, %v352_v1  ;;  %v1428_v61 = vmul.f32 %v11741_v36, %v6903_v52  ;;  %v1560_v14 = vmul.f32 %v11742_v5, %v7183_v34 }
 0x10d   :  { %v3320_v54 = vsel %vm17_vm0, %v3240_v38, 0.0  ;;  %v4119_v23 = vadd.f32 %v4055_v35, %v3987_v18  ;;  %v1768_v48 = vmul.f32 %v11743_v26, %v6911_v32  ;;  %v1900_v62 = vmul.f32 %v11744_v12, %v7190_v4 }
 0x10e   :  { %v3321_v2 = vadd.f32 %v3320_v54, %v3319_v50  ;;  %v756_v43 = vadd.f32 %v692_v30, %v548_v25  ;;  %v1624_v58 = vadd.f32 %v1560_v14, %v1428_v61  ;;  %v2507_v41 = vmul.f32 %v6545_v45, %v6885_v40 }
 0x10f   :  { %v2639_v1 = vmul.f32 %v6550_v47, %v7166_v13  ;;  %v4199_v7 = vsel %vm17_vm0, %v4119_v23, 0.0  ;;  %v4317_v24 = vmul.f32 %v4119_v23, %v4119_v23  ;;  %4516 = vst.msk [vmem:[#allocation3 + $0x688] sm:$0xff] %vm17_vm0, %v4119_v23  ;;  %v2847_v35 = vmul.f32 %v6555_v6, %v6901_v27 }
 0x110   :  { %v888_v50 = vadd.f32 %v824_v19, %v756_v43  ;;  %v4200_v22 = vadd.f32 %v4199_v7, %v4198_v20  ;;  %v1832_v38 = vadd.f32 %v1768_v48, %v1624_v58  ;;  %v2979_v18 = vmul.f32 %v6563_v33, %v7181_v57  ;;  %v7218_v20 = vld [vmem:[#allocation2 + $0x129] sm:$0xff] }
 0x111   :  { %v2703_v30 = vadd.f32 %v2639_v1, %v2507_v41  ;;  %v4397_v40 = vsel %vm17_vm0, %v4317_v24, 0.0  ;;  %v3584_v61 = vmul.f32 %v6697_v31, %v6903_v52  ;;  %v3716_v48 = vmul.f32 %v6701_v17, %v7183_v34 }
 0x112   :  { %v967_v25 = vsel %vm17_vm0, %v888_v50, 0.0  ;;  %v1086_v54 = vmul.f32 %v888_v50, %v888_v50  ;;  %1284 = vst.msk [vmem:[#allocation3 + $0x80] sm:$0xff] %vm17_vm0, %v888_v50  ;;  %v4398_v19 = vadd.f32 %v4397_v40, %v4396_v49  ;;  %v1964_v23 = vadd.f32 %v1900_v62, %v1832_v38 }
 0x113   :  { %v968_v14 = vadd.f32 %v967_v25, %v966_v8  ;;  %v2911_v27 = vadd.f32 %v2847_v35, %v2703_v30  ;;  %v3924_v58 = vmul.f32 %v6706_v42, %v6911_v32  ;;  %v4056_v41 = vmul.f32 %v6718_v51, %v7190_v4  ;;  %v7233_v35 = vld [vmem:[#allocation2 + $0x12c] sm:$0xff] }
 0x114   :  { %v1165_v43 = vsel %vm17_vm0, %v1086_v54, 0.0  ;;  %v2043_v52 = vsel %vm17_vm0, %v1964_v23, 0.0  ;;  %v2162_v49 = vmul.f32 %v1964_v23, %v1964_v23  ;;  %2361 = vst.msk [vmem:[#allocation3 + $0x280] sm:$0xff] %vm17_vm0, %v1964_v23  ;;  %v3780_v7 = vadd.f32 %v3716_v48, %v3584_v61  ;;  %v7235_v32 = vld [vmem:[#allocation2 + $0x128] sm:$0xff] }
 0x115   :  { %v1166_v1 = vadd.f32 %v1165_v43, %v1164_v0  ;;  %v3043_v8 = vadd.f32 %v2979_v18, %v2911_v27  ;;  %v2044_v62 = vadd.f32 %v2043_v52, %v2042_v11  ;;  %v353_v24 = vmul.f32 %v11737_v60, %v6938_v9  ;;  %11755 = vst [vmem:[#allocation20_spill] sm:$0xff] %v7235_v32  ;;  %v7242_v61 = vld [vmem:[#allocation2 + $0x12b] sm:$0xff] }
 0x116   :  { %v485_v50 = vmul.f32 %v11738_v56, %v7218_v20  ;;  %v2241_v0 = vsel %vm17_vm0, %v2162_v49, 0.0  ;;  %v693_v11 = vmul.f32 %v11739_v46, %v6952_v15  ;;  %v3988_v25 = vadd.f32 %v3924_v58, %v3780_v7  ;;  %11756 = vst [vmem:[#allocation21_spill] sm:$0xff] %v7242_v61 }
 0x117   :  { %v3124_v38 = vsel %vm17_vm0, %v3043_v8, 0.0  ;;  %v3241_v30 = vmul.f32 %v3043_v8, %v3043_v8  ;;  %3440 = vst.msk [vmem:[#allocation3 + $0x490] sm:$0xff] %vm17_vm0, %v3043_v8  ;;  %v2242_v18 = vadd.f32 %v2241_v0, %v2240_v28  ;;  %v825_v27 = vmul.f32 %v11740_v21, %v7233_v35 }
 0x118   :  { %v3125_v40 = vadd.f32 %v3124_v38, %v3123_v10  ;;  %v549_v54 = vadd.f32 %v485_v50, %v353_v24  ;;  %v1429_v43 = vmul.f32 %v11741_v36, %v6954_v44  ;;  %v1561_v48 = vmul.f32 %v11742_v5, %v7235_v32 }
 0x119   :  { %v3322_v23 = vsel %vm17_vm0, %v3241_v30, 0.0  ;;  %v4120_v49 = vadd.f32 %v4056_v41, %v3988_v25  ;;  %v1769_v28 = vmul.f32 %v11743_v26, %v6960_v39  ;;  %v1901_v58 = vmul.f32 %v11744_v12, %v7242_v61 }
 0x11a   :  { %v3323_v52 = vadd.f32 %v3322_v23, %v3321_v2  ;;  %v757_v8 = vadd.f32 %v693_v11, %v549_v54  ;;  %v1625_v10 = vadd.f32 %v1561_v48, %v1429_v43  ;;  %v2508_v7 = vmul.f32 %v6545_v45, %v6938_v9 }
 0x11b   :  { %v2640_v24 = vmul.f32 %v6550_v47, %v7218_v20  ;;  %v4201_v50 = vsel %vm17_vm0, %v4120_v49, 0.0  ;;  %v4318_v0 = vmul.f32 %v4120_v49, %v4120_v49  ;;  %4517 = vst.msk [vmem:[#allocation3 + $0x690] sm:$0xff] %vm17_vm0, %v4120_v49  ;;  %v2848_v41 = vmul.f32 %v6555_v6, %v6952_v15 }
 0x11c   :  { %v889_v2 = vadd.f32 %v825_v27, %v757_v8  ;;  %v4202_v38 = vadd.f32 %v4201_v50, %v4200_v22  ;;  %v1833_v30 = vadd.f32 %v1769_v28, %v1625_v10  ;;  %v2980_v25 = vmul.f32 %v6563_v33, %v7233_v35  ;;  %v7270_v22 = vld [vmem:[#allocation2 + $0x139] sm:$0xff] }
 0x11d   :  { %v2704_v11 = vadd.f32 %v2640_v24, %v2508_v7  ;;  %v4399_v9 = vsel %vm17_vm0, %v4318_v0, 0.0  ;;  %v3585_v43 = vmul.f32 %v6697_v31, %v6954_v44  ;;  %11757 = vst [vmem:[#allocation22_spill] sm:$0xff] %v7270_v22  ;;  %v3717_v28 = vmul.f32 %v6701_v17, %v7235_v32 }
 0x11e   :  { %v969_v54 = vsel %vm17_vm0, %v889_v2, 0.0  ;;  %v1087_v23 = vmul.f32 %v889_v2, %v889_v2  ;;  %1285 = vst.msk [vmem:[#allocation3 + $0x88] sm:$0xff] %vm17_vm0, %v889_v2  ;;  %v4400_v27 = vadd.f32 %v4399_v9, %v4398_v19  ;;  %v1965_v49 = vadd.f32 %v1901_v58, %v1833_v30 }
 0x11f   :  { %v970_v48 = vadd.f32 %v969_v54, %v968_v14  ;;  %v2912_v15 = vadd.f32 %v2848_v41, %v2704_v11  ;;  %v3925_v10 = vmul.f32 %v6706_v42, %v6960_v39  ;;  %v4057_v7 = vmul.f32 %v6718_v51, %v7242_v61  ;;  %v7285_v41 = vld [vmem:[#allocation2 + $0x13c] sm:$0xff] }
 0x120   :  { %v1167_v8 = vsel %vm17_vm0, %v1087_v23, 0.0  ;;  %v2045_v44 = vsel %vm17_vm0, %v1965_v49, 0.0  ;;  %v2163_v19 = vmul.f32 %v1965_v49, %v1965_v49  ;;  %2362 = vst.msk [vmem:[#allocation3 + $0x288] sm:$0xff] %vm17_vm0, %v1965_v49  ;;  %v3781_v50 = vadd.f32 %v3717_v28, %v3585_v43  ;;  %11758 = vst [vmem:[#allocation23_spill] sm:$0xff] %v7285_v41  ;;  %v7287_v39 = vld [vmem:[#allocation2 + $0x138] sm:$0xff] }
 0x121   :  { %v1168_v24 = vadd.f32 %v1167_v8, %v1166_v1  ;;  %v3044_v14 = vadd.f32 %v2980_v25, %v2912_v15  ;;  %v2046_v58 = vadd.f32 %v2045_v44, %v2044_v62  ;;  %v354_v0 = vmul.f32 %v11737_v60, %v6983_v3  ;;  %11759 = vst [vmem:[#allocation24_spill] sm:$0xff] %v7287_v39  ;;  %v11760_v25 = vld [vmem:[#allocation14_spill] sm:$0xff]  ;;  %v7294_v49 = vld [vmem:[#allocation2 + $0x13b] sm:$0xff] }
 0x122   :  { %v486_v2 = vmul.f32 %v11738_v56, %v7270_v22  ;;  %v2243_v1 = vsel %vm17_vm0, %v2163_v19, 0.0  ;;  %v694_v62 = vmul.f32 %v11739_v46, %v11760_v25  ;;  %v3989_v23 = vadd.f32 %v3925_v10, %v3781_v50  ;;  %11761 = vst [vmem:[#allocation25_spill] sm:$0xff] %v7294_v49  ;;  %v11762_v28 = vld [vmem:[#allocation15_spill] sm:$0xff] }
 0x123   :  { %v3126_v30 = vsel %vm17_vm0, %v3044_v14, 0.0  ;;  %v3242_v11 = vmul.f32 %v3044_v14, %v3044_v14  ;;  %3441 = vst.msk [vmem:[#allocation3 + $0x498] sm:$0xff] %vm17_vm0, %v3044_v14  ;;  %v2244_v9 = vadd.f32 %v2243_v1, %v2242_v18  ;;  %v826_v8 = vmul.f32 %v11740_v21, %v7285_v41  ;;  %v11763_v18 = vld [vmem:[#allocation16_spill] sm:$0xff] }
 0x124   :  { %v3127_v54 = vadd.f32 %v3126_v30, %v3125_v40  ;;  %v550_v43 = vadd.f32 %v486_v2, %v354_v0  ;;  %v1430_v44 = vmul.f32 %v11741_v36, %v11762_v28  ;;  %v1562_v19 = vmul.f32 %v11742_v5, %v7287_v39 }
 0x125   :  { %v3324_v15 = vsel %vm17_vm0, %v3242_v11, 0.0  ;;  %v4121_v61 = vadd.f32 %v4057_v7, %v3989_v23  ;;  %v1770_v40 = vmul.f32 %v11743_v26, %v11763_v18  ;;  %v1902_v50 = vmul.f32 %v11744_v12, %v7294_v49 }
 0x126   :  { %v3325_v14 = vadd.f32 %v3324_v15, %v3323_v52  ;;  %v758_v32 = vadd.f32 %v694_v62, %v550_v43  ;;  %v1626_v10 = vadd.f32 %v1562_v19, %v1430_v44  ;;  %v2509_v0 = vmul.f32 %v6545_v45, %v6983_v3 }
 0x127   :  { %v2641_v2 = vmul.f32 %v6550_v47, %v7270_v22  ;;  %v4203_v1 = vsel %vm17_vm0, %v4121_v61, 0.0  ;;  %v4319_v30 = vmul.f32 %v4121_v61, %v4121_v61  ;;  %4518 = vst.msk [vmem:[#allocation3 + $0x698] sm:$0xff] %vm17_vm0, %v4121_v61  ;;  %v2849_v7 = vmul.f32 %v6555_v6, %v11760_v25 }
 0x128   :  { %v890_v52 = vadd.f32 %v826_v8, %v758_v32  ;;  %v4204_v11 = vadd.f32 %v4203_v1, %v4202_v38  ;;  %v1834_v62 = vadd.f32 %v1770_v40, %v1626_v10  ;;  %v2981_v43 = vmul.f32 %v6563_v33, %v7285_v41  ;;  %v7322_v38 = vld [vmem:[#allocation2 + $0x141] sm:$0xff] }
 0x129   :  { %v2705_v23 = vadd.f32 %v2641_v2, %v2509_v0  ;;  %v4401_v3 = vsel %vm17_vm0, %v4319_v30, 0.0  ;;  %v3586_v61 = vmul.f32 %v6697_v31, %v11762_v28  ;;  %v3718_v10 = vmul.f32 %v6701_v17, %v7287_v39 }
 0x12a   :  { %v971_v15 = vsel %vm17_vm0, %v890_v52, 0.0  ;;  %v1088_v44 = vmul.f32 %v890_v52, %v890_v52  ;;  %1286 = vst.msk [vmem:[#allocation3 + $0x90] sm:$0xff] %vm17_vm0, %v890_v52  ;;  %v4402_v32 = vadd.f32 %v4401_v3, %v4400_v27  ;;  %v1966_v19 = vadd.f32 %v1902_v50, %v1834_v62  ;;  %v161_v50 = vld [vmem:[%s11496_s0 + $0x120] sm:$0xff] }
 0x12b   :  { %v972_v8 = vadd.f32 %v971_v15, %v970_v48  ;;  %v2913_v25 = vadd.f32 %v2849_v7, %v2705_v23  ;;  %v3926_v0 = vmul.f32 %v6706_v42, %v11763_v18  ;;  %v4058_v2 = vmul.f32 %v6718_v51, %v7294_v49  ;;  %v11764_v7 = vld [vmem:[#allocation17_spill] sm:$0xff]  ;;  %226 = vst.msk [vmem:[#allocation2 + $0x242] sm:$0xff] %vm17_vm0, %v161_v50 }
 0x12c   :  { %v1169_v40 = vsel %vm17_vm0, %v1088_v44, 0.0  ;;  %v2047_v28 = vsel %vm17_vm0, %v1966_v19, 0.0  ;;  %v2164_v27 = vmul.f32 %v1966_v19, %v1966_v19  ;;  %2363 = vst.msk [vmem:[#allocation3 + $0x290] sm:$0xff] %vm17_vm0, %v1966_v19  ;;  %v3782_v52 = vadd.f32 %v3718_v10, %v3586_v61  ;;  %v7340_v23 = vld [vmem:[#allocation2 + $0x144] sm:$0xff] }
 0x12d   :  { %v1170_v1 = vadd.f32 %v1169_v40, %v1168_v24  ;;  %v3045_v48 = vadd.f32 %v2981_v43, %v2913_v25  ;;  %v2048_v30 = vadd.f32 %v2047_v28, %v2046_v58  ;;  %v355_v62 = vmul.f32 %v11737_v60, %v11764_v7  ;;  %v7342_v24 = vld [vmem:[#allocation2 + $0x140] sm:$0xff]  ;;  %v11765_v58 = vld [vmem:[#allocation18_spill] sm:$0xff] }
 0x12e   :  { %v487_v18 = vmul.f32 %v11738_v56, %v7322_v38  ;;  %v2245_v43 = vsel %vm17_vm0, %v2164_v27, 0.0  ;;  %v695_v44 = vmul.f32 %v11739_v46, %v11765_v58  ;;  %v3990_v25 = vadd.f32 %v3926_v0, %v3782_v52  ;;  %v7350_v10 = vld [vmem:[#allocation2 + $0x143] sm:$0xff]  ;;  %v11766_v27 = vld [vmem:[#allocation30_spill] sm:$0xff] }
 0x12f   :  { %v3128_v3 = vsel %vm17_vm0, %v3045_v48, 0.0  ;;  %v3243_v15 = vmul.f32 %v3045_v48, %v3045_v48  ;;  %3442 = vst.msk [vmem:[#allocation3 + $0x4a0] sm:$0xff] %vm17_vm0, %v3045_v48  ;;  %v2246_v61 = vadd.f32 %v2245_v43, %v2244_v9  ;;  %v827_v50 = vmul.f32 %v11740_v21, %v7340_v23  ;;  %v11767_v9 = vld [vmem:[#allocation33_spill] sm:$0xff] }
 0x130   :  { %v3129_v19 = vadd.f32 %v3128_v3, %v3127_v54  ;;  %v551_v40 = vadd.f32 %v487_v18, %v355_v62  ;;  %v1431_v49 = vmul.f32 %v11741_v36, %v11766_v27  ;;  %v1563_v48 = vmul.f32 %v11742_v5, %v7342_v24 }
 0x131   :  { %v3326_v28 = vsel %vm17_vm0, %v3243_v15, 0.0  ;;  %v4122_v41 = vadd.f32 %v4058_v2, %v3990_v25  ;;  %v1771_v54 = vmul.f32 %v11743_v26, %v11767_v9  ;;  %v1903_v52 = vmul.f32 %v11744_v12, %v7350_v10 }
 0x132   :  { %v3327_v39 = vadd.f32 %v3326_v28, %v3325_v14  ;;  %v759_v22 = vadd.f32 %v695_v44, %v551_v40  ;;  %v1627_v0 = vadd.f32 %v1563_v48, %v1431_v49  ;;  %v2510_v62 = vmul.f32 %v6545_v45, %v11764_v7  ;;  %v7384_v48 = vld [vmem:[#allocation2 + $0x151] sm:$0xff] }
 0x133   :  { %v2642_v18 = vmul.f32 %v6550_v47, %v7322_v38  ;;  %v4205_v43 = vsel %vm17_vm0, %v4122_v41, 0.0  ;;  %v4320_v3 = vmul.f32 %v4122_v41, %v4122_v41  ;;  %4519 = vst.msk [vmem:[#allocation3 + $0x6a0] sm:$0xff] %vm17_vm0, %v4122_v41  ;;  %v2850_v2 = vmul.f32 %v6555_v6, %v11765_v58 }
 0x134   :  { %v891_v14 = vadd.f32 %v827_v50, %v759_v22  ;;  %v7371_v15 = vadd.f32 %v4205_v43, %v4204_v11  ;;  %v1835_v49 = vadd.f32 %v1771_v54, %v1627_v0  ;;  %v2982_v25 = vmul.f32 %v6563_v33, %v7340_v23  ;;  %v159_v43 = vld [vmem:[%s11496_s0 + $0x110] sm:$0xff] }
 0x135   :  { %v2706_v44 = vadd.f32 %v2642_v18, %v2510_v62  ;;  %v4403_v7 = vsel %vm17_vm0, %v4320_v3, 0.0  ;;  %v3587_v22 = vmul.f32 %v6697_v31, %v11766_v27  ;;  %v3719_v0 = vmul.f32 %v6701_v17, %v7342_v24  ;;  %v162_v3 = vld [vmem:[%s11496_s0 + $0x128] sm:$0xff]  ;;  %224 = vst.msk [vmem:[#allocation2 + $0x22a] sm:$0xff] %vm17_vm0, %v159_v43 }
 0x136   :  { %v973_v40 = vsel %vm17_vm0, %v891_v14, 0.0  ;;  %v1089_v28 = vmul.f32 %v891_v14, %v891_v14  ;;  %1287 = vst.msk [vmem:[#allocation3 + $0x98] sm:$0xff] %vm17_vm0, %v891_v14  ;;  %v7380_v41 = vadd.f32 %v4403_v7, %v4402_v32  ;;  %v1967_v11 = vadd.f32 %v1903_v52, %v1835_v49  ;;  %v7414_v7 = vld [vmem:[#allocation2 + $0x150] sm:$0xff]  ;;  %227 = vst.msk [vmem:[#allocation2 + $0x24a] sm:$0xff] %vm17_vm0, %v162_v3 }
 0x137   :  { %v7382_v58 = vadd.f32 %v973_v40, %v972_v8  ;;  %v2914_v50 = vadd.f32 %v2850_v2, %v2706_v44  ;;  %v3927_v62 = vmul.f32 %v6706_v42, %v11767_v9  ;;  %v4059_v18 = vmul.f32 %v6718_v51, %v7350_v10  ;;  %v167_v9 = vld [vmem:[%s11496_s0 + $0x150] sm:$0xff]  ;;  %v11768_v2 = vld [vmem:[#allocation19_spill] sm:$0xff] }
 0x138   :  { %v1171_v54 = vsel %vm17_vm0, %v1089_v28, 0.0  ;;  %v2049_v32 = vsel %vm17_vm0, %v1967_v11, 0.0  ;;  %v2165_v8 = vmul.f32 %v1967_v11, %v1967_v11  ;;  %2364 = vst.msk [vmem:[#allocation3 + $0x298] sm:$0xff] %vm17_vm0, %v1967_v11  ;;  %v3783_v14 = vadd.f32 %v3719_v0, %v3587_v22  ;;  %232 = vst.msk [vmem:[#allocation2 + $0x28a] sm:$0xff] %vm17_vm0, %v167_v9 }
 0x139   :  { %v7393_v27 = vadd.f32 %v1171_v54, %v1170_v1  ;;  %v3046_v52 = vadd.f32 %v2982_v25, %v2914_v50  ;;  %v7406_v1 = vadd.f32 %v2049_v32, %v2048_v30  ;;  %v356_v49 = vmul.f32 %v11737_v60, %v11768_v2  ;;  %v7412_v25 = vld [vmem:[#allocation2 + $0x154] sm:$0xff] }
 0x13a   :  { %v488_v44 = vmul.f32 %v11738_v56, %v7384_v48  ;;  %v2247_v30 = vsel %vm17_vm0, %v2165_v8, 0.0  ;;  %v696_v22 = vmul.f32 %v11739_v46, %v7084_v53  ;;  %v3991_v54 = vadd.f32 %v3927_v62, %v3783_v14  ;;  %v7428_v32 = vld [vmem:[#allocation2 + $0x153] sm:$0xff]  ;;  %v157_v14 = vld [vmem:[%s11496_s0 + $0x100] sm:$0xff] }
 0x13b   :  { %v3130_v40 = vsel %vm17_vm0, %v3046_v52, 0.0  ;;  %v3244_v28 = vmul.f32 %v3046_v52, %v3046_v52  ;;  %3443 = vst.msk [vmem:[#allocation3 + $0x4a8] sm:$0xff] %vm17_vm0, %v3046_v52  ;;  %v7424_v11 = vadd.f32 %v2247_v30, %v2246_v61  ;;  %v828_v8 = vmul.f32 %v11740_v21, %v7412_v25  ;;  %222 = vst.msk [vmem:[#allocation2 + $0x212] sm:$0xff] %vm17_vm0, %v157_v14 }
 0x13c   :  { %v7426_v50 = vadd.f32 %v3130_v40, %v3129_v19  ;;  %v552_v0 = vadd.f32 %v488_v44, %v356_v49  ;;  %v1432_v3 = vmul.f32 %v11741_v36, %v7086_v55  ;;  %v1564_v52 = vmul.f32 %v11742_v5, %v7414_v7  ;;  %v160_v49 = vld [vmem:[%s11496_s0 + $0x118] sm:$0xff]  ;;  %v163_v44 = vld [vmem:[%s11496_s0 + $0x130] sm:$0xff] }
 0x13d   :  { %v3328_v43 = vsel %vm17_vm0, %v3244_v28, 0.0  ;;  %v4123_v61 = vadd.f32 %v4059_v18, %v3991_v54  ;;  %v1772_v62 = vmul.f32 %v11743_v26, %v7092_v63  ;;  %v2511_v18 = vmul.f32 %v6545_v45, %v11768_v2  ;;  %225 = vst.msk [vmem:[#allocation2 + $0x232] sm:$0xff] %vm17_vm0, %v160_v49  ;;  %228 = vst.msk [vmem:[#allocation2 + $0x25a] sm:$0xff] %vm17_vm0, %v163_v44  ;;  %v165_v28 = vld [vmem:[%s11496_s0 + $0x140] sm:$0xff] }
 0x13e   :  { %v7437_v9 = vadd.f32 %v3328_v43, %v3327_v39  ;;  %v760_v19 = vadd.f32 %v696_v22, %v552_v0  ;;  %v1628_v30 = vadd.f32 %v1564_v52, %v1432_v3  ;;  %v1904_v39 = vmul.f32 %v11744_v12, %v7428_v32  ;;  %v168_v22 = vld [vmem:[%s11496_s0 + $0x158] sm:$0xff]  ;;  %230 = vst.msk [vmem:[#allocation2 + $0x272] sm:$0xff] %vm17_vm0, %v165_v28 }
 0x13f   :  { %v2643_v40 = vmul.f32 %v6550_v47, %v7384_v48  ;;  %v4207_v54 = vsel %vm17_vm0, %v4123_v61, 0.0  ;;  %v4321_v2 = vmul.f32 %v4123_v61, %v4123_v61  ;;  %4520 = vst.msk [vmem:[#allocation3 + $0x6a8] sm:$0xff] %vm17_vm0, %v4123_v61  ;;  %v2851_v43 = vmul.f32 %v6555_v6, %v7084_v53  ;;  %233 = vst.msk [vmem:[#allocation2 + $0x292] sm:$0xff] %vm17_vm0, %v168_v22 }
 0x140   :  { %v892_v0 = vadd.f32 %v828_v8, %v760_v19  ;;  %v7472_v3 = vadd.f32 %v4207_v54, %v7371_v15  ;;  %v1836_v52 = vadd.f32 %v1772_v62, %v1628_v30  ;;  %v2983_v49 = vmul.f32 %v6563_v33, %v7412_v25 }
 0x141   :  { %v2707_v14 = vadd.f32 %v2643_v40, %v2511_v18  ;;  %v4405_v44 = vsel %vm17_vm0, %v4321_v2, 0.0  ;;  %v3588_v53 = vmul.f32 %v6697_v31, %v7086_v55  ;;  %v7487_v18 = vld [vmem:[#allocation2 + $0x159] sm:$0xff]  ;;  %v3720_v28 = vmul.f32 %v6701_v17, %v7414_v7  ;;  %v158_v2 = vld [vmem:[%s11496_s0 + $0x108] sm:$0xff] }
 0x142   :  { %v975_v61 = vsel %vm17_vm0, %v892_v0, 0.0  ;;  %v1090_v8 = vmul.f32 %v892_v0, %v892_v0  ;;  %1288 = vst.msk [vmem:[#allocation3 + $0xa0] sm:$0xff] %vm17_vm0, %v892_v0  ;;  %v7482_v19 = vadd.f32 %v4405_v44, %v7380_v41  ;;  %v1968_v62 = vadd.f32 %v1904_v39, %v1836_v52  ;;  %v166_v0 = vld [vmem:[%s11496_s0 + $0x148] sm:$0xff]  ;;  %v7519_v44 = vld [vmem:[#allocation2 + $0x158] sm:$0xff]  ;;  %223 = vst.msk [vmem:[#allocation2 + $0x21a] sm:$0xff] %vm17_vm0, %v158_v2 }
 0x143   :  { %v7485_v15 = vadd.f32 %v975_v61, %v7382_v58  ;;  %v2915_v30 = vadd.f32 %v2851_v43, %v2707_v14  ;;  %v3928_v22 = vmul.f32 %v6706_v42, %v7092_v63  ;;  %v4060_v55 = vmul.f32 %v6718_v51, %v7428_v32  ;;  %v164_v63 = vld [vmem:[%s11496_s0 + $0x138] sm:$0xff]  ;;  %231 = vst.msk [vmem:[#allocation2 + $0x27a] sm:$0xff] %vm17_vm0, %v166_v0  ;;  %v173_v0 = vld [vmem:[%s11496_s0 + $0x180] sm:$0xff] }
 0x144   :  { %v1173_v40 = vsel %vm17_vm0, %v1090_v8, 0.0  ;;  %v2051_v58 = vsel %vm17_vm0, %v1968_v62, 0.0  ;;  %v2166_v39 = vmul.f32 %v1968_v62, %v1968_v62  ;;  %2365 = vst.msk [vmem:[#allocation3 + $0x2a0] sm:$0xff] %vm17_vm0, %v1968_v62  ;;  %v3784_v43 = vadd.f32 %v3720_v28, %v3588_v53  ;;  %229 = vst.msk [vmem:[#allocation2 + $0x262] sm:$0xff] %vm17_vm0, %v164_v63  ;;  %v172_v28 = vld [vmem:[%s11496_s0 + $0x178] sm:$0xff] }
 0x145   :  { %v7497_v41 = vadd.f32 %v1173_v40, %v7393_v27  ;;  %v3047_v54 = vadd.f32 %v2983_v49, %v2915_v30  ;;  %v7511_v27 = vadd.f32 %v2051_v58, %v7406_v1  ;;  %v357_v52 = vmul.f32 %v11737_v60, %v7115_v59  ;;  %v7517_v49 = vld [vmem:[#allocation2 + $0x15c] sm:$0xff]  ;;  %v170_v30 = vld [vmem:[%s11496_s0 + $0x168] sm:$0xff]  ;;  %v171_v40 = vld [vmem:[%s11496_s0 + $0x170] sm:$0xff]  ;;  %237 = vst.msk [vmem:[#allocation2 + $0x2c2] sm:$0xff] %vm17_vm0, %v172_v28 }
 0x146   :  { %v489_v14 = vmul.f32 %v11738_v56, %v7487_v18  ;;  %v169_v1 = vld [vmem:[%s11496_s0 + $0x160] sm:$0xff]  ;;  %v2249_v61 = vsel %vm17_vm0, %v2166_v39, 0.0  ;;  %v697_v62 = vmul.f32 %v11739_v46, %v7129_v37  ;;  %235 = vst.msk [vmem:[#allocation2 + $0x2aa] sm:$0xff] %vm17_vm0, %v170_v30  ;;  %236 = vst.msk [vmem:[#allocation2 + $0x2ba] sm:$0xff] %vm17_vm0, %v171_v40  ;;  %v2512_v40 = vmul.f32 %v6545_v45, %v7115_v59 }
 0x147   :  { %v3132_v8 = vsel %vm17_vm0, %v3047_v54, 0.0  ;;  %v3245_v53 = vmul.f32 %v3047_v54, %v3047_v54  ;;  %3444 = vst.msk [vmem:[#allocation3 + $0x4b0] sm:$0xff] %vm17_vm0, %v3047_v54  ;;  %234 = vst.msk [vmem:[#allocation2 + $0x2a2] sm:$0xff] %vm17_vm0, %v169_v1  ;;  %v7543_v58 = vadd.f32 %v2249_v61, %v7424_v11  ;;  %v3992_v54 = vadd.f32 %v3928_v22, %v3784_v43  ;;  %v7548_v63 = vld [vmem:[#allocation2 + $0x15b] sm:$0xff]  ;;  %v174_v11 = vld [vmem:[%s11496_s0 + $0x188] sm:$0xff] }
 0x148   :  { %v7546_v39 = vadd.f32 %v3132_v8, %v7426_v50  ;;  %v553_v2 = vadd.f32 %v489_v14, %v357_v52  ;;  %11769 = vst [vmem:[#allocation27_spill] sm:$0xff] %v7548_v63  ;;  %v829_v22 = vmul.f32 %v11740_v21, %v7517_v49  ;;  %v1433_v43 = vmul.f32 %v11741_v36, %v7131_v29 }
 0x149   :  { %v3330_v50 = vsel %vm17_vm0, %v3245_v53, 0.0  ;;  %v1565_v52 = vmul.f32 %v11742_v5, %v7519_v44  ;;  %238 = vst.msk [vmem:[#allocation2 + $0x2d2] sm:$0xff] %vm17_vm0, %v173_v0  ;;  %239 = vst.msk [vmem:[#allocation2 + $0x2da] sm:$0xff] %vm17_vm0, %v174_v11  ;;  %v4124_v1 = vadd.f32 %v4060_v55, %v3992_v54  ;;  %v1773_v8 = vmul.f32 %v11743_v26, %v7138_v16 }
 0x14a   :  { %v3331_v14 = vadd.f32 %v3330_v50, %v7437_v9  ;;  %v761_v61 = vadd.f32 %v697_v62, %v553_v2  ;;  %v1905_v30 = vmul.f32 %v11744_v12, %v7548_v63  ;;  %v2644_v28 = vmul.f32 %v6550_v47, %v7487_v18 }
 0x14b   :  { %v1629_v53 = vadd.f32 %v1565_v52, %v1433_v43  ;;  %v4209_v0 = vsel %vm17_vm0, %v4124_v1, 0.0  ;;  %v4322_v11 = vmul.f32 %v4124_v1, %v4124_v1  ;;  %4521 = vst.msk [vmem:[#allocation3 + $0x6b0] sm:$0xff] %vm17_vm0, %v4124_v1  ;;  %v2852_v55 = vmul.f32 %v6555_v6, %v7129_v37 }
 0x14c   :  { %v893_v9 = vadd.f32 %v829_v22, %v761_v61  ;;  %v4210_v62 = vadd.f32 %v4209_v0, %v7472_v3  ;;  %v2708_v2 = vadd.f32 %v2644_v28, %v2512_v40  ;;  %v2984_v50 = vmul.f32 %v6563_v33, %v7517_v49 }
 0x14d   :  { %v1837_v54 = vadd.f32 %v1773_v8, %v1629_v53  ;;  %v4407_v59 = vsel %vm17_vm0, %v4322_v11, 0.0  ;;  %v3589_v22 = vmul.f32 %v6697_v31, %v7131_v29  ;;  %v7591_v8 = vld [vmem:[#allocation2 + $0x169] sm:$0xff]  ;;  %v3721_v40 = vmul.f32 %v6701_v17, %v7519_v44 }
 0x14e   :  { %v977_v43 = vsel %vm17_vm0, %v893_v9, 0.0  ;;  %v1091_v52 = vmul.f32 %v893_v9, %v893_v9  ;;  %1289 = vst.msk [vmem:[#allocation3 + $0xa8] sm:$0xff] %vm17_vm0, %v893_v9  ;;  %v4408_v1 = vadd.f32 %v4407_v59, %v7482_v19  ;;  %v2916_v61 = vadd.f32 %v2852_v55, %v2708_v2  ;;  %v175_v11 = vld [vmem:[%s11496_s0 + $0x190] sm:$0xff]  ;;  %v7613_v2 = vld [vmem:[#allocation2 + $0x168] sm:$0xff] }
 0x14f   :  { %v978_v37 = vadd.f32 %v977_v43, %v7485_v15  ;;  %v1969_v3 = vadd.f32 %v1905_v30, %v1837_v54  ;;  %v3929_v28 = vmul.f32 %v6706_v42, %v7138_v16  ;;  %v4061_v0 = vmul.f32 %v6718_v51, %v7548_v63  ;;  %11770 = vst [vmem:[#allocation28_spill] sm:$0xff] %v7613_v2 }
 0x150   :  { %v1175_v53 = vsel %vm17_vm0, %v1091_v52, 0.0  ;;  %v3048_v30 = vadd.f32 %v2984_v50, %v2916_v61  ;;  %v3785_v55 = vadd.f32 %v3721_v40, %v3589_v22  ;;  %v358_v16 = vmul.f32 %v11737_v60, %v7166_v13  ;;  %240 = vst.msk [vmem:[#allocation2 + $0x2ea] sm:$0xff] %vm17_vm0, %v175_v11 }
 0x151   :  { %v1176_v29 = vadd.f32 %v1175_v53, %v7497_v41  ;;  %v2053_v19 = vsel %vm17_vm0, %v1969_v3, 0.0  ;;  %v2167_v15 = vmul.f32 %v1969_v3, %v1969_v3  ;;  %2366 = vst.msk [vmem:[#allocation3 + $0x2a8] sm:$0xff] %vm17_vm0, %v1969_v3  ;;  %v490_v54 = vmul.f32 %v11738_v56, %v7591_v8  ;;  %v7611_v41 = vld [vmem:[#allocation2 + $0x16c] sm:$0xff] }
 0x152   :  { %v2054_v9 = vadd.f32 %v2053_v19, %v7511_v27  ;;  %v3134_v59 = vsel %vm17_vm0, %v3048_v30, 0.0  ;;  %v3246_v43 = vmul.f32 %v3048_v30, %v3048_v30  ;;  %3445 = vst.msk [vmem:[#allocation3 + $0x4b8] sm:$0xff] %vm17_vm0, %v3048_v30  ;;  %v698_v27 = vmul.f32 %v11739_v46, %v7181_v57  ;;  %v7623_v53 = vld [vmem:[#allocation2 + $0x16b] sm:$0xff] }
 0x153   :  { %v2251_v50 = vsel %vm17_vm0, %v2167_v15, 0.0  ;;  %v3135_v22 = vadd.f32 %v3134_v59, %v7546_v39  ;;  %v3993_v3 = vadd.f32 %v3929_v28, %v3785_v55  ;;  %v554_v61 = vadd.f32 %v490_v54, %v358_v16  ;;  %11771 = vst [vmem:[#allocation29_spill] sm:$0xff] %v7623_v53 }
 0x154   :  { %v2252_v52 = vadd.f32 %v2251_v50, %v7543_v58  ;;  %v3332_v40 = vsel %vm17_vm0, %v3246_v43, 0.0  ;;  %v830_v19 = vmul.f32 %v11740_v21, %v7611_v41  ;;  %v1434_v15 = vmul.f32 %v11741_v36, %v7183_v34 }
 0x155   :  { %v1566_v30 = vmul.f32 %v11742_v5, %v7613_v2  ;;  %v3333_v11 = vadd.f32 %v3332_v40, %v3331_v14  ;;  %v4125_v63 = vadd.f32 %v4061_v0, %v3993_v3  ;;  %v762_v58 = vadd.f32 %v698_v27, %v554_v61 }
 0x156   :  { %v1774_v39 = vmul.f32 %v11743_v26, %v7190_v4  ;;  %v1906_v55 = vmul.f32 %v11744_v12, %v7623_v53  ;;  %v2513_v16 = vmul.f32 %v6545_v45, %v7166_v13  ;;  %v2645_v54 = vmul.f32 %v6550_v47, %v7591_v8 }
 0x157   :  { %v1630_v28 = vadd.f32 %v1566_v30, %v1434_v15  ;;  %v4211_v50 = vsel %vm17_vm0, %v4125_v63, 0.0  ;;  %v4323_v59 = vmul.f32 %v4125_v63, %v4125_v63  ;;  %4522 = vst.msk [vmem:[#allocation3 + $0x6b8] sm:$0xff] %vm17_vm0, %v4125_v63  ;;  %v894_v14 = vadd.f32 %v830_v19, %v762_v58 }
 0x158   :  { %v2853_v0 = vmul.f32 %v6555_v6, %v7181_v57  ;;  %v4212_v43 = vadd.f32 %v4211_v50, %v4210_v62  ;;  %v2709_v3 = vadd.f32 %v2645_v54, %v2513_v16  ;;  %v2985_v61 = vmul.f32 %v6563_v33, %v7611_v41  ;;  %v7651_v62 = vld [vmem:[#allocation2 + $0x171] sm:$0xff] }
 0x159   :  { %v1838_v27 = vadd.f32 %v1774_v39, %v1630_v28  ;;  %v4409_v13 = vsel %vm17_vm0, %v4323_v59, 0.0  ;;  %v979_v40 = vsel %vm17_vm0, %v894_v14, 0.0  ;;  %v1092_v15 = vmul.f32 %v894_v14, %v894_v14  ;;  %1290 = vst.msk [vmem:[#allocation3 + $0xb0] sm:$0xff] %vm17_vm0, %v894_v14  ;;  %11772 = vst [vmem:[#allocation32_spill] sm:$0xff] %v7651_v62 }
 0x15a   :  { %v3590_v63 = vmul.f32 %v6697_v31, %v7183_v34  ;;  %v4410_v19 = vadd.f32 %v4409_v13, %v4408_v1  ;;  %v980_v30 = vadd.f32 %v979_v40, %v978_v37  ;;  %v2917_v57 = vadd.f32 %v2853_v0, %v2709_v3 }
 0x15b   :  { %v1970_v58 = vadd.f32 %v1906_v55, %v1838_v27  ;;  %v1177_v39 = vsel %vm17_vm0, %v1092_v15, 0.0  ;;  %v3722_v28 = vmul.f32 %v6701_v17, %v7613_v2  ;;  %v3930_v16 = vmul.f32 %v6706_v42, %v7190_v4  ;;  %v7666_v27 = vld [vmem:[#allocation2 + $0x174] sm:$0xff] }
 0x15c   :  { %v4062_v54 = vmul.f32 %v6718_v51, %v7623_v53  ;;  %v1178_v50 = vadd.f32 %v1177_v39, %v1176_v29  ;;  %v3049_v37 = vadd.f32 %v2985_v61, %v2917_v57  ;;  %v359_v14 = vmul.f32 %v11737_v60, %v7218_v20  ;;  %11773 = vst [vmem:[#allocation34_spill] sm:$0xff] %v7666_v27  ;;  %v7668_v4 = vld [vmem:[#allocation2 + $0x170] sm:$0xff] }
 0x15d   :  { %v2055_v34 = vsel %vm17_vm0, %v1970_v58, 0.0  ;;  %v2168_v1 = vmul.f32 %v1970_v58, %v1970_v58  ;;  %2367 = vst.msk [vmem:[#allocation3 + $0x2b0] sm:$0xff] %vm17_vm0, %v1970_v58  ;;  %v3786_v59 = vadd.f32 %v3722_v28, %v3590_v63  ;;  %v491_v0 = vmul.f32 %v11738_v56, %v7651_v62  ;;  %11774 = vst [vmem:[#allocation35_spill] sm:$0xff] %v7668_v4  ;;  %v7675_v58 = vld [vmem:[#allocation2 + $0x173] sm:$0xff]  ;;  %v11776_v28 = vld [vmem:[#allocation20_spill] sm:$0xff] }
 0x15e   :  { %v2056_v55 = vadd.f32 %v2055_v34, %v2054_v9  ;;  %v3136_v3 = vsel %vm17_vm0, %v3049_v37, 0.0  ;;  %v3247_v13 = vmul.f32 %v3049_v37, %v3049_v37  ;;  %3446 = vst.msk [vmem:[#allocation3 + $0x4c0] sm:$0xff] %vm17_vm0, %v3049_v37  ;;  %v699_v9 = vmul.f32 %v11739_v46, %v7233_v35  ;;  %11775 = vst [vmem:[#allocation36_spill] sm:$0xff] %v7675_v58 }
 0x15f   :  { %v2253_v29 = vsel %vm17_vm0, %v2168_v1, 0.0  ;;  %v3137_v40 = vadd.f32 %v3136_v3, %v3135_v22  ;;  %v3994_v15 = vadd.f32 %v3930_v16, %v3786_v59  ;;  %v555_v63 = vadd.f32 %v491_v0, %v359_v14 }
 0x160   :  { %v2254_v61 = vadd.f32 %v2253_v29, %v2252_v52  ;;  %v3334_v57 = vsel %vm17_vm0, %v3247_v13, 0.0  ;;  %v831_v39 = vmul.f32 %v11740_v21, %v7666_v27  ;;  %v1435_v34 = vmul.f32 %v11741_v36, %v11776_v28  ;;  %v11777_v52 = vld [vmem:[#allocation21_spill] sm:$0xff] }
 0x161   :  { %v1567_v1 = vmul.f32 %v11742_v5, %v7668_v4  ;;  %v3335_v37 = vadd.f32 %v3334_v57, %v3333_v11  ;;  %v4126_v53 = vadd.f32 %v4062_v54, %v3994_v15  ;;  %v763_v2 = vadd.f32 %v699_v9, %v555_v63 }
 0x162   :  { %v1775_v22 = vmul.f32 %v11743_v26, %v11777_v52  ;;  %v1907_v59 = vmul.f32 %v11744_v12, %v7675_v58  ;;  %v2514_v14 = vmul.f32 %v6545_v45, %v7218_v20  ;;  %v2646_v0 = vmul.f32 %v6550_v47, %v7651_v62 }
 0x163   :  { %v1631_v16 = vadd.f32 %v1567_v1, %v1435_v34  ;;  %v4213_v29 = vsel %vm17_vm0, %v4126_v53, 0.0  ;;  %v4324_v3 = vmul.f32 %v4126_v53, %v4126_v53  ;;  %4523 = vst.msk [vmem:[#allocation3 + $0x6c0] sm:$0xff] %vm17_vm0, %v4126_v53  ;;  %v895_v11 = vadd.f32 %v831_v39, %v763_v2 }
 0x164   :  { %v2854_v54 = vmul.f32 %v6555_v6, %v7233_v35  ;;  %v4214_v13 = vadd.f32 %v4213_v29, %v4212_v43  ;;  %v2710_v15 = vadd.f32 %v2646_v0, %v2514_v14  ;;  %v2986_v63 = vmul.f32 %v6563_v33, %v7666_v27  ;;  %v7703_v43 = vld [vmem:[#allocation2 + $0x181] sm:$0xff] }
 0x165   :  { %v1839_v9 = vadd.f32 %v1775_v22, %v1631_v16  ;;  %v4411_v20 = vsel %vm17_vm0, %v4324_v3, 0.0  ;;  %v981_v57 = vsel %vm17_vm0, %v895_v11, 0.0  ;;  %v1093_v34 = vmul.f32 %v895_v11, %v895_v11  ;;  %1291 = vst.msk [vmem:[#allocation3 + $0xb8] sm:$0xff] %vm17_vm0, %v895_v11  ;;  %v11778_v11 = vld [vmem:[#allocation22_spill] sm:$0xff] }
 0x166   :  { %v3591_v53 = vmul.f32 %v6697_v31, %v11776_v28  ;;  %v4412_v2 = vadd.f32 %v4411_v20, %v4410_v19  ;;  %v982_v39 = vadd.f32 %v981_v57, %v980_v30  ;;  %v2918_v35 = vadd.f32 %v2854_v54, %v2710_v15  ;;  %v7718_v15 = vld [vmem:[#allocation2 + $0x184] sm:$0xff]  ;;  %v11779_v57 = vld [vmem:[#allocation23_spill] sm:$0xff] }
 0x167   :  { %v1971_v1 = vadd.f32 %v1907_v59, %v1839_v9  ;;  %v1179_v22 = vsel %vm17_vm0, %v1093_v34, 0.0  ;;  %v3723_v16 = vmul.f32 %v6701_v17, %v7668_v4  ;;  %v3931_v14 = vmul.f32 %v6706_v42, %v11777_v52  ;;  %v7720_v52 = vld [vmem:[#allocation2 + $0x180] sm:$0xff] }
 0x168   :  { %v4063_v0 = vmul.f32 %v6718_v51, %v7675_v58  ;;  %v1180_v29 = vadd.f32 %v1179_v22, %v1178_v50  ;;  %v3050_v30 = vadd.f32 %v2986_v63, %v2918_v35  ;;  %v360_v54 = vmul.f32 %v11737_v60, %v11778_v11  ;;  %v176_v50 = vld [vmem:[%s11496_s0 + $0x198] sm:$0xff]  ;;  %v11781_v58 = vld [vmem:[#allocation24_spill] sm:$0xff] }
 0x169   :  { %v2057_v28 = vsel %vm17_vm0, %v1971_v1, 0.0  ;;  %v2169_v19 = vmul.f32 %v1971_v1, %v1971_v1  ;;  %2368 = vst.msk [vmem:[#allocation3 + $0x2b8] sm:$0xff] %vm17_vm0, %v1971_v1  ;;  %v3787_v3 = vadd.f32 %v3723_v16, %v3591_v53  ;;  %v492_v9 = vmul.f32 %v11738_v56, %v7703_v43  ;;  %241 = vst.msk [vmem:[#allocation2 + $0x2f2] sm:$0xff] %vm17_vm0, %v176_v50  ;;  %v7731_v16 = vld [vmem:[#allocation2 + $0x183] sm:$0xff] }
 0x16a   :  { %v2058_v59 = vadd.f32 %v2057_v28, %v2056_v55  ;;  %v3138_v63 = vsel %vm17_vm0, %v3050_v30, 0.0  ;;  %v3248_v55 = vmul.f32 %v3050_v30, %v3050_v30  ;;  %3447 = vst.msk [vmem:[#allocation3 + $0x4c8] sm:$0xff] %vm17_vm0, %v3050_v30  ;;  %v700_v34 = vmul.f32 %v11739_v46, %v11779_v57  ;;  %11780 = vst [vmem:[#allocation37_spill] sm:$0xff] %v7731_v16 }
 0x16b   :  { %v2255_v20 = vsel %vm17_vm0, %v2169_v19, 0.0  ;;  %v3139_v1 = vadd.f32 %v3138_v63, %v3137_v40  ;;  %v3995_v35 = vadd.f32 %v3931_v14, %v3787_v3  ;;  %v556_v22 = vadd.f32 %v492_v9, %v360_v54 }
 0x16c   :  { %v2256_v53 = vadd.f32 %v2255_v20, %v2254_v61  ;;  %v3336_v28 = vsel %vm17_vm0, %v3248_v55, 0.0  ;;  %v832_v19 = vmul.f32 %v11740_v21, %v7718_v15  ;;  %v1436_v4 = vmul.f32 %v11741_v36, %v11781_v58  ;;  %v11782_v61 = vld [vmem:[#allocation25_spill] sm:$0xff] }
 0x16d   :  { %v1568_v30 = vmul.f32 %v11742_v5, %v7720_v52  ;;  %v3337_v27 = vadd.f32 %v3336_v28, %v3335_v37  ;;  %v4127_v62 = vadd.f32 %v4063_v0, %v3995_v35  ;;  %v764_v50 = vadd.f32 %v700_v34, %v556_v22 }
 0x16e   :  { %v1776_v40 = vmul.f32 %v11743_v26, %v11782_v61  ;;  %v1908_v3 = vmul.f32 %v11744_v12, %v7731_v16  ;;  %v2515_v54 = vmul.f32 %v6545_v45, %v11778_v11  ;;  %v2647_v9 = vmul.f32 %v6550_v47, %v7703_v43 }
 0x16f   :  { %v1632_v14 = vadd.f32 %v1568_v30, %v1436_v4  ;;  %v4215_v20 = vsel %vm17_vm0, %v4127_v62, 0.0  ;;  %v4325_v63 = vmul.f32 %v4127_v62, %v4127_v62  ;;  %4524 = vst.msk [vmem:[#allocation3 + $0x6c8] sm:$0xff] %vm17_vm0, %v4127_v62  ;;  %v896_v37 = vadd.f32 %v832_v19, %v764_v50 }
 0x170   :  { %v2855_v0 = vmul.f32 %v6555_v6, %v11779_v57  ;;  %v4216_v55 = vadd.f32 %v4215_v20, %v4214_v13  ;;  %v2711_v34 = vadd.f32 %v2647_v9, %v2515_v54  ;;  %v2987_v35 = vmul.f32 %v6563_v33, %v7718_v15  ;;  %v7759_v13 = vld [vmem:[#allocation2 + $0x189] sm:$0xff] }
 0x171   :  { %v1840_v4 = vadd.f32 %v1776_v40, %v1632_v14  ;;  %v4413_v11 = vsel %vm17_vm0, %v4325_v63, 0.0  ;;  %v983_v22 = vsel %vm17_vm0, %v896_v37, 0.0  ;;  %v1094_v28 = vmul.f32 %v896_v37, %v896_v37  ;;  %1292 = vst.msk [vmem:[#allocation3 + $0xc0] sm:$0xff] %vm17_vm0, %v896_v37 }
 0x172   :  { %v3592_v62 = vmul.f32 %v6697_v31, %v11781_v58  ;;  %v4414_v19 = vadd.f32 %v4413_v11, %v4412_v2  ;;  %v984_v30 = vadd.f32 %v983_v22, %v982_v39  ;;  %v2919_v57 = vadd.f32 %v2855_v0, %v2711_v34 }
 0x173   :  { %v1972_v50 = vadd.f32 %v1908_v3, %v1840_v4  ;;  %v1181_v40 = vsel %vm17_vm0, %v1094_v28, 0.0  ;;  %v3724_v14 = vmul.f32 %v6701_v17, %v7720_v52  ;;  %v3932_v54 = vmul.f32 %v6706_v42, %v11782_v61  ;;  %v7774_v4 = vld [vmem:[#allocation2 + $0x18c] sm:$0xff] }
 0x174   :  { %v4064_v9 = vmul.f32 %v6718_v51, %v7731_v16  ;;  %v1182_v20 = vadd.f32 %v1181_v40, %v1180_v29  ;;  %v3051_v39 = vadd.f32 %v2987_v35, %v2919_v57  ;;  %v361_v37 = vmul.f32 %v11737_v60, %v7322_v38  ;;  %v7776_v61 = vld [vmem:[#allocation2 + $0x188] sm:$0xff] }
 0x175   :  { %v2059_v58 = vsel %vm17_vm0, %v1972_v50, 0.0  ;;  %v2170_v2 = vmul.f32 %v1972_v50, %v1972_v50  ;;  %2369 = vst.msk [vmem:[#allocation3 + $0x2c0] sm:$0xff] %vm17_vm0, %v1972_v50  ;;  %v3788_v63 = vadd.f32 %v3724_v14, %v3592_v62  ;;  %v493_v0 = vmul.f32 %v11738_v56, %v7759_v13  ;;  %v7783_v50 = vld [vmem:[#allocation2 + $0x18b] sm:$0xff] }
 0x176   :  { %v2060_v3 = vadd.f32 %v2059_v58, %v2058_v59  ;;  %v3140_v34 = vsel %vm17_vm0, %v3051_v39, 0.0  ;;  %v3249_v11 = vmul.f32 %v3051_v39, %v3051_v39  ;;  %3448 = vst.msk [vmem:[#allocation3 + $0x4d0] sm:$0xff] %vm17_vm0, %v3051_v39  ;;  %v701_v59 = vmul.f32 %v11739_v46, %v7340_v23  ;;  %11783 = vst [vmem:[#allocation38_spill] sm:$0xff] %v7783_v50 }
 0x177   :  { %v2257_v29 = vsel %vm17_vm0, %v2170_v2, 0.0  ;;  %v3141_v22 = vadd.f32 %v3140_v34, %v3139_v1  ;;  %v3996_v28 = vadd.f32 %v3932_v54, %v3788_v63  ;;  %v557_v62 = vadd.f32 %v493_v0, %v361_v37 }
 0x178   :  { %v2258_v35 = vadd.f32 %v2257_v29, %v2256_v53  ;;  %v3338_v57 = vsel %vm17_vm0, %v3249_v11, 0.0  ;;  %v833_v40 = vmul.f32 %v11740_v21, %v7774_v4  ;;  %v1437_v14 = vmul.f32 %v11741_v36, %v7342_v24 }
 0x179   :  { %v1569_v58 = vmul.f32 %v11742_v5, %v7776_v61  ;;  %v3339_v2 = vadd.f32 %v3338_v57, %v3337_v27  ;;  %v4128_v39 = vadd.f32 %v4064_v9, %v3996_v28  ;;  %v765_v16 = vadd.f32 %v701_v59, %v557_v62 }
 0x17a   :  { %v1777_v53 = vmul.f32 %v11743_v26, %v7350_v10  ;;  %v1909_v54 = vmul.f32 %v11744_v12, %v7783_v50  ;;  %v2516_v63 = vmul.f32 %v6545_v45, %v7322_v38  ;;  %v2648_v37 = vmul.f32 %v6550_v47, %v7759_v13 }
 0x17b   :  { %v1633_v1 = vadd.f32 %v1569_v58, %v1437_v14  ;;  %v4217_v0 = vsel %vm17_vm0, %v4128_v39, 0.0  ;;  %v4326_v29 = vmul.f32 %v4128_v39, %v4128_v39  ;;  %4525 = vst.msk [vmem:[#allocation3 + $0x6d0] sm:$0xff] %vm17_vm0, %v4128_v39  ;;  %v897_v27 = vadd.f32 %v833_v40, %v765_v16 }
 0x17c   :  { %v2856_v9 = vmul.f32 %v6555_v6, %v7340_v23  ;;  %v4218_v34 = vadd.f32 %v4217_v0, %v4216_v55  ;;  %v2712_v59 = vadd.f32 %v2648_v37, %v2516_v63  ;;  %v2988_v28 = vmul.f32 %v6563_v33, %v7774_v4  ;;  %v288_v55 = vld [vmem:[#allocation2 + $0x199] sm:$0xff] }
 0x17d   :  { %v1841_v11 = vadd.f32 %v1777_v53, %v1633_v1  ;;  %v4415_v38 = vsel %vm17_vm0, %v4326_v29, 0.0  ;;  %v985_v62 = vsel %vm17_vm0, %v897_v27, 0.0  ;;  %v1095_v57 = vmul.f32 %v897_v27, %v897_v27  ;;  %1293 = vst.msk [vmem:[#allocation3 + $0xc8] sm:$0xff] %vm17_vm0, %v897_v27 }
 0x17e   :  { %v3593_v14 = vmul.f32 %v6697_v31, %v7342_v24  ;;  %v4416_v16 = vadd.f32 %v4415_v38, %v4414_v19  ;;  %v986_v40 = vadd.f32 %v985_v62, %v984_v30  ;;  %v2920_v23 = vadd.f32 %v2856_v9, %v2712_v59  ;;  %v628_v9 = vld [vmem:[#allocation2 + $0x19c] sm:$0xff] }
 0x17f   :  { %v1973_v58 = vadd.f32 %v1909_v54, %v1841_v11  ;;  %v1183_v39 = vsel %vm17_vm0, %v1095_v57, 0.0  ;;  %v3725_v53 = vmul.f32 %v6701_v17, %v7776_v61  ;;  %v3933_v1 = vmul.f32 %v6706_v42, %v7350_v10  ;;  %v1364_v11 = vld [vmem:[#allocation2 + $0x198] sm:$0xff] }
 0x180   :  { %v4065_v63 = vmul.f32 %v6718_v51, %v7783_v50  ;;  %v1184_v37 = vadd.f32 %v1183_v39, %v1182_v20  ;;  %v3052_v19 = vadd.f32 %v2988_v28, %v2920_v23  ;;  %v362_v29 = vmul.f32 %v11737_v60, %v7384_v48 }
 0x181   :  { %v2061_v0 = vsel %vm17_vm0, %v1973_v58, 0.0  ;;  %v2171_v24 = vmul.f32 %v1973_v58, %v1973_v58  ;;  %2370 = vst.msk [vmem:[#allocation3 + $0x2c8] sm:$0xff] %vm17_vm0, %v1973_v58  ;;  %v3789_v54 = vadd.f32 %v3725_v53, %v3593_v14  ;;  %v494_v27 = vmul.f32 %v11738_v56, %v288_v55  ;;  %v1704_v14 = vld [vmem:[#allocation2 + $0x19b] sm:$0xff] }
 0x182   :  { %v2062_v30 = vadd.f32 %v2061_v0, %v2060_v3  ;;  %v3142_v59 = vsel %vm17_vm0, %v3052_v19, 0.0  ;;  %v3250_v20 = vmul.f32 %v3052_v19, %v3052_v19  ;;  %3449 = vst.msk [vmem:[#allocation3 + $0x4d8] sm:$0xff] %vm17_vm0, %v3052_v19  ;;  %v702_v38 = vmul.f32 %v11739_v46, %v7412_v25 }
 0x183   :  { %v2259_v10 = vsel %vm17_vm0, %v2171_v24, 0.0  ;;  %v3143_v3 = vadd.f32 %v3142_v59, %v3141_v22  ;;  %v3997_v62 = vadd.f32 %v3933_v1, %v3789_v54  ;;  %v558_v57 = vadd.f32 %v494_v27, %v362_v29 }
 0x184   :  { %v2260_v28 = vadd.f32 %v2259_v10, %v2258_v35  ;;  %v3340_v58 = vsel %vm17_vm0, %v3250_v20, 0.0  ;;  %v834_v23 = vmul.f32 %v11740_v21, %v628_v9  ;;  %v1438_v39 = vmul.f32 %v11741_v36, %v7414_v7 }
 0x185   :  { %v1570_v53 = vmul.f32 %v11742_v5, %v1364_v11  ;;  %v3341_v0 = vadd.f32 %v3340_v58, %v3339_v2  ;;  %v4129_v24 = vadd.f32 %v4065_v63, %v3997_v62  ;;  %v766_v19 = vadd.f32 %v702_v38, %v558_v57 }
 0x186   :  { %v1778_v50 = vmul.f32 %v11743_v26, %v7428_v32  ;;  %v1910_v22 = vmul.f32 %v11744_v12, %v1704_v14  ;;  %v2517_v1 = vmul.f32 %v6545_v45, %v7384_v48  ;;  %v2649_v54 = vmul.f32 %v6550_v47, %v288_v55 }
 0x187   :  { %v1634_v35 = vadd.f32 %v1570_v53, %v1438_v39  ;;  %v4219_v29 = vsel %vm17_vm0, %v4129_v24, 0.0  ;;  %v4327_v27 = vmul.f32 %v4129_v24, %v4129_v24  ;;  %4526 = vst.msk [vmem:[#allocation3 + $0x6d8] sm:$0xff] %vm17_vm0, %v4129_v24  ;;  %v898_v10 = vadd.f32 %v834_v23, %v766_v19 }
 0x188   :  { %v2857_v2 = vmul.f32 %v6555_v6, %v7412_v25  ;;  %v4220_v63 = vadd.f32 %v4219_v29, %v4218_v34  ;;  %v2713_v20 = vadd.f32 %v2649_v54, %v2517_v1  ;;  %v2989_v38 = vmul.f32 %v6563_v33, %v628_v9  ;;  %v289_v25 = vld [vmem:[#allocation2 + $0x1a1] sm:$0xff] }
 0x189   :  { %v1842_v59 = vadd.f32 %v1778_v50, %v1634_v35  ;;  %v4417_v62 = vsel %vm17_vm0, %v4327_v27, 0.0  ;;  %v987_v48 = vsel %vm17_vm0, %v898_v10, 0.0  ;;  %v1096_v57 = vmul.f32 %v898_v10, %v898_v10  ;;  %1294 = vst.msk [vmem:[#allocation3 + $0xd0] sm:$0xff] %vm17_vm0, %v898_v10  ;;  %v1365_v29 = vld [vmem:[#allocation2 + $0x1a0] sm:$0xff] }
 0x18a   :  { %v3594_v55 = vmul.f32 %v6697_v31, %v7414_v7  ;;  %v4418_v58 = vadd.f32 %v4417_v62, %v4416_v16  ;;  %v988_v23 = vadd.f32 %v987_v48, %v986_v40  ;;  %v2921_v53 = vadd.f32 %v2857_v2, %v2713_v20  ;;  %v1705_v20 = vld [vmem:[#allocation2 + $0x1a3] sm:$0xff] }
 0x18b   :  { %v1974_v39 = vadd.f32 %v1910_v22, %v1842_v59  ;;  %v1185_v50 = vsel %vm17_vm0, %v1096_v57, 0.0  ;;  %v3726_v34 = vmul.f32 %v6701_v17, %v1364_v11  ;;  %v3934_v9 = vmul.f32 %v6706_v42, %v7428_v32  ;;  %v629_v11 = vld [vmem:[#allocation2 + $0x1a4] sm:$0xff] }
 0x18c   :  { %v4066_v24 = vmul.f32 %v6718_v51, %v1704_v14  ;;  %v1186_v19 = vadd.f32 %v1185_v50, %v1184_v37  ;;  %v3053_v7 = vadd.f32 %v2989_v38, %v2921_v53  ;;  %v363_v22 = vmul.f32 %v11737_v60, %v7487_v18  ;;  %v11784_v50 = vld [vmem:[#allocation27_spill] sm:$0xff] }
 0x18d   :  { %v2063_v35 = vsel %vm17_vm0, %v1974_v39, 0.0  ;;  %v2172_v1 = vmul.f32 %v1974_v39, %v1974_v39  ;;  %2371 = vst.msk [vmem:[#allocation3 + $0x2d0] sm:$0xff] %vm17_vm0, %v1974_v39  ;;  %v3790_v40 = vadd.f32 %v3726_v34, %v3594_v55  ;;  %v495_v54 = vmul.f32 %v11738_v56, %v289_v25 }
 0x18e   :  { %v2064_v16 = vadd.f32 %v2063_v35, %v2062_v30  ;;  %v3144_v14 = vsel %vm17_vm0, %v3053_v7, 0.0  ;;  %v3251_v37 = vmul.f32 %v3053_v7, %v3053_v7  ;;  %3450 = vst.msk [vmem:[#allocation3 + $0x4e0] sm:$0xff] %vm17_vm0, %v3053_v7  ;;  %v703_v27 = vmul.f32 %v11739_v46, %v7517_v49 }
 0x18f   :  { %v2261_v32 = vsel %vm17_vm0, %v2172_v1, 0.0  ;;  %v3145_v30 = vadd.f32 %v3144_v14, %v3143_v3  ;;  %v3998_v2 = vadd.f32 %v3934_v9, %v3790_v40  ;;  %v559_v59 = vadd.f32 %v495_v54, %v363_v22  ;;  %v177_v1 = vld [vmem:[%s11496_s0 + $0x1a0] sm:$0xff] }
 0x190   :  { %v2262_v10 = vadd.f32 %v2261_v32, %v2260_v28  ;;  %v3342_v38 = vsel %vm17_vm0, %v3251_v37, 0.0  ;;  %v835_v62 = vmul.f32 %v11740_v21, %v629_v11  ;;  %v1439_v48 = vmul.f32 %v11741_v36, %v7519_v44  ;;  %242 = vst.msk [vmem:[#allocation2 + $0x302] sm:$0xff] %vm17_vm0, %v177_v1 }
 0x191   :  { %v1571_v57 = vmul.f32 %v11742_v5, %v1365_v29  ;;  %v3343_v55 = vadd.f32 %v3342_v38, %v3341_v0  ;;  %v4130_v39 = vadd.f32 %v4066_v24, %v3998_v2  ;;  %v767_v53 = vadd.f32 %v703_v27, %v559_v59 }
 0x192   :  { %v1779_v34 = vmul.f32 %v11743_v26, %v11784_v50  ;;  %v1911_v3 = vmul.f32 %v11744_v12, %v1705_v20  ;;  %v2518_v9 = vmul.f32 %v6545_v45, %v7487_v18  ;;  %v2650_v35 = vmul.f32 %v6550_v47, %v289_v25 }
 0x193   :  { %v1635_v28 = vadd.f32 %v1571_v57, %v1439_v48  ;;  %v4221_v7 = vsel %vm17_vm0, %v4130_v39, 0.0  ;;  %v4328_v0 = vmul.f32 %v4130_v39, %v4130_v39  ;;  %4527 = vst.msk [vmem:[#allocation3 + $0x6e0] sm:$0xff] %vm17_vm0, %v4130_v39  ;;  %v899_v24 = vadd.f32 %v835_v62, %v767_v53  ;;  %v290_v62 = vld [vmem:[#allocation2 + $0x1b1] sm:$0xff] }
 0x194   :  { %v2858_v40 = vmul.f32 %v6555_v6, %v7517_v49  ;;  %v4222_v22 = vadd.f32 %v4221_v7, %v4220_v63  ;;  %v2714_v18 = vadd.f32 %v2650_v35, %v2518_v9  ;;  %v2990_v25 = vmul.f32 %v6563_v33, %v629_v11  ;;  %v1366_v9 = vld [vmem:[#allocation2 + $0x1b0] sm:$0xff] }
 0x195   :  { %v1843_v54 = vadd.f32 %v1779_v34, %v1635_v28  ;;  %v4419_v32 = vsel %vm17_vm0, %v4328_v0, 0.0  ;;  %v989_v14 = vsel %vm17_vm0, %v899_v24, 0.0  ;;  %v1097_v37 = vmul.f32 %v899_v24, %v899_v24  ;;  %1295 = vst.msk [vmem:[#allocation3 + $0xd8] sm:$0xff] %vm17_vm0, %v899_v24  ;;  %v1706_v24 = vld [vmem:[#allocation2 + $0x1b3] sm:$0xff] }
 0x196   :  { %v3595_v27 = vmul.f32 %v6697_v31, %v7519_v44  ;;  %v4420_v2 = vadd.f32 %v4419_v32, %v4418_v58  ;;  %v990_v59 = vadd.f32 %v989_v14, %v988_v23  ;;  %v2922_v38 = vadd.f32 %v2858_v40, %v2714_v18  ;;  %v11785_v18 = vld [vmem:[#allocation28_spill] sm:$0xff] }
 0x197   :  { %v1975_v49 = vadd.f32 %v1911_v3, %v1843_v54  ;;  %v1187_v63 = vsel %vm17_vm0, %v1097_v37, 0.0  ;;  %v3727_v48 = vmul.f32 %v6701_v17, %v1365_v29  ;;  %v3935_v11 = vmul.f32 %v6706_v42, %v11784_v50  ;;  %v630_v29 = vld [vmem:[#allocation2 + $0x1b4] sm:$0xff] }
 0x198   :  { %v4067_v57 = vmul.f32 %v6718_v51, %v1705_v20  ;;  %v1188_v39 = vadd.f32 %v1187_v63, %v1186_v19  ;;  %v3054_v44 = vadd.f32 %v2990_v25, %v2922_v38  ;;  %v364_v28 = vmul.f32 %v11737_v60, %v7591_v8 }
 0x199   :  { %v2065_v53 = vsel %vm17_vm0, %v1975_v49, 0.0  ;;  %v2173_v34 = vmul.f32 %v1975_v49, %v1975_v49  ;;  %2372 = vst.msk [vmem:[#allocation3 + $0x2d8] sm:$0xff] %vm17_vm0, %v1975_v49  ;;  %v3791_v23 = vadd.f32 %v3727_v48, %v3595_v27  ;;  %v496_v3 = vmul.f32 %v11738_v56, %v290_v62  ;;  %v11786_v49 = vld [vmem:[#allocation29_spill] sm:$0xff] }
 0x19a   :  { %v2066_v58 = vadd.f32 %v2065_v53, %v2064_v16  ;;  %v3146_v20 = vsel %vm17_vm0, %v3054_v44, 0.0  ;;  %v3252_v19 = vmul.f32 %v3054_v44, %v3054_v44  ;;  %3451 = vst.msk [vmem:[#allocation3 + $0x4e8] sm:$0xff] %vm17_vm0, %v3054_v44  ;;  %v704_v35 = vmul.f32 %v11739_v46, %v7611_v41 }
 0x19b   :  { %v2263_v50 = vsel %vm17_vm0, %v2173_v34, 0.0  ;;  %v3147_v16 = vadd.f32 %v3146_v20, %v3145_v30  ;;  %v3999_v7 = vadd.f32 %v3935_v11, %v3791_v23  ;;  %v560_v0 = vadd.f32 %v496_v3, %v364_v28 }
 0x19c   :  { %v2264_v1 = vadd.f32 %v2263_v50, %v2262_v10  ;;  %v3344_v40 = vsel %vm17_vm0, %v3252_v19, 0.0  ;;  %v836_v54 = vmul.f32 %v11740_v21, %v630_v29  ;;  %v1440_v25 = vmul.f32 %v11741_v36, %v11785_v18 }
 0x19d   :  { %v1572_v32 = vmul.f32 %v11742_v5, %v1366_v9  ;;  %v3345_v14 = vadd.f32 %v3344_v40, %v3343_v55  ;;  %v4131_v37 = vadd.f32 %v4067_v57, %v3999_v7  ;;  %v768_v27 = vadd.f32 %v704_v35, %v560_v0 }
 0x19e   :  { %v1780_v38 = vmul.f32 %v11743_v26, %v11786_v49  ;;  %v1912_v30 = vmul.f32 %v11744_v12, %v1706_v24  ;;  %v2519_v63 = vmul.f32 %v6545_v45, %v7591_v8  ;;  %v2651_v48 = vmul.f32 %v6550_v47, %v290_v62 }
 0x19f   :  { %v1636_v10 = vadd.f32 %v1572_v32, %v1440_v25  ;;  %v4223_v11 = vsel %vm17_vm0, %v4131_v37, 0.0  ;;  %v4329_v53 = vmul.f32 %v4131_v37, %v4131_v37  ;;  %4528 = vst.msk [vmem:[#allocation3 + $0x6e8] sm:$0xff] %vm17_vm0, %v4131_v37  ;;  %v900_v34 = vadd.f32 %v836_v54, %v768_v27  ;;  %v11787_v37 = vld [vmem:[#allocation32_spill] sm:$0xff] }
 0x1a0   :  { %v2859_v55 = vmul.f32 %v6555_v6, %v7611_v41  ;;  %v4224_v57 = vadd.f32 %v4223_v11, %v4222_v22  ;;  %v2715_v23 = vadd.f32 %v2651_v48, %v2519_v63  ;;  %v2991_v28 = vmul.f32 %v6563_v33, %v630_v29  ;;  %v291_v41 = vld [vmem:[#allocation2 + $0x1b9] sm:$0xff] }
 0x1a1   :  { %v1844_v44 = vadd.f32 %v1780_v38, %v1636_v10  ;;  %v4421_v3 = vsel %vm17_vm0, %v4329_v53, 0.0  ;;  %v991_v8 = vsel %vm17_vm0, %v900_v34, 0.0  ;;  %v1098_v50 = vmul.f32 %v900_v34, %v900_v34  ;;  %1296 = vst.msk [vmem:[#allocation3 + $0xe0] sm:$0xff] %vm17_vm0, %v900_v34  ;;  %v1367_v10 = vld [vmem:[#allocation2 + $0x1b8] sm:$0xff] }
 0x1a2   :  { %v3596_v62 = vmul.f32 %v6697_v31, %v11785_v18  ;;  %v4422_v20 = vadd.f32 %v4421_v3, %v4420_v2  ;;  %v992_v19 = vadd.f32 %v991_v8, %v990_v59  ;;  %v2923_v7 = vadd.f32 %v2859_v55, %v2715_v23  ;;  %v1707_v34 = vld [vmem:[#allocation2 + $0x1bb] sm:$0xff] }
 0x1a3   :  { %v1976_v35 = vadd.f32 %v1912_v30, %v1844_v44  ;;  %v1189_v22 = vsel %vm17_vm0, %v1098_v50, 0.0  ;;  %v3728_v0 = vmul.f32 %v6701_v17, %v1366_v9  ;;  %v3936_v29 = vmul.f32 %v6706_v42, %v11786_v49  ;;  %v631_v9 = vld [vmem:[#allocation2 + $0x1bc] sm:$0xff]  ;;  %v11788_v30 = vld [vmem:[#allocation34_spill] sm:$0xff] }
 0x1a4   :  { %v4068_v40 = vmul.f32 %v6718_v51, %v1706_v24  ;;  %v1190_v54 = vadd.f32 %v1189_v22, %v1188_v39  ;;  %v3055_v2 = vadd.f32 %v2991_v28, %v2923_v7  ;;  %v365_v27 = vmul.f32 %v11737_v60, %v11787_v37  ;;  %v11789_v23 = vld [vmem:[#allocation35_spill] sm:$0xff] }
 0x1a5   :  { %v2067_v25 = vsel %vm17_vm0, %v1976_v35, 0.0  ;;  %v2174_v32 = vmul.f32 %v1976_v35, %v1976_v35  ;;  %2373 = vst.msk [vmem:[#allocation3 + $0x2e0] sm:$0xff] %vm17_vm0, %v1976_v35  ;;  %v3792_v18 = vadd.f32 %v3728_v0, %v3596_v62  ;;  %v497_v38 = vmul.f32 %v11738_v56, %v291_v41  ;;  %v11790_v35 = vld [vmem:[#allocation36_spill] sm:$0xff] }
 0x1a6   :  { %v2068_v59 = vadd.f32 %v2067_v25, %v2066_v58  ;;  %v3148_v24 = vsel %vm17_vm0, %v3055_v2, 0.0  ;;  %v3253_v39 = vmul.f32 %v3055_v2, %v3055_v2  ;;  %3452 = vst.msk [vmem:[#allocation3 + $0x4f0] sm:$0xff] %vm17_vm0, %v3055_v2  ;;  %v705_v63 = vmul.f32 %v11739_v46, %v11788_v30 }
 0x1a7   :  { %v2265_v49 = vsel %vm17_vm0, %v2174_v32, 0.0  ;;  %v3149_v58 = vadd.f32 %v3148_v24, %v3147_v16  ;;  %v4000_v11 = vadd.f32 %v3936_v29, %v3792_v18  ;;  %v561_v53 = vadd.f32 %v497_v38, %v365_v27 }
 0x1a8   :  { %v2266_v48 = vadd.f32 %v2265_v49, %v2264_v1  ;;  %v3346_v55 = vsel %vm17_vm0, %v3253_v39, 0.0  ;;  %v837_v44 = vmul.f32 %v11740_v21, %v631_v9  ;;  %v1441_v28 = vmul.f32 %v11741_v36, %v11789_v23 }
 0x1a9   :  { %v1573_v3 = vmul.f32 %v11742_v5, %v1367_v10  ;;  %v3347_v8 = vadd.f32 %v3346_v55, %v3345_v14  ;;  %v4132_v50 = vadd.f32 %v4068_v40, %v4000_v11  ;;  %v769_v62 = vadd.f32 %v705_v63, %v561_v53 }
 0x1aa   :  { %v1781_v7 = vmul.f32 %v11743_v26, %v11790_v35  ;;  %v1913_v16 = vmul.f32 %v11744_v12, %v1707_v34  ;;  %v2520_v22 = vmul.f32 %v6545_v45, %v11787_v37  ;;  %v2652_v0 = vmul.f32 %v6550_v47, %v291_v41 }
 0x1ab   :  { %v1637_v1 = vadd.f32 %v1573_v3, %v1441_v28  ;;  %v4225_v29 = vsel %vm17_vm0, %v4132_v50, 0.0  ;;  %v4330_v25 = vmul.f32 %v4132_v50, %v4132_v50  ;;  %4529 = vst.msk [vmem:[#allocation3 + $0x6f0] sm:$0xff] %vm17_vm0, %v4132_v50  ;;  %v901_v32 = vadd.f32 %v837_v44, %v769_v62  ;;  %v632_v62 = vld [vmem:[#allocation2 + $0x1cc] sm:$0xff] }
 0x1ac   :  { %v2860_v14 = vmul.f32 %v6555_v6, %v11788_v30  ;;  %v4226_v40 = vadd.f32 %v4225_v29, %v4224_v57  ;;  %v2716_v18 = vadd.f32 %v2652_v0, %v2520_v22  ;;  %v2992_v27 = vmul.f32 %v6563_v33, %v631_v9  ;;  %v292_v30 = vld [vmem:[#allocation2 + $0x1c9] sm:$0xff]  ;;  %v293_v29 = vld [vmem:[#allocation2 + $0x1d1] sm:$0xff] }
 0x1ad   :  { %v1845_v2 = vadd.f32 %v1781_v7, %v1637_v1  ;;  %v4423_v38 = vsel %vm17_vm0, %v4330_v25, 0.0  ;;  %v993_v37 = vsel %vm17_vm0, %v901_v32, 0.0  ;;  %v1099_v49 = vmul.f32 %v901_v32, %v901_v32  ;;  %1297 = vst.msk [vmem:[#allocation3 + $0xe8] sm:$0xff] %vm17_vm0, %v901_v32  ;;  %v1708_v0 = vld [vmem:[#allocation2 + $0x1cb] sm:$0xff] }
 0x1ae   :  { %v3597_v41 = vmul.f32 %v6697_v31, %v11789_v23  ;;  %v4424_v24 = vadd.f32 %v4423_v38, %v4422_v20  ;;  %v994_v39 = vadd.f32 %v993_v37, %v992_v19  ;;  %v2924_v11 = vadd.f32 %v2860_v14, %v2716_v18  ;;  %v633_v38 = vld [vmem:[#allocation2 + $0x1d4] sm:$0xff] }
 0x1af   :  { %v1977_v63 = vadd.f32 %v1913_v16, %v1845_v2  ;;  %v1191_v57 = vsel %vm17_vm0, %v1099_v49, 0.0  ;;  %v3729_v53 = vmul.f32 %v6701_v17, %v1367_v10  ;;  %v3937_v9 = vmul.f32 %v6706_v42, %v11790_v35  ;;  %v1368_v35 = vld [vmem:[#allocation2 + $0x1c8] sm:$0xff] }
 0x1b0   :  { %v4069_v55 = vmul.f32 %v6718_v51, %v1707_v34  ;;  %v7966_v44 = vadd.f32 %v1191_v57, %v1190_v54  ;;  %v3056_v20 = vadd.f32 %v2992_v27, %v2924_v11  ;;  %v366_v50 = vmul.f32 %v11737_v60, %v7703_v43  ;;  %v11791_v27 = vld [vmem:[#allocation37_spill] sm:$0xff] }
 0x1b1   :  { %v2069_v28 = vsel %vm17_vm0, %v1977_v63, 0.0  ;;  %v2175_v3 = vmul.f32 %v1977_v63, %v1977_v63  ;;  %2374 = vst.msk [vmem:[#allocation3 + $0x2e8] sm:$0xff] %vm17_vm0, %v1977_v63  ;;  %v3793_v23 = vadd.f32 %v3729_v53, %v3597_v41  ;;  %v498_v10 = vmul.f32 %v11738_v56, %v292_v30 }
 0x1b2   :  { %v7970_v19 = vadd.f32 %v2069_v28, %v2068_v59  ;;  %v3150_v54 = vsel %vm17_vm0, %v3056_v20, 0.0  ;;  %v3254_v7 = vmul.f32 %v3056_v20, %v3056_v20  ;;  %3453 = vst.msk [vmem:[#allocation3 + $0x4f8] sm:$0xff] %vm17_vm0, %v3056_v20  ;;  %v706_v1 = vmul.f32 %v11739_v46, %v7718_v15  ;;  %v1369_v28 = vld [vmem:[#allocation2 + $0x1d0] sm:$0xff] }
 0x1b3   :  { %v2267_v34 = vsel %vm17_vm0, %v2175_v3, 0.0  ;;  %v7982_v16 = vadd.f32 %v3150_v54, %v3149_v58  ;;  %v4001_v22 = vadd.f32 %v3937_v9, %v3793_v23  ;;  %v562_v43 = vadd.f32 %v498_v10, %v366_v50  ;;  %v1709_v3 = vld [vmem:[#allocation2 + $0x1d3] sm:$0xff]  ;;  %v178_v54 = vld [vmem:[%s11496_s0 + $0x1a8] sm:$0xff] }
 0x1b4   :  { %v7980_v59 = vadd.f32 %v2267_v34, %v2266_v48  ;;  %v3348_v25 = vsel %vm17_vm0, %v3254_v7, 0.0  ;;  %v838_v32 = vmul.f32 %v11740_v21, %v632_v62  ;;  %v1442_v14 = vmul.f32 %v11741_v36, %v7720_v52  ;;  %v8011_v34 = vld [vmem:[#allocation2 + $0x241] sm:$0xff]  ;;  %243 = vst.msk [vmem:[#allocation2 + $0x30a] sm:$0xff] %vm17_vm0, %v178_v54 }
 0x1b5   :  { %v1574_v2 = vmul.f32 %v11742_v5, %v1368_v35  ;;  %v7989_v18 = vadd.f32 %v3348_v25, %v3347_v8  ;;  %v4133_v15 = vadd.f32 %v4069_v55, %v4001_v22  ;;  %v770_v48 = vadd.f32 %v706_v1, %v562_v43  ;;  %v294_v35 = vld [vmem:[#allocation2 + $0x1f9] sm:$0xff]  ;;  %v11792_v22 = vld [vmem:[#allocation38_spill] sm:$0xff] }
 0x1b6   :  { %v1782_v58 = vmul.f32 %v11743_v26, %v11791_v27  ;;  %v1914_v49 = vmul.f32 %v11744_v12, %v1708_v0  ;;  %v367_v41 = vmul.f32 %v11737_v60, %v7759_v13  ;;  %v499_v63 = vmul.f32 %v11738_v56, %v293_v29  ;;  %v1370_v27 = vld [vmem:[#allocation2 + $0x1f8] sm:$0xff] }
 0x1b7   :  { %v1638_v37 = vadd.f32 %v1574_v2, %v1442_v14  ;;  %v4227_v52 = vsel %vm17_vm0, %v4133_v15, 0.0  ;;  %v4331_v11 = vmul.f32 %v4133_v15, %v4133_v15  ;;  %4530 = vst.msk [vmem:[#allocation3 + $0x6f8] sm:$0xff] %vm17_vm0, %v4133_v15  ;;  %v902_v8 = vadd.f32 %v838_v32, %v770_v48  ;;  %v8029_v48 = vld [vmem:[#allocation2 + $0x244] sm:$0xff] }
 0x1b8   :  { %v707_v30 = vmul.f32 %v11739_v46, %v7774_v4  ;;  %v8001_v57 = vadd.f32 %v4227_v52, %v4226_v40  ;;  %v563_v9 = vadd.f32 %v499_v63, %v367_v41  ;;  %v839_v55 = vmul.f32 %v11740_v21, %v633_v38 }
 0x1b9   :  { %v1846_v53 = vadd.f32 %v1782_v58, %v1638_v37  ;;  %v4425_v13 = vsel %vm17_vm0, %v4331_v11, 0.0  ;;  %v995_v20 = vsel %vm17_vm0, %v902_v8, 0.0  ;;  %v1100_v23 = vmul.f32 %v902_v8, %v902_v8  ;;  %1298 = vst.msk [vmem:[#allocation3 + $0xf0] sm:$0xff] %vm17_vm0, %v902_v8  ;;  %v8031_v58 = vld [vmem:[#allocation2 + $0x240] sm:$0xff] }
 0x1ba   :  { %v1443_v50 = vmul.f32 %v11741_v36, %v7776_v61  ;;  %v8009_v10 = vadd.f32 %v4425_v13, %v4424_v24  ;;  %v996_v4 = vadd.f32 %v995_v20, %v994_v39  ;;  %v771_v62 = vadd.f32 %v707_v30, %v563_v9  ;;  %v634_v24 = vld [vmem:[#allocation2 + $0x1fc] sm:$0xff] }
 0x1bb   :  { %v1978_v40 = vadd.f32 %v1914_v49, %v1846_v53  ;;  %v1193_v7 = vsel %vm17_vm0, %v1100_v23, 0.0  ;;  %v1575_v1 = vmul.f32 %v11742_v5, %v1369_v28  ;;  %v1783_v43 = vmul.f32 %v11743_v26, %v11792_v22  ;;  %v1710_v49 = vld [vmem:[#allocation2 + $0x1fb] sm:$0xff]  ;;  %v8038_v8 = vld [vmem:[#allocation2 + $0x243] sm:$0xff] }
 0x1bc   :  { %v1915_v61 = vmul.f32 %v11744_v12, %v1709_v3  ;;  %v1194_v39 = vadd.f32 %v1193_v7, %v7966_v44  ;;  %v903_v25 = vadd.f32 %v839_v55, %v771_v62  ;;  %v368_v2 = vmul.f32 %v11737_v60, %v294_v35 }
 0x1bd   :  { %v2071_v0 = vsel %vm17_vm0, %v1978_v40, 0.0  ;;  %v2176_v29 = vmul.f32 %v1978_v40, %v1978_v40  ;;  %2375 = vst.msk [vmem:[#allocation3 + $0x2f0] sm:$0xff] %vm17_vm0, %v1978_v40  ;;  %v1639_v14 = vadd.f32 %v1575_v1, %v1443_v50  ;;  %v500_v15 = vmul.f32 %v11738_v56, %v8011_v34 }
 0x1be   :  { %v2072_v32 = vadd.f32 %v2071_v0, %v7970_v19  ;;  %v997_v38 = vsel %vm17_vm0, %v903_v25, 0.0  ;;  %v1101_v37 = vmul.f32 %v903_v25, %v903_v25  ;;  %1299 = vst.msk [vmem:[#allocation3 + $0xf8] sm:$0xff] %vm17_vm0, %v903_v25  ;;  %v708_v19 = vmul.f32 %v11739_v46, %v634_v24 }
 0x1bf   :  { %v2269_v44 = vsel %vm17_vm0, %v2176_v29, 0.0  ;;  %v998_v63 = vadd.f32 %v997_v38, %v996_v4  ;;  %v1847_v52 = vadd.f32 %v1783_v43, %v1639_v14  ;;  %v564_v11 = vadd.f32 %v500_v15, %v368_v2  ;;  %v8065_v15 = vld [vmem:[#allocation2 + $0x249] sm:$0xff] }
 0x1c0   :  { %v2270_v41 = vadd.f32 %v2269_v44, %v7980_v59  ;;  %v1195_v30 = vsel %vm17_vm0, %v1101_v37, 0.0  ;;  %v840_v53 = vmul.f32 %v11740_v21, %v8029_v48  ;;  %v1444_v9 = vmul.f32 %v11741_v36, %v1370_v27 }
 0x1c1   :  { %v1576_v55 = vmul.f32 %v11742_v5, %v8031_v58  ;;  %v1196_v28 = vadd.f32 %v1195_v30, %v1194_v39  ;;  %v1979_v3 = vadd.f32 %v1915_v61, %v1847_v52  ;;  %v772_v13 = vadd.f32 %v708_v19, %v564_v11 }
 0x1c2   :  { %v1784_v59 = vmul.f32 %v11743_v26, %v1710_v49  ;;  %v1916_v23 = vmul.f32 %v11744_v12, %v8038_v8  ;;  %v2523_v50 = vmul.f32 %v6545_v45, %v294_v35  ;;  %v2655_v4 = vmul.f32 %v6550_v47, %v8011_v34 }
 0x1c3   :  { %v1640_v20 = vadd.f32 %v1576_v55, %v1444_v9  ;;  %v2073_v40 = vsel %vm17_vm0, %v1979_v3, 0.0  ;;  %v2177_v62 = vmul.f32 %v1979_v3, %v1979_v3  ;;  %2376 = vst.msk [vmem:[#allocation3 + $0x2f8] sm:$0xff] %vm17_vm0, %v1979_v3  ;;  %v904_v54 = vadd.f32 %v840_v53, %v772_v13  ;;  %v8082_v53 = vld [vmem:[#allocation2 + $0x24c] sm:$0xff] }
 0x1c4   :  { %v2863_v7 = vmul.f32 %v6555_v6, %v634_v24  ;;  %v2074_v1 = vadd.f32 %v2073_v40, %v2072_v32  ;;  %v2719_v43 = vadd.f32 %v2655_v4, %v2523_v50  ;;  %v2995_v61 = vmul.f32 %v6563_v33, %v8029_v48  ;;  %v8063_v32 = vld [vmem:[#allocation2 + $0x201] sm:$0xff]  ;;  %v8091_v3 = vld [vmem:[#allocation2 + $0x289] sm:$0xff] }
 0x1c5   :  { %v1848_v22 = vadd.f32 %v1784_v59, %v1640_v20  ;;  %v2271_v39 = vsel %vm17_vm0, %v2177_v62, 0.0  ;;  %v999_v35 = vsel %vm17_vm0, %v904_v54, 0.0  ;;  %v1102_v0 = vmul.f32 %v904_v54, %v904_v54  ;;  %1300 = vst.msk [vmem:[#allocation3 + $0x100] sm:$0xff] %vm17_vm0, %v904_v54  ;;  %v8100_v50 = vld [vmem:[#allocation2 + $0x28c] sm:$0xff]  ;;  %v8102_v4 = vld [vmem:[#allocation2 + $0x200] sm:$0xff] }
 0x1c6   :  { %v3600_v29 = vmul.f32 %v6697_v31, %v1370_v27  ;;  %v2272_v25 = vadd.f32 %v2271_v39, %v2270_v41  ;;  %v8061_v14 = vadd.f32 %v999_v35, %v998_v63  ;;  %v2927_v24 = vadd.f32 %v2863_v7, %v2719_v43  ;;  %v8073_v27 = vld [vmem:[#allocation2 + $0x204] sm:$0xff]  ;;  %v179_v41 = vld [vmem:[%s11496_s0 + $0x1b0] sm:$0xff] }
 0x1c7   :  { %v1980_v2 = vadd.f32 %v1916_v23, %v1848_v22  ;;  %v1197_v44 = vsel %vm17_vm0, %v1102_v0, 0.0  ;;  %v3732_v38 = vmul.f32 %v6701_v17, %v8031_v58  ;;  %v3940_v37 = vmul.f32 %v6706_v42, %v1710_v49  ;;  %244 = vst.msk [vmem:[#allocation2 + $0x31a] sm:$0xff] %vm17_vm0, %v179_v41  ;;  %v8110_v22 = vld [vmem:[#allocation2 + $0x203] sm:$0xff]  ;;  %v8112_v43 = vld [vmem:[#allocation2 + $0x24b] sm:$0xff] }
 0x1c8   :  { %v4072_v19 = vmul.f32 %v6718_v51, %v8038_v8  ;;  %v8078_v63 = vadd.f32 %v1197_v44, %v1196_v28  ;;  %v3059_v30 = vadd.f32 %v2995_v61, %v2927_v24  ;;  %v369_v55 = vmul.f32 %v11737_v60, %v8063_v32  ;;  %v8127_v44 = vld [vmem:[#allocation2 + $0x288] sm:$0xff] }
 0x1c9   :  { %v2075_v52 = vsel %vm17_vm0, %v1980_v2, 0.0  ;;  %v2178_v11 = vmul.f32 %v1980_v2, %v1980_v2  ;;  %2377 = vst.msk [vmem:[#allocation3 + $0x300] sm:$0xff] %vm17_vm0, %v1980_v2  ;;  %v3796_v9 = vadd.f32 %v3732_v38, %v3600_v29  ;;  %v501_v28 = vmul.f32 %v11738_v56, %v8065_v15 }
 0x1ca   :  { %v8085_v49 = vadd.f32 %v2075_v52, %v2074_v1  ;;  %v8095_v59 = vsel %vm17_vm0, %v3059_v30, 0.0  ;;  %v3257_v20 = vmul.f32 %v3059_v30, %v3059_v30  ;;  %3456 = vst.msk [vmem:[#allocation3 + $0x510] sm:$0xff] %vm17_vm0, %v3059_v30  ;;  %v709_v23 = vmul.f32 %v11739_v46, %v8073_v27  ;;  %v8108_v1 = vld [vmem:[#allocation2 + $0x248] sm:$0xff] }
 0x1cb   :  { %v2273_v13 = vsel %vm17_vm0, %v2178_v11, 0.0  ;;  %11793 = vst [vmem:[#allocation11_spill] sm:$0xff] %v8095_v59  ;;  %v4004_v62 = vadd.f32 %v3940_v37, %v3796_v9  ;;  %v565_v54 = vadd.f32 %v501_v28, %v369_v55  ;;  %v841_v7 = vmul.f32 %v11740_v21, %v8082_v53  ;;  %v180_v59 = vld [vmem:[%s11496_s0 + $0x1b8] sm:$0xff] }
 0x1cc   :  { %v8104_v40 = vadd.f32 %v2273_v13, %v2272_v25  ;;  %v8115_v61 = vsel %vm17_vm0, %v3257_v20, 0.0  ;;  %v374_v39 = vmul.f32 %v11737_v60, %v8011_v34  ;;  %v506_v35 = vmul.f32 %v11738_v56, %v8091_v3  ;;  %245 = vst.msk [vmem:[#allocation2 + $0x322] sm:$0xff] %vm17_vm0, %v180_v59 }
 0x1cd   :  { %11794 = vst [vmem:[#allocation26_spill] sm:$0xff] %v8115_v61  ;;  %v714_v0 = vmul.f32 %v11739_v46, %v8029_v48  ;;  %v4136_v29 = vadd.f32 %v4072_v19, %v4004_v62  ;;  %v773_v25 = vadd.f32 %v709_v23, %v565_v54  ;;  %v846_v2 = vmul.f32 %v11740_v21, %v8100_v50  ;;  %v8135_v19 = vld [vmem:[#allocation2 + $0x28b] sm:$0xff]  ;;  %v2447_v62 = vld [vmem:[#allocation2 + $0x1e1] sm:$0xff] }
 0x1ce   :  { %v1445_v24 = vmul.f32 %v11741_v36, %v8102_v4  ;;  %v570_v38 = vadd.f32 %v506_v35, %v374_v39  ;;  %v1577_v37 = vmul.f32 %v11742_v5, %v8108_v1  ;;  %v1785_v41 = vmul.f32 %v11743_v26, %v8110_v22  ;;  %v8147_v54 = vld [vmem:[#allocation2 + $0x229] sm:$0xff] }
 0x1cf   :  { %v1917_v52 = vmul.f32 %v11744_v12, %v8112_v43  ;;  %v8138_v11 = vsel %vm17_vm0, %v4136_v29, 0.0  ;;  %v4334_v30 = vmul.f32 %v4136_v29, %v4136_v29  ;;  %4533 = vst.msk [vmem:[#allocation3 + $0x710] sm:$0xff] %vm17_vm0, %v4136_v29  ;;  %v905_v9 = vadd.f32 %v841_v7, %v773_v25  ;;  %v2787_v39 = vld [vmem:[#allocation2 + $0x1e4] sm:$0xff] }
 0x1d0   :  { %11795 = vst [vmem:[#allocation31_spill] sm:$0xff] %v8138_v11  ;;  %v1450_v55 = vmul.f32 %v11741_v36, %v8031_v58  ;;  %v778_v28 = vadd.f32 %v714_v0, %v570_v38  ;;  %v1641_v13 = vadd.f32 %v1577_v37, %v1445_v24  ;;  %v1582_v20 = vmul.f32 %v11742_v5, %v8127_v44  ;;  %v8159_v11 = vld [vmem:[#allocation2 + $0x22c] sm:$0xff] }
 0x1d1   :  { %v1790_v23 = vmul.f32 %v11743_v26, %v8038_v8  ;;  %v8150_v35 = vsel %vm17_vm0, %v4334_v30, 0.0  ;;  %v1001_v7 = vsel %vm17_vm0, %v905_v9, 0.0  ;;  %v1103_v29 = vmul.f32 %v905_v9, %v905_v9  ;;  %1301 = vst.msk [vmem:[#allocation3 + $0x108] sm:$0xff] %vm17_vm0, %v905_v9 }
 0x1d2   :  { %11796 = vst [vmem:[#allocation14_spill] sm:$0xff] %v8150_v35  ;;  %v1922_v0 = vmul.f32 %v11744_v12, %v8135_v19  ;;  %v8157_v25 = vadd.f32 %v1001_v7, %v8061_v14  ;;  %v910_v24 = vadd.f32 %v846_v2, %v778_v28  ;;  %v1849_v38 = vadd.f32 %v1785_v41, %v1641_v13 }
 0x1d3   :  { %v1646_v37 = vadd.f32 %v1582_v20, %v1450_v55  ;;  %v1199_v61 = vsel %vm17_vm0, %v1103_v29, 0.0  ;;  %v2521_v30 = vmul.f32 %v6545_v45, %v2447_v62  ;;  %v2653_v35 = vmul.f32 %v6550_v47, %v8147_v54 }
 0x1d4   :  { %v2861_v9 = vmul.f32 %v6555_v6, %v2787_v39  ;;  %v8170_v14 = vadd.f32 %v1199_v61, %v8078_v63  ;;  %v8173_v2 = vsel %vm17_vm0, %v910_v24, 0.0  ;;  %v1108_v41 = vmul.f32 %v910_v24, %v910_v24  ;;  %1306 = vst.msk [vmem:[#allocation3 + $0x130] sm:$0xff] %vm17_vm0, %v910_v24 }
 0x1d5   :  { %11797 = vst [vmem:[#allocation15_spill] sm:$0xff] %v8173_v2  ;;  %v1981_v55 = vadd.f32 %v1917_v52, %v1849_v38  ;;  %v1854_v28 = vadd.f32 %v1790_v23, %v1646_v37  ;;  %v2717_v13 = vadd.f32 %v2653_v35, %v2521_v30  ;;  %v2993_v20 = vmul.f32 %v6563_v33, %v8159_v11  ;;  %v3524_v37 = vld [vmem:[#allocation2 + $0x1e0] sm:$0xff]  ;;  %v8350_v2 = vld [vmem:[#allocation2 + $0x270] sm:$0xff] }
 0x1d6   :  { %v2524_v62 = vmul.f32 %v6545_v45, %v8063_v32  ;;  %v8182_v63 = vsel %vm17_vm0, %v1108_v41, 0.0  ;;  %v2656_v52 = vmul.f32 %v6550_v47, %v8065_v15  ;;  %v2864_v7 = vmul.f32 %v6555_v6, %v8073_v27  ;;  %11811 = vst [vmem:[#allocation28_spill] sm:$0xff] %v8350_v2 }
 0x1d7   :  { %11798 = vst [vmem:[#allocation16_spill] sm:$0xff] %v8182_v63  ;;  %v2077_v61 = vsel %vm17_vm0, %v1981_v55, 0.0  ;;  %v2179_v39 = vmul.f32 %v1981_v55, %v1981_v55  ;;  %2378 = vst.msk [vmem:[#allocation3 + $0x308] sm:$0xff] %vm17_vm0, %v1981_v55  ;;  %v1986_v23 = vadd.f32 %v1922_v0, %v1854_v28  ;;  %v2925_v35 = vadd.f32 %v2861_v9, %v2717_v13  ;;  %v8205_v9 = vld [vmem:[#allocation2 + $0x228] sm:$0xff] }
 0x1d8   :  { %v8189_v59 = vadd.f32 %v2077_v61, %v8085_v49  ;;  %v2720_v29 = vadd.f32 %v2656_v52, %v2524_v62  ;;  %v2996_v24 = vmul.f32 %v6563_v33, %v8082_v53  ;;  %v2529_v38 = vmul.f32 %v6545_v45, %v8011_v34  ;;  %v3864_v28 = vld [vmem:[#allocation2 + $0x1e3] sm:$0xff]  ;;  %v8213_v13 = vld [vmem:[#allocation2 + $0x22b] sm:$0xff] }
 0x1d9   :  { %v2275_v32 = vsel %vm17_vm0, %v2179_v39, 0.0  ;;  %v8202_v49 = vsel %vm17_vm0, %v1986_v23, 0.0  ;;  %v2184_v0 = vmul.f32 %v1986_v23, %v1986_v23  ;;  %2383 = vst.msk [vmem:[#allocation3 + $0x330] sm:$0xff] %vm17_vm0, %v1986_v23  ;;  %v3057_v27 = vadd.f32 %v2993_v20, %v2925_v35 }
 0x1da   :  { %v8199_v30 = vadd.f32 %v2275_v32, %v8104_v40  ;;  %11799 = vst [vmem:[#allocation17_spill] sm:$0xff] %v8202_v49  ;;  %v2928_v41 = vadd.f32 %v2864_v7, %v2720_v29  ;;  %v2661_v55 = vmul.f32 %v6550_v47, %v8091_v3  ;;  %v2869_v34 = vmul.f32 %v6555_v6, %v8029_v48 }
 0x1db   :  { %v3001_v40 = vmul.f32 %v6563_v33, %v8100_v50  ;;  %v8216_v62 = vsel %vm17_vm0, %v2184_v0, 0.0  ;;  %v3152_v20 = vsel %vm17_vm0, %v3057_v27, 0.0  ;;  %v3255_v61 = vmul.f32 %v3057_v27, %v3057_v27  ;;  %3454 = vst.msk [vmem:[#allocation3 + $0x500] sm:$0xff] %vm17_vm0, %v3057_v27 }
 0x1dc   :  { %11800 = vst [vmem:[#allocation18_spill] sm:$0xff] %v8216_v62  ;;  %v3598_v39 = vmul.f32 %v6697_v31, %v3524_v37  ;;  %v8222_v3 = vadd.f32 %v3152_v20, %v7982_v16  ;;  %v3060_v48 = vadd.f32 %v2996_v24, %v2928_v41  ;;  %v2725_v52 = vadd.f32 %v2661_v55, %v2529_v38  ;;  %v8245_v41 = vld [vmem:[#allocation2 + $0x211] sm:$0xff] }
 0x1dd   :  { %v3730_v50 = vmul.f32 %v6701_v17, %v8205_v9  ;;  %v3350_v23 = vsel %vm17_vm0, %v3255_v61, 0.0  ;;  %v3938_v35 = vmul.f32 %v6706_v42, %v3864_v28  ;;  %v4070_v7 = vmul.f32 %v6718_v51, %v8213_v13  ;;  %v8259_v61 = vld [vmem:[#allocation2 + $0x214] sm:$0xff] }
 0x1de   :  { %v3601_v32 = vmul.f32 %v6697_v31, %v8102_v4  ;;  %v8233_v29 = vadd.f32 %v3350_v23, %v7989_v18  ;;  %v8236_v16 = vsel %vm17_vm0, %v3060_v48, 0.0  ;;  %v3258_v24 = vmul.f32 %v3060_v48, %v3060_v48  ;;  %3457 = vst.msk [vmem:[#allocation3 + $0x518] sm:$0xff] %vm17_vm0, %v3060_v48  ;;  %v181_v18 = vld [vmem:[%s11496_s0 + $0x1c0] sm:$0xff] }
 0x1df   :  { %v2933_v38 = vadd.f32 %v2869_v34, %v2725_v52  ;;  %v3794_v37 = vadd.f32 %v3730_v50, %v3598_v39  ;;  %v3733_v0 = vmul.f32 %v6701_v17, %v8108_v1  ;;  %v3941_v27 = vmul.f32 %v6706_v42, %v8110_v22  ;;  %v8257_v22 = vld [vmem:[#allocation2 + $0x259] sm:$0xff]  ;;  %246 = vst.msk [vmem:[#allocation2 + $0x332] sm:$0xff] %vm17_vm0, %v181_v18 }
 0x1e0   :  { %v4073_v4 = vmul.f32 %v6718_v51, %v8112_v43  ;;  %v8251_v55 = vsel %vm17_vm0, %v3258_v24, 0.0  ;;  %v3606_v28 = vmul.f32 %v6697_v31, %v8031_v58  ;;  %v3738_v20 = vmul.f32 %v6701_v17, %v8127_v44  ;;  %v8266_v50 = vld [vmem:[#allocation2 + $0x25c] sm:$0xff] }
 0x1e1   :  { %v3065_v34 = vadd.f32 %v3001_v40, %v2933_v38  ;;  %v4002_v39 = vadd.f32 %v3938_v35, %v3794_v37  ;;  %v3797_v48 = vadd.f32 %v3733_v0, %v3601_v32  ;;  %v3946_v52 = vmul.f32 %v6706_v42, %v8038_v8  ;;  %v8278_v38 = vld [vmem:[#allocation2 + $0x271] sm:$0xff] }
 0x1e2   :  { %v4078_v40 = vmul.f32 %v6718_v51, %v8135_v19  ;;  %v3802_v23 = vadd.f32 %v3738_v20, %v3606_v28  ;;  %v370_v24 = vmul.f32 %v11737_v60, %v8245_v41  ;;  %v502_v8 = vmul.f32 %v11738_v56, %v8257_v22  ;;  %11802 = vst [vmem:[#allocation33_spill] sm:$0xff] %v8278_v38 }
 0x1e3   :  { %v8269_v58 = vsel %vm17_vm0, %v3065_v34, 0.0  ;;  %v3263_v44 = vmul.f32 %v3065_v34, %v3065_v34  ;;  %3462 = vst.msk [vmem:[#allocation3 + $0x540] sm:$0xff] %vm17_vm0, %v3065_v34  ;;  %v4134_v35 = vadd.f32 %v4070_v7, %v4002_v39  ;;  %v4005_v32 = vadd.f32 %v3941_v27, %v3797_v48 }
 0x1e4   :  { %11801 = vst [vmem:[#allocation30_spill] sm:$0xff] %v8269_v58  ;;  %v710_v19 = vmul.f32 %v11739_v46, %v8259_v61  ;;  %v4010_v0 = vadd.f32 %v3946_v52, %v3802_v23  ;;  %v842_v18 = vmul.f32 %v11740_v21, %v8266_v50  ;;  %v372_v34 = vmul.f32 %v8147_v54, %v11737_v60 }
 0x1e5   :  { %v8281_v37 = vsel %vm17_vm0, %v3263_v44, 0.0  ;;  %v4229_v7 = vsel %vm17_vm0, %v4134_v35, 0.0  ;;  %v4332_v27 = vmul.f32 %v4134_v35, %v4134_v35  ;;  %4531 = vst.msk [vmem:[#allocation3 + $0x700] sm:$0xff] %vm17_vm0, %v4134_v35  ;;  %v4137_v28 = vadd.f32 %v4073_v4, %v4005_v32  ;;  %v8294_v44 = vld [vmem:[#allocation2 + $0x274] sm:$0xff] }
 0x1e6   :  { %11803 = vst [vmem:[#allocation19_spill] sm:$0xff] %v8281_v37  ;;  %v566_v20 = vadd.f32 %v502_v8, %v370_v24  ;;  %v8290_v39 = vadd.f32 %v4229_v7, %v8001_v57  ;;  %v4142_v48 = vadd.f32 %v4078_v40, %v4010_v0  ;;  %v504_v52 = vmul.f32 %v11738_v56, %v8278_v38  ;;  %v8303_v57 = vld [vmem:[#allocation2 + $0x291] sm:$0xff] }
 0x1e7   :  { %11804 = vst [vmem:[#allocation20_spill] sm:$0xff] %v8294_v44  ;;  %v712_v23 = vmul.f32 %v8159_v11, %v11739_v46  ;;  %v4427_v37 = vsel %vm17_vm0, %v4332_v27, 0.0  ;;  %v8300_v58 = vsel %vm17_vm0, %v4137_v28, 0.0  ;;  %v4335_v35 = vmul.f32 %v4137_v28, %v4137_v28  ;;  %4534 = vst.msk [vmem:[#allocation3 + $0x718] sm:$0xff] %vm17_vm0, %v4137_v28  ;;  %v8312_v0 = vld [vmem:[#allocation2 + $0x294] sm:$0xff] }
 0x1e8   :  { %11805 = vst [vmem:[#allocation21_spill] sm:$0xff] %v8300_v58  ;;  %v774_v4 = vadd.f32 %v710_v19, %v566_v20  ;;  %v8306_v40 = vadd.f32 %v4427_v37, %v8009_v10  ;;  %v8309_v24 = vsel %vm17_vm0, %v4142_v48, 0.0  ;;  %v4340_v32 = vmul.f32 %v4142_v48, %v4142_v48  ;;  %4539 = vst.msk [vmem:[#allocation3 + $0x740] sm:$0xff] %vm17_vm0, %v4142_v48  ;;  %v8314_v7 = vld [vmem:[#allocation2 + $0x210] sm:$0xff]  ;;  %v8323_v37 = vld [vmem:[#allocation2 + $0x258] sm:$0xff] }
 0x1e9   :  { %11807 = vst [vmem:[#allocation23_spill] sm:$0xff] %v8309_v24  ;;  %v568_v8 = vadd.f32 %v504_v52, %v372_v34  ;;  %v8317_v27 = vsel %vm17_vm0, %v4335_v35, 0.0  ;;  %v844_v28 = vmul.f32 %v11740_v21, %v8294_v44  ;;  %v375_v10 = vmul.f32 %v11737_v60, %v8065_v15  ;;  %v8332_v35 = vld [vmem:[#allocation2 + $0x213] sm:$0xff] }
 0x1ea   :  { %11806 = vst [vmem:[#allocation22_spill] sm:$0xff] %v8306_v40  ;;  %11808 = vst [vmem:[#allocation24_spill] sm:$0xff] %v8317_v27  ;;  %v906_v19 = vadd.f32 %v842_v18, %v774_v4  ;;  %v8326_v20 = vsel %vm17_vm0, %v4340_v32, 0.0  ;;  %v507_v48 = vmul.f32 %v11738_v56, %v8303_v57  ;;  %v715_v52 = vmul.f32 %v11739_v46, %v8082_v53  ;;  %v8334_v18 = vld [vmem:[#allocation2 + $0x25b] sm:$0xff] }
 0x1eb   :  { %11809 = vst [vmem:[#allocation25_spill] sm:$0xff] %v8326_v20  ;;  %v776_v34 = vadd.f32 %v712_v23, %v568_v8  ;;  %v847_v32 = vmul.f32 %v11740_v21, %v8312_v0  ;;  %v1446_v23 = vmul.f32 %v11741_v36, %v8314_v7  ;;  %v182_v8 = vld [vmem:[%s11496_s0 + $0x1c8] sm:$0xff]  ;;  %v1578_v63 = vmul.f32 %v11742_v5, %v8323_v37 }
 0x1ec   :  { %v1003_v4 = vsel %vm17_vm0, %v906_v19, 0.0  ;;  %v1104_v24 = vmul.f32 %v906_v19, %v906_v19  ;;  %1302 = vst.msk [vmem:[#allocation3 + $0x110] sm:$0xff] %vm17_vm0, %v906_v19  ;;  %v571_v49 = vadd.f32 %v507_v48, %v375_v10  ;;  %v8352_v19 = vld [vmem:[#allocation2 + $0x273] sm:$0xff]  ;;  %247 = vst.msk [vmem:[#allocation2 + $0x33a] sm:$0xff] %vm17_vm0, %v182_v8  ;;  %v1786_v21 = vmul.f32 %v11743_v26, %v8332_v35 }
 0x1ed   :  { %v8346_v20 = vadd.f32 %v1003_v4, %v8157_v25  ;;  %v908_v62 = vadd.f32 %v844_v28, %v776_v34  ;;  %11812 = vst [vmem:[#allocation29_spill] sm:$0xff] %v8352_v19  ;;  %v1918_v25 = vmul.f32 %v11744_v12, %v8334_v18  ;;  %v1448_v28 = vmul.f32 %v8205_v9, %v11741_v36  ;;  %v8362_v10 = vld [vmem:[#allocation2 + $0x290] sm:$0xff] }
 0x1ee   :  { %v1201_v27 = vsel %vm17_vm0, %v1104_v24, 0.0  ;;  %v779_v24 = vadd.f32 %v715_v52, %v571_v49  ;;  %v8371_v8 = vld [vmem:[#allocation2 + $0x293] sm:$0xff]  ;;  %v1580_v58 = vmul.f32 %v11742_v5, %v8350_v2  ;;  %v1788_v46 = vmul.f32 %v8213_v13, %v11743_v26 }
 0x1ef   :  { %11810 = vst [vmem:[#allocation27_spill] sm:$0xff] %v8346_v20  ;;  %v8365_v34 = vadd.f32 %v1201_v27, %v8170_v14  ;;  %v8368_v48 = vsel %vm17_vm0, %v908_v62, 0.0  ;;  %v1106_v4 = vmul.f32 %v908_v62, %v908_v62  ;;  %1304 = vst.msk [vmem:[#allocation3 + $0x120] sm:$0xff] %vm17_vm0, %v908_v62  ;;  %v1642_v20 = vadd.f32 %v1578_v63, %v1446_v23  ;;  %v2448_v27 = vld [vmem:[#allocation2 + $0x1e9] sm:$0xff]  ;;  %v8386_v62 = vld [vmem:[#allocation2 + $0x231] sm:$0xff] }
 0x1f0   :  { %11814 = vst [vmem:[#allocation34_spill] sm:$0xff] %v8368_v48  ;;  %v1920_v14 = vmul.f32 %v11744_v12, %v8352_v19  ;;  %v911_v48 = vadd.f32 %v847_v32, %v779_v24  ;;  %v1451_v49 = vmul.f32 %v11741_v36, %v8108_v1  ;;  %v1583_v63 = vmul.f32 %v11742_v5, %v8362_v10  ;;  %v2788_v52 = vld [vmem:[#allocation2 + $0x1ec] sm:$0xff] }
 0x1f1   :  { %11813 = vst [vmem:[#allocation32_spill] sm:$0xff] %v8365_v34  ;;  %v8380_v34 = vsel %vm17_vm0, %v1106_v4, 0.0  ;;  %v1850_v23 = vadd.f32 %v1786_v21, %v1642_v20  ;;  %v1644_v56 = vadd.f32 %v1580_v58, %v1448_v28  ;;  %v1791_v40 = vmul.f32 %v11743_v26, %v8112_v43  ;;  %v8392_v4 = vld [vmem:[#allocation2 + $0x234] sm:$0xff] }
 0x1f2   :  { %11815 = vst [vmem:[#allocation35_spill] sm:$0xff] %v8380_v34  ;;  %v1923_v60 = vmul.f32 %v11744_v12, %v8371_v8  ;;  %v8395_v32 = vsel %vm17_vm0, %v911_v48, 0.0  ;;  %v1109_v24 = vmul.f32 %v911_v48, %v911_v48  ;;  %1307 = vst.msk [vmem:[#allocation3 + $0x138] sm:$0xff] %vm17_vm0, %v911_v48  ;;  %v1647_v34 = vadd.f32 %v1583_v63, %v1451_v49 }
 0x1f3   :  { %11816 = vst [vmem:[#allocation36_spill] sm:$0xff] %v8395_v32  ;;  %v2522_v5 = vmul.f32 %v6545_v45, %v2448_v27  ;;  %v1982_v36 = vadd.f32 %v1918_v25, %v1850_v23  ;;  %v1852_v21 = vadd.f32 %v1788_v46, %v1644_v56  ;;  %v2654_v58 = vmul.f32 %v6550_v47, %v8386_v62 }
 0x1f4   :  { %v2862_v20 = vmul.f32 %v6555_v6, %v2788_v52  ;;  %v8403_v28 = vsel %vm17_vm0, %v1109_v24, 0.0  ;;  %v1855_v12 = vadd.f32 %v1791_v40, %v1647_v34  ;;  %v2994_v32 = vmul.f32 %v6563_v33, %v8392_v4 }
 0x1f5   :  { %v2525_v48 = vmul.f32 %v6545_v45, %v8245_v41  ;;  %v2079_v49 = vsel %vm17_vm0, %v1982_v36, 0.0  ;;  %v2180_v27 = vmul.f32 %v1982_v36, %v1982_v36  ;;  %2379 = vst.msk [vmem:[#allocation3 + $0x310] sm:$0xff] %vm17_vm0, %v1982_v36  ;;  %v1984_v56 = vadd.f32 %v1920_v14, %v1852_v21 }
 0x1f6   :  { %v2718_v46 = vadd.f32 %v2654_v58, %v2522_v5  ;;  %v8412_v25 = vadd.f32 %v2079_v49, %v8189_v59  ;;  %v1987_v63 = vadd.f32 %v1923_v60, %v1855_v12  ;;  %v2657_v40 = vmul.f32 %v6550_v47, %v8257_v22  ;;  %v183_v5 = vld [vmem:[%s11496_s0 + $0x1d0] sm:$0xff] }
 0x1f7   :  { %v2865_v34 = vmul.f32 %v6555_v6, %v8259_v61  ;;  %v2277_v52 = vsel %vm17_vm0, %v2180_v27, 0.0  ;;  %v8420_v41 = vsel %vm17_vm0, %v1984_v56, 0.0  ;;  %v2182_v23 = vmul.f32 %v1984_v56, %v1984_v56  ;;  %2381 = vst.msk [vmem:[#allocation3 + $0x320] sm:$0xff] %vm17_vm0, %v1984_v56  ;;  %248 = vst.msk [vmem:[#allocation2 + $0x34a] sm:$0xff] %vm17_vm0, %v183_v5  ;;  %v3525_v27 = vld [vmem:[#allocation2 + $0x1e8] sm:$0xff] }
 0x1f8   :  { %v2926_v36 = vadd.f32 %v2862_v20, %v2718_v46  ;;  %v8427_v60 = vadd.f32 %v2277_v52, %v8199_v30  ;;  %v8430_v12 = vsel %vm17_vm0, %v1987_v63, 0.0  ;;  %v2185_v59 = vmul.f32 %v1987_v63, %v1987_v63  ;;  %2384 = vst.msk [vmem:[#allocation3 + $0x338] sm:$0xff] %vm17_vm0, %v1987_v63 }
 0x1f9   :  { %v2721_v61 = vadd.f32 %v2657_v40, %v2525_v48  ;;  %v8435_v14 = vsel %vm17_vm0, %v2182_v23, 0.0  ;;  %v2997_v21 = vmul.f32 %v6563_v33, %v8266_v50  ;;  %v2527_v30 = vmul.f32 %v6545_v45, %v8147_v54  ;;  %v3865_v23 = vld [vmem:[#allocation2 + $0x1eb] sm:$0xff] }
 0x1fa   :  { %v3058_v24 = vadd.f32 %v2994_v32, %v2926_v36  ;;  %v8442_v58 = vsel %vm17_vm0, %v2185_v59, 0.0  ;;  %v2659_v49 = vmul.f32 %v6550_v47, %v8278_v38  ;;  %v2867_v48 = vmul.f32 %v6555_v6, %v8159_v11  ;;  %v8457_v11 = vld [vmem:[#allocation2 + $0x230] sm:$0xff]  ;;  %v11835_v38 = vld [vmem:[#allocation24_spill] sm:$0xff] }
 0x1fb   :  { %v2929_v20 = vadd.f32 %v2865_v34, %v2721_v61  ;;  %v2999_v46 = vmul.f32 %v6563_v33, %v8294_v44  ;;  %v2530_v54 = vmul.f32 %v6545_v45, %v8065_v15  ;;  %v2662_v52 = vmul.f32 %v6550_v47, %v8303_v57  ;;  %11817 = vst [vmem:[#allocation37_spill] sm:$0xff] %v8457_v11  ;;  %v8465_v61 = vld [vmem:[#allocation2 + $0x233] sm:$0xff] }
 0x1fc   :  { %v3154_v56 = vsel %vm17_vm0, %v3058_v24, 0.0  ;;  %v3256_v32 = vmul.f32 %v3058_v24, %v3058_v24  ;;  %3455 = vst.msk [vmem:[#allocation3 + $0x508] sm:$0xff] %vm17_vm0, %v3058_v24  ;;  %v2723_v34 = vadd.f32 %v2659_v49, %v2527_v30  ;;  %v2870_v5 = vmul.f32 %v6555_v6, %v8082_v53  ;;  %11818 = vst [vmem:[#allocation38_spill] sm:$0xff] %v8465_v61 }
 0x1fd   :  { %v3155_v63 = vadd.f32 %v3154_v56, %v8222_v3  ;;  %v3061_v40 = vadd.f32 %v2997_v21, %v2929_v20  ;;  %v3002_v59 = vmul.f32 %v6563_v33, %v8312_v0  ;;  %v3599_v15 = vmul.f32 %v6697_v31, %v3525_v27  ;;  %v11819_v3 = vld [vmem:[#allocation11_spill] sm:$0xff]  ;;  %v11820_v56 = vld [vmem:[#allocation26_spill] sm:$0xff] }
 0x1fe   :  { %v3352_v36 = vsel %vm17_vm0, %v3256_v32, 0.0  ;;  %v2931_v20 = vadd.f32 %v2867_v48, %v2723_v34  ;;  %v2726_v49 = vadd.f32 %v2662_v52, %v2530_v54  ;;  %v3731_v53 = vmul.f32 %v6701_v17, %v8457_v11 }
 0x1ff   :  { %v3157_v24 = vadd.f32 %v11819_v3, %v3155_v63  ;;  %v3353_v21 = vadd.f32 %v3352_v36, %v8233_v29  ;;  %v3160_v57 = vsel %vm17_vm0, %v3061_v40, 0.0  ;;  %v3259_v30 = vmul.f32 %v3061_v40, %v3061_v40  ;;  %3458 = vst.msk [vmem:[#allocation3 + $0x520] sm:$0xff] %vm17_vm0, %v3061_v40 }
 0x200   :  { %v3939_v0 = vmul.f32 %v6706_v42, %v3865_v23  ;;  %v4071_v29 = vmul.f32 %v6718_v51, %v8465_v61  ;;  %v3063_v36 = vadd.f32 %v2999_v46, %v2931_v20  ;;  %v2934_v3 = vadd.f32 %v2870_v5, %v2726_v49 }
 0x201   :  { %v3355_v27 = vadd.f32 %v11820_v56, %v3353_v21  ;;  %v3159_v32 = vadd.f32 %v8236_v16, %v3157_v24  ;;  %v3358_v63 = vsel %vm17_vm0, %v3259_v30, 0.0  ;;  %v3795_v44 = vadd.f32 %v3731_v53, %v3599_v15  ;;  %v8515_v53 = vld [vmem:[#allocation2 + $0x219] sm:$0xff] }
 0x202   :  { %v3602_v48 = vmul.f32 %v6697_v31, %v8314_v7  ;;  %v3734_v34 = vmul.f32 %v6701_v17, %v8323_v37  ;;  %v3942_v16 = vmul.f32 %v6706_v42, %v8332_v35  ;;  %v8489_v52 = vsel %vm17_vm0, %v3063_v36, 0.0  ;;  %3460 = vst.msk [vmem:[#allocation3 + $0x530] sm:$0xff] %vm17_vm0, %v3063_v36  ;;  %v184_v7 = vld [vmem:[%s11496_s0 + $0x1d8] sm:$0xff] }
 0x203   :  { %v8481_v54 = vadd.f32 %v3160_v57, %v3159_v32  ;;  %v3357_v40 = vadd.f32 %v8251_v55, %v3355_v27  ;;  %11821 = vst [vmem:[#allocation11_spill] sm:$0xff] %v8489_v52  ;;  %v3261_v23 = vmul.f32 %v3063_v36, %v3063_v36  ;;  %v3066_v46 = vadd.f32 %v3002_v59, %v2934_v3  ;;  %v8527_v3 = vld [vmem:[#allocation2 + $0x261] sm:$0xff] }
 0x204   :  { %v4003_v5 = vadd.f32 %v3939_v0, %v3795_v44  ;;  %v3798_v55 = vadd.f32 %v3734_v34, %v3602_v48  ;;  %v4074_v24 = vmul.f32 %v6718_v51, %v8334_v18  ;;  %v3604_v35 = vmul.f32 %v6697_v31, %v8205_v9  ;;  %249 = vst.msk [vmem:[#allocation2 + $0x352] sm:$0xff] %vm17_vm0, %v184_v7  ;;  %v8529_v48 = vld [vmem:[#allocation2 + $0x21c] sm:$0xff] }
 0x205   :  { %v8495_v15 = vadd.f32 %v3358_v63, %v3357_v40  ;;  %v8503_v21 = vsel %vm17_vm0, %v3261_v23, 0.0  ;;  %v8506_v44 = vsel %vm17_vm0, %v3066_v46, 0.0  ;;  %v3264_v59 = vmul.f32 %v3066_v46, %v3066_v46  ;;  %3463 = vst.msk [vmem:[#allocation3 + $0x548] sm:$0xff] %vm17_vm0, %v3066_v46  ;;  %v8538_v23 = vld [vmem:[#allocation2 + $0x264] sm:$0xff]  ;;  %v11827_v46 = vld [vmem:[#allocation31_spill] sm:$0xff] }
 0x206   :  { %11823 = vst [vmem:[#allocation39_spill] sm:$0xff] %v8503_v21  ;;  %11824 = vst [vmem:[#allocation40_spill] sm:$0xff] %v8506_v44  ;;  %v4135_v57 = vadd.f32 %v4071_v29, %v4003_v5  ;;  %v4006_v30 = vadd.f32 %v3942_v16, %v3798_v55  ;;  %v3736_v20 = vmul.f32 %v6701_v17, %v8350_v2  ;;  %v8624_v44 = vld [vmem:[#allocation2 + $0x27b] sm:$0xff] }
 0x207   :  { %11822 = vst [vmem:[#allocation26_spill] sm:$0xff] %v8495_v15  ;;  %v3944_v49 = vmul.f32 %v6706_v42, %v8213_v13  ;;  %v4076_v9 = vmul.f32 %v6718_v51, %v8352_v19  ;;  %v8518_v0 = vsel %vm17_vm0, %v3264_v59, 0.0  ;;  %v3607_v32 = vmul.f32 %v6697_v31, %v8108_v1  ;;  %v11826_v1 = vld [vmem:[#allocation5_spill] sm:$0xff] }
 0x208   :  { %11825 = vst [vmem:[#allocation41_spill] sm:$0xff] %v8518_v0  ;;  %v4231_v56 = vsel %vm17_vm0, %v4135_v57, 0.0  ;;  %v4333_v27 = vmul.f32 %v4135_v57, %v4135_v57  ;;  %4532 = vst.msk [vmem:[#allocation3 + $0x708] sm:$0xff] %vm17_vm0, %v4135_v57  ;;  %v4138_v29 = vadd.f32 %v4074_v24, %v4006_v30  ;;  %v3800_v13 = vadd.f32 %v3736_v20, %v3604_v35  ;;  %v8548_v20 = vld [vmem:[#allocation2 + $0x279] sm:$0xff] }
 0x209   :  { %v4232_v63 = vadd.f32 %v4231_v56, %v8290_v39  ;;  %v3739_v36 = vmul.f32 %v6701_v17, %v8362_v10  ;;  %v3947_v34 = vmul.f32 %v6706_v42, %v8112_v43  ;;  %v4079_v16 = vmul.f32 %v6718_v51, %v8371_v8  ;;  %v11828_v10 = vld [vmem:[#allocation22_spill] sm:$0xff]  ;;  %v11830_v8 = vld [vmem:[#allocation7_spill] sm:$0xff] }
 0x20a   :  { %v4429_v40 = vsel %vm17_vm0, %v4333_v27, 0.0  ;;  %v371_v39 = vmul.f32 %v11826_v1, %v8515_v53  ;;  %v4237_v55 = vsel %vm17_vm0, %v4138_v29, 0.0  ;;  %v4336_v24 = vmul.f32 %v4138_v29, %v4138_v29  ;;  %4535 = vst.msk [vmem:[#allocation3 + $0x720] sm:$0xff] %vm17_vm0, %v4138_v29  ;;  %v11829_v43 = vld [vmem:[#allocation6_spill] sm:$0xff]  ;;  %v11848_v51 = vld [vmem:[#allocation35_spill] sm:$0xff] }
 0x20b   :  { %v4234_v5 = vadd.f32 %v11827_v46, %v4232_v63  ;;  %v4430_v7 = vadd.f32 %v4429_v40, %v11828_v10  ;;  %v4008_v35 = vadd.f32 %v3944_v49, %v3800_v13  ;;  %v3803_v59 = vadd.f32 %v3739_v36, %v3607_v32  ;;  %v11831_v56 = vld [vmem:[#allocation14_spill] sm:$0xff]  ;;  %v11832_v63 = vld [vmem:[#allocation21_spill] sm:$0xff]  ;;  %v11833_v10 = vld [vmem:[#allocation8_spill] sm:$0xff] }
 0x20c   :  { %v503_v57 = vmul.f32 %v11829_v43, %v8527_v3  ;;  %v711_v30 = vmul.f32 %v11830_v8, %v8529_v48  ;;  %v4435_v40 = vsel %vm17_vm0, %v4336_v24, 0.0  ;;  %v843_v19 = vmul.f32 %v11833_v10, %v8538_v23  ;;  %v8557_v36 = vld [vmem:[#allocation2 + $0x27c] sm:$0xff] }
 0x20d   :  { %v4432_v27 = vadd.f32 %v11831_v56, %v4430_v7  ;;  %v4236_v46 = vadd.f32 %v11832_v63, %v4234_v5  ;;  %v4140_v29 = vadd.f32 %v4076_v9, %v4008_v35  ;;  %v4011_v49 = vadd.f32 %v3947_v34, %v3803_v59  ;;  %v8570_v35 = vld [vmem:[#allocation2 + $0x2a1] sm:$0xff]  ;;  %v8583_v63 = vld [vmem:[#allocation2 + $0x218] sm:$0xff] }
 0x20e   :  { %v567_v32 = vadd.f32 %v503_v57, %v371_v39  ;;  %v373_v13 = vmul.f32 %v8386_v62, %v11826_v1  ;;  %v505_v5 = vmul.f32 %v11829_v43, %v8548_v20  ;;  %v713_v7 = vmul.f32 %v8392_v4, %v11830_v8 }
 0x20f   :  { %v8559_v2 = vadd.f32 %v4237_v55, %v4236_v46  ;;  %v4434_v0 = vadd.f32 %v11835_v38, %v4432_v27  ;;  %v8567_v24 = vsel %vm17_vm0, %v4140_v29, 0.0  ;;  %v4338_v9 = vmul.f32 %v4140_v29, %v4140_v29  ;;  %4537 = vst.msk [vmem:[#allocation3 + $0x730] sm:$0xff] %vm17_vm0, %v4140_v29  ;;  %v8572_v55 = vld [vmem:[#allocation2 + $0x2a4] sm:$0xff] }
 0x210   :  { %11836 = vst [vmem:[#allocation22_spill] sm:$0xff] %v8567_v24  ;;  %v4143_v34 = vadd.f32 %v4079_v16, %v4011_v49  ;;  %v775_v39 = vadd.f32 %v711_v30, %v567_v32  ;;  %v185_v38 = vld [vmem:[%s11496_s0 + $0x1e0] sm:$0xff]  ;;  %v569_v57 = vadd.f32 %v505_v5, %v373_v13  ;;  %v845_v56 = vmul.f32 %v11833_v10, %v8557_v36 }
 0x211   :  { %11834 = vst [vmem:[#allocation31_spill] sm:$0xff] %v8559_v2  ;;  %v8577_v59 = vadd.f32 %v4435_v40, %v4434_v0  ;;  %v376_v27 = vmul.f32 %v11826_v1, %v8257_v22  ;;  %250 = vst.msk [vmem:[#allocation2 + $0x362] sm:$0xff] %vm17_vm0, %v185_v38  ;;  %v8587_v16 = vsel %vm17_vm0, %v4338_v9, 0.0  ;;  %v8593_v40 = vld [vmem:[#allocation2 + $0x260] sm:$0xff]  ;;  %v508_v49 = vmul.f32 %v11829_v43, %v8570_v35  ;;  %v8615_v1 = vld [vmem:[#allocation2 + $0x278] sm:$0xff] }
 0x212   :  { %11838 = vst [vmem:[#allocation21_spill] sm:$0xff] %v8587_v16  ;;  %v8590_v30 = vsel %vm17_vm0, %v4143_v34, 0.0  ;;  %v4341_v46 = vmul.f32 %v4143_v34, %v4143_v34  ;;  %4540 = vst.msk [vmem:[#allocation3 + $0x748] sm:$0xff] %vm17_vm0, %v4143_v34  ;;  %v907_v0 = vadd.f32 %v843_v19, %v775_v39  ;;  %v777_v29 = vadd.f32 %v713_v7, %v569_v57  ;;  %v8601_v5 = vld [vmem:[#allocation2 + $0x21b] sm:$0xff]  ;;  %v8603_v9 = vld [vmem:[#allocation2 + $0x263] sm:$0xff] }
 0x213   :  { %11837 = vst [vmem:[#allocation14_spill] sm:$0xff] %v8577_v59  ;;  %11839 = vst [vmem:[#allocation24_spill] sm:$0xff] %v8590_v30  ;;  %v716_v32 = vmul.f32 %v11830_v8, %v8266_v50  ;;  %v848_v13 = vmul.f32 %v11833_v10, %v8572_v55  ;;  %v11841_v7 = vld [vmem:[#allocation9_spill] sm:$0xff]  ;;  %v11842_v57 = vld [vmem:[#allocation27_spill] sm:$0xff]  ;;  %v572_v16 = vadd.f32 %v508_v49, %v376_v27 }
 0x214   :  { %v8606_v38 = vsel %vm17_vm0, %v4341_v46, 0.0  ;;  %v1005_v19 = vsel %vm17_vm0, %v907_v0, 0.0  ;;  %v1105_v34 = vmul.f32 %v907_v0, %v907_v0  ;;  %1303 = vst.msk [vmem:[#allocation3 + $0x118] sm:$0xff] %vm17_vm0, %v907_v0  ;;  %v1447_v39 = vmul.f32 %v11841_v7, %v8583_v63  ;;  %v11843_v10 = vld [vmem:[#allocation10_spill] sm:$0xff]  ;;  %11844 = vst [vmem:[#allocation9_spill] sm:$0xff] %v8615_v1  ;;  %v11845_v24 = vld [vmem:[#allocation12_spill] sm:$0xff] }
 0x215   :  { %11840 = vst [vmem:[#allocation42_spill] sm:$0xff] %v8606_v38  ;;  %v1006_v30 = vadd.f32 %v1005_v19, %v11842_v57  ;;  %v909_v8 = vadd.f32 %v845_v56, %v777_v29  ;;  %v1579_v43 = vmul.f32 %v11843_v10, %v8593_v40  ;;  %v1787_v38 = vmul.f32 %v11743_v26, %v8601_v5  ;;  %v11846_v56 = vld [vmem:[#allocation32_spill] sm:$0xff]  ;;  %v11847_v29 = vld [vmem:[#allocation34_spill] sm:$0xff] }
 0x216   :  { %v1203_v46 = vsel %vm17_vm0, %v1105_v34, 0.0  ;;  %v1919_v0 = vmul.f32 %v11845_v24, %v8603_v9  ;;  %v1449_v59 = vmul.f32 %v8457_v11, %v11841_v7  ;;  %v780_v34 = vadd.f32 %v716_v32, %v572_v16  ;;  %v8634_v11 = vld [vmem:[#allocation2 + $0x2a0] sm:$0xff] }
 0x217   :  { %v1204_v27 = vadd.f32 %v1203_v46, %v11846_v56  ;;  %v1008_v49 = vadd.f32 %v11847_v29, %v1006_v30  ;;  %v1009_v19 = vsel %vm17_vm0, %v909_v8, 0.0  ;;  %v1107_v57 = vmul.f32 %v909_v8, %v909_v8  ;;  %1305 = vst.msk [vmem:[#allocation3 + $0x128] sm:$0xff] %vm17_vm0, %v909_v8  ;;  %v8642_v32 = vld [vmem:[#allocation2 + $0x2a3] sm:$0xff] }
 0x218   :  { %v1643_v2 = vadd.f32 %v1579_v43, %v1447_v39  ;;  %v1581_v21 = vmul.f32 %v11843_v10, %v8615_v1  ;;  %v1789_v52 = vmul.f32 %v8465_v61, %v11743_v26  ;;  %v1921_v56 = vmul.f32 %v11845_v24, %v8624_v44  ;;  %v11849_v39 = vld [vmem:[#allocation15_spill] sm:$0xff] }
 0x219   :  { %v1010_v15 = vadd.f32 %v1009_v19, %v1008_v49  ;;  %v1206_v46 = vadd.f32 %v11848_v51, %v1204_v27  ;;  %v1207_v30 = vsel %vm17_vm0, %v1107_v57, 0.0  ;;  %v912_v29 = vadd.f32 %v848_v13, %v780_v34  ;;  %v11850_v13 = vld [vmem:[#allocation16_spill] sm:$0xff] }
 0x21a   :  { %v1851_v8 = vadd.f32 %v1787_v38, %v1643_v2  ;;  %v1645_v16 = vadd.f32 %v1581_v21, %v1449_v59  ;;  %v1452_v43 = vmul.f32 %v11841_v7, %v8323_v37  ;;  %v1584_v49 = vmul.f32 %v11843_v10, %v8634_v11  ;;  %v186_v59 = vld [vmem:[%s11496_s0 + $0x1e8] sm:$0xff]  ;;  %v11851_v38 = vld [vmem:[#allocation36_spill] sm:$0xff] }
 0x21b   :  { %v1012_v61 = vadd.f32 %v11849_v39, %v1010_v15  ;;  %v1208_v1 = vadd.f32 %v1207_v30, %v1206_v46  ;;  %v1792_v51 = vmul.f32 %v11743_v26, %v8334_v18  ;;  %v1015_v27 = vsel %vm17_vm0, %v912_v29, 0.0  ;;  %1308 = vst.msk [vmem:[#allocation3 + $0x140] sm:$0xff] %vm17_vm0, %v912_v29  ;;  %251 = vst.msk [vmem:[#allocation2 + $0x36a] sm:$0xff] %vm17_vm0, %v186_v59 }
 0x21c   :  { %v1110_v19 = vmul.f32 %v912_v29, %v912_v29  ;;  %v1983_v2 = vadd.f32 %v1919_v0, %v1851_v8  ;;  %v1853_v21 = vadd.f32 %v1789_v52, %v1645_v16  ;;  %v1648_v34 = vadd.f32 %v1584_v49, %v1452_v43 }
 0x21d   :  { %v1210_v15 = vadd.f32 %v11850_v13, %v1208_v1  ;;  %v1014_v57 = vadd.f32 %v11851_v38, %v1012_v61  ;;  %v1924_v46 = vmul.f32 %v11845_v24, %v8642_v32  ;;  %v2528_v38 = vmul.f32 %v6545_v45, %v8386_v62 }
 0x21e   :  { %v1213_v30 = vsel %vm17_vm0, %v1110_v19, 0.0  ;;  %v2081_v29 = vsel %vm17_vm0, %v1983_v2, 0.0  ;;  %v2181_v0 = vmul.f32 %v1983_v2, %v1983_v2  ;;  %2380 = vst.msk [vmem:[#allocation3 + $0x318] sm:$0xff] %vm17_vm0, %v1983_v2  ;;  %v1985_v52 = vadd.f32 %v1921_v56, %v1853_v21 }
 0x21f   :  { %v8662_v8 = vadd.f32 %v1015_v27, %v1014_v57  ;;  %v1212_v1 = vadd.f32 %v8403_v28, %v1210_v15  ;;  %v2082_v61 = vadd.f32 %v2081_v29, %v8412_v25  ;;  %v1856_v16 = vadd.f32 %v1792_v51, %v1648_v34  ;;  %v11852_v34 = vld [vmem:[#allocation17_spill] sm:$0xff] }
 0x220   :  { %v2279_v43 = vsel %vm17_vm0, %v2181_v0, 0.0  ;;  %v2085_v39 = vsel %vm17_vm0, %v1985_v52, 0.0  ;;  %v2183_v49 = vmul.f32 %v1985_v52, %v1985_v52  ;;  %2382 = vst.msk [vmem:[#allocation3 + $0x328] sm:$0xff] %vm17_vm0, %v1985_v52  ;;  %v2526_v19 = vmul.f32 %v6545_v45, %v8515_v53 }
 0x221   :  { %v8671_v59 = vadd.f32 %v1213_v30, %v1212_v1  ;;  %v2280_v56 = vadd.f32 %v2279_v43, %v8427_v60  ;;  %v2084_v27 = vadd.f32 %v8420_v41, %v2082_v61  ;;  %v1988_v28 = vadd.f32 %v1924_v46, %v1856_v16  ;;  %v11853_v61 = vld [vmem:[#allocation18_spill] sm:$0xff] }
 0x222   :  { %v2283_v25 = vsel %vm17_vm0, %v2183_v49, 0.0  ;;  %v2658_v51 = vmul.f32 %v6550_v47, %v8527_v3  ;;  %v2866_v2 = vmul.f32 %v6555_v6, %v8529_v48  ;;  %v2998_v21 = vmul.f32 %v6563_v33, %v8538_v23 }
 0x223   :  { %v2086_v13 = vadd.f32 %v2085_v39, %v2084_v27  ;;  %v2282_v53 = vadd.f32 %v8435_v14, %v2280_v56  ;;  %v2091_v15 = vsel %vm17_vm0, %v1988_v28, 0.0  ;;  %v2186_v60 = vmul.f32 %v1988_v28, %v1988_v28  ;;  %2385 = vst.msk [vmem:[#allocation3 + $0x340] sm:$0xff] %vm17_vm0, %v1988_v28 }
 0x224   :  { %v2722_v41 = vadd.f32 %v2658_v51, %v2526_v19  ;;  %v2660_v57 = vmul.f32 %v6550_v47, %v8548_v20  ;;  %v2868_v48 = vmul.f32 %v6555_v6, %v8392_v4  ;;  %v3000_v29 = vmul.f32 %v6563_v33, %v8557_v36 }
 0x225   :  { %v2088_v46 = vadd.f32 %v11852_v34, %v2086_v13  ;;  %v2284_v30 = vadd.f32 %v2283_v25, %v2282_v53  ;;  %v2289_v14 = vsel %vm17_vm0, %v2186_v60, 0.0  ;;  %v2531_v1 = vmul.f32 %v6545_v45, %v8257_v22  ;;  %v187_v22 = vld [vmem:[%s11496_s0 + $0x1f0] sm:$0xff] }
 0x226   :  { %v2930_v0 = vadd.f32 %v2866_v2, %v2722_v41  ;;  %v2724_v52 = vadd.f32 %v2660_v57, %v2528_v38  ;;  %v2663_v62 = vmul.f32 %v6550_v47, %v8570_v35  ;;  %v2871_v43 = vmul.f32 %v6555_v6, %v8266_v50  ;;  %252 = vst.msk [vmem:[#allocation2 + $0x37a] sm:$0xff] %vm17_vm0, %v187_v22 }
 0x227   :  { %v2286_v16 = vadd.f32 %v11853_v61, %v2284_v30  ;;  %v2090_v4 = vadd.f32 %v8430_v12, %v2088_v46  ;;  %v3003_v39 = vmul.f32 %v6563_v33, %v8572_v55  ;;  %v3603_v27 = vmul.f32 %v6697_v31, %v8583_v63  ;;  %v11856_v46 = vld [vmem:[#allocation11_spill] sm:$0xff] }
 0x228   :  { %v3062_v49 = vadd.f32 %v2998_v21, %v2930_v0  ;;  %v2932_v19 = vadd.f32 %v2868_v48, %v2724_v52  ;;  %v2727_v56 = vadd.f32 %v2663_v62, %v2531_v1  ;;  %v3735_v50 = vmul.f32 %v6701_v17, %v8593_v40  ;;  %v11855_v48 = vld [vmem:[#allocation26_spill] sm:$0xff]  ;;  %v11858_v62 = vld [vmem:[#allocation9_spill] sm:$0xff] }
 0x229   :  { %v8710_v28 = vadd.f32 %v2091_v15, %v2090_v4  ;;  %v2288_v12 = vadd.f32 %v8442_v58, %v2286_v16  ;;  %v3943_v25 = vmul.f32 %v6706_v42, %v8601_v5  ;;  %v11854_v15 = vld [vmem:[#allocation13_spill] sm:$0xff]  ;;  %v3737_v61 = vmul.f32 %v6701_v17, %v11858_v62  ;;  %v11859_v4 = vld [vmem:[#allocation39_spill] sm:$0xff] }
 0x22a   :  { %v3162_v51 = vsel %vm17_vm0, %v3062_v49, 0.0  ;;  %v3260_v2 = vmul.f32 %v3062_v49, %v3062_v49  ;;  %3459 = vst.msk [vmem:[#allocation3 + $0x528] sm:$0xff] %vm17_vm0, %v3062_v49  ;;  %v3064_v63 = vadd.f32 %v3000_v29, %v2932_v19  ;;  %v2935_v21 = vadd.f32 %v2871_v43, %v2727_v56  ;;  %v11857_v29 = vld [vmem:[#allocation37_spill] sm:$0xff]  ;;  %v11860_v49 = vld [vmem:[#allocation38_spill] sm:$0xff] }
 0x22b   :  { %v8720_v13 = vadd.f32 %v2289_v14, %v2288_v12  ;;  %v3163_v53 = vadd.f32 %v3162_v51, %v8481_v54  ;;  %v3799_v58 = vadd.f32 %v3735_v50, %v3603_v27  ;;  %v4075_v60 = vmul.f32 %v11854_v15, %v8603_v9  ;;  %v11861_v50 = vld [vmem:[#allocation30_spill] sm:$0xff] }
 0x22c   :  { %v3360_v41 = vsel %vm17_vm0, %v3260_v2, 0.0  ;;  %v3166_v5 = vsel %vm17_vm0, %v3064_v63, 0.0  ;;  %v3262_v38 = vmul.f32 %v3064_v63, %v3064_v63  ;;  %3461 = vst.msk [vmem:[#allocation3 + $0x538] sm:$0xff] %vm17_vm0, %v3064_v63  ;;  %v3067_v57 = vadd.f32 %v3003_v39, %v2935_v21  ;;  %v11862_v21 = vld [vmem:[#allocation31_spill] sm:$0xff] }
 0x22d   :  { %v3361_v34 = vadd.f32 %v3360_v41, %v11855_v48  ;;  %v3165_v30 = vadd.f32 %v11856_v46, %v3163_v53  ;;  %v4007_v14 = vadd.f32 %v3943_v25, %v3799_v58  ;;  %v3605_v54 = vmul.f32 %v6697_v31, %v11857_v29 }
 0x22e   :  { %v3364_v0 = vsel %vm17_vm0, %v3262_v38, 0.0  ;;  %v3172_v52 = vsel %vm17_vm0, %v3067_v57, 0.0  ;;  %v3265_v1 = vmul.f32 %v3067_v57, %v3067_v57  ;;  %3464 = vst.msk [vmem:[#allocation3 + $0x550] sm:$0xff] %vm17_vm0, %v3067_v57  ;;  %v3945_v19 = vmul.f32 %v6706_v42, %v11860_v49  ;;  %v11864_v57 = vld [vmem:[#allocation40_spill] sm:$0xff]  ;;  %v11869_v49 = vld [vmem:[#allocation6_spill] sm:$0xff] }
 0x22f   :  { %v3167_v16 = vadd.f32 %v3166_v5, %v3165_v30  ;;  %v3363_v43 = vadd.f32 %v11859_v4, %v3361_v34  ;;  %v4139_v39 = vadd.f32 %v4075_v60, %v4007_v14  ;;  %v3801_v27 = vadd.f32 %v3737_v61, %v3605_v54  ;;  %v8753_v5 = vld [vmem:[#allocation2 + $0x2a9] sm:$0xff] }
 0x230   :  { %v3370_v56 = vsel %vm17_vm0, %v3265_v1, 0.0  ;;  %v4077_v22 = vmul.f32 %v11854_v15, %v8624_v44  ;;  %v3608_v12 = vmul.f32 %v6697_v31, %v8323_v37  ;;  %v3740_v60 = vmul.f32 %v6701_v17, %v8634_v11  ;;  %v11863_v37 = vld [vmem:[#allocation19_spill] sm:$0xff]  ;;  %v11865_v30 = vld [vmem:[#allocation14_spill] sm:$0xff] }
 0x231   :  { %v3169_v25 = vadd.f32 %v11861_v50, %v3167_v16  ;;  %v3365_v51 = vadd.f32 %v3364_v0, %v3363_v43  ;;  %v4239_v2 = vsel %vm17_vm0, %v4139_v39, 0.0  ;;  %v4337_v63 = vmul.f32 %v4139_v39, %v4139_v39  ;;  %4536 = vst.msk [vmem:[#allocation3 + $0x728] sm:$0xff] %vm17_vm0, %v4139_v39  ;;  %v11866_v54 = vld [vmem:[#allocation22_spill] sm:$0xff]  ;;  %v11867_v16 = vld [vmem:[#allocation41_spill] sm:$0xff] }
 0x232   :  { %v4240_v53 = vadd.f32 %v4239_v2, %v11862_v21  ;;  %v4009_v58 = vadd.f32 %v3945_v19, %v3801_v27  ;;  %v3948_v41 = vmul.f32 %v6706_v42, %v8334_v18  ;;  %v4080_v46 = vmul.f32 %v11854_v15, %v8642_v32  ;;  %v188_v18 = vld [vmem:[%s11496_s0 + $0x1f8] sm:$0xff]  ;;  %v11868_v43 = vld [vmem:[#allocation5_spill] sm:$0xff] }
 0x233   :  { %v3367_v38 = vadd.f32 %v11863_v37, %v3365_v51  ;;  %v3171_v48 = vadd.f32 %v11864_v57, %v3169_v25  ;;  %v4437_v34 = vsel %vm17_vm0, %v4337_v63, 0.0  ;;  %v3804_v1 = vadd.f32 %v3740_v60, %v3608_v12  ;;  %v8772_v27 = vld [vmem:[#allocation2 + $0x2ac] sm:$0xff]  ;;  %253 = vst.msk [vmem:[#allocation2 + $0x382] sm:$0xff] %vm17_vm0, %v188_v18  ;;  %v11872_v57 = vld [vmem:[#allocation8_spill] sm:$0xff] }
 0x234   :  { %v4438_v14 = vadd.f32 %v4437_v34, %v11865_v30  ;;  %v4141_v29 = vadd.f32 %v4077_v22, %v4009_v58  ;;  %v4242_v0 = vadd.f32 %v11866_v54, %v4240_v53  ;;  %v377_v39 = vmul.f32 %v11868_v43, %v8527_v3  ;;  %v11870_v50 = vld [vmem:[#allocation21_spill] sm:$0xff]  ;;  %v11871_v53 = vld [vmem:[#allocation7_spill] sm:$0xff] }
 0x235   :  { %v8765_v61 = vadd.f32 %v3172_v52, %v3171_v48  ;;  %v3369_v4 = vadd.f32 %v11867_v16, %v3367_v38  ;;  %v509_v19 = vmul.f32 %v11869_v49, %v8753_v5  ;;  %v4012_v52 = vadd.f32 %v3948_v41, %v3804_v1  ;;  %v8778_v51 = vld [vmem:[#allocation2 + $0x2a8] sm:$0xff]  ;;  %v11873_v34 = vld [vmem:[#allocation23_spill] sm:$0xff] }
 0x236   :  { %v4243_v22 = vsel %vm17_vm0, %v4141_v29, 0.0  ;;  %v4339_v12 = vmul.f32 %v4141_v29, %v4141_v29  ;;  %v4440_v25 = vadd.f32 %v11870_v50, %v4438_v14  ;;  %4538 = vst.msk [vmem:[#allocation3 + $0x738] sm:$0xff] %vm17_vm0, %v4141_v29  ;;  %v717_v58 = vmul.f32 %v11871_v53, %v8538_v23  ;;  %v8784_v60 = vld [vmem:[#allocation2 + $0x2ab] sm:$0xff] }
 0x237   :  { %v8780_v2 = vadd.f32 %v3370_v56, %v3369_v4  ;;  %v4244_v63 = vadd.f32 %v4243_v22, %v4242_v0  ;;  %v573_v21 = vadd.f32 %v509_v19, %v377_v39  ;;  %v4144_v38 = vadd.f32 %v4080_v46, %v4012_v52  ;;  %v11874_v18 = vld [vmem:[#allocation25_spill] sm:$0xff]  ;;  %v11875_v4 = vld [vmem:[#allocation24_spill] sm:$0xff] }
 0x238   :  { %v4441_v37 = vsel %vm17_vm0, %v4339_v12, 0.0  ;;  %v849_v48 = vmul.f32 %v11872_v57, %v8772_v27  ;;  %v1453_v41 = vmul.f32 %v11841_v7, %v8593_v40  ;;  %v1585_v29 = vmul.f32 %v11843_v10, %v8778_v51 }
 0x239   :  { %v4246_v30 = vadd.f32 %v11873_v34, %v4244_v63  ;;  %v4442_v56 = vadd.f32 %v4441_v37, %v4440_v25  ;;  %v781_v14 = vadd.f32 %v717_v58, %v573_v21  ;;  %v4249_v54 = vsel %vm17_vm0, %v4144_v38, 0.0  ;;  %4541 = vst.msk [vmem:[#allocation3 + $0x750] sm:$0xff] %vm17_vm0, %v4144_v38  ;;  %v11876_v21 = vld [vmem:[#allocation42_spill] sm:$0xff] }
 0x23a   :  { %v4342_v0 = vmul.f32 %v4144_v38, %v4144_v38  ;;  %v1793_v46 = vmul.f32 %v11743_v26, %v8603_v9  ;;  %v1925_v1 = vmul.f32 %v11845_v24, %v8784_v60  ;;  %v1649_v22 = vadd.f32 %v1585_v29, %v1453_v41 }
 0x23b   :  { %v4444_v16 = vadd.f32 %v11874_v18, %v4442_v56  ;;  %v4248_v39 = vadd.f32 %v11875_v4, %v4246_v30  ;;  %v913_v19 = vadd.f32 %v849_v48, %v781_v14  ;;  %v2532_v50 = vmul.f32 %v6545_v45, %v8527_v3  ;;  %v8815_v30 = vld [vmem:[#allocation2 + $0x2b9] sm:$0xff] }
 0x23c   :  { %v4447_v12 = vsel %vm17_vm0, %v4342_v0, 0.0  ;;  %v2664_v25 = vmul.f32 %v6550_v47, %v8753_v5  ;;  %v2872_v52 = vmul.f32 %v6555_v6, %v8538_v23  ;;  %v1857_v41 = vadd.f32 %v1793_v46, %v1649_v22  ;;  %v8825_v18 = vld [vmem:[#allocation2 + $0x2bc] sm:$0xff] }
 0x23d   :  { %v4250_v63 = vadd.f32 %v4249_v54, %v4248_v39  ;;  %v4446_v58 = vadd.f32 %v11876_v21, %v4444_v16  ;;  %v1017_v37 = vsel %vm17_vm0, %v913_v19, 0.0  ;;  %v1111_v38 = vmul.f32 %v913_v19, %v913_v19  ;;  %1309 = vst.msk [vmem:[#allocation3 + $0x148] sm:$0xff] %vm17_vm0, %v913_v19  ;;  %v11877_v39 = vld [vmem:[#allocation33_spill] sm:$0xff] }
 0x23e   :  { %v1018_v48 = vadd.f32 %v1017_v37, %v8662_v8  ;;  %v2728_v34 = vadd.f32 %v2664_v25, %v2532_v50  ;;  %v3004_v3 = vmul.f32 %v6563_v33, %v8772_v27  ;;  %v3609_v14 = vmul.f32 %v6697_v31, %v8593_v40  ;;  %v8842_v37 = vld [vmem:[#allocation2 + $0x2bb] sm:$0xff] }
 0x23f   :  { %v4448_v56 = vadd.f32 %v4447_v12, %v4446_v58  ;;  %v1215_v23 = vsel %vm17_vm0, %v1111_v38, 0.0  ;;  %v3741_v29 = vmul.f32 %v6701_v17, %v8778_v51  ;;  %v1989_v0 = vadd.f32 %v1925_v1, %v1857_v41  ;;  %v11878_v12 = vld [vmem:[#allocation20_spill] sm:$0xff]  ;;  %v8840_v58 = vld [vmem:[#allocation2 + $0x2b8] sm:$0xff] }
 0x240   :  { %v1216_v54 = vadd.f32 %v1215_v23, %v8671_v59  ;;  %v2936_v8 = vadd.f32 %v2872_v52, %v2728_v34  ;;  %v3949_v46 = vmul.f32 %v6706_v42, %v8603_v9  ;;  %v4081_v4 = vmul.f32 %v11854_v15, %v8784_v60 }
 0x241   :  { %v3805_v16 = vadd.f32 %v3741_v29, %v3609_v14  ;;  %v378_v19 = vmul.f32 %v11868_v43, %v11877_v39  ;;  %v510_v40 = vmul.f32 %v11869_v49, %v8815_v30  ;;  %v2093_v22 = vsel %vm17_vm0, %v1989_v0, 0.0  ;;  %2386 = vst.msk [vmem:[#allocation3 + $0x348] sm:$0xff] %vm17_vm0, %v1989_v0 }
 0x242   :  { %v2187_v59 = vmul.f32 %v1989_v0, %v1989_v0  ;;  %v3068_v1 = vadd.f32 %v3004_v3, %v2936_v8  ;;  %v718_v9 = vmul.f32 %v11871_v53, %v11878_v12  ;;  %v2094_v50 = vadd.f32 %v2093_v22, %v8710_v28  ;;  %v11879_v3 = vld [vmem:[#allocation28_spill] sm:$0xff] }
 0x243   :  { %v4013_v25 = vadd.f32 %v3949_v46, %v3805_v16  ;;  %v574_v52 = vadd.f32 %v510_v40, %v378_v19  ;;  %v850_v21 = vmul.f32 %v11872_v57, %v8825_v18  ;;  %v1454_v23 = vmul.f32 %v11841_v7, %v11879_v3  ;;  %v11880_v16 = vld [vmem:[#allocation29_spill] sm:$0xff] }
 0x244   :  { %v2291_v38 = vsel %vm17_vm0, %v2187_v59, 0.0  ;;  %v3174_v41 = vsel %vm17_vm0, %v3068_v1, 0.0  ;;  %v3266_v34 = vmul.f32 %v3068_v1, %v3068_v1  ;;  %3465 = vst.msk [vmem:[#allocation3 + $0x558] sm:$0xff] %vm17_vm0, %v3068_v1  ;;  %v1586_v46 = vmul.f32 %v11843_v10, %v8840_v58 }
 0x245   :  { %v2292_v28 = vadd.f32 %v2291_v38, %v8720_v13  ;;  %v3175_v14 = vadd.f32 %v3174_v41, %v8765_v61  ;;  %v4145_v29 = vadd.f32 %v4081_v4, %v4013_v25  ;;  %v782_v0 = vadd.f32 %v718_v9, %v574_v52 }
 0x246   :  { %v3372_v8 = vsel %vm17_vm0, %v3266_v34, 0.0  ;;  %v1794_v19 = vmul.f32 %v11743_v26, %v11880_v16  ;;  %v1926_v40 = vmul.f32 %v11845_v24, %v8842_v37  ;;  %v1650_v1 = vadd.f32 %v1586_v46, %v1454_v23 }
 0x247   :  { %v3373_v22 = vadd.f32 %v3372_v8, %v8780_v2  ;;  %v4251_v59 = vsel %vm17_vm0, %v4145_v29, 0.0  ;;  %v4343_v13 = vmul.f32 %v4145_v29, %v4145_v29  ;;  %4542 = vst.msk [vmem:[#allocation3 + $0x758] sm:$0xff] %vm17_vm0, %v4145_v29  ;;  %v914_v61 = vadd.f32 %v850_v21, %v782_v0  ;;  %v8870_v29 = vld [vmem:[#allocation2 + $0x2c1] sm:$0xff] }
 0x248   :  { %v4252_v4 = vadd.f32 %v4251_v59, %v4250_v63  ;;  %v2533_v9 = vmul.f32 %v6545_v45, %v11877_v39  ;;  %v2665_v25 = vmul.f32 %v6550_v47, %v8815_v30  ;;  %v2873_v2 = vmul.f32 %v6555_v6, %v11878_v12  ;;  %11881 = vst [vmem:[#allocation27_spill] sm:$0xff] %v8870_v29 }
 0x249   :  { %v4449_v52 = vsel %vm17_vm0, %v4343_v13, 0.0  ;;  %v1019_v38 = vsel %vm17_vm0, %v914_v61, 0.0  ;;  %v1112_v41 = vmul.f32 %v914_v61, %v914_v61  ;;  %1310 = vst.msk [vmem:[#allocation3 + $0x150] sm:$0xff] %vm17_vm0, %v914_v61  ;;  %v1858_v63 = vadd.f32 %v1794_v19, %v1650_v1 }
 0x24a   :  { %v4450_v34 = vadd.f32 %v4449_v52, %v4448_v56  ;;  %v1020_v21 = vadd.f32 %v1019_v38, %v1018_v48  ;;  %v2729_v23 = vadd.f32 %v2665_v25, %v2533_v9  ;;  %v3005_v0 = vmul.f32 %v6563_v33, %v8825_v18  ;;  %v8881_v56 = vld [vmem:[#allocation2 + $0x2c4] sm:$0xff] }
 0x24b   :  { %v1217_v39 = vsel %vm17_vm0, %v1112_v41, 0.0  ;;  %v3610_v8 = vmul.f32 %v6697_v31, %v11879_v3  ;;  %v3742_v46 = vmul.f32 %v6701_v17, %v8840_v58  ;;  %v1990_v13 = vadd.f32 %v1926_v40, %v1858_v63  ;;  %11882 = vst [vmem:[#allocation10_spill] sm:$0xff] %v8881_v56  ;;  %v8897_v63 = vld [vmem:[#allocation2 + $0x2c3] sm:$0xff] }
 0x24c   :  { %v1218_v59 = vadd.f32 %v1217_v39, %v1216_v54  ;;  %v2937_v12 = vadd.f32 %v2873_v2, %v2729_v23  ;;  %v3950_v48 = vmul.f32 %v6706_v42, %v11880_v16  ;;  %v4082_v61 = vmul.f32 %v11854_v15, %v8842_v37  ;;  %v8895_v2 = vld [vmem:[#allocation2 + $0x2c0] sm:$0xff]  ;;  %11884 = vst [vmem:[#allocation32_spill] sm:$0xff] %v8897_v63 }
 0x24d   :  { %v3806_v19 = vadd.f32 %v3742_v46, %v3610_v8  ;;  %v379_v1 = vmul.f32 %v11868_v43, %v8548_v20  ;;  %v511_v3 = vmul.f32 %v11869_v49, %v8870_v29  ;;  %v2095_v9 = vsel %vm17_vm0, %v1990_v13, 0.0  ;;  %2387 = vst.msk [vmem:[#allocation3 + $0x350] sm:$0xff] %vm17_vm0, %v1990_v13  ;;  %11883 = vst [vmem:[#allocation12_spill] sm:$0xff] %v8895_v2 }
 0x24e   :  { %v2188_v54 = vmul.f32 %v1990_v13, %v1990_v13  ;;  %v3069_v40 = vadd.f32 %v3005_v0, %v2937_v12  ;;  %v719_v16 = vmul.f32 %v11871_v53, %v8557_v36  ;;  %v2096_v25 = vadd.f32 %v2095_v9, %v2094_v50 }
 0x24f   :  { %v4014_v52 = vadd.f32 %v3950_v48, %v3806_v19  ;;  %v575_v38 = vadd.f32 %v511_v3, %v379_v1  ;;  %v851_v41 = vmul.f32 %v11872_v57, %v8881_v56  ;;  %v1455_v0 = vmul.f32 %v11841_v7, %v11858_v62 }
 0x250   :  { %v2293_v23 = vsel %vm17_vm0, %v2188_v54, 0.0  ;;  %v3176_v39 = vsel %vm17_vm0, %v3069_v40, 0.0  ;;  %v3267_v8 = vmul.f32 %v3069_v40, %v3069_v40  ;;  %3466 = vst.msk [vmem:[#allocation3 + $0x560] sm:$0xff] %vm17_vm0, %v3069_v40  ;;  %v1587_v19 = vmul.f32 %v11843_v10, %v8895_v2 }
 0x251   :  { %v2294_v50 = vadd.f32 %v2293_v23, %v2292_v28  ;;  %v3177_v46 = vadd.f32 %v3176_v39, %v3175_v14  ;;  %v4146_v13 = vadd.f32 %v4082_v61, %v4014_v52  ;;  %v783_v12 = vadd.f32 %v719_v16, %v575_v38 }
 0x252   :  { %v3374_v48 = vsel %vm17_vm0, %v3267_v8, 0.0  ;;  %v1795_v1 = vmul.f32 %v11743_v26, %v8624_v44  ;;  %v1927_v3 = vmul.f32 %v11845_v24, %v8897_v63  ;;  %v1651_v61 = vadd.f32 %v1587_v19, %v1455_v0 }
 0x253   :  { %v3375_v9 = vadd.f32 %v3374_v48, %v3373_v22  ;;  %v4253_v54 = vsel %vm17_vm0, %v4146_v13, 0.0  ;;  %v4344_v40 = vmul.f32 %v4146_v13, %v4146_v13  ;;  %4543 = vst.msk [vmem:[#allocation3 + $0x760] sm:$0xff] %vm17_vm0, %v4146_v13  ;;  %v915_v28 = vadd.f32 %v851_v41, %v783_v12  ;;  %v8922_v13 = vld [vmem:[#allocation2 + $0x2d1] sm:$0xff] }
 0x254   :  { %v4254_v14 = vadd.f32 %v4253_v54, %v4252_v4  ;;  %v2534_v16 = vmul.f32 %v6545_v45, %v8548_v20  ;;  %v2666_v52 = vmul.f32 %v6550_v47, %v8870_v29  ;;  %v2874_v22 = vmul.f32 %v6555_v6, %v8557_v36  ;;  %11885 = vst [vmem:[#allocation34_spill] sm:$0xff] %v8922_v13 }
 0x255   :  { %v4451_v38 = vsel %vm17_vm0, %v4344_v40, 0.0  ;;  %v1021_v23 = vsel %vm17_vm0, %v915_v28, 0.0  ;;  %v1113_v39 = vmul.f32 %v915_v28, %v915_v28  ;;  %1311 = vst.msk [vmem:[#allocation3 + $0x158] sm:$0xff] %vm17_vm0, %v915_v28  ;;  %v1859_v4 = vadd.f32 %v1795_v1, %v1651_v61  ;;  %v5834_v61 = vld [vmem:[#allocation2 + $0x289] sm:$0xff] }
 0x256   :  { %v4452_v8 = vadd.f32 %v4451_v38, %v4450_v34  ;;  %v1022_v41 = vadd.f32 %v1021_v23, %v1020_v21  ;;  %v2730_v0 = vadd.f32 %v2666_v52, %v2534_v16  ;;  %v3006_v12 = vmul.f32 %v6563_v33, %v8881_v56  ;;  %v8933_v21 = vld [vmem:[#allocation2 + $0x2d4] sm:$0xff]  ;;  %v5835_v38 = vld [vmem:[#allocation2 + $0x28c] sm:$0xff] }
 0x257   :  { %v1219_v20 = vsel %vm17_vm0, %v1113_v39, 0.0  ;;  %v3611_v48 = vmul.f32 %v6697_v31, %v11858_v62  ;;  %v3743_v19 = vmul.f32 %v6701_v17, %v8895_v2  ;;  %v1991_v40 = vadd.f32 %v1927_v3, %v1859_v4  ;;  %11886 = vst [vmem:[#allocation35_spill] sm:$0xff] %v8933_v21 }
 0x258   :  { %v1220_v54 = vadd.f32 %v1219_v20, %v1218_v59  ;;  %v2938_v36 = vadd.f32 %v2874_v22, %v2730_v0  ;;  %v3951_v34 = vmul.f32 %v6706_v42, %v8624_v44  ;;  %v4083_v28 = vmul.f32 %v11854_v15, %v8897_v63  ;;  %v8945_v0 = vld [vmem:[#allocation2 + $0x2d0] sm:$0xff] }
 0x259   :  { %v3807_v1 = vadd.f32 %v3743_v19, %v3611_v48  ;;  %v380_v16 = vmul.f32 %v5834_v61, %v11868_v43  ;;  %v512_v62 = vmul.f32 %v11869_v49, %v8922_v13  ;;  %v2097_v52 = vsel %vm17_vm0, %v1991_v40, 0.0  ;;  %2388 = vst.msk [vmem:[#allocation3 + $0x358] sm:$0xff] %vm17_vm0, %v1991_v40  ;;  %11887 = vst [vmem:[#allocation15_spill] sm:$0xff] %v8945_v0  ;;  %v8947_v20 = vld [vmem:[#allocation2 + $0x2d3] sm:$0xff] }
 0x25a   :  { %v2189_v59 = vmul.f32 %v1991_v40, %v1991_v40  ;;  %v3070_v3 = vadd.f32 %v3006_v12, %v2938_v36  ;;  %v720_v44 = vmul.f32 %v5835_v38, %v11871_v53  ;;  %v2098_v23 = vadd.f32 %v2097_v52, %v2096_v25  ;;  %11888 = vst [vmem:[#allocation16_spill] sm:$0xff] %v8947_v20  ;;  %v5836_v12 = vld [vmem:[#allocation2 + $0x288] sm:$0xff] }
 0x25b   :  { %v4015_v39 = vadd.f32 %v3951_v34, %v3807_v1  ;;  %v576_v22 = vadd.f32 %v512_v62, %v380_v16  ;;  %v852_v4 = vmul.f32 %v11872_v57, %v8933_v21  ;;  %v1456_v40 = vmul.f32 %v5836_v12, %v11841_v7  ;;  %v5837_v52 = vld [vmem:[#allocation2 + $0x28b] sm:$0xff] }
 0x25c   :  { %v2295_v48 = vsel %vm17_vm0, %v2189_v59, 0.0  ;;  %v3178_v19 = vsel %vm17_vm0, %v3070_v3, 0.0  ;;  %v3268_v63 = vmul.f32 %v3070_v3, %v3070_v3  ;;  %3467 = vst.msk [vmem:[#allocation3 + $0x568] sm:$0xff] %vm17_vm0, %v3070_v3  ;;  %v1588_v62 = vmul.f32 %v11843_v10, %v8945_v0 }
 0x25d   :  { %v2296_v25 = vadd.f32 %v2295_v48, %v2294_v50  ;;  %v3179_v36 = vadd.f32 %v3178_v19, %v3177_v46  ;;  %v4147_v34 = vadd.f32 %v4083_v28, %v4015_v39  ;;  %v784_v1 = vadd.f32 %v720_v44, %v576_v22 }
 0x25e   :  { %v3376_v16 = vsel %vm17_vm0, %v3268_v63, 0.0  ;;  %v1796_v59 = vmul.f32 %v5837_v52, %v11743_v26  ;;  %v1928_v2 = vmul.f32 %v11845_v24, %v8947_v20  ;;  %v1652_v28 = vadd.f32 %v1588_v62, %v1456_v40 }
 0x25f   :  { %v3377_v56 = vadd.f32 %v3376_v16, %v3375_v9  ;;  %v4255_v3 = vsel %vm17_vm0, %v4147_v34, 0.0  ;;  %v4345_v29 = vmul.f32 %v4147_v34, %v4147_v34  ;;  %4544 = vst.msk [vmem:[#allocation3 + $0x768] sm:$0xff] %vm17_vm0, %v4147_v34  ;;  %v916_v50 = vadd.f32 %v852_v4, %v784_v1 }
 0x260   :  { %v4256_v46 = vadd.f32 %v4255_v3, %v4254_v14  ;;  %v2535_v63 = vmul.f32 %v5834_v61, %v6545_v45  ;;  %v2667_v44 = vmul.f32 %v6550_v47, %v8922_v13  ;;  %v2875_v9 = vmul.f32 %v5835_v38, %v6555_v6  ;;  %v8968_v14 = vld [vmem:[#allocation2 + $0x2d9] sm:$0xff] }
 0x261   :  { %v4453_v39 = vsel %vm17_vm0, %v4345_v29, 0.0  ;;  %v1023_v22 = vsel %vm17_vm0, %v916_v50, 0.0  ;;  %v1114_v48 = vmul.f32 %v916_v50, %v916_v50  ;;  %1312 = vst.msk [vmem:[#allocation3 + $0x160] sm:$0xff] %vm17_vm0, %v916_v50  ;;  %v1860_v34 = vadd.f32 %v1796_v59, %v1652_v28  ;;  %v5838_v28 = vld [vmem:[#allocation2 + $0x291] sm:$0xff] }
 0x262   :  { %v4454_v19 = vadd.f32 %v4453_v39, %v4452_v8  ;;  %v1024_v16 = vadd.f32 %v1023_v22, %v1022_v41  ;;  %v2731_v4 = vadd.f32 %v2667_v44, %v2535_v63  ;;  %v3007_v40 = vmul.f32 %v6563_v33, %v8933_v21  ;;  %v8977_v41 = vld [vmem:[#allocation2 + $0x2dc] sm:$0xff] }
 0x263   :  { %v1221_v61 = vsel %vm17_vm0, %v1114_v48, 0.0  ;;  %v3612_v29 = vmul.f32 %v5836_v12, %v6697_v31  ;;  %v3744_v1 = vmul.f32 %v6701_v17, %v8945_v0  ;;  %v1992_v3 = vadd.f32 %v1928_v2, %v1860_v34 }
 0x264   :  { %v1222_v62 = vadd.f32 %v1221_v61, %v1220_v54  ;;  %v2939_v50 = vadd.f32 %v2875_v9, %v2731_v4  ;;  %v3952_v8 = vmul.f32 %v5837_v52, %v6706_v42  ;;  %v4084_v59 = vmul.f32 %v11854_v15, %v8947_v20  ;;  %v5839_v54 = vld [vmem:[#allocation2 + $0x294] sm:$0xff] }
 0x265   :  { %v3808_v38 = vadd.f32 %v3744_v1, %v3612_v29  ;;  %v381_v63 = vmul.f32 %v5838_v28, %v11868_v43  ;;  %v513_v12 = vmul.f32 %v11869_v49, %v8968_v14  ;;  %v2099_v44 = vsel %vm17_vm0, %v1992_v3, 0.0  ;;  %2389 = vst.msk [vmem:[#allocation3 + $0x360] sm:$0xff] %vm17_vm0, %v1992_v3  ;;  %v8989_v4 = vld [vmem:[#allocation2 + $0x2d8] sm:$0xff] }
 0x266   :  { %v2190_v39 = vmul.f32 %v1992_v3, %v1992_v3  ;;  %v3071_v2 = vadd.f32 %v3007_v40, %v2939_v50  ;;  %v721_v52 = vmul.f32 %v5839_v54, %v11871_v53  ;;  %v2100_v22 = vadd.f32 %v2099_v44, %v2098_v23  ;;  %v8991_v61 = vld [vmem:[#allocation2 + $0x2db] sm:$0xff]  ;;  %v5840_v40 = vld [vmem:[#allocation2 + $0x290] sm:$0xff] }
 0x267   :  { %v4016_v48 = vadd.f32 %v3952_v8, %v3808_v38  ;;  %v577_v9 = vadd.f32 %v513_v12, %v381_v63  ;;  %v853_v34 = vmul.f32 %v11872_v57, %v8977_v41  ;;  %v1457_v3 = vmul.f32 %v5840_v40, %v11841_v7  ;;  %v5841_v44 = vld [vmem:[#allocation2 + $0x293] sm:$0xff] }
 0x268   :  { %v2297_v29 = vsel %vm17_vm0, %v2190_v39, 0.0  ;;  %v3180_v1 = vsel %vm17_vm0, %v3071_v2, 0.0  ;;  %v3269_v20 = vmul.f32 %v3071_v2, %v3071_v2  ;;  %3468 = vst.msk [vmem:[#allocation3 + $0x570] sm:$0xff] %vm17_vm0, %v3071_v2  ;;  %v1589_v12 = vmul.f32 %v11843_v10, %v8989_v4 }
 0x269   :  { %v2298_v23 = vadd.f32 %v2297_v29, %v2296_v25  ;;  %v3181_v50 = vadd.f32 %v3180_v1, %v3179_v36  ;;  %v4148_v8 = vadd.f32 %v4084_v59, %v4016_v48  ;;  %v785_v38 = vadd.f32 %v721_v52, %v577_v9 }
 0x26a   :  { %v3378_v63 = vsel %vm17_vm0, %v3269_v20, 0.0  ;;  %v1797_v39 = vmul.f32 %v5841_v44, %v11743_v26  ;;  %v1929_v0 = vmul.f32 %v11845_v24, %v8991_v61  ;;  %v1653_v59 = vadd.f32 %v1589_v12, %v1457_v3 }
 0x26b   :  { %v3379_v21 = vadd.f32 %v3378_v63, %v3377_v56  ;;  %v4257_v2 = vsel %vm17_vm0, %v4148_v8, 0.0  ;;  %v4346_v13 = vmul.f32 %v4148_v8, %v4148_v8  ;;  %4545 = vst.msk [vmem:[#allocation3 + $0x770] sm:$0xff] %vm17_vm0, %v4148_v8  ;;  %v917_v25 = vadd.f32 %v853_v34, %v785_v38 }
 0x26c   :  { %v4258_v36 = vadd.f32 %v4257_v2, %v4256_v46  ;;  %v2536_v20 = vmul.f32 %v5838_v28, %v6545_v45  ;;  %v2668_v52 = vmul.f32 %v6550_v47, %v8968_v14  ;;  %v2876_v56 = vmul.f32 %v5839_v54, %v6555_v6  ;;  %v9012_v46 = vld [vmem:[#allocation2 + $0x2e9] sm:$0xff] }
 0x26d   :  { %v4455_v48 = vsel %vm17_vm0, %v4346_v13, 0.0  ;;  %v1025_v9 = vsel %vm17_vm0, %v917_v25, 0.0  ;;  %v1115_v29 = vmul.f32 %v917_v25, %v917_v25  ;;  %1313 = vst.msk [vmem:[#allocation3 + $0x168] sm:$0xff] %vm17_vm0, %v917_v25  ;;  %v1861_v8 = vadd.f32 %v1797_v39, %v1653_v59 }
 0x26e   :  { %v4456_v1 = vadd.f32 %v4455_v48, %v4454_v19  ;;  %v1026_v63 = vadd.f32 %v1025_v9, %v1024_v16  ;;  %v2732_v34 = vadd.f32 %v2668_v52, %v2536_v20  ;;  %v3008_v3 = vmul.f32 %v6563_v33, %v8977_v41  ;;  %v9021_v16 = vld [vmem:[#allocation2 + $0x2ec] sm:$0xff] }
 0x26f   :  { %v1223_v28 = vsel %vm17_vm0, %v1115_v29, 0.0  ;;  %v3613_v13 = vmul.f32 %v5840_v40, %v6697_v31  ;;  %v3745_v38 = vmul.f32 %v6701_v17, %v8989_v4  ;;  %v1993_v2 = vadd.f32 %v1929_v0, %v1861_v8  ;;  %v9037_v8 = vld [vmem:[#allocation2 + $0x2eb] sm:$0xff] }
 0x270   :  { %v1224_v12 = vadd.f32 %v1223_v28, %v1222_v62  ;;  %v2940_v25 = vadd.f32 %v2876_v56, %v2732_v34  ;;  %v3953_v19 = vmul.f32 %v5841_v44, %v6706_v42  ;;  %v4085_v39 = vmul.f32 %v11854_v15, %v8991_v61  ;;  %v9035_v56 = vld [vmem:[#allocation2 + $0x2e8] sm:$0xff] }
 0x271   :  { %v3809_v54 = vadd.f32 %v3745_v38, %v3613_v13  ;;  %v382_v59 = vmul.f32 %v11868_v43, %v8570_v35  ;;  %v514_v40 = vmul.f32 %v11869_v49, %v9012_v46  ;;  %v2101_v20 = vsel %vm17_vm0, %v1993_v2, 0.0  ;;  %2390 = vst.msk [vmem:[#allocation3 + $0x368] sm:$0xff] %vm17_vm0, %v1993_v2 }
 0x272   :  { %v2191_v52 = vmul.f32 %v1993_v2, %v1993_v2  ;;  %v3072_v0 = vadd.f32 %v3008_v3, %v2940_v25  ;;  %v722_v62 = vmul.f32 %v11871_v53, %v8572_v55  ;;  %v2102_v44 = vadd.f32 %v2101_v20, %v2100_v22 }
 0x273   :  { %v4017_v48 = vadd.f32 %v3953_v19, %v3809_v54  ;;  %v578_v9 = vadd.f32 %v514_v40, %v382_v59  ;;  %v854_v29 = vmul.f32 %v11872_v57, %v9021_v16  ;;  %v1458_v3 = vmul.f32 %v11841_v7, %v8634_v11 }
 0x274   :  { %v2299_v34 = vsel %vm17_vm0, %v2191_v52, 0.0  ;;  %v3182_v28 = vsel %vm17_vm0, %v3072_v0, 0.0  ;;  %v3270_v13 = vmul.f32 %v3072_v0, %v3072_v0  ;;  %3469 = vst.msk [vmem:[#allocation3 + $0x578] sm:$0xff] %vm17_vm0, %v3072_v0  ;;  %v1590_v54 = vmul.f32 %v11843_v10, %v9035_v56 }
 0x275   :  { %v2300_v22 = vadd.f32 %v2299_v34, %v2298_v23  ;;  %v3183_v38 = vadd.f32 %v3182_v28, %v3181_v50  ;;  %v4149_v2 = vadd.f32 %v4085_v39, %v4017_v48  ;;  %v786_v25 = vadd.f32 %v722_v62, %v578_v9 }
 0x276   :  { %v3380_v19 = vsel %vm17_vm0, %v3270_v13, 0.0  ;;  %v1798_v59 = vmul.f32 %v11743_v26, %v8642_v32  ;;  %v1930_v40 = vmul.f32 %v11845_v24, %v9037_v8  ;;  %v1654_v39 = vadd.f32 %v1590_v54, %v1458_v3 }
 0x277   :  { %v3381_v20 = vadd.f32 %v3380_v19, %v3379_v21  ;;  %v4259_v52 = vsel %vm17_vm0, %v4149_v2, 0.0  ;;  %v4347_v0 = vmul.f32 %v4149_v2, %v4149_v2  ;;  %4546 = vst.msk [vmem:[#allocation3 + $0x778] sm:$0xff] %vm17_vm0, %v4149_v2  ;;  %v918_v23 = vadd.f32 %v854_v29, %v786_v25  ;;  %v9062_v2 = vld [vmem:[#allocation2 + $0x2f1] sm:$0xff] }
 0x278   :  { %v4260_v50 = vadd.f32 %v4259_v52, %v4258_v36  ;;  %v2537_v62 = vmul.f32 %v6545_v45, %v8570_v35  ;;  %v2669_v48 = vmul.f32 %v6550_v47, %v9012_v46  ;;  %v2877_v21 = vmul.f32 %v6555_v6, %v8572_v55 }
 0x279   :  { %v4457_v9 = vsel %vm17_vm0, %v4347_v0, 0.0  ;;  %v1027_v34 = vsel %vm17_vm0, %v918_v23, 0.0  ;;  %v1116_v28 = vmul.f32 %v918_v23, %v918_v23  ;;  %1314 = vst.msk [vmem:[#allocation3 + $0x170] sm:$0xff] %vm17_vm0, %v918_v23  ;;  %v1862_v36 = vadd.f32 %v1798_v59, %v1654_v39 }
 0x27a   :  { %v4458_v13 = vadd.f32 %v4457_v9, %v4456_v1  ;;  %v1028_v29 = vadd.f32 %v1027_v34, %v1026_v63  ;;  %v2733_v3 = vadd.f32 %v2669_v48, %v2537_v62  ;;  %v3009_v25 = vmul.f32 %v6563_v33, %v9021_v16  ;;  %v9073_v63 = vld [vmem:[#allocation2 + $0x2f4] sm:$0xff] }
 0x27b   :  { %v1225_v35 = vsel %vm17_vm0, %v1116_v28, 0.0  ;;  %v3614_v19 = vmul.f32 %v6697_v31, %v8634_v11  ;;  %v3746_v54 = vmul.f32 %v6701_v17, %v9035_v56  ;;  %v1994_v0 = vadd.f32 %v1930_v40, %v1862_v36  ;;  %v9089_v36 = vld [vmem:[#allocation2 + $0x2f3] sm:$0xff] }
 0x27c   :  { %v1226_v52 = vadd.f32 %v1225_v35, %v1224_v12  ;;  %v2941_v55 = vadd.f32 %v2877_v21, %v2733_v3  ;;  %v3954_v1 = vmul.f32 %v6706_v42, %v8642_v32  ;;  %v4086_v23 = vmul.f32 %v11854_v15, %v9037_v8  ;;  %v9087_v21 = vld [vmem:[#allocation2 + $0x2f0] sm:$0xff] }
 0x27d   :  { %v3810_v59 = vadd.f32 %v3746_v54, %v3614_v19  ;;  %v383_v39 = vmul.f32 %v11868_v43, %v8753_v5  ;;  %v515_v11 = vmul.f32 %v11869_v49, %v9062_v2  ;;  %v2103_v62 = vsel %vm17_vm0, %v1994_v0, 0.0  ;;  %2391 = vst.msk [vmem:[#allocation3 + $0x370] sm:$0xff] %vm17_vm0, %v1994_v0 }
 0x27e   :  { %v2192_v12 = vmul.f32 %v1994_v0, %v1994_v0  ;;  %v3073_v40 = vadd.f32 %v3009_v25, %v2941_v55  ;;  %v723_v32 = vmul.f32 %v11871_v53, %v8772_v27  ;;  %v2104_v48 = vadd.f32 %v2103_v62, %v2102_v44 }
 0x27f   :  { %v4018_v9 = vadd.f32 %v3954_v1, %v3810_v59  ;;  %v579_v34 = vadd.f32 %v515_v11, %v383_v39  ;;  %v855_v28 = vmul.f32 %v11872_v57, %v9073_v63  ;;  %v1459_v25 = vmul.f32 %v11841_v7, %v8778_v51 }
 0x280   :  { %v2301_v3 = vsel %vm17_vm0, %v2192_v12, 0.0  ;;  %v3184_v35 = vsel %vm17_vm0, %v3073_v40, 0.0  ;;  %v3271_v19 = vmul.f32 %v3073_v40, %v3073_v40  ;;  %3470 = vst.msk [vmem:[#allocation3 + $0x580] sm:$0xff] %vm17_vm0, %v3073_v40  ;;  %v1591_v59 = vmul.f32 %v11843_v10, %v9087_v21 }
 0x281   :  { %v2302_v44 = vadd.f32 %v2301_v3, %v2300_v22  ;;  %v3185_v54 = vadd.f32 %v3184_v35, %v3183_v38  ;;  %v4150_v0 = vadd.f32 %v4086_v23, %v4018_v9  ;;  %v787_v55 = vadd.f32 %v723_v32, %v579_v34 }
 0x282   :  { %v3382_v1 = vsel %vm17_vm0, %v3271_v19, 0.0  ;;  %v1799_v39 = vmul.f32 %v11743_v26, %v8784_v60  ;;  %v1931_v11 = vmul.f32 %v11845_v24, %v9089_v36  ;;  %v1655_v23 = vadd.f32 %v1591_v59, %v1459_v25 }
 0x283   :  { %v3383_v62 = vadd.f32 %v3382_v1, %v3381_v20  ;;  %v4261_v12 = vsel %vm17_vm0, %v4150_v0, 0.0  ;;  %v4348_v40 = vmul.f32 %v4150_v0, %v4150_v0  ;;  %4547 = vst.msk [vmem:[#allocation3 + $0x780] sm:$0xff] %vm17_vm0, %v4150_v0  ;;  %v919_v22 = vadd.f32 %v855_v28, %v787_v55  ;;  %v9114_v0 = vld [vmem:[#allocation2 + $0x301] sm:$0xff] }
 0x284   :  { %v4262_v38 = vadd.f32 %v4261_v12, %v4260_v50  ;;  %v2538_v32 = vmul.f32 %v6545_v45, %v8753_v5  ;;  %v2670_v9 = vmul.f32 %v6550_v47, %v9062_v2  ;;  %v2878_v20 = vmul.f32 %v6555_v6, %v8772_v27  ;;  %11889 = vst [vmem:[#allocation36_spill] sm:$0xff] %v9114_v0 }
 0x285   :  { %v4459_v34 = vsel %vm17_vm0, %v4348_v40, 0.0  ;;  %v1029_v3 = vsel %vm17_vm0, %v919_v22, 0.0  ;;  %v1117_v35 = vmul.f32 %v919_v22, %v919_v22  ;;  %1315 = vst.msk [vmem:[#allocation3 + $0x178] sm:$0xff] %vm17_vm0, %v919_v22  ;;  %v1863_v50 = vadd.f32 %v1799_v39, %v1655_v23 }
 0x286   :  { %v4460_v19 = vadd.f32 %v4459_v34, %v4458_v13  ;;  %v1030_v28 = vadd.f32 %v1029_v3, %v1028_v29  ;;  %v2734_v25 = vadd.f32 %v2670_v9, %v2538_v32  ;;  %v3010_v55 = vmul.f32 %v6563_v33, %v9073_v63  ;;  %v9125_v29 = vld [vmem:[#allocation2 + $0x304] sm:$0xff] }
 0x287   :  { %v1227_v5 = vsel %vm17_vm0, %v1117_v35, 0.0  ;;  %v3615_v1 = vmul.f32 %v6697_v31, %v8778_v51  ;;  %v3747_v59 = vmul.f32 %v6701_v17, %v9087_v21  ;;  %v1995_v40 = vadd.f32 %v1931_v11, %v1863_v50  ;;  %11890 = vst [vmem:[#allocation17_spill] sm:$0xff] %v9125_v29  ;;  %v9141_v50 = vld [vmem:[#allocation2 + $0x303] sm:$0xff] }
 0x288   :  { %v1228_v12 = vadd.f32 %v1227_v5, %v1226_v52  ;;  %v2942_v27 = vadd.f32 %v2878_v20, %v2734_v25  ;;  %v3955_v13 = vmul.f32 %v6706_v42, %v8784_v60  ;;  %v4087_v22 = vmul.f32 %v11854_v15, %v9089_v36  ;;  %v9139_v20 = vld [vmem:[#allocation2 + $0x300] sm:$0xff]  ;;  %11892 = vst [vmem:[#allocation13_spill] sm:$0xff] %v9141_v50 }
 0x289   :  { %v3811_v39 = vadd.f32 %v3747_v59, %v3615_v1  ;;  %v384_v23 = vmul.f32 %v11868_v43, %v8815_v30  ;;  %v516_v51 = vmul.f32 %v11869_v49, %v9114_v0  ;;  %v2105_v32 = vsel %vm17_vm0, %v1995_v40, 0.0  ;;  %2392 = vst.msk [vmem:[#allocation3 + $0x378] sm:$0xff] %vm17_vm0, %v1995_v40  ;;  %11891 = vst [vmem:[#allocation18_spill] sm:$0xff] %v9139_v20 }
 0x28a   :  { %v2193_v52 = vmul.f32 %v1995_v40, %v1995_v40  ;;  %v3074_v11 = vadd.f32 %v3010_v55, %v2942_v27  ;;  %v724_v60 = vmul.f32 %v11871_v53, %v8825_v18  ;;  %v2106_v9 = vadd.f32 %v2105_v32, %v2104_v48 }
 0x28b   :  { %v4019_v34 = vadd.f32 %v3955_v13, %v3811_v39  ;;  %v580_v3 = vadd.f32 %v516_v51, %v384_v23  ;;  %v856_v35 = vmul.f32 %v11872_v57, %v9125_v29  ;;  %v1460_v55 = vmul.f32 %v11841_v7, %v8840_v58 }
 0x28c   :  { %v2303_v25 = vsel %vm17_vm0, %v2193_v52, 0.0  ;;  %v3186_v5 = vsel %vm17_vm0, %v3074_v11, 0.0  ;;  %v3272_v1 = vmul.f32 %v3074_v11, %v3074_v11  ;;  %3471 = vst.msk [vmem:[#allocation3 + $0x588] sm:$0xff] %vm17_vm0, %v3074_v11  ;;  %v1592_v39 = vmul.f32 %v11843_v10, %v9139_v20 }
 0x28d   :  { %v2304_v48 = vadd.f32 %v2303_v25, %v2302_v44  ;;  %v3187_v59 = vadd.f32 %v3186_v5, %v3185_v54  ;;  %v4151_v40 = vadd.f32 %v4087_v22, %v4019_v34  ;;  %v788_v27 = vadd.f32 %v724_v60, %v580_v3 }
 0x28e   :  { %v3384_v13 = vsel %vm17_vm0, %v3272_v1, 0.0  ;;  %v1800_v23 = vmul.f32 %v11743_v26, %v8842_v37  ;;  %v1932_v51 = vmul.f32 %v11845_v24, %v9141_v50  ;;  %v1656_v22 = vadd.f32 %v1592_v39, %v1460_v55 }
 0x28f   :  { %v3385_v32 = vadd.f32 %v3384_v13, %v3383_v62  ;;  %v4263_v52 = vsel %vm17_vm0, %v4151_v40, 0.0  ;;  %v4349_v11 = vmul.f32 %v4151_v40, %v4151_v40  ;;  %4548 = vst.msk [vmem:[#allocation3 + $0x788] sm:$0xff] %vm17_vm0, %v4151_v40  ;;  %v920_v44 = vadd.f32 %v856_v35, %v788_v27  ;;  %v9166_v40 = vld [vmem:[#allocation2 + $0x309] sm:$0xff] }
 0x290   :  { %v4264_v54 = vadd.f32 %v4263_v52, %v4262_v38  ;;  %v2539_v60 = vmul.f32 %v6545_v45, %v8815_v30  ;;  %v2671_v34 = vmul.f32 %v6550_v47, %v9114_v0  ;;  %v2879_v62 = vmul.f32 %v6555_v6, %v8825_v18  ;;  %11893 = vst [vmem:[#allocation26_spill] sm:$0xff] %v9166_v40 }
 0x291   :  { %v4461_v3 = vsel %vm17_vm0, %v4349_v11, 0.0  ;;  %v1031_v25 = vsel %vm17_vm0, %v920_v44, 0.0  ;;  %v1118_v5 = vmul.f32 %v920_v44, %v920_v44  ;;  %1316 = vst.msk [vmem:[#allocation3 + $0x180] sm:$0xff] %vm17_vm0, %v920_v44  ;;  %v1864_v38 = vadd.f32 %v1800_v23, %v1656_v22  ;;  %v11895_v22 = vld [vmem:[#allocation27_spill] sm:$0xff] }
 0x292   :  { %v4462_v1 = vadd.f32 %v4461_v3, %v4460_v19  ;;  %v1032_v35 = vadd.f32 %v1031_v25, %v1030_v28  ;;  %v2735_v55 = vadd.f32 %v2671_v34, %v2539_v60  ;;  %v3011_v27 = vmul.f32 %v6563_v33, %v9125_v29  ;;  %v9177_v28 = vld [vmem:[#allocation2 + $0x30c] sm:$0xff] }
 0x293   :  { %v1229_v30 = vsel %vm17_vm0, %v1118_v5, 0.0  ;;  %v3616_v13 = vmul.f32 %v6697_v31, %v8840_v58  ;;  %v3748_v39 = vmul.f32 %v6701_v17, %v9139_v20  ;;  %v1996_v11 = vadd.f32 %v1932_v51, %v1864_v38  ;;  %11894 = vst [vmem:[#allocation11_spill] sm:$0xff] %v9177_v28  ;;  %v11896_v3 = vld [vmem:[#allocation10_spill] sm:$0xff] }
 0x294   :  { %v1230_v52 = vadd.f32 %v1229_v30, %v1228_v12  ;;  %v2943_v18 = vadd.f32 %v2879_v62, %v2735_v55  ;;  %v3956_v19 = vmul.f32 %v6706_v42, %v8842_v37  ;;  %v4088_v44 = vmul.f32 %v11854_v15, %v9141_v50  ;;  %v9191_v55 = vld [vmem:[#allocation2 + $0x308] sm:$0xff] }
 0x295   :  { %v3812_v23 = vadd.f32 %v3748_v39, %v3616_v13  ;;  %v385_v60 = vmul.f32 %v11868_v43, %v11895_v22  ;;  %v517_v58 = vmul.f32 %v11869_v49, %v9166_v40  ;;  %v2107_v34 = vsel %vm17_vm0, %v1996_v11, 0.0  ;;  %2393 = vst.msk [vmem:[#allocation3 + $0x380] sm:$0xff] %vm17_vm0, %v1996_v11  ;;  %11897 = vst [vmem:[#allocation37_spill] sm:$0xff] %v9191_v55  ;;  %v9193_v30 = vld [vmem:[#allocation2 + $0x30b] sm:$0xff] }
 0x296   :  { %v2194_v12 = vmul.f32 %v1996_v11, %v1996_v11  ;;  %v3075_v51 = vadd.f32 %v3011_v27, %v2943_v18  ;;  %v725_v37 = vmul.f32 %v11871_v53, %v11896_v3  ;;  %v2108_v25 = vadd.f32 %v2107_v34, %v2106_v9  ;;  %11898 = vst [vmem:[#allocation9_spill] sm:$0xff] %v9193_v30  ;;  %v11899_v27 = vld [vmem:[#allocation12_spill] sm:$0xff] }
 0x297   :  { %v4020_v5 = vadd.f32 %v3956_v19, %v3812_v23  ;;  %v581_v62 = vadd.f32 %v517_v58, %v385_v60  ;;  %v857_v38 = vmul.f32 %v11872_v57, %v9177_v28  ;;  %v1461_v11 = vmul.f32 %v11841_v7, %v11899_v27  ;;  %v11900_v34 = vld [vmem:[#allocation32_spill] sm:$0xff] }
 0x298   :  { %v2305_v13 = vsel %vm17_vm0, %v2194_v12, 0.0  ;;  %v3188_v39 = vsel %vm17_vm0, %v3075_v51, 0.0  ;;  %v3273_v50 = vmul.f32 %v3075_v51, %v3075_v51  ;;  %3472 = vst.msk [vmem:[#allocation3 + $0x590] sm:$0xff] %vm17_vm0, %v3075_v51  ;;  %v1593_v58 = vmul.f32 %v11843_v10, %v9191_v55 }
 0x299   :  { %v2306_v9 = vadd.f32 %v2305_v13, %v2304_v48  ;;  %v3189_v18 = vadd.f32 %v3188_v39, %v3187_v59  ;;  %v4152_v19 = vadd.f32 %v4088_v44, %v4020_v5  ;;  %v789_v23 = vadd.f32 %v725_v37, %v581_v62 }
 0x29a   :  { %v3386_v60 = vsel %vm17_vm0, %v3273_v50, 0.0  ;;  %v1801_v12 = vmul.f32 %v11743_v26, %v11900_v34  ;;  %v1933_v20 = vmul.f32 %v11845_v24, %v9193_v30  ;;  %v1657_v44 = vadd.f32 %v1593_v58, %v1461_v11 }
 0x29b   :  { %v3387_v29 = vadd.f32 %v3386_v60, %v3385_v32  ;;  %v4265_v51 = vsel %vm17_vm0, %v4152_v19, 0.0  ;;  %v4350_v0 = vmul.f32 %v4152_v19, %v4152_v19  ;;  %4549 = vst.msk [vmem:[#allocation3 + $0x790] sm:$0xff] %vm17_vm0, %v4152_v19  ;;  %v921_v48 = vadd.f32 %v857_v38, %v789_v23  ;;  %v9218_v19 = vld [vmem:[#allocation2 + $0x319] sm:$0xff] }
 0x29c   :  { %v4266_v59 = vadd.f32 %v4265_v51, %v4264_v54  ;;  %v2540_v50 = vmul.f32 %v6545_v45, %v11895_v22  ;;  %v2672_v37 = vmul.f32 %v6550_v47, %v9166_v40  ;;  %v2880_v32 = vmul.f32 %v6555_v6, %v11896_v3 }
 0x29d   :  { %v4463_v5 = vsel %vm17_vm0, %v4350_v0, 0.0  ;;  %v1033_v62 = vsel %vm17_vm0, %v921_v48, 0.0  ;;  %v1119_v13 = vmul.f32 %v921_v48, %v921_v48  ;;  %1317 = vst.msk [vmem:[#allocation3 + $0x188] sm:$0xff] %vm17_vm0, %v921_v48  ;;  %v1865_v54 = vadd.f32 %v1801_v12, %v1657_v44  ;;  %v11901_v44 = vld [vmem:[#allocation34_spill] sm:$0xff] }
 0x29e   :  { %v4464_v39 = vadd.f32 %v4463_v5, %v4462_v1  ;;  %v1034_v38 = vadd.f32 %v1033_v62, %v1032_v35  ;;  %v2736_v11 = vadd.f32 %v2672_v37, %v2540_v50  ;;  %v3012_v23 = vmul.f32 %v6563_v33, %v9177_v28  ;;  %v9229_v35 = vld [vmem:[#allocation2 + $0x31c] sm:$0xff] }
 0x29f   :  { %v1231_v22 = vsel %vm17_vm0, %v1119_v13, 0.0  ;;  %v3617_v0 = vmul.f32 %v6697_v31, %v11899_v27  ;;  %v3749_v60 = vmul.f32 %v6701_v17, %v9191_v55  ;;  %v1997_v51 = vadd.f32 %v1933_v20, %v1865_v54  ;;  %v11902_v5 = vld [vmem:[#allocation35_spill] sm:$0xff] }
 0x2a0   :  { %v1232_v58 = vadd.f32 %v1231_v22, %v1230_v52  ;;  %v2944_v3 = vadd.f32 %v2880_v32, %v2736_v11  ;;  %v3957_v1 = vmul.f32 %v6706_v42, %v11900_v34  ;;  %v4089_v48 = vmul.f32 %v11854_v15, %v9193_v30  ;;  %v9243_v11 = vld [vmem:[#allocation2 + $0x318] sm:$0xff] }
 0x2a1   :  { %v3813_v12 = vadd.f32 %v3749_v60, %v3617_v0  ;;  %v386_v50 = vmul.f32 %v11868_v43, %v11901_v44  ;;  %v518_v27 = vmul.f32 %v11869_v49, %v9218_v19  ;;  %v2109_v37 = vsel %vm17_vm0, %v1997_v51, 0.0  ;;  %2394 = vst.msk [vmem:[#allocation3 + $0x388] sm:$0xff] %vm17_vm0, %v1997_v51  ;;  %v9245_v22 = vld [vmem:[#allocation2 + $0x31b] sm:$0xff] }
 0x2a2   :  { %v2195_v52 = vmul.f32 %v1997_v51, %v1997_v51  ;;  %v3076_v20 = vadd.f32 %v3012_v23, %v2944_v3  ;;  %v726_v34 = vmul.f32 %v11871_v53, %v11902_v5  ;;  %v2110_v62 = vadd.f32 %v2109_v37, %v2108_v25  ;;  %v11903_v23 = vld [vmem:[#allocation15_spill] sm:$0xff]  ;;  %v11904_v37 = vld [vmem:[#allocation16_spill] sm:$0xff] }
 0x2a3   :  { %v4021_v13 = vadd.f32 %v3957_v1, %v3813_v12  ;;  %v582_v32 = vadd.f32 %v518_v27, %v386_v50  ;;  %v858_v54 = vmul.f32 %v11872_v57, %v9229_v35  ;;  %v1462_v51 = vmul.f32 %v11841_v7, %v11903_v23 }
 0x2a4   :  { %v2307_v0 = vsel %vm17_vm0, %v2195_v52, 0.0  ;;  %v3190_v60 = vsel %vm17_vm0, %v3076_v20, 0.0  ;;  %v3274_v30 = vmul.f32 %v3076_v20, %v3076_v20  ;;  %3473 = vst.msk [vmem:[#allocation3 + $0x598] sm:$0xff] %vm17_vm0, %v3076_v20  ;;  %v1594_v27 = vmul.f32 %v11843_v10, %v9243_v11 }
 0x2a5   :  { %v2308_v25 = vadd.f32 %v2307_v0, %v2306_v9  ;;  %v3191_v3 = vadd.f32 %v3190_v60, %v3189_v18  ;;  %v4153_v1 = vadd.f32 %v4089_v48, %v4021_v13  ;;  %v790_v12 = vadd.f32 %v726_v34, %v582_v32 }
 0x2a6   :  { %v3388_v50 = vsel %vm17_vm0, %v3274_v30, 0.0  ;;  %v1802_v52 = vmul.f32 %v11743_v26, %v11904_v37  ;;  %v1934_v55 = vmul.f32 %v11845_v24, %v9245_v22  ;;  %v1658_v48 = vadd.f32 %v1594_v27, %v1462_v51 }
 0x2a7   :  { %v3389_v28 = vadd.f32 %v3388_v50, %v3387_v29  ;;  %v4267_v20 = vsel %vm17_vm0, %v4153_v1, 0.0  ;;  %v4351_v40 = vmul.f32 %v4153_v1, %v4153_v1  ;;  %4550 = vst.msk [vmem:[#allocation3 + $0x798] sm:$0xff] %vm17_vm0, %v4153_v1  ;;  %v922_v9 = vadd.f32 %v858_v54, %v790_v12  ;;  %v9270_v1 = vld [vmem:[#allocation2 + $0x321] sm:$0xff] }
 0x2a8   :  { %v4268_v18 = vadd.f32 %v4267_v20, %v4266_v59  ;;  %v2541_v30 = vmul.f32 %v6545_v45, %v11901_v44  ;;  %v2673_v34 = vmul.f32 %v6550_v47, %v9218_v19  ;;  %v2881_v29 = vmul.f32 %v6555_v6, %v11902_v5 }
 0x2a9   :  { %v4465_v13 = vsel %vm17_vm0, %v4351_v40, 0.0  ;;  %v1035_v32 = vsel %vm17_vm0, %v922_v9, 0.0  ;;  %v1120_v0 = vmul.f32 %v922_v9, %v922_v9  ;;  %1318 = vst.msk [vmem:[#allocation3 + $0x190] sm:$0xff] %vm17_vm0, %v922_v9  ;;  %v1866_v59 = vadd.f32 %v1802_v52, %v1658_v48 }
 0x2aa   :  { %v4466_v60 = vadd.f32 %v4465_v13, %v4464_v39  ;;  %v1036_v54 = vadd.f32 %v1035_v32, %v1034_v38  ;;  %v2737_v51 = vadd.f32 %v2673_v34, %v2541_v30  ;;  %v3013_v12 = vmul.f32 %v6563_v33, %v9229_v35  ;;  %v9281_v38 = vld [vmem:[#allocation2 + $0x324] sm:$0xff] }
 0x2ab   :  { %v1233_v44 = vsel %vm17_vm0, %v1120_v0, 0.0  ;;  %v3618_v40 = vmul.f32 %v6697_v31, %v11903_v23  ;;  %v3750_v50 = vmul.f32 %v6701_v17, %v9243_v11  ;;  %v1998_v20 = vadd.f32 %v1934_v55, %v1866_v59  ;;  %v9297_v59 = vld [vmem:[#allocation2 + $0x323] sm:$0xff] }
 0x2ac   :  { %v1234_v27 = vadd.f32 %v1233_v44, %v1232_v58  ;;  %v2945_v5 = vadd.f32 %v2881_v29, %v2737_v51  ;;  %v3958_v39 = vmul.f32 %v6706_v42, %v11904_v37  ;;  %v4090_v9 = vmul.f32 %v11854_v15, %v9245_v22  ;;  %v9295_v29 = vld [vmem:[#allocation2 + $0x320] sm:$0xff] }
 0x2ad   :  { %v3814_v52 = vadd.f32 %v3750_v50, %v3618_v40  ;;  %v387_v48 = vmul.f32 %v11868_v43, %v8968_v14  ;;  %v519_v23 = vmul.f32 %v11869_v49, %v9270_v1  ;;  %v2111_v30 = vsel %vm17_vm0, %v1998_v20, 0.0  ;;  %2395 = vst.msk [vmem:[#allocation3 + $0x390] sm:$0xff] %vm17_vm0, %v1998_v20 }
 0x2ae   :  { %v2196_v58 = vmul.f32 %v1998_v20, %v1998_v20  ;;  %v3077_v55 = vadd.f32 %v3013_v12, %v2945_v5  ;;  %v727_v37 = vmul.f32 %v11871_v53, %v8977_v41  ;;  %v2112_v34 = vadd.f32 %v2111_v30, %v2110_v62 }
 0x2af   :  { %v4022_v13 = vadd.f32 %v3958_v39, %v3814_v52  ;;  %v583_v32 = vadd.f32 %v519_v23, %v387_v48  ;;  %v859_v0 = vmul.f32 %v11872_v57, %v9281_v38  ;;  %v1463_v12 = vmul.f32 %v11841_v7, %v8989_v4 }
 0x2b0   :  { %v2309_v51 = vsel %vm17_vm0, %v2196_v58, 0.0  ;;  %v3192_v44 = vsel %vm17_vm0, %v3077_v55, 0.0  ;;  %v3275_v40 = vmul.f32 %v3077_v55, %v3077_v55  ;;  %3474 = vst.msk [vmem:[#allocation3 + $0x5a0] sm:$0xff] %vm17_vm0, %v3077_v55  ;;  %v1595_v52 = vmul.f32 %v11843_v10, %v9295_v29 }
 0x2b1   :  { %v2310_v62 = vadd.f32 %v2309_v51, %v2308_v25  ;;  %v3193_v50 = vadd.f32 %v3192_v44, %v3191_v3  ;;  %v4154_v20 = vadd.f32 %v4090_v9, %v4022_v13  ;;  %v791_v5 = vadd.f32 %v727_v37, %v583_v32 }
 0x2b2   :  { %v3390_v39 = vsel %vm17_vm0, %v3275_v40, 0.0  ;;  %v1803_v48 = vmul.f32 %v11743_v26, %v8991_v61  ;;  %v1935_v23 = vmul.f32 %v11845_v24, %v9297_v59  ;;  %v1659_v9 = vadd.f32 %v1595_v52, %v1463_v12 }
 0x2b3   :  { %v3391_v30 = vadd.f32 %v3390_v39, %v3389_v28  ;;  %v4269_v58 = vsel %vm17_vm0, %v4154_v20, 0.0  ;;  %v4352_v55 = vmul.f32 %v4154_v20, %v4154_v20  ;;  %4551 = vst.msk [vmem:[#allocation3 + $0x7a0] sm:$0xff] %vm17_vm0, %v4154_v20  ;;  %v923_v25 = vadd.f32 %v859_v0, %v791_v5  ;;  %v9322_v20 = vld [vmem:[#allocation2 + $0x331] sm:$0xff] }
 0x2b4   :  { %v4270_v3 = vadd.f32 %v4269_v58, %v4268_v18  ;;  %v2542_v37 = vmul.f32 %v6545_v45, %v8968_v14  ;;  %v2674_v13 = vmul.f32 %v6550_v47, %v9270_v1  ;;  %v2882_v28 = vmul.f32 %v6555_v6, %v8977_v41 }
 0x2b5   :  { %v4467_v32 = vsel %vm17_vm0, %v4352_v55, 0.0  ;;  %v1037_v51 = vsel %vm17_vm0, %v923_v25, 0.0  ;;  %v1121_v44 = vmul.f32 %v923_v25, %v923_v25  ;;  %1319 = vst.msk [vmem:[#allocation3 + $0x198] sm:$0xff] %vm17_vm0, %v923_v25  ;;  %v1867_v18 = vadd.f32 %v1803_v48, %v1659_v9 }
 0x2b6   :  { %v4468_v40 = vadd.f32 %v4467_v32, %v4466_v60  ;;  %v1038_v0 = vadd.f32 %v1037_v51, %v1036_v54  ;;  %v2738_v12 = vadd.f32 %v2674_v13, %v2542_v37  ;;  %v3014_v5 = vmul.f32 %v6563_v33, %v9281_v38  ;;  %v9333_v54 = vld [vmem:[#allocation2 + $0x334] sm:$0xff] }
 0x2b7   :  { %v1235_v14 = vsel %vm17_vm0, %v1121_v44, 0.0  ;;  %v3619_v39 = vmul.f32 %v6697_v31, %v8989_v4  ;;  %v3751_v52 = vmul.f32 %v6701_v17, %v9295_v29  ;;  %v1999_v55 = vadd.f32 %v1935_v23, %v1867_v18  ;;  %v9349_v18 = vld [vmem:[#allocation2 + $0x333] sm:$0xff] }
 0x2b8   :  { %v1236_v58 = vadd.f32 %v1235_v14, %v1234_v27  ;;  %v2946_v41 = vadd.f32 %v2882_v28, %v2738_v12  ;;  %v3959_v60 = vmul.f32 %v6706_v42, %v8991_v61  ;;  %v4091_v25 = vmul.f32 %v11854_v15, %v9297_v59  ;;  %v9347_v28 = vld [vmem:[#allocation2 + $0x330] sm:$0xff] }
 0x2b9   :  { %v3815_v48 = vadd.f32 %v3751_v52, %v3619_v39  ;;  %v388_v9 = vmul.f32 %v11868_v43, %v9012_v46  ;;  %v520_v4 = vmul.f32 %v11869_v49, %v9322_v20  ;;  %v2113_v37 = vsel %vm17_vm0, %v1999_v55, 0.0  ;;  %2396 = vst.msk [vmem:[#allocation3 + $0x398] sm:$0xff] %vm17_vm0, %v1999_v55 }
 0x2ba   :  { %v2197_v27 = vmul.f32 %v1999_v55, %v1999_v55  ;;  %v3078_v23 = vadd.f32 %v3014_v5, %v2946_v41  ;;  %v728_v61 = vmul.f32 %v11871_v53, %v9021_v16  ;;  %v2114_v13 = vadd.f32 %v2113_v37, %v2112_v34 }
 0x2bb   :  { %v4023_v32 = vadd.f32 %v3959_v60, %v3815_v48  ;;  %v584_v51 = vadd.f32 %v520_v4, %v388_v9  ;;  %v860_v44 = vmul.f32 %v11872_v57, %v9333_v54  ;;  %v1464_v5 = vmul.f32 %v11841_v7, %v9035_v56 }
 0x2bc   :  { %v2311_v12 = vsel %vm17_vm0, %v2197_v27, 0.0  ;;  %v3194_v14 = vsel %vm17_vm0, %v3078_v23, 0.0  ;;  %v3276_v39 = vmul.f32 %v3078_v23, %v3078_v23  ;;  %3475 = vst.msk [vmem:[#allocation3 + $0x5a8] sm:$0xff] %vm17_vm0, %v3078_v23  ;;  %v1596_v48 = vmul.f32 %v11843_v10, %v9347_v28 }
 0x2bd   :  { %v2312_v34 = vadd.f32 %v2311_v12, %v2310_v62  ;;  %v3195_v52 = vadd.f32 %v3194_v14, %v3193_v50  ;;  %v4155_v55 = vadd.f32 %v4091_v25, %v4023_v32  ;;  %v792_v41 = vadd.f32 %v728_v61, %v584_v51 }
 0x2be   :  { %v3392_v60 = vsel %vm17_vm0, %v3276_v39, 0.0  ;;  %v1804_v9 = vmul.f32 %v11743_v26, %v9037_v8  ;;  %v1936_v4 = vmul.f32 %v11845_v24, %v9349_v18  ;;  %v1660_v25 = vadd.f32 %v1596_v48, %v1464_v5 }
 0x2bf   :  { %v3393_v37 = vadd.f32 %v3392_v60, %v3391_v30  ;;  %v4271_v27 = vsel %vm17_vm0, %v4155_v55, 0.0  ;;  %v4353_v23 = vmul.f32 %v4155_v55, %v4155_v55  ;;  %4552 = vst.msk [vmem:[#allocation3 + $0x7a8] sm:$0xff] %vm17_vm0, %v4155_v55  ;;  %v924_v62 = vadd.f32 %v860_v44, %v792_v41  ;;  %v9374_v55 = vld [vmem:[#allocation2 + $0x339] sm:$0xff] }
 0x2c0   :  { %v4272_v50 = vadd.f32 %v4271_v27, %v4270_v3  ;;  %v2543_v61 = vmul.f32 %v6545_v45, %v9012_v46  ;;  %v2675_v32 = vmul.f32 %v6550_v47, %v9322_v20  ;;  %v2883_v30 = vmul.f32 %v6555_v6, %v9021_v16  ;;  %11905 = vst [vmem:[#allocation39_spill] sm:$0xff] %v9374_v55 }
 0x2c1   :  { %v4469_v51 = vsel %vm17_vm0, %v4353_v23, 0.0  ;;  %v1039_v12 = vsel %vm17_vm0, %v924_v62, 0.0  ;;  %v1122_v14 = vmul.f32 %v924_v62, %v924_v62  ;;  %1320 = vst.msk [vmem:[#allocation3 + $0x1a0] sm:$0xff] %vm17_vm0, %v924_v62  ;;  %v1868_v3 = vadd.f32 %v1804_v9, %v1660_v25 }
 0x2c2   :  { %v4470_v39 = vadd.f32 %v4469_v51, %v4468_v40  ;;  %v1040_v44 = vadd.f32 %v1039_v12, %v1038_v0  ;;  %v2739_v5 = vadd.f32 %v2675_v32, %v2543_v61  ;;  %v3015_v41 = vmul.f32 %v6563_v33, %v9333_v54  ;;  %v9385_v0 = vld [vmem:[#allocation2 + $0x33c] sm:$0xff] }
 0x2c3   :  { %v1237_v46 = vsel %vm17_vm0, %v1122_v14, 0.0  ;;  %v3620_v60 = vmul.f32 %v6697_v31, %v9035_v56  ;;  %v3752_v48 = vmul.f32 %v6701_v17, %v9347_v28  ;;  %v2000_v23 = vadd.f32 %v1936_v4, %v1868_v3  ;;  %11906 = vst [vmem:[#allocation38_spill] sm:$0xff] %v9385_v0  ;;  %v9401_v3 = vld [vmem:[#allocation2 + $0x33b] sm:$0xff] }
 0x2c4   :  { %v1238_v27 = vadd.f32 %v1237_v46, %v1236_v58  ;;  %v2947_v16 = vadd.f32 %v2883_v30, %v2739_v5  ;;  %v3960_v40 = vmul.f32 %v6706_v42, %v9037_v8  ;;  %v4092_v62 = vmul.f32 %v11854_v15, %v9349_v18  ;;  %v9399_v30 = vld [vmem:[#allocation2 + $0x338] sm:$0xff]  ;;  %11908 = vst [vmem:[#allocation31_spill] sm:$0xff] %v9401_v3 }
 0x2c5   :  { %v3816_v9 = vadd.f32 %v3752_v48, %v3620_v60  ;;  %v389_v25 = vmul.f32 %v11868_v43, %v9062_v2  ;;  %v521_v56 = vmul.f32 %v11869_v49, %v9374_v55  ;;  %v2115_v61 = vsel %vm17_vm0, %v2000_v23, 0.0  ;;  %2397 = vst.msk [vmem:[#allocation3 + $0x3a0] sm:$0xff] %vm17_vm0, %v2000_v23  ;;  %11907 = vst [vmem:[#allocation30_spill] sm:$0xff] %v9399_v30 }
 0x2c6   :  { %v2198_v58 = vmul.f32 %v2000_v23, %v2000_v23  ;;  %v3079_v4 = vadd.f32 %v3015_v41, %v2947_v16  ;;  %v729_v8 = vmul.f32 %v11871_v53, %v9073_v63  ;;  %v2116_v32 = vadd.f32 %v2115_v61, %v2114_v13 }
 0x2c7   :  { %v4024_v51 = vadd.f32 %v3960_v40, %v3816_v9  ;;  %v585_v12 = vadd.f32 %v521_v56, %v389_v25  ;;  %v861_v14 = vmul.f32 %v11872_v57, %v9385_v0  ;;  %v1465_v41 = vmul.f32 %v11841_v7, %v9087_v21 }
 0x2c8   :  { %v2313_v5 = vsel %vm17_vm0, %v2198_v58, 0.0  ;;  %v3196_v46 = vsel %vm17_vm0, %v3079_v4, 0.0  ;;  %v3277_v60 = vmul.f32 %v3079_v4, %v3079_v4  ;;  %3476 = vst.msk [vmem:[#allocation3 + $0x5b0] sm:$0xff] %vm17_vm0, %v3079_v4  ;;  %v1597_v9 = vmul.f32 %v11843_v10, %v9399_v30 }
 0x2c9   :  { %v2314_v13 = vadd.f32 %v2313_v5, %v2312_v34  ;;  %v3197_v48 = vadd.f32 %v3196_v46, %v3195_v52  ;;  %v4156_v23 = vadd.f32 %v4092_v62, %v4024_v51  ;;  %v793_v16 = vadd.f32 %v729_v8, %v585_v12 }
 0x2ca   :  { %v3394_v40 = vsel %vm17_vm0, %v3277_v60, 0.0  ;;  %v1805_v25 = vmul.f32 %v11743_v26, %v9089_v36  ;;  %v1937_v56 = vmul.f32 %v11845_v24, %v9401_v3  ;;  %v1661_v62 = vadd.f32 %v1597_v9, %v1465_v41 }
 0x2cb   :  { %v3395_v61 = vadd.f32 %v3394_v40, %v3393_v37  ;;  %v4273_v58 = vsel %vm17_vm0, %v4156_v23, 0.0  ;;  %v4354_v4 = vmul.f32 %v4156_v23, %v4156_v23  ;;  %4553 = vst.msk [vmem:[#allocation3 + $0x7b0] sm:$0xff] %vm17_vm0, %v4156_v23  ;;  %v925_v34 = vadd.f32 %v861_v14, %v793_v16  ;;  %v9426_v23 = vld [vmem:[#allocation2 + $0x349] sm:$0xff] }
 0x2cc   :  { %v4274_v52 = vadd.f32 %v4273_v58, %v4272_v50  ;;  %v2544_v8 = vmul.f32 %v6545_v45, %v9062_v2  ;;  %v2676_v51 = vmul.f32 %v6550_v47, %v9374_v55  ;;  %v2884_v37 = vmul.f32 %v6555_v6, %v9073_v63  ;;  %11909 = vst [vmem:[#allocation19_spill] sm:$0xff] %v9426_v23 }
 0x2cd   :  { %v4471_v12 = vsel %vm17_vm0, %v4354_v4, 0.0  ;;  %v1041_v5 = vsel %vm17_vm0, %v925_v34, 0.0  ;;  %v1123_v46 = vmul.f32 %v925_v34, %v925_v34  ;;  %1321 = vst.msk [vmem:[#allocation3 + $0x1a8] sm:$0xff] %vm17_vm0, %v925_v34  ;;  %v1869_v50 = vadd.f32 %v1805_v25, %v1661_v62  ;;  %v11911_v62 = vld [vmem:[#allocation36_spill] sm:$0xff] }
 0x2ce   :  { %v4472_v60 = vadd.f32 %v4471_v12, %v4470_v39  ;;  %v1042_v14 = vadd.f32 %v1041_v5, %v1040_v44  ;;  %v2740_v41 = vadd.f32 %v2676_v51, %v2544_v8  ;;  %v3016_v16 = vmul.f32 %v6563_v33, %v9385_v0  ;;  %v9437_v44 = vld [vmem:[#allocation2 + $0x34c] sm:$0xff] }
 0x2cf   :  { %v1239_v2 = vsel %vm17_vm0, %v1123_v46, 0.0  ;;  %v3621_v40 = vmul.f32 %v6697_v31, %v9087_v21  ;;  %v3753_v9 = vmul.f32 %v6701_v17, %v9399_v30  ;;  %v2001_v4 = vadd.f32 %v1937_v56, %v1869_v50  ;;  %11910 = vst [vmem:[#allocation40_spill] sm:$0xff] %v9437_v44  ;;  %v11912_v12 = vld [vmem:[#allocation17_spill] sm:$0xff] }
 0x2d0   :  { %v1240_v58 = vadd.f32 %v1239_v2, %v1238_v27  ;;  %v2948_v63 = vadd.f32 %v2884_v37, %v2740_v41  ;;  %v3961_v39 = vmul.f32 %v6706_v42, %v9089_v36  ;;  %v4093_v34 = vmul.f32 %v11854_v15, %v9401_v3  ;;  %v9451_v41 = vld [vmem:[#allocation2 + $0x348] sm:$0xff] }
 0x2d1   :  { %v3817_v25 = vadd.f32 %v3753_v9, %v3621_v40  ;;  %v390_v8 = vmul.f32 %v11868_v43, %v11911_v62  ;;  %v522_v21 = vmul.f32 %v11869_v49, %v9426_v23  ;;  %v2117_v51 = vsel %vm17_vm0, %v2001_v4, 0.0  ;;  %2398 = vst.msk [vmem:[#allocation3 + $0x3a8] sm:$0xff] %vm17_vm0, %v2001_v4  ;;  %11913 = vst [vmem:[#allocation14_spill] sm:$0xff] %v9451_v41  ;;  %v9453_v2 = vld [vmem:[#allocation2 + $0x34b] sm:$0xff] }
 0x2d2   :  { %v2199_v27 = vmul.f32 %v2001_v4, %v2001_v4  ;;  %v3080_v56 = vadd.f32 %v3016_v16, %v2948_v63  ;;  %v730_v36 = vmul.f32 %v11871_v53, %v11912_v12  ;;  %v2118_v5 = vadd.f32 %v2117_v51, %v2116_v32  ;;  %11914 = vst [vmem:[#allocation22_spill] sm:$0xff] %v9453_v2  ;;  %v11915_v16 = vld [vmem:[#allocation18_spill] sm:$0xff]  ;;  %v11916_v51 = vld [vmem:[#allocation13_spill] sm:$0xff] }
 0x2d3   :  { %v4025_v46 = vadd.f32 %v3961_v39, %v3817_v25  ;;  %v586_v37 = vadd.f32 %v522_v21, %v390_v8  ;;  %v862_v50 = vmul.f32 %v11872_v57, %v9437_v44  ;;  %v1466_v4 = vmul.f32 %v11841_v7, %v11915_v16 }
 0x2d4   :  { %v2315_v40 = vsel %vm17_vm0, %v2199_v27, 0.0  ;;  %v3198_v9 = vsel %vm17_vm0, %v3080_v56, 0.0  ;;  %v3278_v3 = vmul.f32 %v3080_v56, %v3080_v56  ;;  %3477 = vst.msk [vmem:[#allocation3 + $0x5b8] sm:$0xff] %vm17_vm0, %v3080_v56  ;;  %v1598_v21 = vmul.f32 %v11843_v10, %v9451_v41 }
 0x2d5   :  { %v2316_v32 = vadd.f32 %v2315_v40, %v2314_v13  ;;  %v3199_v63 = vadd.f32 %v3198_v9, %v3197_v48  ;;  %v4157_v39 = vadd.f32 %v4093_v34, %v4025_v46  ;;  %v794_v25 = vadd.f32 %v730_v36, %v586_v37 }
 0x2d6   :  { %v3396_v8 = vsel %vm17_vm0, %v3278_v3, 0.0  ;;  %v1806_v27 = vmul.f32 %v11743_v26, %v11916_v51  ;;  %v1938_v30 = vmul.f32 %v11845_v24, %v9453_v2  ;;  %v1662_v34 = vadd.f32 %v1598_v21, %v1466_v4 }
 0x2d7   :  { %v3397_v0 = vadd.f32 %v3396_v8, %v3395_v61  ;;  %v4275_v56 = vsel %vm17_vm0, %v4157_v39, 0.0  ;;  %v4355_v55 = vmul.f32 %v4157_v39, %v4157_v39  ;;  %4554 = vst.msk [vmem:[#allocation3 + $0x7b8] sm:$0xff] %vm17_vm0, %v4157_v39  ;;  %v926_v13 = vadd.f32 %v862_v50, %v794_v25  ;;  %v9478_v39 = vld [vmem:[#allocation2 + $0x351] sm:$0xff] }
 0x2d8   :  { %v4276_v48 = vadd.f32 %v4275_v56, %v4274_v52  ;;  %v2545_v3 = vmul.f32 %v6545_v45, %v11911_v62  ;;  %v2677_v36 = vmul.f32 %v6550_v47, %v9426_v23  ;;  %v2885_v61 = vmul.f32 %v6555_v6, %v11912_v12 }
 0x2d9   :  { %v4473_v46 = vsel %vm17_vm0, %v4355_v55, 0.0  ;;  %v1043_v37 = vsel %vm17_vm0, %v926_v13, 0.0  ;;  %v1124_v40 = vmul.f32 %v926_v13, %v926_v13  ;;  %1322 = vst.msk [vmem:[#allocation3 + $0x1b0] sm:$0xff] %vm17_vm0, %v926_v13  ;;  %v1870_v52 = vadd.f32 %v1806_v27, %v1662_v34  ;;  %v11917_v34 = vld [vmem:[#allocation26_spill] sm:$0xff] }
 0x2da   :  { %v4474_v9 = vadd.f32 %v4473_v46, %v4472_v60  ;;  %v1044_v50 = vadd.f32 %v1043_v37, %v1042_v14  ;;  %v2741_v4 = vadd.f32 %v2677_v36, %v2545_v3  ;;  %v3017_v25 = vmul.f32 %v6563_v33, %v9437_v44  ;;  %v9489_v14 = vld [vmem:[#allocation2 + $0x354] sm:$0xff] }
 0x2db   :  { %v1241_v62 = vsel %vm17_vm0, %v1124_v40, 0.0  ;;  %v3622_v55 = vmul.f32 %v6697_v31, %v11915_v16  ;;  %v3754_v8 = vmul.f32 %v6701_v17, %v9451_v41  ;;  %v2002_v56 = vadd.f32 %v1938_v30, %v1870_v52  ;;  %v11918_v46 = vld [vmem:[#allocation11_spill] sm:$0xff] }
 0x2dc   :  { %v1242_v21 = vadd.f32 %v1241_v62, %v1240_v58  ;;  %v2949_v12 = vadd.f32 %v2885_v61, %v2741_v4  ;;  %v3962_v60 = vmul.f32 %v6706_v42, %v11916_v51  ;;  %v4094_v13 = vmul.f32 %v11854_v15, %v9453_v2  ;;  %v9503_v4 = vld [vmem:[#allocation2 + $0x350] sm:$0xff] }
 0x2dd   :  { %v3818_v27 = vadd.f32 %v3754_v8, %v3622_v55  ;;  %v391_v3 = vmul.f32 %v11868_v43, %v11917_v34  ;;  %v523_v16 = vmul.f32 %v11869_v49, %v9478_v39  ;;  %v2119_v36 = vsel %vm17_vm0, %v2002_v56, 0.0  ;;  %2399 = vst.msk [vmem:[#allocation3 + $0x3b0] sm:$0xff] %vm17_vm0, %v2002_v56  ;;  %v9505_v62 = vld [vmem:[#allocation2 + $0x353] sm:$0xff] }
 0x2de   :  { %v2200_v58 = vmul.f32 %v2002_v56, %v2002_v56  ;;  %v3081_v30 = vadd.f32 %v3017_v25, %v2949_v12  ;;  %v731_v51 = vmul.f32 %v11871_v53, %v11918_v46  ;;  %v2120_v37 = vadd.f32 %v2119_v36, %v2118_v5  ;;  %v11919_v25 = vld [vmem:[#allocation37_spill] sm:$0xff] }
 0x2df   :  { %v4026_v40 = vadd.f32 %v3962_v60, %v3818_v27  ;;  %v587_v61 = vadd.f32 %v523_v16, %v391_v3  ;;  %v863_v52 = vmul.f32 %v11872_v57, %v9489_v14  ;;  %v1467_v56 = vmul.f32 %v11841_v7, %v11919_v25  ;;  %v11920_v36 = vld [vmem:[#allocation9_spill] sm:$0xff] }
 0x2e0   :  { %v2317_v55 = vsel %vm17_vm0, %v2200_v58, 0.0  ;;  %v3200_v8 = vsel %vm17_vm0, %v3081_v30, 0.0  ;;  %v3279_v2 = vmul.f32 %v3081_v30, %v3081_v30  ;;  %3478 = vst.msk [vmem:[#allocation3 + $0x5c0] sm:$0xff] %vm17_vm0, %v3081_v30  ;;  %v1599_v16 = vmul.f32 %v11843_v10, %v9503_v4 }
 0x2e1   :  { %v2318_v5 = vadd.f32 %v2317_v55, %v2316_v32  ;;  %v3201_v12 = vadd.f32 %v3200_v8, %v3199_v63  ;;  %v4158_v60 = vadd.f32 %v4094_v13, %v4026_v40  ;;  %v795_v27 = vadd.f32 %v731_v51, %v587_v61 }
 0x2e2   :  { %v3398_v3 = vsel %vm17_vm0, %v3279_v2, 0.0  ;;  %v1807_v58 = vmul.f32 %v11743_v26, %v11920_v36  ;;  %v1939_v41 = vmul.f32 %v11845_v24, %v9505_v62  ;;  %v1663_v13 = vadd.f32 %v1599_v16, %v1467_v56 }
 0x2e3   :  { %v3399_v44 = vadd.f32 %v3398_v3, %v3397_v0  ;;  %v4277_v30 = vsel %vm17_vm0, %v4158_v60, 0.0  ;;  %v4356_v23 = vmul.f32 %v4158_v60, %v4158_v60  ;;  %4555 = vst.msk [vmem:[#allocation3 + $0x7c0] sm:$0xff] %vm17_vm0, %v4158_v60  ;;  %v927_v32 = vadd.f32 %v863_v52, %v795_v27  ;;  %v9530_v60 = vld [vmem:[#allocation2 + $0x361] sm:$0xff] }
 0x2e4   :  { %v4278_v63 = vadd.f32 %v4277_v30, %v4276_v48  ;;  %v2546_v2 = vmul.f32 %v6545_v45, %v11917_v34  ;;  %v2678_v51 = vmul.f32 %v6550_v47, %v9478_v39  ;;  %v2886_v0 = vmul.f32 %v6555_v6, %v11918_v46 }
 0x2e5   :  { %v4475_v40 = vsel %vm17_vm0, %v4356_v23, 0.0  ;;  %v1045_v61 = vsel %vm17_vm0, %v927_v32, 0.0  ;;  %v1125_v55 = vmul.f32 %v927_v32, %v927_v32  ;;  %1323 = vst.msk [vmem:[#allocation3 + $0x1b8] sm:$0xff] %vm17_vm0, %v927_v32  ;;  %v1871_v48 = vadd.f32 %v1807_v58, %v1663_v13 }
 0x2e6   :  { %v4476_v8 = vadd.f32 %v4475_v40, %v4474_v9  ;;  %v1046_v52 = vadd.f32 %v1045_v61, %v1044_v50  ;;  %v2742_v56 = vadd.f32 %v2678_v51, %v2546_v2  ;;  %v3018_v27 = vmul.f32 %v6563_v33, %v9489_v14  ;;  %v9541_v50 = vld [vmem:[#allocation2 + $0x364] sm:$0xff] }
 0x2e7   :  { %v1243_v34 = vsel %vm17_vm0, %v1125_v55, 0.0  ;;  %v3623_v23 = vmul.f32 %v6697_v31, %v11919_v25  ;;  %v3755_v3 = vmul.f32 %v6701_v17, %v9503_v4  ;;  %v2003_v30 = vadd.f32 %v1939_v41, %v1871_v48  ;;  %v9557_v48 = vld [vmem:[#allocation2 + $0x363] sm:$0xff] }
 0x2e8   :  { %v1244_v16 = vadd.f32 %v1243_v34, %v1242_v21  ;;  %v2950_v46 = vadd.f32 %v2886_v0, %v2742_v56  ;;  %v3963_v9 = vmul.f32 %v6706_v42, %v11920_v36  ;;  %v4095_v32 = vmul.f32 %v11854_v15, %v9505_v62  ;;  %v9555_v0 = vld [vmem:[#allocation2 + $0x360] sm:$0xff] }
 0x2e9   :  { %v3819_v58 = vadd.f32 %v3755_v3, %v3623_v23  ;;  %v392_v13 = vmul.f32 %v11868_v43, %v9218_v19  ;;  %v524_v25 = vmul.f32 %v11869_v49, %v9530_v60  ;;  %v2121_v2 = vsel %vm17_vm0, %v2003_v30, 0.0  ;;  %2400 = vst.msk [vmem:[#allocation3 + $0x3b8] sm:$0xff] %vm17_vm0, %v2003_v30 }
 0x2ea   :  { %v2201_v21 = vmul.f32 %v2003_v30, %v2003_v30  ;;  %v3082_v41 = vadd.f32 %v3018_v27, %v2950_v46  ;;  %v732_v36 = vmul.f32 %v11871_v53, %v9229_v35  ;;  %v2122_v51 = vadd.f32 %v2121_v2, %v2120_v37 }
 0x2eb   :  { %v4027_v40 = vadd.f32 %v3963_v9, %v3819_v58  ;;  %v588_v61 = vadd.f32 %v524_v25, %v392_v13  ;;  %v864_v55 = vmul.f32 %v11872_v57, %v9541_v50  ;;  %v1468_v27 = vmul.f32 %v11841_v7, %v9243_v11 }
 0x2ec   :  { %v2319_v56 = vsel %vm17_vm0, %v2201_v21, 0.0  ;;  %v3202_v34 = vsel %vm17_vm0, %v3082_v41, 0.0  ;;  %v3280_v23 = vmul.f32 %v3082_v41, %v3082_v41  ;;  %3479 = vst.msk [vmem:[#allocation3 + $0x5c8] sm:$0xff] %vm17_vm0, %v3082_v41  ;;  %v1600_v58 = vmul.f32 %v11843_v10, %v9555_v0 }
 0x2ed   :  { %v2320_v37 = vadd.f32 %v2319_v56, %v2318_v5  ;;  %v3203_v3 = vadd.f32 %v3202_v34, %v3201_v12  ;;  %v4159_v30 = vadd.f32 %v4095_v32, %v4027_v40  ;;  %v796_v46 = vadd.f32 %v732_v36, %v588_v61 }
 0x2ee   :  { %v3400_v9 = vsel %vm17_vm0, %v3280_v23, 0.0  ;;  %v1808_v13 = vmul.f32 %v11743_v26, %v9245_v22  ;;  %v1940_v25 = vmul.f32 %v11845_v24, %v9557_v48  ;;  %v1664_v32 = vadd.f32 %v1600_v58, %v1468_v27 }
 0x2ef   :  { %v3401_v2 = vadd.f32 %v3400_v9, %v3399_v44  ;;  %v4279_v21 = vsel %vm17_vm0, %v4159_v30, 0.0  ;;  %v4357_v41 = vmul.f32 %v4159_v30, %v4159_v30  ;;  %4556 = vst.msk [vmem:[#allocation3 + $0x7c8] sm:$0xff] %vm17_vm0, %v4159_v30  ;;  %v928_v5 = vadd.f32 %v864_v55, %v796_v46  ;;  %v9582_v30 = vld [vmem:[#allocation2 + $0x369] sm:$0xff] }
 0x2f0   :  { %v4280_v12 = vadd.f32 %v4279_v21, %v4278_v63  ;;  %v2547_v36 = vmul.f32 %v6545_v45, %v9218_v19  ;;  %v2679_v40 = vmul.f32 %v6550_v47, %v9530_v60  ;;  %v2887_v44 = vmul.f32 %v6555_v6, %v9229_v35  ;;  %11921 = vst [vmem:[#allocation41_spill] sm:$0xff] %v9582_v30 }
 0x2f1   :  { %v4477_v61 = vsel %vm17_vm0, %v4357_v41, 0.0  ;;  %v1047_v56 = vsel %vm17_vm0, %v928_v5, 0.0  ;;  %v1126_v34 = vmul.f32 %v928_v5, %v928_v5  ;;  %1324 = vst.msk [vmem:[#allocation3 + $0x1c0] sm:$0xff] %vm17_vm0, %v928_v5  ;;  %v1872_v63 = vadd.f32 %v1808_v13, %v1664_v32 }
 0x2f2   :  { %v4478_v23 = vadd.f32 %v4477_v61, %v4476_v8  ;;  %v1048_v55 = vadd.f32 %v1047_v56, %v1046_v52  ;;  %v2743_v27 = vadd.f32 %v2679_v40, %v2547_v36  ;;  %v3019_v46 = vmul.f32 %v6563_v33, %v9541_v50  ;;  %v9593_v52 = vld [vmem:[#allocation2 + $0x36c] sm:$0xff] }
 0x2f3   :  { %v1245_v19 = vsel %vm17_vm0, %v1126_v34, 0.0  ;;  %v3624_v9 = vmul.f32 %v6697_v31, %v9243_v11  ;;  %v3756_v58 = vmul.f32 %v6701_v17, %v9555_v0  ;;  %v2004_v41 = vadd.f32 %v1940_v25, %v1872_v63  ;;  %11922 = vst [vmem:[#allocation5_spill] sm:$0xff] %v9593_v52  ;;  %v9611_v63 = vld [vmem:[#allocation2 + $0x36b] sm:$0xff] }
 0x2f4   :  { %v1246_v21 = vadd.f32 %v1245_v19, %v1244_v16  ;;  %v2951_v35 = vadd.f32 %v2887_v44, %v2743_v27  ;;  %v3964_v8 = vmul.f32 %v6706_v42, %v9245_v22  ;;  %v4096_v5 = vmul.f32 %v11854_v15, %v9557_v48  ;;  %v9609_v44 = vld [vmem:[#allocation2 + $0x368] sm:$0xff]  ;;  %11924 = vst [vmem:[#allocation21_spill] sm:$0xff] %v9611_v63 }
 0x2f5   :  { %v3820_v13 = vadd.f32 %v3756_v58, %v3624_v9  ;;  %v393_v32 = vmul.f32 %v11868_v43, %v9270_v1  ;;  %v525_v11 = vmul.f32 %v11869_v49, %v9582_v30  ;;  %v2123_v36 = vsel %vm17_vm0, %v2004_v41, 0.0  ;;  %2401 = vst.msk [vmem:[#allocation3 + $0x3c0] sm:$0xff] %vm17_vm0, %v2004_v41  ;;  %11923 = vst [vmem:[#allocation6_spill] sm:$0xff] %v9609_v44 }
 0x2f6   :  { %v2202_v16 = vmul.f32 %v2004_v41, %v2004_v41  ;;  %v3083_v25 = vadd.f32 %v3019_v46, %v2951_v35  ;;  %v733_v22 = vmul.f32 %v11871_v53, %v9281_v38  ;;  %v9605_v40 = vadd.f32 %v2123_v36, %v2122_v51 }
 0x2f7   :  { %v4028_v61 = vadd.f32 %v3964_v8, %v3820_v13  ;;  %v589_v56 = vadd.f32 %v525_v11, %v393_v32  ;;  %v865_v34 = vmul.f32 %v11872_v57, %v9593_v52  ;;  %v1469_v51 = vmul.f32 %v11841_v7, %v9295_v29 }
 0x2f8   :  { %v2321_v27 = vsel %vm17_vm0, %v2202_v16, 0.0  ;;  %v3204_v19 = vsel %vm17_vm0, %v3083_v25, 0.0  ;;  %v3281_v9 = vmul.f32 %v3083_v25, %v3083_v25  ;;  %3480 = vst.msk [vmem:[#allocation3 + $0x5d0] sm:$0xff] %vm17_vm0, %v3083_v25  ;;  %v1601_v13 = vmul.f32 %v11843_v10, %v9609_v44 }
 0x2f9   :  { %v9618_v46 = vadd.f32 %v2321_v27, %v2320_v37  ;;  %v3205_v58 = vadd.f32 %v3204_v19, %v3203_v3  ;;  %v4160_v41 = vadd.f32 %v4096_v5, %v4028_v61  ;;  %v797_v35 = vadd.f32 %v733_v22, %v589_v56 }
 0x2fa   :  { %v3402_v8 = vsel %vm17_vm0, %v3281_v9, 0.0  ;;  %v1809_v32 = vmul.f32 %v11743_v26, %v9297_v59  ;;  %v1941_v11 = vmul.f32 %v11845_v24, %v9611_v63  ;;  %v1665_v5 = vadd.f32 %v1601_v13, %v1469_v51 }
 0x2fb   :  { %v3403_v36 = vadd.f32 %v3402_v8, %v3401_v2  ;;  %v4281_v16 = vsel %vm17_vm0, %v4160_v41, 0.0  ;;  %v4358_v25 = vmul.f32 %v4160_v41, %v4160_v41  ;;  %4557 = vst.msk [vmem:[#allocation3 + $0x7d0] sm:$0xff] %vm17_vm0, %v4160_v41  ;;  %v929_v37 = vadd.f32 %v865_v34, %v797_v35  ;;  %v326_v41 = vld [vmem:[#allocation2 + $0x379] sm:$0xff] }
 0x2fc   :  { %v4282_v3 = vadd.f32 %v4281_v16, %v4280_v12  ;;  %v2548_v22 = vmul.f32 %v6545_v45, %v9270_v1  ;;  %v2680_v61 = vmul.f32 %v6550_v47, %v9582_v30  ;;  %v2888_v2 = vmul.f32 %v6555_v6, %v9281_v38 }
 0x2fd   :  { %v4479_v56 = vsel %vm17_vm0, %v4358_v25, 0.0  ;;  %v1049_v27 = vsel %vm17_vm0, %v929_v37, 0.0  ;;  %v1127_v19 = vmul.f32 %v929_v37, %v929_v37  ;;  %1325 = vst.msk [vmem:[#allocation3 + $0x1c8] sm:$0xff] %vm17_vm0, %v929_v37  ;;  %v1873_v12 = vadd.f32 %v1809_v32, %v1665_v5  ;;  %v666_v32 = vld [vmem:[#allocation2 + $0x37c] sm:$0xff] }
 0x2fe   :  { %v4480_v9 = vadd.f32 %v4479_v56, %v4478_v23  ;;  %v9638_v34 = vadd.f32 %v1049_v27, %v1048_v55  ;;  %v2744_v51 = vadd.f32 %v2680_v61, %v2548_v22  ;;  %v3020_v35 = vmul.f32 %v6563_v33, %v9593_v52  ;;  %v1402_v56 = vld [vmem:[#allocation2 + $0x378] sm:$0xff] }
 0x2ff   :  { %v1247_v1 = vsel %vm17_vm0, %v1127_v19, 0.0  ;;  %v3625_v8 = vmul.f32 %v6697_v31, %v9295_v29  ;;  %v3757_v13 = vmul.f32 %v6701_v17, %v9609_v44  ;;  %v9649_v38 = vadd.f32 %v1941_v11, %v1873_v12  ;;  %v1742_v27 = vld [vmem:[#allocation2 + $0x37b] sm:$0xff]  ;;  %v11931_v44 = vld [vmem:[#allocation14_spill] sm:$0xff] }
 0x300   :  { %v9647_v16 = vadd.f32 %v1247_v1, %v1246_v21  ;;  %v2952_v23 = vadd.f32 %v2888_v2, %v2744_v51  ;;  %v3965_v55 = vmul.f32 %v6706_v42, %v9297_v59  ;;  %v4097_v37 = vmul.f32 %v11854_v15, %v9611_v63 }
 0x301   :  { %v3821_v25 = vadd.f32 %v3757_v13, %v3625_v8  ;;  %v394_v5 = vmul.f32 %v11868_v43, %v9322_v20  ;;  %v526_v29 = vmul.f32 %v11869_v49, %v326_v41  ;;  %2402 = vst.msk [vmem:[#allocation3 + $0x3c8] sm:$0xff] %vm17_vm0, %v9649_v38  ;;  %v734_v11 = vmul.f32 %v11871_v53, %v9333_v54 }
 0x302   :  { %v3084_v21 = vadd.f32 %v3020_v35, %v2952_v23  ;;  %v866_v59 = vmul.f32 %v11872_v57, %v666_v32  ;;  %v1470_v12 = vmul.f32 %v11841_v7, %v9347_v28  ;;  %v1602_v13 = vmul.f32 %v11843_v10, %v1402_v56 }
 0x303   :  { %v4029_v22 = vadd.f32 %v3965_v55, %v3821_v25  ;;  %v590_v61 = vadd.f32 %v526_v29, %v394_v5  ;;  %v1810_v23 = vmul.f32 %v11743_v26, %v9349_v18  ;;  %v1942_v55 = vmul.f32 %v11845_v24, %v1742_v27 }
 0x304   :  { %v3206_v19 = vsel %vm17_vm0, %v3084_v21, 0.0  ;;  %v3282_v2 = vmul.f32 %v3084_v21, %v3084_v21  ;;  %3481 = vst.msk [vmem:[#allocation3 + $0x5d8] sm:$0xff] %vm17_vm0, %v3084_v21  ;;  %v1666_v21 = vadd.f32 %v1602_v13, %v1470_v12  ;;  %v3021_v12 = vmul.f32 %v6563_v33, %v666_v32  ;;  %v667_v13 = vld [vmem:[#allocation2 + $0x384] sm:$0xff] }
 0x305   :  { %v9667_v51 = vadd.f32 %v3206_v19, %v3205_v58  ;;  %v4161_v1 = vadd.f32 %v4097_v37, %v4029_v22  ;;  %v798_v35 = vadd.f32 %v734_v11, %v590_v61  ;;  %v2549_v11 = vmul.f32 %v6545_v45, %v9322_v20 }
 0x306   :  { %v3404_v8 = vsel %vm17_vm0, %v3282_v2, 0.0  ;;  %v2681_v22 = vmul.f32 %v6550_v47, %v326_v41  ;;  %v3626_v20 = vmul.f32 %v6697_v31, %v9347_v28  ;;  %v3758_v41 = vmul.f32 %v6701_v17, %v1402_v56  ;;  %v11926_v56 = vld [vmem:[#allocation38_spill] sm:$0xff] }
 0x307   :  { %v9674_v25 = vadd.f32 %v3404_v8, %v3403_v36  ;;  %v4283_v5 = vsel %vm17_vm0, %v4161_v1, 0.0  ;;  %v4359_v29 = vmul.f32 %v4161_v1, %v4161_v1  ;;  %4558 = vst.msk [vmem:[#allocation3 + $0x7d8] sm:$0xff] %vm17_vm0, %v4161_v1  ;;  %v9678_v58 = vadd.f32 %v866_v59, %v798_v35 }
 0x308   :  { %v9680_v37 = vadd.f32 %v4283_v5, %v4282_v3  ;;  %v2889_v36 = vmul.f32 %v6555_v6, %v9333_v54  ;;  %v1874_v59 = vadd.f32 %v1810_v23, %v1666_v21  ;;  %v2745_v2 = vadd.f32 %v2681_v22, %v2549_v11  ;;  %v327_v3 = vld [vmem:[#allocation2 + $0x381] sm:$0xff]  ;;  %v11925_v23 = vld [vmem:[#allocation39_spill] sm:$0xff] }
 0x309   :  { %v4481_v61 = vsel %vm17_vm0, %v4359_v29, 0.0  ;;  %1326 = vst.msk [vmem:[#allocation3 + $0x1d0] sm:$0xff] %vm17_vm0, %v9678_v58  ;;  %v3966_v8 = vmul.f32 %v6706_v42, %v9349_v18  ;;  %v3822_v54 = vadd.f32 %v3758_v41, %v3626_v20  ;;  %v395_v5 = vmul.f32 %v11868_v43, %v11925_v23  ;;  %v1403_v11 = vld [vmem:[#allocation2 + $0x380] sm:$0xff] }
 0x30a   :  { %v9690_v19 = vadd.f32 %v4481_v61, %v4480_v9  ;;  %v9696_v1 = vadd.f32 %v1942_v55, %v1874_v59  ;;  %v2953_v35 = vadd.f32 %v2889_v36, %v2745_v2  ;;  %v4098_v9 = vmul.f32 %v11854_v15, %v1742_v27  ;;  %v11927_v27 = vld [vmem:[#allocation30_spill] sm:$0xff]  ;;  %v1743_v59 = vld [vmem:[#allocation2 + $0x383] sm:$0xff] }
 0x30b   :  { %v527_v32 = vmul.f32 %v11869_v49, %v327_v3  ;;  %v735_v55 = vmul.f32 %v11871_v53, %v11926_v56  ;;  %v4030_v29 = vadd.f32 %v3966_v8, %v3822_v54  ;;  %v867_v18 = vmul.f32 %v11872_v57, %v667_v13 }
 0x30c   :  { %2403 = vst.msk [vmem:[#allocation3 + $0x3d0] sm:$0xff] %vm17_vm0, %v9696_v1  ;;  %v9706_v28 = vadd.f32 %v3021_v12, %v2953_v35  ;;  %v1471_v22 = vmul.f32 %v11841_v7, %v11927_v27  ;;  %v1603_v2 = vmul.f32 %v11843_v10, %v1403_v11  ;;  %v11928_v12 = vld [vmem:[#allocation31_spill] sm:$0xff]  ;;  %v1943_v8 = vmul.f32 %v11845_v24, %v1743_v59 }
 0x30d   :  { %v591_v21 = vadd.f32 %v527_v32, %v395_v5  ;;  %v9715_v61 = vadd.f32 %v4098_v9, %v4030_v29  ;;  %v1811_v20 = vmul.f32 %v11743_v26, %v11928_v12  ;;  %v2550_v54 = vmul.f32 %v6545_v45, %v11925_v23  ;;  %v328_v29 = vld [vmem:[#allocation2 + $0x391] sm:$0xff] }
 0x30e   :  { %3482 = vst.msk [vmem:[#allocation3 + $0x5e0] sm:$0xff] %vm17_vm0, %v9706_v28  ;;  %v1667_v35 = vadd.f32 %v1603_v2, %v1471_v22  ;;  %v2682_v9 = vmul.f32 %v6550_v47, %v327_v3  ;;  %v2890_v5 = vmul.f32 %v6555_v6, %v11926_v56  ;;  %v3627_v22 = vmul.f32 %v6697_v31, %v11927_v27  ;;  %v668_v56 = vld [vmem:[#allocation2 + $0x394] sm:$0xff] }
 0x30f   :  { %v799_v36 = vadd.f32 %v735_v55, %v591_v21  ;;  %4559 = vst.msk [vmem:[#allocation3 + $0x7e0] sm:$0xff] %vm17_vm0, %v9715_v61  ;;  %v2203_v21 = vmul.f32 %v9649_v38, %v9649_v38  ;;  %v3759_v23 = vmul.f32 %v6701_v17, %v1403_v11  ;;  %v3967_v2 = vmul.f32 %v6706_v42, %v11928_v12  ;;  %v11930_v12 = vld [vmem:[#allocation40_spill] sm:$0xff] }
 0x310   :  { %v1875_v32 = vadd.f32 %v1811_v20, %v1667_v35  ;;  %v2746_v55 = vadd.f32 %v2682_v9, %v2550_v54  ;;  %v4099_v35 = vmul.f32 %v11854_v15, %v1743_v59  ;;  %v11929_v54 = vld [vmem:[#allocation19_spill] sm:$0xff]  ;;  %v2125_v27 = vsel %vm17_vm0, %v9649_v38, 0.0 }
 0x311   :  { %v9722_v41 = vadd.f32 %v867_v18, %v799_v36  ;;  %v3022_v18 = vmul.f32 %v6563_v33, %v667_v13  ;;  %v3823_v20 = vadd.f32 %v3759_v23, %v3627_v22  ;;  %v396_v9 = vmul.f32 %v11868_v43, %v11929_v54  ;;  %v1404_v23 = vld [vmem:[#allocation2 + $0x390] sm:$0xff] }
 0x312   :  { %v9738_v3 = vadd.f32 %v1943_v8, %v1875_v32  ;;  %v2954_v36 = vadd.f32 %v2890_v5, %v2746_v55  ;;  %v528_v13 = vmul.f32 %v11869_v49, %v328_v29  ;;  %v1128_v11 = vmul.f32 %v9678_v58, %v9678_v58 }
 0x313   :  { %1327 = vst.msk [vmem:[#allocation3 + $0x1d8] sm:$0xff] %vm17_vm0, %v9722_v41  ;;  %v736_v5 = vmul.f32 %v11871_v53, %v11930_v12  ;;  %v2323_v59 = vsel %vm17_vm0, %v2203_v21, 0.0  ;;  %v4031_v32 = vadd.f32 %v3967_v2, %v3823_v20  ;;  %v868_v22 = vmul.f32 %v11872_v57, %v668_v56 }
 0x314   :  { %2404 = vst.msk [vmem:[#allocation3 + $0x3d8] sm:$0xff] %vm17_vm0, %v9738_v3  ;;  %v9752_v8 = vadd.f32 %v3022_v18, %v2954_v36  ;;  %v592_v55 = vadd.f32 %v528_v13, %v396_v9  ;;  %v2126_v38 = vadd.f32 %v2125_v27, %v9605_v40  ;;  %v2324_v63 = vadd.f32 %v2323_v59, %v9618_v46  ;;  %v1744_v9 = vld [vmem:[#allocation2 + $0x393] sm:$0xff] }
 0x315   :  { %v1472_v18 = vmul.f32 %v11841_v7, %v11931_v44  ;;  %v1051_v36 = vsel %vm17_vm0, %v9678_v58, 0.0  ;;  %v2204_v21 = vmul.f32 %v9696_v1, %v9696_v1  ;;  %v9768_v2 = vadd.f32 %v4099_v35, %v4031_v32  ;;  %v11932_v27 = vld [vmem:[#allocation22_spill] sm:$0xff] }
 0x316   :  { %3483 = vst.msk [vmem:[#allocation3 + $0x5e8] sm:$0xff] %vm17_vm0, %v9752_v8  ;;  %v800_v20 = vadd.f32 %v736_v5, %v592_v55  ;;  %v1052_v40 = vadd.f32 %v1051_v36, %v9638_v34  ;;  %v1249_v46 = vsel %vm17_vm0, %v1128_v11, 0.0  ;;  %v1604_v13 = vmul.f32 %v11843_v10, %v1404_v23 }
 0x317   :  { %v1812_v59 = vmul.f32 %v11743_v26, %v11932_v27  ;;  %v1250_v52 = vadd.f32 %v1249_v46, %v9647_v16  ;;  %v2127_v58 = vsel %vm17_vm0, %v9696_v1, 0.0  ;;  %v3283_v35 = vmul.f32 %v9706_v28, %v9706_v28  ;;  %4560 = vst.msk [vmem:[#allocation3 + $0x7e8] sm:$0xff] %vm17_vm0, %v9768_v2 }
 0x318   :  { %v9782_v5 = vadd.f32 %v868_v22, %v800_v20  ;;  %v1668_v34 = vadd.f32 %v1604_v13, %v1472_v18  ;;  %v1944_v11 = vmul.f32 %v11845_v24, %v1744_v9  ;;  %v2551_v32 = vmul.f32 %v6545_v45, %v11929_v54  ;;  %v329_v54 = vld [vmem:[#allocation2 + $0x399] sm:$0xff] }
 0x319   :  { %v2683_v55 = vmul.f32 %v6550_v47, %v328_v29  ;;  %v2128_v16 = vadd.f32 %v2127_v58, %v2126_v38  ;;  %v2325_v36 = vsel %vm17_vm0, %v2204_v21, 0.0  ;;  %v3208_v1 = vsel %vm17_vm0, %v9706_v28, 0.0 }
 0x31a   :  { %1328 = vst.msk [vmem:[#allocation3 + $0x1e0] sm:$0xff] %vm17_vm0, %v9782_v5  ;;  %v2891_v22 = vmul.f32 %v6555_v6, %v11930_v12  ;;  %v2326_v18 = vadd.f32 %v2325_v36, %v2324_v63  ;;  %v3209_v20 = vadd.f32 %v3208_v1, %v9667_v51  ;;  %v1876_v46 = vadd.f32 %v1812_v59, %v1668_v34  ;;  %v669_v12 = vld [vmem:[#allocation2 + $0x39c] sm:$0xff] }
 0x31b   :  { %v2747_v13 = vadd.f32 %v2683_v55, %v2551_v32  ;;  %v3406_v29 = vsel %vm17_vm0, %v3283_v35, 0.0  ;;  %v3023_v38 = vmul.f32 %v6563_v33, %v668_v56  ;;  %v3628_v21 = vmul.f32 %v6697_v31, %v11931_v44  ;;  %v1405_v1 = vld [vmem:[#allocation2 + $0x398] sm:$0xff] }
 0x31c   :  { %v3760_v28 = vmul.f32 %v6701_v17, %v1404_v23  ;;  %v4360_v58 = vmul.f32 %v9715_v61, %v9715_v61  ;;  %v9803_v30 = vadd.f32 %v1944_v11, %v1876_v46  ;;  %v3968_v51 = vmul.f32 %v6706_v42, %v11932_v27 }
 0x31d   :  { %v2955_v63 = vadd.f32 %v2891_v22, %v2747_v13  ;;  %v4100_v35 = vmul.f32 %v11854_v15, %v1744_v9  ;;  %v397_v56 = vmul.f32 %v11868_v43, %v9478_v39  ;;  %v529_v44 = vmul.f32 %v11869_v49, %v329_v54 }
 0x31e   :  { %v3824_v59 = vadd.f32 %v3760_v28, %v3628_v21  ;;  %v3407_v23 = vadd.f32 %v3406_v29, %v9674_v25  ;;  %v1129_v34 = vmul.f32 %v9722_v41, %v9722_v41  ;;  %2405 = vst.msk [vmem:[#allocation3 + $0x3e0] sm:$0xff] %vm17_vm0, %v9803_v30  ;;  %v737_v27 = vmul.f32 %v11871_v53, %v9489_v14 }
 0x31f   :  { %v9816_v11 = vadd.f32 %v3023_v38, %v2955_v63  ;;  %v4285_v9 = vsel %vm17_vm0, %v9715_v61, 0.0  ;;  %v593_v55 = vadd.f32 %v529_v44, %v397_v56  ;;  %v869_v36 = vmul.f32 %v11872_v57, %v669_v12 }
 0x320   :  { %v4032_v32 = vadd.f32 %v3968_v51, %v3824_v59  ;;  %v4286_v25 = vadd.f32 %v4285_v9, %v9680_v37  ;;  %v4483_v22 = vsel %vm17_vm0, %v4360_v58, 0.0  ;;  %v1053_v46 = vsel %vm17_vm0, %v9722_v41, 0.0  ;;  %v1745_v37 = vld [vmem:[#allocation2 + $0x39b] sm:$0xff] }
 0x321   :  { %3484 = vst.msk [vmem:[#allocation3 + $0x5f0] sm:$0xff] %vm17_vm0, %v9816_v11  ;;  %v1473_v13 = vmul.f32 %v11841_v7, %v9503_v4  ;;  %v4484_v61 = vadd.f32 %v4483_v22, %v9690_v19  ;;  %v2205_v29 = vmul.f32 %v9738_v3, %v9738_v3  ;;  %v801_v21 = vadd.f32 %v737_v27, %v593_v55 }
 0x322   :  { %v9834_v38 = vadd.f32 %v4100_v35, %v4032_v32  ;;  %v1054_v28 = vadd.f32 %v1053_v46, %v1052_v40  ;;  %v1251_v58 = vsel %vm17_vm0, %v1129_v34, 0.0  ;;  %v1605_v41 = vmul.f32 %v11843_v10, %v1405_v1  ;;  %v330_v46 = vld [vmem:[#allocation2 + $0x3a9] sm:$0xff] }
 0x323   :  { %v1813_v63 = vmul.f32 %v11743_v26, %v9505_v62  ;;  %v1252_v51 = vadd.f32 %v1251_v58, %v1250_v52  ;;  %v2129_v59 = vsel %vm17_vm0, %v9738_v3, 0.0  ;;  %v3284_v19 = vmul.f32 %v9752_v8, %v9752_v8 }
 0x324   :  { %4561 = vst.msk [vmem:[#allocation3 + $0x7f0] sm:$0xff] %vm17_vm0, %v9834_v38  ;;  %v9846_v35 = vadd.f32 %v869_v36, %v801_v21  ;;  %v1669_v40 = vadd.f32 %v1605_v41, %v1473_v13  ;;  %v1945_v56 = vmul.f32 %v11845_v24, %v1745_v37  ;;  %v2552_v44 = vmul.f32 %v6545_v45, %v9478_v39 }
 0x325   :  { %v2684_v34 = vmul.f32 %v6550_v47, %v329_v54  ;;  %v2130_v52 = vadd.f32 %v2129_v59, %v2128_v16  ;;  %v2327_v27 = vsel %vm17_vm0, %v2205_v29, 0.0  ;;  %v3210_v3 = vsel %vm17_vm0, %v9752_v8, 0.0  ;;  %v1406_v29 = vld [vmem:[#allocation2 + $0x3a8] sm:$0xff] }
 0x326   :  { %1329 = vst.msk [vmem:[#allocation3 + $0x1e8] sm:$0xff] %vm17_vm0, %v9846_v35  ;;  %v2892_v9 = vmul.f32 %v6555_v6, %v9489_v14  ;;  %v2328_v32 = vadd.f32 %v2327_v27, %v2326_v18  ;;  %v3211_v55 = vadd.f32 %v3210_v3, %v3209_v20  ;;  %v1877_v36 = vadd.f32 %v1813_v63, %v1669_v40  ;;  %v1746_v40 = vld [vmem:[#allocation2 + $0x3ab] sm:$0xff] }
 0x327   :  { %v2748_v22 = vadd.f32 %v2684_v34, %v2552_v44  ;;  %v3408_v45 = vsel %vm17_vm0, %v3284_v19, 0.0  ;;  %v3024_v47 = vmul.f32 %v6563_v33, %v669_v12  ;;  %v3629_v39 = vmul.f32 %v6697_v31, %v9503_v4  ;;  %v670_v31 = vld [vmem:[#allocation2 + $0x3ac] sm:$0xff] }
 0x328   :  { %v3761_v8 = vmul.f32 %v6701_v17, %v1405_v1  ;;  %v4361_v16 = vmul.f32 %v9768_v2, %v9768_v2  ;;  %v9866_v54 = vadd.f32 %v1945_v56, %v1877_v36  ;;  %v3969_v14 = vmul.f32 %v6706_v42, %v9505_v62  ;;  %v331_v56 = vld [vmem:[#allocation2 + $0x3b1] sm:$0xff] }
 0x329   :  { %v2956_v6 = vadd.f32 %v2892_v9, %v2748_v22  ;;  %v4101_v20 = vmul.f32 %v11854_v15, %v1745_v37  ;;  %v398_v33 = vmul.f32 %v11868_v43, %v9530_v60  ;;  %v530_v12 = vmul.f32 %v11869_v49, %v330_v46  ;;  %v11933_v9 = vld [vmem:[#allocation41_spill] sm:$0xff] }
 0x32a   :  { %v3825_v18 = vadd.f32 %v3761_v8, %v3629_v39  ;;  %v4287_v17 = vsel %vm17_vm0, %v9768_v2, 0.0  ;;  %v1130_v4 = vmul.f32 %v9782_v5, %v9782_v5  ;;  %2406 = vst.msk [vmem:[#allocation3 + $0x3e8] sm:$0xff] %vm17_vm0, %v9866_v54  ;;  %v738_v42 = vmul.f32 %v11871_v53, %v9541_v50 }
 0x32b   :  { %v3088_v1 = vadd.f32 %v3024_v47, %v2956_v6  ;;  %v3409_v15 = vadd.f32 %v3408_v45, %v3407_v23  ;;  %v4288_v62 = vadd.f32 %v4287_v17, %v4286_v25  ;;  %v594_v60 = vadd.f32 %v530_v12, %v398_v33 }
 0x32c   :  { %v4033_v13 = vadd.f32 %v3969_v14, %v3825_v18  ;;  %v4485_v21 = vsel %vm17_vm0, %v4361_v16, 0.0  ;;  %v1055_v2 = vsel %vm17_vm0, %v9782_v5, 0.0  ;;  %v870_v37 = vmul.f32 %v11872_v57, %v670_v31  ;;  %v11934_v31 = vld [vmem:[#allocation5_spill] sm:$0xff] }
 0x32d   :  { %3485 = vst.msk [vmem:[#allocation3 + $0x5f8] sm:$0xff] %vm17_vm0, %v3088_v1  ;;  %v1474_v58 = vmul.f32 %v11841_v7, %v9555_v0  ;;  %v4486_v41 = vadd.f32 %v4485_v21, %v4484_v61  ;;  %v2206_v50 = vmul.f32 %v9803_v30, %v9803_v30  ;;  %v802_v25 = vadd.f32 %v738_v42, %v594_v60 }
 0x32e   :  { %v4165_v23 = vadd.f32 %v4101_v20, %v4033_v13  ;;  %v1056_v63 = vadd.f32 %v1055_v2, %v1054_v28  ;;  %v1253_v59 = vsel %vm17_vm0, %v1130_v4, 0.0  ;;  %v3285_v19 = vmul.f32 %v9816_v11, %v9816_v11  ;;  %v1407_v2 = vld [vmem:[#allocation2 + $0x3b0] sm:$0xff] }
 0x32f   :  { %v1606_v5 = vmul.f32 %v11843_v10, %v1406_v29  ;;  %v1254_v44 = vadd.f32 %v1253_v59, %v1252_v51  ;;  %v2131_v0 = vsel %vm17_vm0, %v9803_v30, 0.0  ;;  %v4362_v61 = vmul.f32 %v9834_v38, %v9834_v38 }
 0x330   :  { %4562 = vst.msk [vmem:[#allocation3 + $0x7f8] sm:$0xff] %vm17_vm0, %v4165_v23  ;;  %v1814_v28 = vmul.f32 %v11743_v26, %v9557_v48  ;;  %v1131_v34 = vmul.f32 %v9846_v35, %v9846_v35  ;;  %v934_v27 = vadd.f32 %v870_v37, %v802_v25  ;;  %v399_v36 = vmul.f32 %v11868_v43, %v11933_v9 }
 0x331   :  { %v1670_v3 = vadd.f32 %v1606_v5, %v1474_v58  ;;  %v2329_v51 = vsel %vm17_vm0, %v2206_v50, 0.0  ;;  %v3212_v30 = vsel %vm17_vm0, %v9816_v11, 0.0  ;;  %v1946_v22 = vmul.f32 %v11845_v24, %v1746_v40  ;;  %v671_v11 = vld [vmem:[#allocation2 + $0x3b4] sm:$0xff]  ;;  %v11936_v40 = vld [vmem:[#allocation21_spill] sm:$0xff] }
 0x332   :  { %v531_v46 = vmul.f32 %v11869_v49, %v331_v56  ;;  %v2132_v45 = vadd.f32 %v2131_v0, %v2130_v52  ;;  %v2330_v47 = vadd.f32 %v2329_v51, %v2328_v32  ;;  %v3213_v48 = vadd.f32 %v3212_v30, %v3211_v55  ;;  %1330 = vst.msk [vmem:[#allocation3 + $0x1f0] sm:$0xff] %vm17_vm0, %v934_v27 }
 0x333   :  { %v3410_v39 = vsel %vm17_vm0, %v3285_v19, 0.0  ;;  %v4289_v43 = vsel %vm17_vm0, %v9834_v38, 0.0  ;;  %v1057_v16 = vsel %vm17_vm0, %v9846_v35, 0.0  ;;  %v1878_v6 = vadd.f32 %v1814_v28, %v1670_v3 }
 0x334   :  { %v3411_v8 = vadd.f32 %v3410_v39, %v3409_v15  ;;  %v4487_v14 = vsel %vm17_vm0, %v4362_v61, 0.0  ;;  %v1058_v18 = vadd.f32 %v1057_v16, %v1056_v63  ;;  %v1255_v49 = vsel %vm17_vm0, %v1131_v34, 0.0  ;;  %v1747_v63 = vld [vmem:[#allocation2 + $0x3b3] sm:$0xff] }
 0x335   :  { %v595_v52 = vadd.f32 %v531_v46, %v399_v36  ;;  %v2207_v32 = vmul.f32 %v9866_v54, %v9866_v54  ;;  %v3214_v55 = vsel %vm17_vm0, %v3088_v1, 0.0  ;;  %v3286_v20 = vmul.f32 %v3088_v1, %v3088_v1 }
 0x336   :  { %v2010_v33 = vadd.f32 %v1946_v22, %v1878_v6  ;;  %v3215_v12 = vadd.f32 %v3214_v55, %v3213_v48  ;;  %v1132_v38 = vmul.f32 %v934_v27, %v934_v27  ;;  %v739_v35 = vmul.f32 %v11871_v53, %v11934_v31 }
 0x337   :  { %v871_v17 = vmul.f32 %v11872_v57, %v671_v11  ;;  %v4290_v4 = vadd.f32 %v4289_v43, %v4288_v62  ;;  %v4488_v42 = vadd.f32 %v4487_v14, %v4486_v41  ;;  %v1256_v15 = vadd.f32 %v1255_v49, %v1254_v44  ;;  %v11935_v57 = vld [vmem:[#allocation6_spill] sm:$0xff] }
 0x338   :  { %v2133_v13 = vsel %vm17_vm0, %v9866_v54, 0.0  ;;  %2407 = vst.msk [vmem:[#allocation3 + $0x3f0] sm:$0xff] %vm17_vm0, %v2010_v33  ;;  %v4363_v29 = vmul.f32 %v4165_v23, %v4165_v23  ;;  %v1059_v1 = vsel %vm17_vm0, %v934_v27, 0.0  ;;  %v803_v21 = vadd.f32 %v739_v35, %v595_v52 }
 0x339   :  { %v2134_v60 = vadd.f32 %v2133_v13, %v2132_v45  ;;  %v2331_v37 = vsel %vm17_vm0, %v2207_v32, 0.0  ;;  %v3412_v53 = vsel %vm17_vm0, %v3286_v20, 0.0  ;;  %v1060_v58 = vadd.f32 %v1059_v1, %v1058_v18 }
 0x33a   :  { %v1475_v62 = vmul.f32 %v11841_v7, %v11935_v57  ;;  %v3216_v41 = vrot.slane %v3215_v12, 4  ;;  %v3413_v50 = vadd.f32 %v3412_v53, %v3411_v8  ;;  %v1257_v54 = vsel %vm17_vm0, %v1132_v38, 0.0 }
 0x33b   :  { %v935_v25 = vadd.f32 %v871_v17, %v803_v21  ;;  %v4291_v59 = vsel %vm17_vm0, %v4165_v23, 0.0  ;;  %v1258_v19 = vadd.f32 %v1257_v54, %v1256_v15  ;;  %v1607_v5 = vmul.f32 %v11843_v10, %v1407_v2 }
 0x33c   :  { %v1815_v56 = vmul.f32 %v11743_v26, %v11936_v40  ;;  %v4292_v44 = vadd.f32 %v4291_v59, %v4290_v4  ;;  %v4489_v0 = vsel %vm17_vm0, %v4363_v29, 0.0  ;;  %v2208_v28 = vmul.f32 %v2010_v33, %v2010_v33 }
 0x33d   :  { %v1061_v61 = vsel %vm17_vm0, %v935_v25, 0.0  ;;  %v1133_v7 = vmul.f32 %v935_v25, %v935_v25  ;;  %1331 = vst.msk [vmem:[#allocation3 + $0x1f8] sm:$0xff] %vm17_vm0, %v935_v25  ;;  %v1671_v27 = vadd.f32 %v1607_v5, %v1475_v62  ;;  %v1947_v3 = vmul.f32 %v11845_v24, %v1747_v63 }
 0x33e   :  { %v1062_v34 = vadd.f32 %v1061_v61, %v1060_v58  ;;  %v2332_v23 = vadd.f32 %v2331_v37, %v2330_v47  ;;  %v3414_v9 = vrot.slane %v3413_v50, 4  ;;  %v4490_v36 = vadd.f32 %v4489_v0, %v4488_v42 }
 0x33f   :  { %v1259_v10 = vsel %vm17_vm0, %v1133_v7, 0.0  ;;  %v2135_v26 = vsel %vm17_vm0, %v2010_v33, 0.0  ;;  %v1879_v22 = vadd.f32 %v1815_v56, %v1671_v27  ;;  %v3217_v46 = vadd.f32 %v3216_v41, %v3215_v12 }
 0x340   :  { %v1063_v51 = vrot.slane %v1062_v34, 4  ;;  %v1260_v30 = vadd.f32 %v1259_v10, %v1258_v19  ;;  %v4293_v45 = vrot.slane %v4292_v44, 4  ;;  %v2136_v48 = vadd.f32 %v2135_v26, %v2134_v60 }
 0x341   :  { %v2333_v39 = vsel %vm17_vm0, %v2208_v28, 0.0  ;;  %v2011_v16 = vadd.f32 %v1947_v3, %v1879_v22  ;;  %v3415_v6 = vadd.f32 %v3414_v9, %v3413_v50  ;;  %v4491_v24 = vrot.slane %v4490_v36, 4 }
 0x342   :  { %v1064_v8 = vadd.f32 %v1063_v51, %v1062_v34  ;;  %v1261_v43 = vrot.slane %v1260_v30, 4  ;;  %v2334_v47 = vadd.f32 %v2333_v39, %v2332_v23  ;;  %v4294_v52 = vadd.f32 %v4293_v45, %v4292_v44 }
 0x343   :  { %v2137_v18 = vsel %vm17_vm0, %v2011_v16, 0.0  ;;  %v2209_v49 = vmul.f32 %v2011_v16, %v2011_v16  ;;  %2408 = vst.msk [vmem:[#allocation3 + $0x3f8] sm:$0xff] %vm17_vm0, %v2011_v16  ;;  %v3218_v55 = vrot.slane %v3217_v46, 2  ;;  %v4492_v12 = vadd.f32 %v4491_v24, %v4490_v36 }
 0x344   :  { %v1065_v11 = vrot.slane %v1064_v8, 2  ;;  %v1262_v14 = vadd.f32 %v1261_v43, %v1260_v30  ;;  %v2138_v32 = vadd.f32 %v2137_v18, %v2136_v48  ;;  %v3416_v17 = vrot.slane %v3415_v6, 2  ;;  %v4571_v48 = vld [vmem:[%s11498_s2] sm:$0x1]  ;;  %v4579_v18 = vld [vmem:[#allocation3 + $0x18] sm:$0xff] }
 0x345   :  { %v2335_v33 = vsel %vm17_vm0, %v2209_v49, 0.0  ;;  %v4295_v4 = vrot.slane %v4294_v52, 2  ;;  %v3219_v60 = vadd.f32 %v3218_v55, %v3217_v46  ;;  %v4493_v29 = vrot.slane %v4492_v12, 2  ;;  %v4573_v43 = vld [vmem:[%s11499_s3] sm:$0x1] }
 0x346   :  { %v1263_v20 = vrot.slane %v1262_v14, 2  ;;  %v1066_v38 = vadd.f32 %v1065_v11, %v1064_v8  ;;  %v2139_v31 = vrot.slane %v2138_v32, 4  ;;  %v2336_v35 = vadd.f32 %v2335_v33, %v2334_v47  ;;  %v4576_v47 = vld [vmem:[#allocation3] sm:$0xff]  ;;  %v4577_v11 = vld [vmem:[#allocation3 + $0x8] sm:$0xff] }
 0x347   :  { %v3417_v37 = vadd.f32 %v3416_v17, %v3415_v6  ;;  %v4296_v53 = vadd.f32 %v4295_v4, %v4294_v52  ;;  %v3220_v41 = vrot.slane %v3219_v60, 1  ;;  %v4494_v50 = vadd.f32 %v4493_v29, %v4492_v12  ;;  %v11937_v6 = vld [vmem:[#allocation4_spill] sm:$0xff]  ;;  %v4581_v33 = vld [vmem:[#allocation3 + $0x28] sm:$0xff]  ;;  %v4582_v12 = vld [vmem:[#allocation3 + $0x30] sm:$0xff] }
 0x348   :  { %v1264_v42 = vadd.f32 %v1263_v20, %v1262_v14  ;;  %v2140_v15 = vadd.f32 %v2139_v31, %v2138_v32  ;;  %v2337_v13 = vrot.slane %v2336_v35, 4  ;;  %v1067_v1 = vrot.slane %v1066_v38, 1  ;;  %v4578_v14 = vld [vmem:[#allocation3 + $0x10] sm:$0xff]  ;;  %v4580_v49 = vld [vmem:[#allocation3 + $0x20] sm:$0xff] }
 0x349   :  { %v3418_v59 = vrot.slane %v3417_v37, 1  ;;  %v4297_v19 = vrot.slane %v4296_v53, 1  ;;  %v3221_v44 = vadd.f32 %v3220_v41, %v3219_v60  ;;  %v4495_v0 = vrot.slane %v4494_v50, 1 }
 0x34a   :  { %v2141_v21 = vrot.slane %v2140_v15, 2  ;;  %v2338_v2 = vadd.f32 %v2337_v13, %v2336_v35  ;;  %v1265_v58 = vrot.slane %v1264_v42, 1  ;;  %v1068_v54 = vadd.f32 %v1067_v1, %v1066_v38  ;;  %v4583_v38 = vld [vmem:[#allocation3 + $0x38] sm:$0xff]  ;;  %v4586_v13 = vld [vmem:[#allocation3 + $0x50] sm:$0xff] }
 0x34b   :  { %v3419_v28 = vadd.f32 %v3418_v59, %v3417_v37  ;;  %v4298_v34 = vadd.f32 %v4297_v19, %v4296_v53  ;;  %v4496_v23 = vadd.f32 %v4495_v0, %v4494_v50  ;;  %v4588_v37 = vld [vmem:[#allocation3 + $0x60] sm:$0xff]  ;;  %v4589_v53 = vld [vmem:[#allocation3 + $0x68] sm:$0xff] }
 0x34c   :  { %v2142_v57 = vadd.f32 %v2141_v21, %v2140_v15  ;;  %v2339_v62 = vrot.slane %v2338_v2, 2  ;;  %v1266_v5 = vadd.f32 %v1265_v58, %v1264_v42  ;;  %v4584_v42 = vld [vmem:[#allocation3 + $0x40] sm:$0xff]  ;;  %v4585_v15 = vld [vmem:[#allocation3 + $0x48] sm:$0xff] }
 0x34e   :  { %v2143_v25 = vrot.slane %v2142_v57, 1  ;;  %v2340_v63 = vadd.f32 %v2339_v62, %v2338_v2  ;;  %v4587_v2 = vld [vmem:[#allocation3 + $0x58] sm:$0xff] }
 0x350   :  { %v2144_v40 = vadd.f32 %v2143_v25, %v2142_v57  ;;  %v2341_v56 = vrot.slane %v2340_v63, 1 }
 0x352   :  { %v2145_v61 = vadd.f32 %v2144_v40, %v1068_v54  ;;  %v2342_v7 = vadd.f32 %v2341_v56, %v2340_v63 }
 0x354   :  { %v2343_v27 = vadd.f32 %v2342_v7, %v1266_v5  ;;  %v3222_v3 = vadd.f32 %v3221_v44, %v2145_v61  ;;  %v4590_v7 = vld [vmem:[#allocation3 + $0x70] sm:$0xff] }
 0x356   :  { %v3420_v9 = vadd.f32 %v3419_v28, %v2343_v27  ;;  %v4299_v36 = vadd.f32 %v4298_v34, %v3222_v3  ;;  %v4591_v28 = vld [vmem:[#allocation3 + $0x78] sm:$0xff]  ;;  %v4592_v34 = vld [vmem:[#allocation3 + $0x80] sm:$0xff] }
 0x358   :  { %v4497_v10 = vadd.f32 %v4496_v23, %v3420_v9  ;;  %v4564_v26 = vmul.f32 0.00048828125, %v4299_v36  ;;  %v4593_v36 = vld [vmem:[#allocation3 + $0x88] sm:$0xff] }
 0x35a   :  { %v4565_v51 = vmul.f32 0.00048828125, %v4497_v10  ;;  %v4566_v30 = vmul.f32 %v4564_v26, %v4564_v26  ;;  %v4594_v10 = vld [vmem:[#allocation3 + $0x90] sm:$0xff] }
 0x35c   :  { %v4567_v22 = vsub.f32 %v4565_v51, %v4566_v30 }
 0x35e   :  { %v4568_v46 = vmax.f32 %v4567_v22, 0.0 }
 0x360   :  { %v4569_v45 = vadd.f32 1e-05, %v4568_v46 }
 0x362   :  { %5812 = vrsqrt.f32 %v4569_v45  ;;  %v4596_v45 = vld [vmem:[#allocation3 + $0xa0] sm:$0xff] }
 0x36c   :  { %v5813_v39 = vpop.eup %5812 }
 0x36d   :  { %v4572_v8 = vmul.f32 %v5813_v39, %v4571_v48  ;;  %v4597_v48 = vld [vmem:[#allocation3 + $0xa8] sm:$0xff] }
 0x36f   :  { %v4574_v16 = vmul.f32 %v4572_v8, %v4564_v26  ;;  %v9955_v24 = vrot.slane %v4572_v8, %v11937_v6  ;;  %v4595_v26 = vld [vmem:[#allocation3 + $0x98] sm:$0xff] }
 0x371   :  { %v4575_v52 = vsub.f32 %v4573_v43, %v4574_v16  ;;  %v4646_v32 = vmul.f32 %v9955_v24, %v4576_v47  ;;  %v4647_v55 = vmul.f32 %v9955_v24, %v4577_v11  ;;  %v4648_v20 = vmul.f32 %v9955_v24, %v4578_v14 }
 0x372   :  { %v4649_v31 = vmul.f32 %v9955_v24, %v4579_v18  ;;  %v4650_v35 = vmul.f32 %v9955_v24, %v4580_v49  ;;  %v4651_v17 = vmul.f32 %v9955_v24, %v4581_v33  ;;  %v4652_v4 = vmul.f32 %v9955_v24, %v4582_v12  ;;  %v4598_v18 = vld [vmem:[#allocation3 + $0xb0] sm:$0xff]  ;;  %v4599_v49 = vld [vmem:[#allocation3 + $0xb8] sm:$0xff]  ;;  %v4601_v12 = vld [vmem:[#allocation3 + $0xc8] sm:$0xff] }
 0x373   :  { %v9965_v60 = vrot.slane %v4575_v52, %v11937_v6  ;;  %v4653_v29 = vmul.f32 %v9955_v24, %v4583_v38  ;;  %v4654_v1 = vmul.f32 %v9955_v24, %v4584_v42  ;;  %v4655_v21 = vmul.f32 %v9955_v24, %v4585_v15  ;;  %v4600_v52 = vld [vmem:[#allocation3 + $0xc0] sm:$0xff]  ;;  %v4602_v38 = vld [vmem:[#allocation3 + $0xd0] sm:$0xff] }
 0x374   :  { %v4656_v58 = vmul.f32 %v9955_v24, %v4586_v13  ;;  %v4657_v57 = vmul.f32 %v9955_v24, %v4587_v2  ;;  %v4658_v62 = vmul.f32 %v9955_v24, %v4588_v37  ;;  %v4659_v41 = vmul.f32 %v9955_v24, %v4589_v53  ;;  %v4604_v15 = vld [vmem:[#allocation3 + $0xe0] sm:$0xff]  ;;  %v4605_v13 = vld [vmem:[#allocation3 + $0xe8] sm:$0xff] }
 0x375   :  { %v4716_v50 = vadd.f32 %v9965_v60, %v4646_v32  ;;  %v4717_v54 = vadd.f32 %v9965_v60, %v4647_v55  ;;  %v4718_v25 = vadd.f32 %v9965_v60, %v4648_v20  ;;  %v4719_v63 = vadd.f32 %v9965_v60, %v4649_v31  ;;  %v4603_v31 = vld [vmem:[#allocation3 + $0xd8] sm:$0xff] }
 0x376   :  { %v4720_v59 = vadd.f32 %v9965_v60, %v4650_v35  ;;  %v4721_v19 = vadd.f32 %v9965_v60, %v4651_v17  ;;  %v4722_v5 = vadd.f32 %v9965_v60, %v4652_v4  ;;  %v4723_v40 = vadd.f32 %v9965_v60, %v4653_v29 }
 0x377   :  { %4780 = vst.msk [vmem:[%s11500_s4] sm:$0xff] %vm17_vm0, %v4716_v50  ;;  %4781 = vst.msk [vmem:[%s11500_s4 + $0x8] sm:$0xff] %vm17_vm0, %v4717_v54  ;;  %v4724_v56 = vadd.f32 %v9965_v60, %v4654_v1  ;;  %v4725_v44 = vadd.f32 %v9965_v60, %v4655_v21  ;;  %v4726_v0 = vadd.f32 %v9965_v60, %v4656_v58  ;;  %v4608_v50 = vld [vmem:[#allocation3 + $0x100] sm:$0xff] }
 0x378   :  { %4782 = vst.msk [vmem:[%s11500_s4 + $0x10] sm:$0xff] %vm17_vm0, %v4718_v25  ;;  %4783 = vst.msk [vmem:[%s11500_s4 + $0x18] sm:$0xff] %vm17_vm0, %v4719_v63  ;;  %v4727_v61 = vadd.f32 %v9965_v60, %v4657_v57  ;;  %v4728_v27 = vadd.f32 %v9965_v60, %v4658_v62  ;;  %v4729_v3 = vadd.f32 %v9965_v60, %v4659_v41  ;;  %v4606_v62 = vld [vmem:[#allocation3 + $0xf0] sm:$0xff]  ;;  %v4607_v41 = vld [vmem:[#allocation3 + $0xf8] sm:$0xff] }
 0x379   :  { %4784 = vst.msk [vmem:[%s11500_s4 + $0x20] sm:$0xff] %vm17_vm0, %v4720_v59  ;;  %4785 = vst.msk [vmem:[%s11500_s4 + $0x28] sm:$0xff] %vm17_vm0, %v4721_v19  ;;  %v4660_v23 = vmul.f32 %v9955_v24, %v4590_v7  ;;  %v4661_v9 = vmul.f32 %v9955_v24, %v4591_v28  ;;  %v4662_v51 = vmul.f32 %v9955_v24, %v4592_v34  ;;  %v4609_v19 = vld [vmem:[#allocation3 + $0x108] sm:$0xff]  ;;  %v4612_v7 = vld [vmem:[#allocation3 + $0x120] sm:$0xff] }
 0x37a   :  { %4786 = vst.msk [vmem:[%s11500_s4 + $0x30] sm:$0xff] %vm17_vm0, %v4722_v5  ;;  %4787 = vst.msk [vmem:[%s11500_s4 + $0x38] sm:$0xff] %vm17_vm0, %v4723_v40  ;;  %v4663_v30 = vmul.f32 %v9955_v24, %v4593_v36  ;;  %v4664_v22 = vmul.f32 %v9955_v24, %v4594_v10  ;;  %v4665_v46 = vmul.f32 %v9955_v24, %v4595_v26  ;;  %v4610_v5 = vld [vmem:[#allocation3 + $0x110] sm:$0xff]  ;;  %v4611_v40 = vld [vmem:[#allocation3 + $0x118] sm:$0xff] }
 0x37b   :  { %4788 = vst.msk [vmem:[%s11500_s4 + $0x40] sm:$0xff] %vm17_vm0, %v4724_v56  ;;  %4789 = vst.msk [vmem:[%s11500_s4 + $0x48] sm:$0xff] %vm17_vm0, %v4725_v44  ;;  %v4730_v39 = vadd.f32 %v9965_v60, %v4660_v23  ;;  %v4731_v8 = vadd.f32 %v9965_v60, %v4661_v9  ;;  %v4666_v43 = vmul.f32 %v9955_v24, %v4596_v45  ;;  %v4613_v28 = vld [vmem:[#allocation3 + $0x128] sm:$0xff] }
 0x37c   :  { %4790 = vst.msk [vmem:[%s11500_s4 + $0x50] sm:$0xff] %vm17_vm0, %v4726_v0  ;;  %4791 = vst.msk [vmem:[%s11500_s4 + $0x58] sm:$0xff] %vm17_vm0, %v4727_v61  ;;  %v4667_v16 = vmul.f32 %v9955_v24, %v4597_v48  ;;  %v4732_v6 = vadd.f32 %v9965_v60, %v4662_v51  ;;  %v4733_v47 = vadd.f32 %v9965_v60, %v4663_v30  ;;  %v4614_v51 = vld [vmem:[#allocation3 + $0x130] sm:$0xff]  ;;  %v4615_v30 = vld [vmem:[#allocation3 + $0x138] sm:$0xff] }
 0x37d   :  { %4792 = vst.msk [vmem:[%s11500_s4 + $0x60] sm:$0xff] %vm17_vm0, %v4728_v27  ;;  %4793 = vst.msk [vmem:[%s11500_s4 + $0x68] sm:$0xff] %vm17_vm0, %v4729_v3  ;;  %v4734_v11 = vadd.f32 %v9965_v60, %v4664_v22  ;;  %v4735_v14 = vadd.f32 %v9965_v60, %v4665_v46  ;;  %v4736_v32 = vadd.f32 %v9965_v60, %v4666_v43  ;;  %v4616_v22 = vld [vmem:[#allocation3 + $0x140] sm:$0xff]  ;;  %v4618_v43 = vld [vmem:[#allocation3 + $0x150] sm:$0xff] }
 0x37e   :  { %4794 = vst.msk [vmem:[%s11500_s4 + $0x70] sm:$0xff] %vm17_vm0, %v4730_v39  ;;  %4795 = vst.msk [vmem:[%s11500_s4 + $0x78] sm:$0xff] %vm17_vm0, %v4731_v8  ;;  %v4737_v55 = vadd.f32 %v9965_v60, %v4667_v16  ;;  %v4668_v20 = vmul.f32 %v9955_v24, %v4598_v18  ;;  %v4669_v33 = vmul.f32 %v9955_v24, %v4599_v49  ;;  %v4617_v8 = vld [vmem:[#allocation3 + $0x148] sm:$0xff]  ;;  %v4619_v16 = vld [vmem:[#allocation3 + $0x158] sm:$0xff] }
 0x37f   :  { %4796 = vst.msk [vmem:[%s11500_s4 + $0x80] sm:$0xff] %vm17_vm0, %v4732_v6  ;;  %4797 = vst.msk [vmem:[%s11500_s4 + $0x88] sm:$0xff] %vm17_vm0, %v4733_v47  ;;  %v4670_v35 = vmul.f32 %v9955_v24, %v4600_v52  ;;  %v4671_v17 = vmul.f32 %v9955_v24, %v4601_v12  ;;  %v4672_v4 = vmul.f32 %v9955_v24, %v4602_v38  ;;  %v4620_v18 = vld [vmem:[#allocation3 + $0x160] sm:$0xff]  ;;  %v4621_v49 = vld [vmem:[#allocation3 + $0x168] sm:$0xff] }
 0x380   :  { %4798 = vst.msk [vmem:[%s11500_s4 + $0x90] sm:$0xff] %vm17_vm0, %v4734_v11  ;;  %4799 = vst.msk [vmem:[%s11500_s4 + $0x98] sm:$0xff] %vm17_vm0, %v4735_v14  ;;  %v4673_v42 = vmul.f32 %v9955_v24, %v4603_v31  ;;  %v4738_v29 = vadd.f32 %v9965_v60, %v4668_v20  ;;  %v4739_v1 = vadd.f32 %v9965_v60, %v4669_v33 }
 0x381   :  { %4800 = vst.msk [vmem:[%s11500_s4 + $0xa0] sm:$0xff] %vm17_vm0, %v4736_v32  ;;  %4801 = vst.msk [vmem:[%s11500_s4 + $0xa8] sm:$0xff] %vm17_vm0, %v4737_v55  ;;  %v4674_v21 = vmul.f32 %v9955_v24, %v4604_v15  ;;  %v4675_v2 = vmul.f32 %v9955_v24, %v4605_v13  ;;  %v4740_v37 = vadd.f32 %v9965_v60, %v4670_v35  ;;  %v4622_v35 = vld [vmem:[#allocation3 + $0x170] sm:$0xff] }
 0x382   :  { %v4741_v53 = vadd.f32 %v9965_v60, %v4671_v17  ;;  %v4742_v58 = vadd.f32 %v9965_v60, %v4672_v4  ;;  %v4743_v57 = vadd.f32 %v9965_v60, %v4673_v42  ;;  %4802 = vst.msk [vmem:[%s11500_s4 + $0xb0] sm:$0xff] %vm17_vm0, %v4738_v29  ;;  %4803 = vst.msk [vmem:[%s11500_s4 + $0xb8] sm:$0xff] %vm17_vm0, %v4739_v1  ;;  %v4623_v17 = vld [vmem:[#allocation3 + $0x178] sm:$0xff]  ;;  %v4624_v4 = vld [vmem:[#allocation3 + $0x180] sm:$0xff] }
 0x383   :  { %v4744_v54 = vadd.f32 %v9965_v60, %v4674_v21  ;;  %v4745_v25 = vadd.f32 %v9965_v60, %v4675_v2  ;;  %v4676_v63 = vmul.f32 %v9955_v24, %v4606_v62  ;;  %v4677_v59 = vmul.f32 %v9955_v24, %v4607_v41  ;;  %4804 = vst.msk [vmem:[%s11500_s4 + $0xc0] sm:$0xff] %vm17_vm0, %v4740_v37  ;;  %v4625_v1 = vld [vmem:[#allocation3 + $0x188] sm:$0xff]  ;;  %v4626_v21 = vld [vmem:[#allocation3 + $0x190] sm:$0xff]  ;;  %v4627_v2 = vld [vmem:[#allocation3 + $0x198] sm:$0xff] }
 0x384   :  { %4805 = vst.msk [vmem:[%s11500_s4 + $0xc8] sm:$0xff] %vm17_vm0, %v4741_v53  ;;  %4806 = vst.msk [vmem:[%s11500_s4 + $0xd0] sm:$0xff] %vm17_vm0, %v4742_v58  ;;  %v4678_v56 = vmul.f32 %v9955_v24, %v4608_v50  ;;  %v4679_v44 = vmul.f32 %v9955_v24, %v4609_v19  ;;  %v4680_v0 = vmul.f32 %v9955_v24, %v4610_v5  ;;  %v4628_v62 = vld [vmem:[#allocation3 + $0x1a0] sm:$0xff]  ;;  %v4629_v41 = vld [vmem:[#allocation3 + $0x1a8] sm:$0xff] }
 0x385   :  { %4807 = vst.msk [vmem:[%s11500_s4 + $0xd8] sm:$0xff] %vm17_vm0, %v4743_v57  ;;  %v4681_v61 = vmul.f32 %v9955_v24, %v4611_v40  ;;  %4808 = vst.msk [vmem:[%s11500_s4 + $0xe0] sm:$0xff] %vm17_vm0, %v4744_v54  ;;  %v4746_v34 = vadd.f32 %v9965_v60, %v4676_v63  ;;  %v4747_v27 = vadd.f32 %v9965_v60, %v4677_v59 }
 0x386   :  { %4809 = vst.msk [vmem:[%s11500_s4 + $0xe8] sm:$0xff] %vm17_vm0, %v4745_v25  ;;  %v4682_v3 = vmul.f32 %v9955_v24, %v4612_v7  ;;  %v4683_v23 = vmul.f32 %v9955_v24, %v4613_v28  ;;  %v4748_v9 = vadd.f32 %v9965_v60, %v4678_v56  ;;  %v4749_v36 = vadd.f32 %v9965_v60, %v4679_v44  ;;  %v4630_v56 = vld [vmem:[#allocation3 + $0x1b0] sm:$0xff]  ;;  %v4631_v44 = vld [vmem:[#allocation3 + $0x1b8] sm:$0xff] }
 0x387   :  { %v4750_v10 = vadd.f32 %v9965_v60, %v4680_v0  ;;  %v4751_v26 = vadd.f32 %v9965_v60, %v4681_v61  ;;  %4810 = vst.msk [vmem:[%s11500_s4 + $0xf0] sm:$0xff] %vm17_vm0, %v4746_v34  ;;  %4811 = vst.msk [vmem:[%s11500_s4 + $0xf8] sm:$0xff] %vm17_vm0, %v4747_v27  ;;  %v4684_v48 = vmul.f32 %v9955_v24, %v4614_v51  ;;  %v4632_v0 = vld [vmem:[#allocation3 + $0x1c0] sm:$0xff]  ;;  %v4633_v27 = vld [vmem:[#allocation3 + $0x1c8] sm:$0xff] }
 0x388   :  { %v4752_v46 = vadd.f32 %v9965_v60, %v4682_v3  ;;  %v4753_v45 = vadd.f32 %v9965_v60, %v4683_v23  ;;  %v4685_v39 = vmul.f32 %v9955_v24, %v4615_v30  ;;  %4812 = vst.msk [vmem:[%s11500_s4 + $0x100] sm:$0xff] %vm17_vm0, %v4748_v9  ;;  %4813 = vst.msk [vmem:[%s11500_s4 + $0x108] sm:$0xff] %vm17_vm0, %v4749_v36  ;;  %v4634_v3 = vld [vmem:[#allocation3 + $0x1d0] sm:$0xff]  ;;  %v4635_v23 = vld [vmem:[#allocation3 + $0x1d8] sm:$0xff] }
 0x389   :  { %4814 = vst.msk [vmem:[%s11500_s4 + $0x110] sm:$0xff] %vm17_vm0, %v4750_v10  ;;  %4815 = vst.msk [vmem:[%s11500_s4 + $0x118] sm:$0xff] %vm17_vm0, %v4751_v26  ;;  %v4686_v6 = vmul.f32 %v9955_v24, %v4616_v22  ;;  %v4687_v47 = vmul.f32 %v9955_v24, %v4617_v8  ;;  %v4688_v11 = vmul.f32 %v9955_v24, %v4618_v43  ;;  %v4636_v51 = vld [vmem:[#allocation3 + $0x1e0] sm:$0xff]  ;;  %v4637_v30 = vld [vmem:[#allocation3 + $0x1e8] sm:$0xff] }
 0x38a   :  { %v4689_v14 = vmul.f32 %v9955_v24, %v4619_v16  ;;  %4816 = vst.msk [vmem:[%s11500_s4 + $0x120] sm:$0xff] %vm17_vm0, %v4752_v46  ;;  %4817 = vst.msk [vmem:[%s11500_s4 + $0x128] sm:$0xff] %vm17_vm0, %v4753_v45  ;;  %v4754_v52 = vadd.f32 %v9965_v60, %v4684_v48  ;;  %v4755_v32 = vadd.f32 %v9965_v60, %v4685_v39 }
 0x38b   :  { %v4690_v55 = vmul.f32 %v9955_v24, %v4620_v18  ;;  %v4691_v20 = vmul.f32 %v9955_v24, %v4621_v49  ;;  %v4756_v33 = vadd.f32 %v9965_v60, %v4686_v6  ;;  %v4757_v12 = vadd.f32 %v9965_v60, %v4687_v47  ;;  %v4638_v6 = vld [vmem:[#allocation3 + $0x1f0] sm:$0xff]  ;;  %v4639_v47 = vld [vmem:[#allocation3 + $0x1f8] sm:$0xff] }
 0x38c   :  { %v4758_v38 = vadd.f32 %v9965_v60, %v4688_v11  ;;  %v4759_v31 = vadd.f32 %v9965_v60, %v4689_v14  ;;  %4818 = vst.msk [vmem:[%s11500_s4 + $0x130] sm:$0xff] %vm17_vm0, %v4754_v52  ;;  %4819 = vst.msk [vmem:[%s11500_s4 + $0x138] sm:$0xff] %vm17_vm0, %v4755_v32  ;;  %v4692_v13 = vmul.f32 %v9955_v24, %v4622_v35  ;;  %v4844_v11 = vld [vmem:[#allocation3 + $0x200] sm:$0xff]  ;;  %v4845_v32 = vld [vmem:[#allocation3 + $0x208] sm:$0xff] }
 0x38d   :  { %v4760_v42 = vadd.f32 %v9965_v60, %v4690_v55  ;;  %v4761_v15 = vadd.f32 %v9965_v60, %v4691_v20  ;;  %v4693_v29 = vmul.f32 %v9955_v24, %v4623_v17  ;;  %4820 = vst.msk [vmem:[%s11500_s4 + $0x140] sm:$0xff] %vm17_vm0, %v4756_v33  ;;  %4821 = vst.msk [vmem:[%s11500_s4 + $0x148] sm:$0xff] %vm17_vm0, %v4757_v12  ;;  %v4846_v55 = vld [vmem:[#allocation3 + $0x210] sm:$0xff]  ;;  %v4847_v20 = vld [vmem:[#allocation3 + $0x218] sm:$0xff] }
 0x38e   :  { %4822 = vst.msk [vmem:[%s11500_s4 + $0x150] sm:$0xff] %vm17_vm0, %v4758_v38  ;;  %4823 = vst.msk [vmem:[%s11500_s4 + $0x158] sm:$0xff] %vm17_vm0, %v4759_v31  ;;  %v4694_v37 = vmul.f32 %v9955_v24, %v4624_v4  ;;  %v4695_v53 = vmul.f32 %v9955_v24, %v4625_v1  ;;  %v4696_v58 = vmul.f32 %v9955_v24, %v4626_v21  ;;  %v4848_v35 = vld [vmem:[#allocation3 + $0x220] sm:$0xff]  ;;  %v4849_v17 = vld [vmem:[#allocation3 + $0x228] sm:$0xff] }
 0x38f   :  { %v4697_v57 = vmul.f32 %v9955_v24, %v4627_v2  ;;  %4824 = vst.msk [vmem:[%s11500_s4 + $0x160] sm:$0xff] %vm17_vm0, %v4760_v42  ;;  %4825 = vst.msk [vmem:[%s11500_s4 + $0x168] sm:$0xff] %vm17_vm0, %v4761_v15  ;;  %v4762_v50 = vadd.f32 %v9965_v60, %v4692_v13  ;;  %v4763_v54 = vadd.f32 %v9965_v60, %v4693_v29 }
 0x390   :  { %v4698_v25 = vmul.f32 %v9955_v24, %v4628_v62  ;;  %v4699_v63 = vmul.f32 %v9955_v24, %v4629_v41  ;;  %v4764_v59 = vadd.f32 %v9965_v60, %v4694_v37  ;;  %v4765_v19 = vadd.f32 %v9965_v60, %v4695_v53  ;;  %v4850_v37 = vld [vmem:[#allocation3 + $0x230] sm:$0xff]  ;;  %v4851_v53 = vld [vmem:[#allocation3 + $0x238] sm:$0xff] }
 0x391   :  { %v4766_v5 = vadd.f32 %v9965_v60, %v4696_v58  ;;  %v4767_v40 = vadd.f32 %v9965_v60, %v4697_v57  ;;  %4826 = vst.msk [vmem:[%s11500_s4 + $0x170] sm:$0xff] %vm17_vm0, %v4762_v50  ;;  %4827 = vst.msk [vmem:[%s11500_s4 + $0x178] sm:$0xff] %vm17_vm0, %v4763_v54  ;;  %v4700_v28 = vmul.f32 %v9955_v24, %v4630_v56  ;;  %v4852_v58 = vld [vmem:[#allocation3 + $0x240] sm:$0xff]  ;;  %v4853_v54 = vld [vmem:[#allocation3 + $0x248] sm:$0xff] }
 0x392   :  { %v4768_v61 = vadd.f32 %v9965_v60, %v4698_v25  ;;  %v4769_v7 = vadd.f32 %v9965_v60, %v4699_v63  ;;  %v4701_v34 = vmul.f32 %v9955_v24, %v4631_v44  ;;  %4828 = vst.msk [vmem:[%s11500_s4 + $0x180] sm:$0xff] %vm17_vm0, %v4764_v59  ;;  %4829 = vst.msk [vmem:[%s11500_s4 + $0x188] sm:$0xff] %vm17_vm0, %v4765_v19  ;;  %v4854_v25 = vld [vmem:[#allocation3 + $0x250] sm:$0xff]  ;;  %v4855_v63 = vld [vmem:[#allocation3 + $0x258] sm:$0xff] }
 0x393   :  { %4830 = vst.msk [vmem:[%s11500_s4 + $0x190] sm:$0xff] %vm17_vm0, %v4766_v5  ;;  %4831 = vst.msk [vmem:[%s11500_s4 + $0x198] sm:$0xff] %vm17_vm0, %v4767_v40  ;;  %v4702_v9 = vmul.f32 %v9955_v24, %v4632_v0  ;;  %v4703_v36 = vmul.f32 %v9955_v24, %v4633_v27  ;;  %v4704_v10 = vmul.f32 %v9955_v24, %v4634_v3  ;;  %v4856_v56 = vld [vmem:[#allocation3 + $0x260] sm:$0xff]  ;;  %v4857_v44 = vld [vmem:[#allocation3 + $0x268] sm:$0xff] }
 0x394   :  { %v4705_v26 = vmul.f32 %v9955_v24, %v4635_v23  ;;  %4832 = vst.msk [vmem:[%s11500_s4 + $0x1a0] sm:$0xff] %vm17_vm0, %v4768_v61  ;;  %4833 = vst.msk [vmem:[%s11500_s4 + $0x1a8] sm:$0xff] %vm17_vm0, %v4769_v7  ;;  %v4770_v22 = vadd.f32 %v9965_v60, %v4700_v28  ;;  %v4771_v46 = vadd.f32 %v9965_v60, %v4701_v34 }
 0x395   :  { %v4706_v45 = vmul.f32 %v9955_v24, %v4636_v51  ;;  %v4707_v48 = vmul.f32 %v9955_v24, %v4637_v30  ;;  %v4772_v39 = vadd.f32 %v9965_v60, %v4702_v9  ;;  %v4773_v8 = vadd.f32 %v9965_v60, %v4703_v36  ;;  %v4858_v9 = vld [vmem:[#allocation3 + $0x270] sm:$0xff]  ;;  %v4859_v36 = vld [vmem:[#allocation3 + $0x278] sm:$0xff] }
 0x396   :  { %v4774_v43 = vadd.f32 %v9965_v60, %v4704_v10  ;;  %v4775_v16 = vadd.f32 %v9965_v60, %v4705_v26  ;;  %4834 = vst.msk [vmem:[%s11500_s4 + $0x1b0] sm:$0xff] %vm17_vm0, %v4770_v22  ;;  %4835 = vst.msk [vmem:[%s11500_s4 + $0x1b8] sm:$0xff] %vm17_vm0, %v4771_v46  ;;  %v4708_v49 = vmul.f32 %v9955_v24, %v4638_v6  ;;  %v4860_v10 = vld [vmem:[#allocation3 + $0x280] sm:$0xff]  ;;  %v4861_v46 = vld [vmem:[#allocation3 + $0x288] sm:$0xff] }
 0x397   :  { %v4776_v14 = vadd.f32 %v9965_v60, %v4706_v45  ;;  %v4777_v18 = vadd.f32 %v9965_v60, %v4707_v48  ;;  %v4709_v52 = vmul.f32 %v9955_v24, %v4639_v47  ;;  %4836 = vst.msk [vmem:[%s11500_s4 + $0x1c0] sm:$0xff] %vm17_vm0, %v4772_v39  ;;  %4837 = vst.msk [vmem:[%s11500_s4 + $0x1c8] sm:$0xff] %vm17_vm0, %v4773_v8  ;;  %v4862_v45 = vld [vmem:[#allocation3 + $0x290] sm:$0xff]  ;;  %v4863_v48 = vld [vmem:[#allocation3 + $0x298] sm:$0xff] }
 0x398   :  { %4838 = vst.msk [vmem:[%s11500_s4 + $0x1d0] sm:$0xff] %vm17_vm0, %v4774_v43  ;;  %4839 = vst.msk [vmem:[%s11500_s4 + $0x1d8] sm:$0xff] %vm17_vm0, %v4775_v16  ;;  %v4908_v33 = vmul.f32 %v4844_v11, %v9955_v24  ;;  %v4909_v12 = vmul.f32 %v4845_v32, %v9955_v24  ;;  %v4910_v38 = vmul.f32 %v4846_v55, %v9955_v24  ;;  %v4864_v6 = vld [vmem:[#allocation3 + $0x2a0] sm:$0xff]  ;;  %v4865_v47 = vld [vmem:[#allocation3 + $0x2a8] sm:$0xff] }
 0x399   :  { %v4911_v31 = vmul.f32 %v4847_v20, %v9955_v24  ;;  %4840 = vst.msk [vmem:[%s11500_s4 + $0x1e0] sm:$0xff] %vm17_vm0, %v4776_v14  ;;  %4841 = vst.msk [vmem:[%s11500_s4 + $0x1e8] sm:$0xff] %vm17_vm0, %v4777_v18  ;;  %v4778_v4 = vadd.f32 %v9965_v60, %v4708_v49  ;;  %v4779_v42 = vadd.f32 %v9965_v60, %v4709_v52 }
 0x39a   :  { %v4912_v15 = vmul.f32 %v4848_v35, %v9955_v24  ;;  %v4913_v13 = vmul.f32 %v4849_v17, %v9955_v24  ;;  %v4972_v29 = vadd.f32 %v4908_v33, %v9965_v60  ;;  %v4973_v1 = vadd.f32 %v4909_v12, %v9965_v60  ;;  %v4866_v33 = vld [vmem:[#allocation3 + $0x2b0] sm:$0xff]  ;;  %v4867_v12 = vld [vmem:[#allocation3 + $0x2b8] sm:$0xff] }
 0x39b   :  { %v4974_v21 = vadd.f32 %v4910_v38, %v9965_v60  ;;  %v4975_v2 = vadd.f32 %v4911_v31, %v9965_v60  ;;  %4842 = vst.msk [vmem:[%s11500_s4 + $0x1f0] sm:$0xff] %vm17_vm0, %v4778_v4  ;;  %4843 = vst.msk [vmem:[%s11500_s4 + $0x1f8] sm:$0xff] %vm17_vm0, %v4779_v42  ;;  %v4914_v41 = vmul.f32 %v4850_v37, %v9955_v24  ;;  %v4868_v38 = vld [vmem:[#allocation3 + $0x2c0] sm:$0xff]  ;;  %v4869_v42 = vld [vmem:[#allocation3 + $0x2c8] sm:$0xff] }
 0x39c   :  { %v4976_v57 = vadd.f32 %v4912_v15, %v9965_v60  ;;  %v4977_v62 = vadd.f32 %v4913_v13, %v9965_v60  ;;  %v4915_v50 = vmul.f32 %v4851_v53, %v9955_v24  ;;  %5619 = vst.msk [vmem:[%s11500_s4 + $0x200] sm:$0xff] %vm17_vm0, %v4972_v29  ;;  %5620 = vst.msk [vmem:[%s11500_s4 + $0x208] sm:$0xff] %vm17_vm0, %v4973_v1  ;;  %v4870_v15 = vld [vmem:[#allocation3 + $0x2d0] sm:$0xff]  ;;  %v4871_v13 = vld [vmem:[#allocation3 + $0x2d8] sm:$0xff] }
 0x39d   :  { %5621 = vst.msk [vmem:[%s11500_s4 + $0x210] sm:$0xff] %vm17_vm0, %v4974_v21  ;;  %5622 = vst.msk [vmem:[%s11500_s4 + $0x218] sm:$0xff] %vm17_vm0, %v4975_v2  ;;  %v4916_v59 = vmul.f32 %v4852_v58, %v9955_v24  ;;  %v4917_v19 = vmul.f32 %v4853_v54, %v9955_v24  ;;  %v4918_v5 = vmul.f32 %v4854_v25, %v9955_v24  ;;  %v4872_v37 = vld [vmem:[#allocation3 + $0x2e0] sm:$0xff]  ;;  %v4873_v53 = vld [vmem:[#allocation3 + $0x2e8] sm:$0xff] }
 0x39e   :  { %v4919_v40 = vmul.f32 %v4855_v63, %v9955_v24  ;;  %5623 = vst.msk [vmem:[%s11500_s4 + $0x220] sm:$0xff] %vm17_vm0, %v4976_v57  ;;  %5624 = vst.msk [vmem:[%s11500_s4 + $0x228] sm:$0xff] %vm17_vm0, %v4977_v62  ;;  %v4978_v0 = vadd.f32 %v4914_v41, %v9965_v60  ;;  %v4979_v61 = vadd.f32 %v4915_v50, %v9965_v60 }
 0x39f   :  { %v4920_v7 = vmul.f32 %v4856_v56, %v9955_v24  ;;  %v4921_v28 = vmul.f32 %v4857_v44, %v9955_v24  ;;  %v4980_v34 = vadd.f32 %v4916_v59, %v9965_v60  ;;  %v4981_v27 = vadd.f32 %v4917_v19, %v9965_v60  ;;  %v4874_v59 = vld [vmem:[#allocation3 + $0x2f0] sm:$0xff]  ;;  %v4875_v19 = vld [vmem:[#allocation3 + $0x2f8] sm:$0xff] }
 0x3a0   :  { %v4982_v3 = vadd.f32 %v4918_v5, %v9965_v60  ;;  %v4983_v23 = vadd.f32 %v4919_v40, %v9965_v60  ;;  %5625 = vst.msk [vmem:[%s11500_s4 + $0x230] sm:$0xff] %vm17_vm0, %v4978_v0  ;;  %5626 = vst.msk [vmem:[%s11500_s4 + $0x238] sm:$0xff] %vm17_vm0, %v4979_v61  ;;  %v4922_v30 = vmul.f32 %v4858_v9, %v9955_v24  ;;  %v4876_v5 = vld [vmem:[#allocation3 + $0x300] sm:$0xff]  ;;  %v4877_v61 = vld [vmem:[#allocation3 + $0x308] sm:$0xff] }
 0x3a1   :  { %v4984_v26 = vadd.f32 %v4920_v7, %v9965_v60  ;;  %v4985_v51 = vadd.f32 %v4921_v28, %v9965_v60  ;;  %v4923_v22 = vmul.f32 %v4859_v36, %v9955_v24  ;;  %5627 = vst.msk [vmem:[%s11500_s4 + $0x240] sm:$0xff] %vm17_vm0, %v4980_v34  ;;  %5628 = vst.msk [vmem:[%s11500_s4 + $0x248] sm:$0xff] %vm17_vm0, %v4981_v27  ;;  %v4878_v7 = vld [vmem:[#allocation3 + $0x310] sm:$0xff]  ;;  %v4879_v28 = vld [vmem:[#allocation3 + $0x318] sm:$0xff] }
 0x3a2   :  { %5629 = vst.msk [vmem:[%s11500_s4 + $0x250] sm:$0xff] %vm17_vm0, %v4982_v3  ;;  %5630 = vst.msk [vmem:[%s11500_s4 + $0x258] sm:$0xff] %vm17_vm0, %v4983_v23  ;;  %v4924_v39 = vmul.f32 %v4860_v10, %v9955_v24  ;;  %v4925_v8 = vmul.f32 %v4861_v46, %v9955_v24  ;;  %v4926_v43 = vmul.f32 %v4862_v45, %v9955_v24  ;;  %v4880_v9 = vld [vmem:[#allocation3 + $0x320] sm:$0xff]  ;;  %v4881_v36 = vld [vmem:[#allocation3 + $0x328] sm:$0xff] }
 0x3a3   :  { %v4927_v16 = vmul.f32 %v4863_v48, %v9955_v24  ;;  %5631 = vst.msk [vmem:[%s11500_s4 + $0x260] sm:$0xff] %vm17_vm0, %v4984_v26  ;;  %5632 = vst.msk [vmem:[%s11500_s4 + $0x268] sm:$0xff] %vm17_vm0, %v4985_v51  ;;  %v4986_v11 = vadd.f32 %v4922_v30, %v9965_v60  ;;  %v4987_v14 = vadd.f32 %v4923_v22, %v9965_v60 }
 0x3a4   :  { %v4928_v18 = vmul.f32 %v4864_v6, %v9955_v24  ;;  %v4929_v49 = vmul.f32 %v4865_v47, %v9955_v24  ;;  %v4988_v52 = vadd.f32 %v4924_v39, %v9965_v60  ;;  %v4989_v32 = vadd.f32 %v4925_v8, %v9965_v60  ;;  %v4882_v39 = vld [vmem:[#allocation3 + $0x330] sm:$0xff]  ;;  %v4883_v8 = vld [vmem:[#allocation3 + $0x338] sm:$0xff] }
 0x3a5   :  { %v4990_v55 = vadd.f32 %v4926_v43, %v9965_v60  ;;  %v4991_v20 = vadd.f32 %v4927_v16, %v9965_v60  ;;  %5633 = vst.msk [vmem:[%s11500_s4 + $0x270] sm:$0xff] %vm17_vm0, %v4986_v11  ;;  %5634 = vst.msk [vmem:[%s11500_s4 + $0x278] sm:$0xff] %vm17_vm0, %v4987_v14  ;;  %v4930_v17 = vmul.f32 %v4866_v33, %v9955_v24  ;;  %v4884_v43 = vld [vmem:[#allocation3 + $0x340] sm:$0xff]  ;;  %v4885_v14 = vld [vmem:[#allocation3 + $0x348] sm:$0xff] }
 0x3a6   :  { %v4992_v31 = vadd.f32 %v4928_v18, %v9965_v60  ;;  %v4993_v35 = vadd.f32 %v4929_v49, %v9965_v60  ;;  %v4931_v4 = vmul.f32 %v4867_v12, %v9955_v24  ;;  %5635 = vst.msk [vmem:[%s11500_s4 + $0x280] sm:$0xff] %vm17_vm0, %v4988_v52  ;;  %5636 = vst.msk [vmem:[%s11500_s4 + $0x288] sm:$0xff] %vm17_vm0, %v4989_v32  ;;  %v4886_v18 = vld [vmem:[#allocation3 + $0x350] sm:$0xff]  ;;  %v4887_v49 = vld [vmem:[#allocation3 + $0x358] sm:$0xff] }
 0x3a7   :  { %5637 = vst.msk [vmem:[%s11500_s4 + $0x290] sm:$0xff] %vm17_vm0, %v4990_v55  ;;  %5638 = vst.msk [vmem:[%s11500_s4 + $0x298] sm:$0xff] %vm17_vm0, %v4991_v20  ;;  %v4932_v29 = vmul.f32 %v4868_v38, %v9955_v24  ;;  %v4933_v1 = vmul.f32 %v4869_v42, %v9955_v24  ;;  %v4934_v21 = vmul.f32 %v4870_v15, %v9955_v24  ;;  %v4888_v33 = vld [vmem:[#allocation3 + $0x360] sm:$0xff]  ;;  %v4889_v12 = vld [vmem:[#allocation3 + $0x368] sm:$0xff] }
 0x3a8   :  { %v4935_v2 = vmul.f32 %v4871_v13, %v9955_v24  ;;  %5639 = vst.msk [vmem:[%s11500_s4 + $0x2a0] sm:$0xff] %vm17_vm0, %v4992_v31  ;;  %5640 = vst.msk [vmem:[%s11500_s4 + $0x2a8] sm:$0xff] %vm17_vm0, %v4993_v35  ;;  %v4994_v58 = vadd.f32 %v4930_v17, %v9965_v60  ;;  %v4995_v57 = vadd.f32 %v4931_v4, %v9965_v60 }
 0x3a9   :  { %v4936_v62 = vmul.f32 %v4872_v37, %v9955_v24  ;;  %v4937_v41 = vmul.f32 %v4873_v53, %v9955_v24  ;;  %v4996_v50 = vadd.f32 %v4932_v29, %v9965_v60  ;;  %v4997_v54 = vadd.f32 %v4933_v1, %v9965_v60  ;;  %v4890_v29 = vld [vmem:[#allocation3 + $0x370] sm:$0xff]  ;;  %v4891_v1 = vld [vmem:[#allocation3 + $0x378] sm:$0xff] }
 0x3aa   :  { %v4998_v25 = vadd.f32 %v4934_v21, %v9965_v60  ;;  %v4999_v63 = vadd.f32 %v4935_v2, %v9965_v60  ;;  %5641 = vst.msk [vmem:[%s11500_s4 + $0x2b0] sm:$0xff] %vm17_vm0, %v4994_v58  ;;  %5642 = vst.msk [vmem:[%s11500_s4 + $0x2b8] sm:$0xff] %vm17_vm0, %v4995_v57  ;;  %v4938_v44 = vmul.f32 %v4874_v59, %v9955_v24  ;;  %v4892_v21 = vld [vmem:[#allocation3 + $0x380] sm:$0xff]  ;;  %v4893_v57 = vld [vmem:[#allocation3 + $0x388] sm:$0xff] }
 0x3ab   :  { %v5000_v40 = vadd.f32 %v4936_v62, %v9965_v60  ;;  %v5001_v56 = vadd.f32 %v4937_v41, %v9965_v60  ;;  %v4939_v0 = vmul.f32 %v4875_v19, %v9955_v24  ;;  %5643 = vst.msk [vmem:[%s11500_s4 + $0x2c0] sm:$0xff] %vm17_vm0, %v4996_v50  ;;  %5644 = vst.msk [vmem:[%s11500_s4 + $0x2c8] sm:$0xff] %vm17_vm0, %v4997_v54  ;;  %v4894_v62 = vld [vmem:[#allocation3 + $0x390] sm:$0xff]  ;;  %v4895_v41 = vld [vmem:[#allocation3 + $0x398] sm:$0xff] }
 0x3ac   :  { %5645 = vst.msk [vmem:[%s11500_s4 + $0x2d0] sm:$0xff] %vm17_vm0, %v4998_v25  ;;  %5646 = vst.msk [vmem:[%s11500_s4 + $0x2d8] sm:$0xff] %vm17_vm0, %v4999_v63  ;;  %v4940_v34 = vmul.f32 %v4876_v5, %v9955_v24  ;;  %v4941_v27 = vmul.f32 %v4877_v61, %v9955_v24  ;;  %v4942_v3 = vmul.f32 %v4878_v7, %v9955_v24  ;;  %v4896_v59 = vld [vmem:[#allocation3 + $0x3a0] sm:$0xff]  ;;  %v4897_v19 = vld [vmem:[#allocation3 + $0x3a8] sm:$0xff] }
 0x3ad   :  { %v4943_v23 = vmul.f32 %v4879_v28, %v9955_v24  ;;  %5647 = vst.msk [vmem:[%s11500_s4 + $0x2e0] sm:$0xff] %vm17_vm0, %v5000_v40  ;;  %5648 = vst.msk [vmem:[%s11500_s4 + $0x2e8] sm:$0xff] %vm17_vm0, %v5001_v56  ;;  %v5002_v10 = vadd.f32 %v4938_v44, %v9965_v60  ;;  %v5003_v26 = vadd.f32 %v4939_v0, %v9965_v60 }
 0x3ae   :  { %v4944_v51 = vmul.f32 %v4880_v9, %v9955_v24  ;;  %v4945_v30 = vmul.f32 %v4881_v36, %v9955_v24  ;;  %v5004_v22 = vadd.f32 %v4940_v34, %v9965_v60  ;;  %v5005_v46 = vadd.f32 %v4941_v27, %v9965_v60  ;;  %v4898_v34 = vld [vmem:[#allocation3 + $0x3b0] sm:$0xff]  ;;  %v4899_v27 = vld [vmem:[#allocation3 + $0x3b8] sm:$0xff] }
 0x3af   :  { %v5006_v45 = vadd.f32 %v4942_v3, %v9965_v60  ;;  %v5007_v48 = vadd.f32 %v4943_v23, %v9965_v60  ;;  %5649 = vst.msk [vmem:[%s11500_s4 + $0x2f0] sm:$0xff] %vm17_vm0, %v5002_v10  ;;  %5650 = vst.msk [vmem:[%s11500_s4 + $0x2f8] sm:$0xff] %vm17_vm0, %v5003_v26  ;;  %v4946_v47 = vmul.f32 %v4882_v39, %v9955_v24  ;;  %v4900_v3 = vld [vmem:[#allocation3 + $0x3c0] sm:$0xff]  ;;  %v4901_v26 = vld [vmem:[#allocation3 + $0x3c8] sm:$0xff] }
 0x3b0   :  { %v5008_v16 = vadd.f32 %v4944_v51, %v9965_v60  ;;  %v5009_v6 = vadd.f32 %v4945_v30, %v9965_v60  ;;  %v4947_v11 = vmul.f32 %v4883_v8, %v9955_v24  ;;  %5651 = vst.msk [vmem:[%s11500_s4 + $0x300] sm:$0xff] %vm17_vm0, %v5004_v22  ;;  %5652 = vst.msk [vmem:[%s11500_s4 + $0x308] sm:$0xff] %vm17_vm0, %v5005_v46  ;;  %v4902_v51 = vld [vmem:[#allocation3 + $0x3d0] sm:$0xff]  ;;  %v4903_v30 = vld [vmem:[#allocation3 + $0x3d8] sm:$0xff] }
 0x3b1   :  { %5653 = vst.msk [vmem:[%s11500_s4 + $0x310] sm:$0xff] %vm17_vm0, %v5006_v45  ;;  %5654 = vst.msk [vmem:[%s11500_s4 + $0x318] sm:$0xff] %vm17_vm0, %v5007_v48  ;;  %v4948_v52 = vmul.f32 %v4884_v43, %v9955_v24  ;;  %v4949_v32 = vmul.f32 %v4885_v14, %v9955_v24  ;;  %v4950_v55 = vmul.f32 %v4886_v18, %v9955_v24  ;;  %v4904_v39 = vld [vmem:[#allocation3 + $0x3e0] sm:$0xff]  ;;  %v4905_v8 = vld [vmem:[#allocation3 + $0x3e8] sm:$0xff] }
 0x3b2   :  { %v4951_v20 = vmul.f32 %v4887_v49, %v9955_v24  ;;  %5655 = vst.msk [vmem:[%s11500_s4 + $0x320] sm:$0xff] %vm17_vm0, %v5008_v16  ;;  %5656 = vst.msk [vmem:[%s11500_s4 + $0x328] sm:$0xff] %vm17_vm0, %v5009_v6  ;;  %v5010_v38 = vadd.f32 %v4946_v47, %v9965_v60  ;;  %v5011_v31 = vadd.f32 %v4947_v11, %v9965_v60 }
 0x3b3   :  { %v4952_v35 = vmul.f32 %v4888_v33, %v9955_v24  ;;  %v4953_v17 = vmul.f32 %v4889_v12, %v9955_v24  ;;  %v5012_v4 = vadd.f32 %v4948_v52, %v9965_v60  ;;  %v5013_v42 = vadd.f32 %v4949_v32, %v9965_v60  ;;  %v4906_v52 = vld [vmem:[#allocation3 + $0x3f0] sm:$0xff]  ;;  %v4907_v32 = vld [vmem:[#allocation3 + $0x3f8] sm:$0xff] }
 0x3b4   :  { %v5014_v15 = vadd.f32 %v4950_v55, %v9965_v60  ;;  %v5015_v13 = vadd.f32 %v4951_v20, %v9965_v60  ;;  %5657 = vst.msk [vmem:[%s11500_s4 + $0x330] sm:$0xff] %vm17_vm0, %v5010_v38  ;;  %5658 = vst.msk [vmem:[%s11500_s4 + $0x338] sm:$0xff] %vm17_vm0, %v5011_v31  ;;  %v4954_v53 = vmul.f32 %v4890_v29, %v9955_v24  ;;  %v5101_v55 = vld [vmem:[#allocation3 + $0x400] sm:$0xff]  ;;  %v5102_v31 = vld [vmem:[#allocation3 + $0x408] sm:$0xff] }
 0x3b5   :  { %v5016_v2 = vadd.f32 %v4952_v35, %v9965_v60  ;;  %v5017_v37 = vadd.f32 %v4953_v17, %v9965_v60  ;;  %v4955_v58 = vmul.f32 %v4891_v1, %v9955_v24  ;;  %5659 = vst.msk [vmem:[%s11500_s4 + $0x340] sm:$0xff] %vm17_vm0, %v5012_v4  ;;  %5660 = vst.msk [vmem:[%s11500_s4 + $0x348] sm:$0xff] %vm17_vm0, %v5013_v42  ;;  %v5103_v35 = vld [vmem:[#allocation3 + $0x410] sm:$0xff]  ;;  %v5104_v17 = vld [vmem:[#allocation3 + $0x418] sm:$0xff] }
 0x3b6   :  { %5661 = vst.msk [vmem:[%s11500_s4 + $0x350] sm:$0xff] %vm17_vm0, %v5014_v15  ;;  %5662 = vst.msk [vmem:[%s11500_s4 + $0x358] sm:$0xff] %vm17_vm0, %v5015_v13  ;;  %v4956_v50 = vmul.f32 %v4892_v21, %v9955_v24  ;;  %v4957_v54 = vmul.f32 %v4893_v57, %v9955_v24  ;;  %v4958_v25 = vmul.f32 %v4894_v62, %v9955_v24  ;;  %v5105_v29 = vld [vmem:[#allocation3 + $0x420] sm:$0xff]  ;;  %v5106_v1 = vld [vmem:[#allocation3 + $0x428] sm:$0xff] }
 0x3b7   :  { %v4959_v63 = vmul.f32 %v4895_v41, %v9955_v24  ;;  %5663 = vst.msk [vmem:[%s11500_s4 + $0x360] sm:$0xff] %vm17_vm0, %v5016_v2  ;;  %5664 = vst.msk [vmem:[%s11500_s4 + $0x368] sm:$0xff] %vm17_vm0, %v5017_v37  ;;  %v5018_v5 = vadd.f32 %v4954_v53, %v9965_v60  ;;  %v5019_v40 = vadd.f32 %v4955_v58, %v9965_v60 }
 0x3b8   :  { %v4960_v56 = vmul.f32 %v4896_v59, %v9955_v24  ;;  %v4961_v44 = vmul.f32 %v4897_v19, %v9955_v24  ;;  %v5020_v0 = vadd.f32 %v4956_v50, %v9965_v60  ;;  %v5021_v61 = vadd.f32 %v4957_v54, %v9965_v60  ;;  %v5107_v50 = vld [vmem:[#allocation3 + $0x430] sm:$0xff]  ;;  %v5108_v54 = vld [vmem:[#allocation3 + $0x438] sm:$0xff] }
 0x3b9   :  { %v5022_v7 = vadd.f32 %v4958_v25, %v9965_v60  ;;  %v5023_v28 = vadd.f32 %v4959_v63, %v9965_v60  ;;  %5665 = vst.msk [vmem:[%s11500_s4 + $0x370] sm:$0xff] %vm17_vm0, %v5018_v5  ;;  %5666 = vst.msk [vmem:[%s11500_s4 + $0x378] sm:$0xff] %vm17_vm0, %v5019_v40  ;;  %v4962_v36 = vmul.f32 %v4898_v34, %v9955_v24  ;;  %v5109_v25 = vld [vmem:[#allocation3 + $0x440] sm:$0xff]  ;;  %v5110_v40 = vld [vmem:[#allocation3 + $0x448] sm:$0xff] }
 0x3ba   :  { %v5024_v23 = vadd.f32 %v4960_v56, %v9965_v60  ;;  %v5025_v9 = vadd.f32 %v4961_v44, %v9965_v60  ;;  %v4963_v10 = vmul.f32 %v4899_v27, %v9955_v24  ;;  %5667 = vst.msk [vmem:[%s11500_s4 + $0x380] sm:$0xff] %vm17_vm0, %v5020_v0  ;;  %5668 = vst.msk [vmem:[%s11500_s4 + $0x388] sm:$0xff] %vm17_vm0, %v5021_v61  ;;  %v5111_v56 = vld [vmem:[#allocation3 + $0x450] sm:$0xff]  ;;  %v5112_v44 = vld [vmem:[#allocation3 + $0x458] sm:$0xff] }
 0x3bb   :  { %5669 = vst.msk [vmem:[%s11500_s4 + $0x390] sm:$0xff] %vm17_vm0, %v5022_v7  ;;  %5670 = vst.msk [vmem:[%s11500_s4 + $0x398] sm:$0xff] %vm17_vm0, %v5023_v28  ;;  %v4964_v22 = vmul.f32 %v4900_v3, %v9955_v24  ;;  %v4965_v46 = vmul.f32 %v4901_v26, %v9955_v24  ;;  %v4966_v45 = vmul.f32 %v4902_v51, %v9955_v24  ;;  %v5113_v34 = vld [vmem:[#allocation3 + $0x460] sm:$0xff]  ;;  %v5114_v27 = vld [vmem:[#allocation3 + $0x468] sm:$0xff] }
 0x3bc   :  { %v4967_v48 = vmul.f32 %v4903_v30, %v9955_v24  ;;  %5671 = vst.msk [vmem:[%s11500_s4 + $0x3a0] sm:$0xff] %vm17_vm0, %v5024_v23  ;;  %5672 = vst.msk [vmem:[%s11500_s4 + $0x3a8] sm:$0xff] %vm17_vm0, %v5025_v9  ;;  %v5026_v43 = vadd.f32 %v4962_v36, %v9965_v60  ;;  %v5027_v16 = vadd.f32 %v4963_v10, %v9965_v60 }
 0x3bd   :  { %v4968_v6 = vmul.f32 %v4904_v39, %v9955_v24  ;;  %v4969_v47 = vmul.f32 %v4905_v8, %v9955_v24  ;;  %v5028_v11 = vadd.f32 %v4964_v22, %v9965_v60  ;;  %v5029_v14 = vadd.f32 %v4965_v46, %v9965_v60  ;;  %v5115_v22 = vld [vmem:[#allocation3 + $0x470] sm:$0xff]  ;;  %v5116_v46 = vld [vmem:[#allocation3 + $0x478] sm:$0xff] }
 0x3be   :  { %v5030_v18 = vadd.f32 %v4966_v45, %v9965_v60  ;;  %v5031_v49 = vadd.f32 %v4967_v48, %v9965_v60  ;;  %5673 = vst.msk [vmem:[%s11500_s4 + $0x3b0] sm:$0xff] %vm17_vm0, %v5026_v43  ;;  %5674 = vst.msk [vmem:[%s11500_s4 + $0x3b8] sm:$0xff] %vm17_vm0, %v5027_v16  ;;  %v4970_v12 = vmul.f32 %v4906_v52, %v9955_v24  ;;  %v5117_v45 = vld [vmem:[#allocation3 + $0x480] sm:$0xff]  ;;  %v5118_v16 = vld [vmem:[#allocation3 + $0x488] sm:$0xff] }
 0x3bf   :  { %v5032_v20 = vadd.f32 %v4968_v6, %v9965_v60  ;;  %v5033_v33 = vadd.f32 %v4969_v47, %v9965_v60  ;;  %v4971_v38 = vmul.f32 %v4907_v32, %v9955_v24  ;;  %5675 = vst.msk [vmem:[%s11500_s4 + $0x3c0] sm:$0xff] %vm17_vm0, %v5028_v11  ;;  %5676 = vst.msk [vmem:[%s11500_s4 + $0x3c8] sm:$0xff] %vm17_vm0, %v5029_v14  ;;  %v5119_v6 = vld [vmem:[#allocation3 + $0x490] sm:$0xff]  ;;  %v5120_v47 = vld [vmem:[#allocation3 + $0x498] sm:$0xff] }
 0x3c0   :  { %5677 = vst.msk [vmem:[%s11500_s4 + $0x3d0] sm:$0xff] %vm17_vm0, %v5030_v18  ;;  %5678 = vst.msk [vmem:[%s11500_s4 + $0x3d8] sm:$0xff] %vm17_vm0, %v5031_v49  ;;  %v5165_v4 = vmul.f32 %v5101_v55, %v9955_v24  ;;  %v5166_v42 = vmul.f32 %v5102_v31, %v9955_v24  ;;  %v5167_v15 = vmul.f32 %v5103_v35, %v9955_v24  ;;  %v5121_v52 = vld [vmem:[#allocation3 + $0x4a0] sm:$0xff]  ;;  %v5122_v32 = vld [vmem:[#allocation3 + $0x4a8] sm:$0xff] }
 0x3c1   :  { %v5168_v13 = vmul.f32 %v5104_v17, %v9955_v24  ;;  %5679 = vst.msk [vmem:[%s11500_s4 + $0x3e0] sm:$0xff] %vm17_vm0, %v5032_v20  ;;  %5680 = vst.msk [vmem:[%s11500_s4 + $0x3e8] sm:$0xff] %vm17_vm0, %v5033_v33  ;;  %v5034_v21 = vadd.f32 %v4970_v12, %v9965_v60  ;;  %v5035_v2 = vadd.f32 %v4971_v38, %v9965_v60 }
 0x3c2   :  { %v5169_v37 = vmul.f32 %v5105_v29, %v9955_v24  ;;  %v5170_v53 = vmul.f32 %v5106_v1, %v9955_v24  ;;  %v5229_v58 = vadd.f32 %v5165_v4, %v9965_v60  ;;  %v5230_v57 = vadd.f32 %v5166_v42, %v9965_v60  ;;  %v5123_v4 = vld [vmem:[#allocation3 + $0x4b0] sm:$0xff]  ;;  %v5124_v42 = vld [vmem:[#allocation3 + $0x4b8] sm:$0xff] }
 0x3c3   :  { %v5231_v62 = vadd.f32 %v5167_v15, %v9965_v60  ;;  %v5232_v41 = vadd.f32 %v5168_v13, %v9965_v60  ;;  %5681 = vst.msk [vmem:[%s11500_s4 + $0x3f0] sm:$0xff] %vm17_vm0, %v5034_v21  ;;  %5682 = vst.msk [vmem:[%s11500_s4 + $0x3f8] sm:$0xff] %vm17_vm0, %v5035_v2  ;;  %v5171_v19 = vmul.f32 %v5107_v50, %v9955_v24  ;;  %v5125_v15 = vld [vmem:[#allocation3 + $0x4c0] sm:$0xff]  ;;  %v5126_v2 = vld [vmem:[#allocation3 + $0x4c8] sm:$0xff] }
 0x3c4   :  { %v5233_v63 = vadd.f32 %v5169_v37, %v9965_v60  ;;  %v5234_v59 = vadd.f32 %v5170_v53, %v9965_v60  ;;  %v5172_v5 = vmul.f32 %v5108_v54, %v9955_v24  ;;  %5683 = vst.msk [vmem:[%s11500_s4 + $0x400] sm:$0xff] %vm17_vm0, %v5229_v58  ;;  %5684 = vst.msk [vmem:[%s11500_s4 + $0x408] sm:$0xff] %vm17_vm0, %v5230_v57  ;;  %v5127_v37 = vld [vmem:[#allocation3 + $0x4d0] sm:$0xff]  ;;  %v5128_v53 = vld [vmem:[#allocation3 + $0x4d8] sm:$0xff] }
 0x3c5   :  { %5685 = vst.msk [vmem:[%s11500_s4 + $0x410] sm:$0xff] %vm17_vm0, %v5231_v62  ;;  %5686 = vst.msk [vmem:[%s11500_s4 + $0x418] sm:$0xff] %vm17_vm0, %v5232_v41  ;;  %v5173_v0 = vmul.f32 %v5109_v25, %v9955_v24  ;;  %v5174_v61 = vmul.f32 %v5110_v40, %v9955_v24  ;;  %v5175_v7 = vmul.f32 %v5111_v56, %v9955_v24  ;;  %v5129_v50 = vld [vmem:[#allocation3 + $0x4e0] sm:$0xff]  ;;  %v5130_v54 = vld [vmem:[#allocation3 + $0x4e8] sm:$0xff] }
 0x3c6   :  { %v5176_v28 = vmul.f32 %v5112_v44, %v9955_v24  ;;  %5687 = vst.msk [vmem:[%s11500_s4 + $0x420] sm:$0xff] %vm17_vm0, %v5233_v63  ;;  %5688 = vst.msk [vmem:[%s11500_s4 + $0x428] sm:$0xff] %vm17_vm0, %v5234_v59  ;;  %v5235_v3 = vadd.f32 %v5171_v19, %v9965_v60  ;;  %v5236_v23 = vadd.f32 %v5172_v5, %v9965_v60 }
 0x3c7   :  { %v5177_v9 = vmul.f32 %v5113_v34, %v9955_v24  ;;  %v5178_v36 = vmul.f32 %v5114_v27, %v9955_v24  ;;  %v5237_v10 = vadd.f32 %v5173_v0, %v9965_v60  ;;  %v5238_v26 = vadd.f32 %v5174_v61, %v9965_v60  ;;  %v5131_v0 = vld [vmem:[#allocation3 + $0x4f0] sm:$0xff]  ;;  %v5132_v61 = vld [vmem:[#allocation3 + $0x4f8] sm:$0xff] }
 0x3c8   :  { %v5239_v51 = vadd.f32 %v5175_v7, %v9965_v60  ;;  %v5240_v30 = vadd.f32 %v5176_v28, %v9965_v60  ;;  %5689 = vst.msk [vmem:[%s11500_s4 + $0x430] sm:$0xff] %vm17_vm0, %v5235_v3  ;;  %5690 = vst.msk [vmem:[%s11500_s4 + $0x438] sm:$0xff] %vm17_vm0, %v5236_v23  ;;  %v5179_v8 = vmul.f32 %v5115_v22, %v9955_v24  ;;  %v5135_v7 = vld [vmem:[#allocation3 + $0x510] sm:$0xff]  ;;  %v5133_v23 = vld [vmem:[#allocation3 + $0x500] sm:$0xff] }
 0x3c9   :  { %v5241_v48 = vadd.f32 %v5177_v9, %v9965_v60  ;;  %v5242_v39 = vadd.f32 %v5178_v36, %v9965_v60  ;;  %v5180_v43 = vmul.f32 %v5116_v46, %v9955_v24  ;;  %5691 = vst.msk [vmem:[%s11500_s4 + $0x440] sm:$0xff] %vm17_vm0, %v5237_v10  ;;  %5692 = vst.msk [vmem:[%s11500_s4 + $0x448] sm:$0xff] %vm17_vm0, %v5238_v26  ;;  %v5134_v9 = vld [vmem:[#allocation3 + $0x508] sm:$0xff]  ;;  %v5136_v36 = vld [vmem:[#allocation3 + $0x518] sm:$0xff] }
 0x3ca   :  { %5693 = vst.msk [vmem:[%s11500_s4 + $0x450] sm:$0xff] %vm17_vm0, %v5239_v51  ;;  %5694 = vst.msk [vmem:[%s11500_s4 + $0x458] sm:$0xff] %vm17_vm0, %v5240_v30  ;;  %v5181_v11 = vmul.f32 %v5117_v45, %v9955_v24  ;;  %v5182_v14 = vmul.f32 %v5118_v16, %v9955_v24  ;;  %v5183_v18 = vmul.f32 %v5119_v6, %v9955_v24  ;;  %v5137_v22 = vld [vmem:[#allocation3 + $0x520] sm:$0xff]  ;;  %v5138_v46 = vld [vmem:[#allocation3 + $0x528] sm:$0xff] }
 0x3cb   :  { %v5184_v49 = vmul.f32 %v5120_v47, %v9955_v24  ;;  %5695 = vst.msk [vmem:[%s11500_s4 + $0x460] sm:$0xff] %vm17_vm0, %v5241_v48  ;;  %5696 = vst.msk [vmem:[%s11500_s4 + $0x468] sm:$0xff] %vm17_vm0, %v5242_v39  ;;  %v5243_v55 = vadd.f32 %v5179_v8, %v9965_v60  ;;  %v5244_v20 = vadd.f32 %v5180_v43, %v9965_v60 }
 0x3cc   :  { %v5185_v33 = vmul.f32 %v5121_v52, %v9955_v24  ;;  %v5186_v12 = vmul.f32 %v5122_v32, %v9955_v24  ;;  %v5245_v38 = vadd.f32 %v5181_v11, %v9965_v60  ;;  %v5246_v31 = vadd.f32 %v5182_v14, %v9965_v60  ;;  %v5139_v11 = vld [vmem:[#allocation3 + $0x530] sm:$0xff]  ;;  %v5140_v14 = vld [vmem:[#allocation3 + $0x538] sm:$0xff] }
 0x3cd   :  { %v5247_v35 = vadd.f32 %v5183_v18, %v9965_v60  ;;  %v5248_v17 = vadd.f32 %v5184_v49, %v9965_v60  ;;  %5697 = vst.msk [vmem:[%s11500_s4 + $0x470] sm:$0xff] %vm17_vm0, %v5243_v55  ;;  %5698 = vst.msk [vmem:[%s11500_s4 + $0x478] sm:$0xff] %vm17_vm0, %v5244_v20  ;;  %v5187_v1 = vmul.f32 %v5123_v4, %v9955_v24  ;;  %v5141_v18 = vld [vmem:[#allocation3 + $0x540] sm:$0xff]  ;;  %v5142_v20 = vld [vmem:[#allocation3 + $0x548] sm:$0xff] }
 0x3ce   :  { %v5249_v13 = vadd.f32 %v5185_v33, %v9965_v60  ;;  %v5250_v29 = vadd.f32 %v5186_v12, %v9965_v60  ;;  %v5188_v21 = vmul.f32 %v5124_v42, %v9955_v24  ;;  %5699 = vst.msk [vmem:[%s11500_s4 + $0x480] sm:$0xff] %vm17_vm0, %v5245_v38  ;;  %5700 = vst.msk [vmem:[%s11500_s4 + $0x488] sm:$0xff] %vm17_vm0, %v5246_v31  ;;  %v5143_v33 = vld [vmem:[#allocation3 + $0x550] sm:$0xff]  ;;  %v5144_v12 = vld [vmem:[#allocation3 + $0x558] sm:$0xff] }
 0x3cf   :  { %5701 = vst.msk [vmem:[%s11500_s4 + $0x490] sm:$0xff] %vm17_vm0, %v5247_v35  ;;  %5702 = vst.msk [vmem:[%s11500_s4 + $0x498] sm:$0xff] %vm17_vm0, %v5248_v17  ;;  %v5189_v58 = vmul.f32 %v5125_v15, %v9955_v24  ;;  %v5190_v57 = vmul.f32 %v5126_v2, %v9955_v24  ;;  %v5191_v62 = vmul.f32 %v5127_v37, %v9955_v24  ;;  %v5145_v4 = vld [vmem:[#allocation3 + $0x560] sm:$0xff]  ;;  %v5146_v42 = vld [vmem:[#allocation3 + $0x568] sm:$0xff] }
 0x3d0   :  { %v5192_v41 = vmul.f32 %v5128_v53, %v9955_v24  ;;  %5703 = vst.msk [vmem:[%s11500_s4 + $0x4a0] sm:$0xff] %vm17_vm0, %v5249_v13  ;;  %5704 = vst.msk [vmem:[%s11500_s4 + $0x4a8] sm:$0xff] %vm17_vm0, %v5250_v29  ;;  %v5251_v25 = vadd.f32 %v5187_v1, %v9965_v60  ;;  %v5252_v63 = vadd.f32 %v5188_v21, %v9965_v60 }
 0x3d1   :  { %v5193_v59 = vmul.f32 %v5129_v50, %v9955_v24  ;;  %v5194_v19 = vmul.f32 %v5130_v54, %v9955_v24  ;;  %v5253_v5 = vadd.f32 %v5189_v58, %v9965_v60  ;;  %v5254_v40 = vadd.f32 %v5190_v57, %v9965_v60  ;;  %v5147_v58 = vld [vmem:[#allocation3 + $0x570] sm:$0xff]  ;;  %v5148_v57 = vld [vmem:[#allocation3 + $0x578] sm:$0xff] }
 0x3d2   :  { %v5255_v56 = vadd.f32 %v5191_v62, %v9965_v60  ;;  %v5256_v44 = vadd.f32 %v5192_v41, %v9965_v60  ;;  %5705 = vst.msk [vmem:[%s11500_s4 + $0x4b0] sm:$0xff] %vm17_vm0, %v5251_v25  ;;  %5706 = vst.msk [vmem:[%s11500_s4 + $0x4b8] sm:$0xff] %vm17_vm0, %v5252_v63  ;;  %v5195_v27 = vmul.f32 %v5131_v0, %v9955_v24  ;;  %v5149_v62 = vld [vmem:[#allocation3 + $0x580] sm:$0xff]  ;;  %v5150_v63 = vld [vmem:[#allocation3 + $0x588] sm:$0xff] }
 0x3d3   :  { %v5257_v28 = vadd.f32 %v5193_v59, %v9965_v60  ;;  %v5258_v34 = vadd.f32 %v5194_v19, %v9965_v60  ;;  %v5196_v3 = vmul.f32 %v5132_v61, %v9955_v24  ;;  %5707 = vst.msk [vmem:[%s11500_s4 + $0x4c0] sm:$0xff] %vm17_vm0, %v5253_v5  ;;  %5708 = vst.msk [vmem:[%s11500_s4 + $0x4c8] sm:$0xff] %vm17_vm0, %v5254_v40  ;;  %v5151_v59 = vld [vmem:[#allocation3 + $0x590] sm:$0xff]  ;;  %v5152_v19 = vld [vmem:[#allocation3 + $0x598] sm:$0xff] }
 0x3d4   :  { %5709 = vst.msk [vmem:[%s11500_s4 + $0x4d0] sm:$0xff] %vm17_vm0, %v5255_v56  ;;  %5710 = vst.msk [vmem:[%s11500_s4 + $0x4d8] sm:$0xff] %vm17_vm0, %v5256_v44  ;;  %v5197_v10 = vmul.f32 %v5133_v23, %v9955_v24  ;;  %v5198_v26 = vmul.f32 %v5134_v9, %v9955_v24  ;;  %v5199_v51 = vmul.f32 %v5135_v7, %v9955_v24  ;;  %v5153_v0 = vld [vmem:[#allocation3 + $0x5a0] sm:$0xff]  ;;  %v5154_v61 = vld [vmem:[#allocation3 + $0x5a8] sm:$0xff] }
 0x3d5   :  { %v5200_v30 = vmul.f32 %v5136_v36, %v9955_v24  ;;  %5711 = vst.msk [vmem:[%s11500_s4 + $0x4e0] sm:$0xff] %vm17_vm0, %v5257_v28  ;;  %5712 = vst.msk [vmem:[%s11500_s4 + $0x4e8] sm:$0xff] %vm17_vm0, %v5258_v34  ;;  %v5259_v45 = vadd.f32 %v5195_v27, %v9965_v60  ;;  %v5260_v48 = vadd.f32 %v5196_v3, %v9965_v60 }
 0x3d6   :  { %v5201_v39 = vmul.f32 %v5137_v22, %v9955_v24  ;;  %v5202_v8 = vmul.f32 %v5138_v46, %v9955_v24  ;;  %v5261_v43 = vadd.f32 %v5197_v10, %v9965_v60  ;;  %v5262_v16 = vadd.f32 %v5198_v26, %v9965_v60  ;;  %v5155_v10 = vld [vmem:[#allocation3 + $0x5b0] sm:$0xff]  ;;  %v5156_v26 = vld [vmem:[#allocation3 + $0x5b8] sm:$0xff] }
 0x3d7   :  { %v5263_v6 = vadd.f32 %v5199_v51, %v9965_v60  ;;  %v5264_v47 = vadd.f32 %v5200_v30, %v9965_v60  ;;  %5713 = vst.msk [vmem:[%s11500_s4 + $0x4f0] sm:$0xff] %vm17_vm0, %v5259_v45  ;;  %5714 = vst.msk [vmem:[%s11500_s4 + $0x4f8] sm:$0xff] %vm17_vm0, %v5260_v48  ;;  %v5203_v32 = vmul.f32 %v5139_v11, %v9955_v24  ;;  %v5157_v51 = vld [vmem:[#allocation3 + $0x5c0] sm:$0xff]  ;;  %v5158_v48 = vld [vmem:[#allocation3 + $0x5c8] sm:$0xff] }
 0x3d8   :  { %v5265_v49 = vadd.f32 %v5201_v39, %v9965_v60  ;;  %v5266_v52 = vadd.f32 %v5202_v8, %v9965_v60  ;;  %v5204_v55 = vmul.f32 %v5140_v14, %v9955_v24  ;;  %5715 = vst.msk [vmem:[%s11500_s4 + $0x500] sm:$0xff] %vm17_vm0, %v5261_v43  ;;  %5716 = vst.msk [vmem:[%s11500_s4 + $0x508] sm:$0xff] %vm17_vm0, %v5262_v16  ;;  %v5159_v39 = vld [vmem:[#allocation3 + $0x5d0] sm:$0xff]  ;;  %v5160_v8 = vld [vmem:[#allocation3 + $0x5d8] sm:$0xff] }
 0x3d9   :  { %5717 = vst.msk [vmem:[%s11500_s4 + $0x510] sm:$0xff] %vm17_vm0, %v5263_v6  ;;  %5718 = vst.msk [vmem:[%s11500_s4 + $0x518] sm:$0xff] %vm17_vm0, %v5264_v47  ;;  %v5205_v38 = vmul.f32 %v5141_v18, %v9955_v24  ;;  %v5206_v31 = vmul.f32 %v5142_v20, %v9955_v24  ;;  %v5207_v35 = vmul.f32 %v5143_v33, %v9955_v24  ;;  %v5161_v11 = vld [vmem:[#allocation3 + $0x5e0] sm:$0xff]  ;;  %v5162_v14 = vld [vmem:[#allocation3 + $0x5e8] sm:$0xff] }
 0x3da   :  { %v5208_v17 = vmul.f32 %v5144_v12, %v9955_v24  ;;  %5719 = vst.msk [vmem:[%s11500_s4 + $0x520] sm:$0xff] %vm17_vm0, %v5265_v49  ;;  %5720 = vst.msk [vmem:[%s11500_s4 + $0x528] sm:$0xff] %vm17_vm0, %v5266_v52  ;;  %v5267_v15 = vadd.f32 %v5203_v32, %v9965_v60  ;;  %v5268_v13 = vadd.f32 %v5204_v55, %v9965_v60 }
 0x3db   :  { %v5209_v29 = vmul.f32 %v5145_v4, %v9955_v24  ;;  %v5210_v1 = vmul.f32 %v5146_v42, %v9955_v24  ;;  %v5269_v21 = vadd.f32 %v5205_v38, %v9965_v60  ;;  %v5270_v2 = vadd.f32 %v5206_v31, %v9965_v60  ;;  %v5163_v38 = vld [vmem:[#allocation3 + $0x5f0] sm:$0xff]  ;;  %v5164_v31 = vld [vmem:[#allocation3 + $0x5f8] sm:$0xff] }
 0x3dc   :  { %v5271_v37 = vadd.f32 %v5207_v35, %v9965_v60  ;;  %v5272_v53 = vadd.f32 %v5208_v17, %v9965_v60  ;;  %5721 = vst.msk [vmem:[%s11500_s4 + $0x530] sm:$0xff] %vm17_vm0, %v5267_v15  ;;  %5722 = vst.msk [vmem:[%s11500_s4 + $0x538] sm:$0xff] %vm17_vm0, %v5268_v13  ;;  %v5211_v54 = vmul.f32 %v5147_v58, %v9955_v24  ;;  %v5358_v35 = vld [vmem:[#allocation3 + $0x600] sm:$0xff]  ;;  %v5359_v13 = vld [vmem:[#allocation3 + $0x608] sm:$0xff] }
 0x3dd   :  { %v5273_v41 = vadd.f32 %v5209_v29, %v9965_v60  ;;  %v5274_v50 = vadd.f32 %v5210_v1, %v9965_v60  ;;  %v5212_v25 = vmul.f32 %v5148_v57, %v9955_v24  ;;  %5723 = vst.msk [vmem:[%s11500_s4 + $0x540] sm:$0xff] %vm17_vm0, %v5269_v21  ;;  %5724 = vst.msk [vmem:[%s11500_s4 + $0x548] sm:$0xff] %vm17_vm0, %v5270_v2  ;;  %v5360_v29 = vld [vmem:[#allocation3 + $0x610] sm:$0xff]  ;;  %v5361_v1 = vld [vmem:[#allocation3 + $0x618] sm:$0xff] }
 0x3de   :  { %5725 = vst.msk [vmem:[%s11500_s4 + $0x550] sm:$0xff] %vm17_vm0, %v5271_v37  ;;  %5726 = vst.msk [vmem:[%s11500_s4 + $0x558] sm:$0xff] %vm17_vm0, %v5272_v53  ;;  %v5213_v5 = vmul.f32 %v5149_v62, %v9955_v24  ;;  %v5214_v40 = vmul.f32 %v5150_v63, %v9955_v24  ;;  %v5215_v56 = vmul.f32 %v5151_v59, %v9955_v24  ;;  %v5362_v58 = vld [vmem:[#allocation3 + $0x620] sm:$0xff]  ;;  %v5363_v57 = vld [vmem:[#allocation3 + $0x628] sm:$0xff] }
 0x3df   :  { %v5216_v44 = vmul.f32 %v5152_v19, %v9955_v24  ;;  %5727 = vst.msk [vmem:[%s11500_s4 + $0x560] sm:$0xff] %vm17_vm0, %v5273_v41  ;;  %5728 = vst.msk [vmem:[%s11500_s4 + $0x568] sm:$0xff] %vm17_vm0, %v5274_v50  ;;  %v5275_v7 = vadd.f32 %v5211_v54, %v9965_v60  ;;  %v5276_v28 = vadd.f32 %v5212_v25, %v9965_v60 }
 0x3e0   :  { %v5217_v34 = vmul.f32 %v5153_v0, %v9955_v24  ;;  %v5218_v27 = vmul.f32 %v5154_v61, %v9955_v24  ;;  %v5277_v3 = vadd.f32 %v5213_v5, %v9965_v60  ;;  %v5278_v23 = vadd.f32 %v5214_v40, %v9965_v60  ;;  %v5364_v5 = vld [vmem:[#allocation3 + $0x630] sm:$0xff]  ;;  %v5365_v40 = vld [vmem:[#allocation3 + $0x638] sm:$0xff] }
 0x3e1   :  { %v5279_v9 = vadd.f32 %v5215_v56, %v9965_v60  ;;  %v5280_v36 = vadd.f32 %v5216_v44, %v9965_v60  ;;  %5729 = vst.msk [vmem:[%s11500_s4 + $0x570] sm:$0xff] %vm17_vm0, %v5275_v7  ;;  %5730 = vst.msk [vmem:[%s11500_s4 + $0x578] sm:$0xff] %vm17_vm0, %v5276_v28  ;;  %v5219_v46 = vmul.f32 %v5155_v10, %v9955_v24  ;;  %v5366_v56 = vld [vmem:[#allocation3 + $0x640] sm:$0xff]  ;;  %v5367_v28 = vld [vmem:[#allocation3 + $0x648] sm:$0xff] }
 0x3e2   :  { %v5281_v30 = vadd.f32 %v5217_v34, %v9965_v60  ;;  %v5282_v22 = vadd.f32 %v5218_v27, %v9965_v60  ;;  %v5220_v45 = vmul.f32 %v5156_v26, %v9955_v24  ;;  %5731 = vst.msk [vmem:[%s11500_s4 + $0x580] sm:$0xff] %vm17_vm0, %v5277_v3  ;;  %5732 = vst.msk [vmem:[%s11500_s4 + $0x588] sm:$0xff] %vm17_vm0, %v5278_v23  ;;  %v5368_v34 = vld [vmem:[#allocation3 + $0x650] sm:$0xff]  ;;  %v5369_v27 = vld [vmem:[#allocation3 + $0x658] sm:$0xff] }
 0x3e3   :  { %5733 = vst.msk [vmem:[%s11500_s4 + $0x590] sm:$0xff] %vm17_vm0, %v5279_v9  ;;  %5734 = vst.msk [vmem:[%s11500_s4 + $0x598] sm:$0xff] %vm17_vm0, %v5280_v36  ;;  %v5221_v43 = vmul.f32 %v5157_v51, %v9955_v24  ;;  %v5222_v16 = vmul.f32 %v5158_v48, %v9955_v24  ;;  %v5223_v6 = vmul.f32 %v5159_v39, %v9955_v24  ;;  %v5370_v10 = vld [vmem:[#allocation3 + $0x660] sm:$0xff]  ;;  %v5371_v26 = vld [vmem:[#allocation3 + $0x668] sm:$0xff] }
 0x3e4   :  { %v5224_v47 = vmul.f32 %v5160_v8, %v9955_v24  ;;  %5735 = vst.msk [vmem:[%s11500_s4 + $0x5a0] sm:$0xff] %vm17_vm0, %v5281_v30  ;;  %5736 = vst.msk [vmem:[%s11500_s4 + $0x5a8] sm:$0xff] %vm17_vm0, %v5282_v22  ;;  %v5283_v18 = vadd.f32 %v5219_v46, %v9965_v60  ;;  %v5284_v49 = vadd.f32 %v5220_v45, %v9965_v60 }
 0x3e5   :  { %v5225_v52 = vmul.f32 %v5161_v11, %v9955_v24  ;;  %v5226_v32 = vmul.f32 %v5162_v14, %v9955_v24  ;;  %v5285_v55 = vadd.f32 %v5221_v43, %v9965_v60  ;;  %v5286_v20 = vadd.f32 %v5222_v16, %v9965_v60  ;;  %v5372_v43 = vld [vmem:[#allocation3 + $0x670] sm:$0xff]  ;;  %v5373_v16 = vld [vmem:[#allocation3 + $0x678] sm:$0xff] }
 0x3e6   :  { %v5287_v33 = vadd.f32 %v5223_v6, %v9965_v60  ;;  %v5288_v12 = vadd.f32 %v5224_v47, %v9965_v60  ;;  %5737 = vst.msk [vmem:[%s11500_s4 + $0x5b0] sm:$0xff] %vm17_vm0, %v5283_v18  ;;  %5738 = vst.msk [vmem:[%s11500_s4 + $0x5b8] sm:$0xff] %vm17_vm0, %v5284_v49  ;;  %v5227_v42 = vmul.f32 %v5163_v38, %v9955_v24  ;;  %v5374_v6 = vld [vmem:[#allocation3 + $0x680] sm:$0xff]  ;;  %v5375_v49 = vld [vmem:[#allocation3 + $0x688] sm:$0xff] }
 0x3e7   :  { %v5289_v17 = vadd.f32 %v5225_v52, %v9965_v60  ;;  %v5290_v4 = vadd.f32 %v5226_v32, %v9965_v60  ;;  %v5228_v15 = vmul.f32 %v5164_v31, %v9955_v24  ;;  %5739 = vst.msk [vmem:[%s11500_s4 + $0x5c0] sm:$0xff] %vm17_vm0, %v5285_v55  ;;  %5740 = vst.msk [vmem:[%s11500_s4 + $0x5c8] sm:$0xff] %vm17_vm0, %v5286_v20  ;;  %v5376_v52 = vld [vmem:[#allocation3 + $0x690] sm:$0xff]  ;;  %v5377_v32 = vld [vmem:[#allocation3 + $0x698] sm:$0xff] }
 0x3e8   :  { %5741 = vst.msk [vmem:[%s11500_s4 + $0x5d0] sm:$0xff] %vm17_vm0, %v5287_v33  ;;  %5742 = vst.msk [vmem:[%s11500_s4 + $0x5d8] sm:$0xff] %vm17_vm0, %v5288_v12  ;;  %v5422_v21 = vmul.f32 %v5358_v35, %v9955_v24  ;;  %v5423_v2 = vmul.f32 %v5359_v13, %v9955_v24  ;;  %v5424_v37 = vmul.f32 %v5360_v29, %v9955_v24  ;;  %v5378_v38 = vld [vmem:[#allocation3 + $0x6a0] sm:$0xff]  ;;  %v5379_v31 = vld [vmem:[#allocation3 + $0x6a8] sm:$0xff] }
 0x3e9   :  { %v5425_v53 = vmul.f32 %v5361_v1, %v9955_v24  ;;  %5743 = vst.msk [vmem:[%s11500_s4 + $0x5e0] sm:$0xff] %vm17_vm0, %v5289_v17  ;;  %5744 = vst.msk [vmem:[%s11500_s4 + $0x5e8] sm:$0xff] %vm17_vm0, %v5290_v4  ;;  %v5291_v62 = vadd.f32 %v5227_v42, %v9965_v60  ;;  %v5292_v41 = vadd.f32 %v5228_v15, %v9965_v60 }
 0x3ea   :  { %v5426_v50 = vmul.f32 %v5362_v58, %v9955_v24  ;;  %v5427_v54 = vmul.f32 %v5363_v57, %v9955_v24  ;;  %v5486_v25 = vadd.f32 %v5422_v21, %v9965_v60  ;;  %v5487_v63 = vadd.f32 %v5423_v2, %v9965_v60  ;;  %v5380_v21 = vld [vmem:[#allocation3 + $0x6b0] sm:$0xff]  ;;  %v5381_v2 = vld [vmem:[#allocation3 + $0x6b8] sm:$0xff] }
 0x3eb   :  { %v5488_v59 = vadd.f32 %v5424_v37, %v9965_v60  ;;  %v5489_v19 = vadd.f32 %v5425_v53, %v9965_v60  ;;  %5745 = vst.msk [vmem:[%s11500_s4 + $0x5f0] sm:$0xff] %vm17_vm0, %v5291_v62  ;;  %5746 = vst.msk [vmem:[%s11500_s4 + $0x5f8] sm:$0xff] %vm17_vm0, %v5292_v41  ;;  %v5428_v61 = vmul.f32 %v5364_v5, %v9955_v24  ;;  %v5382_v37 = vld [vmem:[#allocation3 + $0x6c0] sm:$0xff]  ;;  %v5383_v41 = vld [vmem:[#allocation3 + $0x6c8] sm:$0xff] }
 0x3ec   :  { %v5490_v44 = vadd.f32 %v5426_v50, %v9965_v60  ;;  %v5491_v0 = vadd.f32 %v5427_v54, %v9965_v60  ;;  %v5429_v7 = vmul.f32 %v5365_v40, %v9955_v24  ;;  %5747 = vst.msk [vmem:[%s11500_s4 + $0x600] sm:$0xff] %vm17_vm0, %v5486_v25  ;;  %5748 = vst.msk [vmem:[%s11500_s4 + $0x608] sm:$0xff] %vm17_vm0, %v5487_v63  ;;  %v5384_v50 = vld [vmem:[#allocation3 + $0x6d0] sm:$0xff]  ;;  %v5385_v54 = vld [vmem:[#allocation3 + $0x6d8] sm:$0xff] }
 0x3ed   :  { %5749 = vst.msk [vmem:[%s11500_s4 + $0x610] sm:$0xff] %vm17_vm0, %v5488_v59  ;;  %5750 = vst.msk [vmem:[%s11500_s4 + $0x618] sm:$0xff] %vm17_vm0, %v5489_v19  ;;  %v5430_v3 = vmul.f32 %v5366_v56, %v9955_v24  ;;  %v5431_v23 = vmul.f32 %v5367_v28, %v9955_v24  ;;  %v5432_v9 = vmul.f32 %v5368_v34, %v9955_v24  ;;  %v5386_v5 = vld [vmem:[#allocation3 + $0x6e0] sm:$0xff]  ;;  %v5387_v40 = vld [vmem:[#allocation3 + $0x6e8] sm:$0xff] }
 0x3ee   :  { %v5433_v36 = vmul.f32 %v5369_v27, %v9955_v24  ;;  %5751 = vst.msk [vmem:[%s11500_s4 + $0x620] sm:$0xff] %vm17_vm0, %v5490_v44  ;;  %5752 = vst.msk [vmem:[%s11500_s4 + $0x628] sm:$0xff] %vm17_vm0, %v5491_v0  ;;  %v5492_v51 = vadd.f32 %v5428_v61, %v9965_v60  ;;  %v5493_v30 = vadd.f32 %v5429_v7, %v9965_v60 }
 0x3ef   :  { %v5434_v22 = vmul.f32 %v5370_v10, %v9955_v24  ;;  %v5435_v46 = vmul.f32 %v5371_v26, %v9955_v24  ;;  %v5494_v45 = vadd.f32 %v5430_v3, %v9965_v60  ;;  %v5495_v48 = vadd.f32 %v5431_v23, %v9965_v60  ;;  %v5388_v3 = vld [vmem:[#allocation3 + $0x6f0] sm:$0xff]  ;;  %v5389_v23 = vld [vmem:[#allocation3 + $0x6f8] sm:$0xff] }
 0x3f0   :  { %v5496_v39 = vadd.f32 %v5432_v9, %v9965_v60  ;;  %v5497_v8 = vadd.f32 %v5433_v36, %v9965_v60  ;;  %5753 = vst.msk [vmem:[%s11500_s4 + $0x630] sm:$0xff] %vm17_vm0, %v5492_v51  ;;  %5754 = vst.msk [vmem:[%s11500_s4 + $0x638] sm:$0xff] %vm17_vm0, %v5493_v30  ;;  %v5436_v14 = vmul.f32 %v5372_v43, %v9955_v24  ;;  %v5392_v9 = vld [vmem:[#allocation3 + $0x710] sm:$0xff]  ;;  %v5390_v30 = vld [vmem:[#allocation3 + $0x700] sm:$0xff] }
 0x3f1   :  { %v5498_v47 = vadd.f32 %v5434_v22, %v9965_v60  ;;  %v5499_v11 = vadd.f32 %v5435_v46, %v9965_v60  ;;  %v5437_v18 = vmul.f32 %v5373_v16, %v9955_v24  ;;  %5755 = vst.msk [vmem:[%s11500_s4 + $0x640] sm:$0xff] %vm17_vm0, %v5494_v45  ;;  %5756 = vst.msk [vmem:[%s11500_s4 + $0x648] sm:$0xff] %vm17_vm0, %v5495_v48  ;;  %v5391_v22 = vld [vmem:[#allocation3 + $0x708] sm:$0xff]  ;;  %v5393_v46 = vld [vmem:[#allocation3 + $0x718] sm:$0xff] }
 0x3f2   :  { %5757 = vst.msk [vmem:[%s11500_s4 + $0x650] sm:$0xff] %vm17_vm0, %v5496_v39  ;;  %5758 = vst.msk [vmem:[%s11500_s4 + $0x658] sm:$0xff] %vm17_vm0, %v5497_v8  ;;  %v5438_v55 = vmul.f32 %v5374_v6, %v9955_v24  ;;  %v5439_v20 = vmul.f32 %v5375_v49, %v9955_v24  ;;  %v5440_v33 = vmul.f32 %v5376_v52, %v9955_v24  ;;  %v5394_v43 = vld [vmem:[#allocation3 + $0x720] sm:$0xff]  ;;  %v5395_v16 = vld [vmem:[#allocation3 + $0x728] sm:$0xff] }
 0x3f3   :  { %v5441_v12 = vmul.f32 %v5377_v32, %v9955_v24  ;;  %5759 = vst.msk [vmem:[%s11500_s4 + $0x660] sm:$0xff] %vm17_vm0, %v5498_v47  ;;  %5760 = vst.msk [vmem:[%s11500_s4 + $0x668] sm:$0xff] %vm17_vm0, %v5499_v11  ;;  %v5500_v35 = vadd.f32 %v5436_v14, %v9965_v60  ;;  %v5501_v17 = vadd.f32 %v5437_v18, %v9965_v60 }
 0x3f4   :  { %v5442_v4 = vmul.f32 %v5378_v38, %v9955_v24  ;;  %v5443_v42 = vmul.f32 %v5379_v31, %v9955_v24  ;;  %v5502_v15 = vadd.f32 %v5438_v55, %v9965_v60  ;;  %v5503_v13 = vadd.f32 %v5439_v20, %v9965_v60  ;;  %v5396_v55 = vld [vmem:[#allocation3 + $0x730] sm:$0xff]  ;;  %v5397_v20 = vld [vmem:[#allocation3 + $0x738] sm:$0xff] }
 0x3f5   :  { %v5504_v29 = vadd.f32 %v5440_v33, %v9965_v60  ;;  %v5505_v1 = vadd.f32 %v5441_v12, %v9965_v60  ;;  %5761 = vst.msk [vmem:[%s11500_s4 + $0x670] sm:$0xff] %vm17_vm0, %v5500_v35  ;;  %5762 = vst.msk [vmem:[%s11500_s4 + $0x678] sm:$0xff] %vm17_vm0, %v5501_v17  ;;  %v5444_v57 = vmul.f32 %v5380_v21, %v9955_v24  ;;  %v5398_v33 = vld [vmem:[#allocation3 + $0x740] sm:$0xff]  ;;  %v5399_v17 = vld [vmem:[#allocation3 + $0x748] sm:$0xff] }
 0x3f6   :  { %v5506_v53 = vadd.f32 %v5442_v4, %v9965_v60  ;;  %v5507_v58 = vadd.f32 %v5443_v42, %v9965_v60  ;;  %v5445_v62 = vmul.f32 %v5381_v2, %v9955_v24  ;;  %5763 = vst.msk [vmem:[%s11500_s4 + $0x680] sm:$0xff] %vm17_vm0, %v5502_v15  ;;  %5764 = vst.msk [vmem:[%s11500_s4 + $0x688] sm:$0xff] %vm17_vm0, %v5503_v13  ;;  %v5400_v4 = vld [vmem:[#allocation3 + $0x750] sm:$0xff]  ;;  %v5401_v42 = vld [vmem:[#allocation3 + $0x758] sm:$0xff] }
 0x3f7   :  { %5765 = vst.msk [vmem:[%s11500_s4 + $0x690] sm:$0xff] %vm17_vm0, %v5504_v29  ;;  %5766 = vst.msk [vmem:[%s11500_s4 + $0x698] sm:$0xff] %vm17_vm0, %v5505_v1  ;;  %v5446_v25 = vmul.f32 %v5382_v37, %v9955_v24  ;;  %v5447_v63 = vmul.f32 %v5383_v41, %v9955_v24  ;;  %v5448_v59 = vmul.f32 %v5384_v50, %v9955_v24  ;;  %v5402_v21 = vld [vmem:[#allocation3 + $0x760] sm:$0xff]  ;;  %v5403_v2 = vld [vmem:[#allocation3 + $0x768] sm:$0xff] }
 0x3f8   :  { %v5449_v19 = vmul.f32 %v5385_v54, %v9955_v24  ;;  %5767 = vst.msk [vmem:[%s11500_s4 + $0x6a0] sm:$0xff] %vm17_vm0, %v5506_v53  ;;  %5768 = vst.msk [vmem:[%s11500_s4 + $0x6a8] sm:$0xff] %vm17_vm0, %v5507_v58  ;;  %v5508_v56 = vadd.f32 %v5444_v57, %v9965_v60  ;;  %v5509_v44 = vadd.f32 %v5445_v62, %v9965_v60 }
 0x3f9   :  { %v5450_v0 = vmul.f32 %v5386_v5, %v9955_v24  ;;  %v5451_v61 = vmul.f32 %v5387_v40, %v9955_v24  ;;  %v5510_v7 = vadd.f32 %v5446_v25, %v9965_v60  ;;  %v5511_v28 = vadd.f32 %v5447_v63, %v9965_v60  ;;  %v5404_v25 = vld [vmem:[#allocation3 + $0x770] sm:$0xff]  ;;  %v5405_v63 = vld [vmem:[#allocation3 + $0x778] sm:$0xff] }
 0x3fa   :  { %v5512_v34 = vadd.f32 %v5448_v59, %v9965_v60  ;;  %v5513_v27 = vadd.f32 %v5449_v19, %v9965_v60  ;;  %5769 = vst.msk [vmem:[%s11500_s4 + $0x6b0] sm:$0xff] %vm17_vm0, %v5508_v56  ;;  %5770 = vst.msk [vmem:[%s11500_s4 + $0x6b8] sm:$0xff] %vm17_vm0, %v5509_v44  ;;  %v5452_v26 = vmul.f32 %v5388_v3, %v9955_v24  ;;  %v5406_v59 = vld [vmem:[#allocation3 + $0x780] sm:$0xff]  ;;  %v5407_v44 = vld [vmem:[#allocation3 + $0x788] sm:$0xff] }
 0x3fb   :  { %v5514_v36 = vadd.f32 %v5450_v0, %v9965_v60  ;;  %v5515_v10 = vadd.f32 %v5451_v61, %v9965_v60  ;;  %v5453_v51 = vmul.f32 %v5389_v23, %v9955_v24  ;;  %5771 = vst.msk [vmem:[%s11500_s4 + $0x6c0] sm:$0xff] %vm17_vm0, %v5510_v7  ;;  %5772 = vst.msk [vmem:[%s11500_s4 + $0x6c8] sm:$0xff] %vm17_vm0, %v5511_v28  ;;  %v5408_v0 = vld [vmem:[#allocation3 + $0x790] sm:$0xff]  ;;  %v5409_v61 = vld [vmem:[#allocation3 + $0x798] sm:$0xff] }
 0x3fc   :  { %5773 = vst.msk [vmem:[%s11500_s4 + $0x6d0] sm:$0xff] %vm17_vm0, %v5512_v34  ;;  %5774 = vst.msk [vmem:[%s11500_s4 + $0x6d8] sm:$0xff] %vm17_vm0, %v5513_v27  ;;  %v5454_v45 = vmul.f32 %v5390_v30, %v9955_v24  ;;  %v5455_v48 = vmul.f32 %v5391_v22, %v9955_v24  ;;  %v5456_v39 = vmul.f32 %v5392_v9, %v9955_v24  ;;  %v5410_v3 = vld [vmem:[#allocation3 + $0x7a0] sm:$0xff]  ;;  %v5411_v23 = vld [vmem:[#allocation3 + $0x7a8] sm:$0xff] }
 0x3fd   :  { %v5457_v8 = vmul.f32 %v5393_v46, %v9955_v24  ;;  %5775 = vst.msk [vmem:[%s11500_s4 + $0x6e0] sm:$0xff] %vm17_vm0, %v5514_v36  ;;  %5776 = vst.msk [vmem:[%s11500_s4 + $0x6e8] sm:$0xff] %vm17_vm0, %v5515_v10  ;;  %v5516_v6 = vadd.f32 %v5452_v26, %v9965_v60  ;;  %v5517_v47 = vadd.f32 %v5453_v51, %v9965_v60 }
 0x3fe   :  { %v5458_v11 = vmul.f32 %v5394_v43, %v9955_v24  ;;  %v5459_v14 = vmul.f32 %v5395_v16, %v9955_v24  ;;  %v5518_v18 = vadd.f32 %v5454_v45, %v9965_v60  ;;  %v5519_v49 = vadd.f32 %v5455_v48, %v9965_v60  ;;  %v5412_v45 = vld [vmem:[#allocation3 + $0x7b0] sm:$0xff]  ;;  %v5413_v48 = vld [vmem:[#allocation3 + $0x7b8] sm:$0xff] }
 0x3ff   :  { %v5520_v52 = vadd.f32 %v5456_v39, %v9965_v60  ;;  %v5521_v32 = vadd.f32 %v5457_v8, %v9965_v60  ;;  %5777 = vst.msk [vmem:[%s11500_s4 + $0x6f0] sm:$0xff] %vm17_vm0, %v5516_v6  ;;  %5778 = vst.msk [vmem:[%s11500_s4 + $0x6f8] sm:$0xff] %vm17_vm0, %v5517_v47  ;;  %v5460_v31 = vmul.f32 %v5396_v55, %v9955_v24  ;;  %v5414_v39 = vld [vmem:[#allocation3 + $0x7c0] sm:$0xff]  ;;  %v5415_v47 = vld [vmem:[#allocation3 + $0x7c8] sm:$0xff] }
 0x400   :  { %v5522_v12 = vadd.f32 %v5458_v11, %v9965_v60  ;;  %v5523_v38 = vadd.f32 %v5459_v14, %v9965_v60  ;;  %v5461_v35 = vmul.f32 %v5397_v20, %v9955_v24  ;;  %5779 = vst.msk [vmem:[%s11500_s4 + $0x700] sm:$0xff] %vm17_vm0, %v5518_v18  ;;  %5780 = vst.msk [vmem:[%s11500_s4 + $0x708] sm:$0xff] %vm17_vm0, %v5519_v49  ;;  %v5416_v11 = vld [vmem:[#allocation3 + $0x7d0] sm:$0xff]  ;;  %v5417_v14 = vld [vmem:[#allocation3 + $0x7d8] sm:$0xff] }
 0x401   :  { %5781 = vst.msk [vmem:[%s11500_s4 + $0x710] sm:$0xff] %vm17_vm0, %v5520_v52  ;;  %5782 = vst.msk [vmem:[%s11500_s4 + $0x718] sm:$0xff] %vm17_vm0, %v5521_v32  ;;  %v5462_v15 = vmul.f32 %v5398_v33, %v9955_v24  ;;  %v5463_v13 = vmul.f32 %v5399_v17, %v9955_v24  ;;  %v5464_v29 = vmul.f32 %v5400_v4, %v9955_v24  ;;  %v5418_v55 = vld [vmem:[#allocation3 + $0x7e0] sm:$0xff]  ;;  %v5419_v20 = vld [vmem:[#allocation3 + $0x7e8] sm:$0xff] }
 0x402   :  { %v5465_v1 = vmul.f32 %v5401_v42, %v9955_v24  ;;  %5783 = vst.msk [vmem:[%s11500_s4 + $0x720] sm:$0xff] %vm17_vm0, %v5522_v12  ;;  %5784 = vst.msk [vmem:[%s11500_s4 + $0x728] sm:$0xff] %vm17_vm0, %v5523_v38  ;;  %v5524_v37 = vadd.f32 %v5460_v31, %v9965_v60  ;;  %v5525_v53 = vadd.f32 %v5461_v35, %v9965_v60 }
 0x403   :  { %v5466_v58 = vmul.f32 %v5402_v21, %v9955_v24  ;;  %v5467_v57 = vmul.f32 %v5403_v2, %v9955_v24  ;;  %v5526_v62 = vadd.f32 %v5462_v15, %v9965_v60  ;;  %v5527_v41 = vadd.f32 %v5463_v13, %v9965_v60  ;;  %v5420_v15 = vld [vmem:[#allocation3 + $0x7f0] sm:$0xff]  ;;  %v5421_v13 = vld [vmem:[#allocation3 + $0x7f8] sm:$0xff] }
 0x404   :  { %v5528_v50 = vadd.f32 %v5464_v29, %v9965_v60  ;;  %v5529_v54 = vadd.f32 %v5465_v1, %v9965_v60  ;;  %5785 = vst.msk [vmem:[%s11500_s4 + $0x730] sm:$0xff] %vm17_vm0, %v5524_v37  ;;  %5786 = vst.msk [vmem:[%s11500_s4 + $0x738] sm:$0xff] %vm17_vm0, %v5525_v53  ;;  %v5468_v40 = vmul.f32 %v5404_v25, %v9955_v24 }
 0x405   :  { %v5530_v19 = vadd.f32 %v5466_v58, %v9965_v60  ;;  %v5531_v5 = vadd.f32 %v5467_v57, %v9965_v60  ;;  %v5469_v56 = vmul.f32 %v5405_v63, %v9955_v24  ;;  %5787 = vst.msk [vmem:[%s11500_s4 + $0x740] sm:$0xff] %vm17_vm0, %v5526_v62  ;;  %5788 = vst.msk [vmem:[%s11500_s4 + $0x748] sm:$0xff] %vm17_vm0, %v5527_v41 }
 0x406   :  { %5789 = vst.msk [vmem:[%s11500_s4 + $0x750] sm:$0xff] %vm17_vm0, %v5528_v50  ;;  %5790 = vst.msk [vmem:[%s11500_s4 + $0x758] sm:$0xff] %vm17_vm0, %v5529_v54  ;;  %v5470_v7 = vmul.f32 %v5406_v59, %v9955_v24  ;;  %v5471_v28 = vmul.f32 %v5407_v44, %v9955_v24  ;;  %v5472_v34 = vmul.f32 %v5408_v0, %v9955_v24 }
 0x407   :  { %v5473_v27 = vmul.f32 %v5409_v61, %v9955_v24  ;;  %5791 = vst.msk [vmem:[%s11500_s4 + $0x760] sm:$0xff] %vm17_vm0, %v5530_v19  ;;  %5792 = vst.msk [vmem:[%s11500_s4 + $0x768] sm:$0xff] %vm17_vm0, %v5531_v5  ;;  %v5532_v9 = vadd.f32 %v5468_v40, %v9965_v60  ;;  %v5533_v36 = vadd.f32 %v5469_v56, %v9965_v60 }
 0x408   :  { %v5474_v10 = vmul.f32 %v5410_v3, %v9955_v24  ;;  %v5475_v26 = vmul.f32 %v5411_v23, %v9955_v24  ;;  %v5534_v51 = vadd.f32 %v5470_v7, %v9965_v60  ;;  %v5535_v30 = vadd.f32 %v5471_v28, %v9965_v60 }
 0x409   :  { %v5536_v22 = vadd.f32 %v5472_v34, %v9965_v60  ;;  %v5537_v46 = vadd.f32 %v5473_v27, %v9965_v60  ;;  %5793 = vst.msk [vmem:[%s11500_s4 + $0x770] sm:$0xff] %vm17_vm0, %v5532_v9  ;;  %5794 = vst.msk [vmem:[%s11500_s4 + $0x778] sm:$0xff] %vm17_vm0, %v5533_v36  ;;  %v5476_v16 = vmul.f32 %v5412_v45, %v9955_v24 }
 0x40a   :  { %v5538_v8 = vadd.f32 %v5474_v10, %v9965_v60  ;;  %v5539_v43 = vadd.f32 %v5475_v26, %v9965_v60  ;;  %v5477_v6 = vmul.f32 %v5413_v48, %v9955_v24  ;;  %5795 = vst.msk [vmem:[%s11500_s4 + $0x780] sm:$0xff] %vm17_vm0, %v5534_v51  ;;  %5796 = vst.msk [vmem:[%s11500_s4 + $0x788] sm:$0xff] %vm17_vm0, %v5535_v30 }
 0x40b   :  { %5797 = vst.msk [vmem:[%s11500_s4 + $0x790] sm:$0xff] %vm17_vm0, %v5536_v22  ;;  %5798 = vst.msk [vmem:[%s11500_s4 + $0x798] sm:$0xff] %vm17_vm0, %v5537_v46  ;;  %v5478_v18 = vmul.f32 %v5414_v39, %v9955_v24  ;;  %v5479_v49 = vmul.f32 %v5415_v47, %v9955_v24  ;;  %v5480_v52 = vmul.f32 %v5416_v11, %v9955_v24 }
 0x40c   :  { %v5481_v32 = vmul.f32 %v5417_v14, %v9955_v24  ;;  %5799 = vst.msk [vmem:[%s11500_s4 + $0x7a0] sm:$0xff] %vm17_vm0, %v5538_v8  ;;  %5800 = vst.msk [vmem:[%s11500_s4 + $0x7a8] sm:$0xff] %vm17_vm0, %v5539_v43  ;;  %v5540_v33 = vadd.f32 %v5476_v16, %v9965_v60  ;;  %v5541_v12 = vadd.f32 %v5477_v6, %v9965_v60 }
 0x40d   :  { %v5482_v38 = vmul.f32 %v5418_v55, %v9955_v24  ;;  %v5483_v31 = vmul.f32 %v5419_v20, %v9955_v24  ;;  %v5542_v35 = vadd.f32 %v5478_v18, %v9965_v60  ;;  %v5543_v17 = vadd.f32 %v5479_v49, %v9965_v60 }
 0x40e   :  { %v5544_v4 = vadd.f32 %v5480_v52, %v9965_v60  ;;  %v5545_v42 = vadd.f32 %v5481_v32, %v9965_v60  ;;  %5801 = vst.msk [vmem:[%s11500_s4 + $0x7b0] sm:$0xff] %vm17_vm0, %v5540_v33  ;;  %5802 = vst.msk [vmem:[%s11500_s4 + $0x7b8] sm:$0xff] %vm17_vm0, %v5541_v12  ;;  %v5484_v21 = vmul.f32 %v5420_v15, %v9955_v24 }
 0x40f   :  { %v5546_v29 = vadd.f32 %v5482_v38, %v9965_v60  ;;  %v5547_v1 = vadd.f32 %v5483_v31, %v9965_v60  ;;  %v5485_v2 = vmul.f32 %v5421_v13, %v9955_v24  ;;  %5803 = vst.msk [vmem:[%s11500_s4 + $0x7c0] sm:$0xff] %vm17_vm0, %v5542_v35  ;;  %5804 = vst.msk [vmem:[%s11500_s4 + $0x7c8] sm:$0xff] %vm17_vm0, %v5543_v17 }
 0x410   :  { %5805 = vst.msk [vmem:[%s11500_s4 + $0x7d0] sm:$0xff] %vm17_vm0, %v5544_v4  ;;  %5806 = vst.msk [vmem:[%s11500_s4 + $0x7d8] sm:$0xff] %vm17_vm0, %v5545_v42  ;;  %v5548_v24 = vadd.f32 %v5484_v21, %v9965_v60 }
 0x411   :  { %5807 = vst.msk [vmem:[%s11500_s4 + $0x7e0] sm:$0xff] %vm17_vm0, %v5546_v29  ;;  %5808 = vst.msk [vmem:[%s11500_s4 + $0x7e8] sm:$0xff] %vm17_vm0, %v5547_v1  ;;  %v5549_v37 = vadd.f32 %v5485_v2, %v9965_v60 }
 0x412   :  { %5809 = vst.msk [vmem:[%s11500_s4 + $0x7f0] sm:$0xff] %vm17_vm0, %v5548_v24 }
 0x413   :  { %5810 = vst.msk [vmem:[%s11500_s4 + $0x7f8] sm:$0xff] %vm17_vm0, %v5549_v37 }

</bundles_post_ra>
